<compile_context>
chip_gen: v7x
topology: tpu7x:2x2x1
jax: 0.10.0
libtpu: 0.0.40
codegen_flags: <defaults>
</compile_context>

<pallas_src>
import functools

import numpy as np
import jax
import jax.numpy as jnp
from jax.experimental import pallas as pl
from jax.experimental.pallas import tpu as pltpu


def _round_up(x, m):
    return ((x + m - 1) // m) * m


# ----------------------------- Pallas kernel ------------------------------

def _cnn_mnist_kernel(x_ref, w1_ref, b1_ref, w2_ref, b2_ref,
                      wf1_ref, bf1_ref, wf2_ref, bf2_ref, out_ref,
                      *, n_bands, bpad, qpad, cpad):
    f32 = jnp.float32
    bb = x_ref.shape[0]

    # conv1(+pool+relu) and conv2 accumulation, one 8-row input band at a time.
    acc2 = jnp.zeros((bb, 4 * cpad), f32)
    b1 = b1_ref[...]                                            # (1, qpad) f32
    for a in range(n_bands):
        xa = x_ref[:, a * bpad:(a + 1) * bpad]                  # (bb, bpad) bf16
        v = jnp.dot(xa, w1_ref[...], preferred_element_type=f32)  # (bb, 4*qpad)
        m = jnp.maximum(jnp.maximum(v[:, 0 * qpad:1 * qpad],
                                    v[:, 1 * qpad:2 * qpad]),
                        jnp.maximum(v[:, 2 * qpad:3 * qpad],
                                    v[:, 3 * qpad:4 * qpad]))
        y1a = jnp.maximum(m + b1, 0.0).astype(jnp.bfloat16)     # (bb, qpad)
        acc2 = acc2 + jnp.dot(y1a, w2_ref[a * qpad:(a + 1) * qpad, :],
                              preferred_element_type=f32)       # (bb, 4*cpad)

    # conv2 2x2 max-pool (max over 4 pool-phase lane groups) + bias + relu.
    # TODO(synk): nn.Dropout2d after conv2 is identity in inference mode.
    m2 = jnp.maximum(jnp.maximum(acc2[:, 0 * cpad:1 * cpad],
                                 acc2[:, 1 * cpad:2 * cpad]),
                     jnp.maximum(acc2[:, 2 * cpad:3 * cpad],
                                 acc2[:, 3 * cpad:4 * cpad]))
    y2 = jnp.maximum(m2 + b2_ref[...], 0.0).astype(jnp.bfloat16)  # (bb, cpad)

    # fc1 + relu  (flatten is free: y2 lanes are already (P2, Q2, c2)).
    h = jnp.dot(y2, wf1_ref[...], preferred_element_type=f32) + bf1_ref[...]
    h = jnp.maximum(h, 0.0).astype(jnp.bfloat16)                # (bb, hpad)
    # TODO(synk): F.dropout after fc1 is identity in inference mode.

    # fc2 + fused log_softmax (padded class lanes carry a -1e30 bias -> exp=0).
    logits = jnp.dot(h, wf2_ref[...], preferred_element_type=f32) + bf2_ref[...]
    mx = jnp.max(logits, axis=-1, keepdims=True)
    s = logits - mx
    lse = jnp.log(jnp.sum(jnp.exp(s), axis=-1, keepdims=True))
    out_ref[...] = s - lse                                      # (bb, npad)


# ------------------------ parameter / input packing ------------------------

def pack_params(raw):
    """One-time weight prep: PyTorch layouts in, lane-padded matmul RHS out.

    Lane layouts (every pooling-phase group zero-padded to a multiple of 128):
      band input : dh*28*C + w*C + c        (band a covers input rows 4a..4a+7)
      conv1 out  : group (i,j) x (e*40 + (qh*2+qw)*10 + c1), max over (i,j)
                   -> pooled1 pixel (2a+qh, 2e+qw), channel c1
      conv2 out  : group (r,s) x (P2*80 + Q2*20 + c2), max over (r,s)
                   -> pooled2 pixel (P2, Q2), channel c2
    """
    conv1_w = np.asarray(raw["conv1_w"], np.float32)      # (10, C, 5, 5)
    conv1_b = np.asarray(raw["conv1_b"], np.float32)
    conv2_w = np.asarray(raw["conv2_w"], np.float32)      # (20, 10, 5, 5)
    conv2_b = np.asarray(raw["conv2_b"], np.float32)
    fc1_w = np.asarray(raw["fc1_w"], np.float32)          # (50, 320)
    fc1_b = np.asarray(raw["fc1_b"], np.float32)
    fc2_w = np.asarray(raw["fc2_w"], np.float32)          # (nc, 50)
    fc2_b = np.asarray(raw["fc2_b"], np.float32)

    oc1, c_in = conv1_w.shape[0], conv1_w.shape[1]        # 10, C
    oc2 = conv2_w.shape[0]                                # 20
    hid = fc1_w.shape[0]                                  # 50
    ncls = fc2_w.shape[0]

    bpad = _round_up(8 * 28 * c_in, 128)                  # banded-input lanes
    qpad = _round_up(6 * 4 * oc1, 128)                    # conv1/pool lanes per band
    cpad = _round_up(16 * oc2, 128)                       # conv2/pool lanes
    hpad = _round_up(hid, 128)
    npad = _round_up(ncls, 128)

    # conv1(+pool): (bpad, 4*qpad).  Column group (i,j) holds conv1 evaluated
    # at (4a + 2qh + i, 4e + 2qw + j); rows are the 8x28xC input band.
    w1 = np.zeros((bpad, 4 * qpad), np.float32)
    for i in range(2):
        for j in range(2):
            g = (i * 2 + j) * qpad
            for qh in range(2):
                for qw in range(2):
                    for e in range(6):
                        col0 = g + e * 4 * oc1 + (qh * 2 + qw) * oc1
                        for ki in range(5):
                            for kj in range(5):
                                dh = 2 * qh + i + ki
                                w = 4 * e + 2 * qw + j + kj
                                row0 = (dh * 28 + w) * c_in
                                w1[row0:row0 + c_in, col0:col0 + oc1] = \
                                    conv1_w[:, :, ki, kj].T

    # conv2(+pool): (6*qpad, 4*cpad).  Row = (band a, conv1-out lane); column
    # group (r,s) holds conv2 evaluated at (2*P2 + r, 2*Q2 + s).
    w2 = np.zeros((6 * qpad, 4 * cpad), np.float32)
    for r in range(2):
        for s in range(2):
            g = (r * 2 + s) * cpad
            for p2 in range(4):
                for q2 in range(4):
                    col0 = g + (p2 * 4 + q2) * oc2
                    for ki in range(5):
                        for kj in range(5):
                            h1 = 2 * p2 + r + ki
                            w1i = 2 * q2 + s + kj
                            a, qh = divmod(h1, 2)
                            e, qw = divmod(w1i, 2)
                            row0 = a * qpad + e * 4 * oc1 + (qh * 2 + qw) * oc1
                            w2[row0:row0 + oc1, col0:col0 + oc2] = \
                                conv2_w[:, :, ki, kj].T

    # fc1: absorb PyTorch's NCHW flatten (k = c2*16 + P2*4 + Q2) into rows.
    wf1 = np.zeros((cpad, hpad), np.float32)
    t = fc1_w.reshape(hid, oc2, 4, 4).transpose(2, 3, 1, 0).reshape(16 * oc2, hid)
    wf1[:16 * oc2, :hid] = t

    wf2 = np.zeros((hpad, npad), np.float32)
    wf2[:hid, :ncls] = fc2_w.T

    b1 = np.zeros((1, qpad), np.float32)
    b1[0, :6 * 4 * oc1] = np.tile(conv1_b, 6 * 4)
    b2 = np.zeros((1, cpad), np.float32)
    b2[0, :16 * oc2] = np.tile(conv2_b, 16)
    bf1 = np.zeros((1, hpad), np.float32)
    bf1[0, :hid] = fc1_b
    bf2 = np.full((1, npad), -1e30, np.float32)           # mask padded classes
    bf2[0, :ncls] = fc2_b

    bf16 = jnp.bfloat16
    return {
        "w1": jnp.asarray(w1, bf16), "b1": jnp.asarray(b1),
        "w2": jnp.asarray(w2, bf16), "b2": jnp.asarray(b2),
        "wf1": jnp.asarray(wf1, bf16), "bf1": jnp.asarray(bf1),
        "wf2": jnp.asarray(wf2, bf16), "bf2": jnp.asarray(bf2),
    }


def _band_input(x_nchw, bpad):
    """(B, C, 28, 28) -> (B, 6*bpad) bf16: band a = input rows 4a..4a+7,
    flattened (dh, w, c) and zero-padded to bpad lanes (128-aligned)."""
    B, C, H, W = x_nchw.shape
    assert H == 28 and W == 28, "CNNMnist expects 28x28 inputs"
    x = jnp.transpose(x_nchw, (0, 2, 3, 1)).astype(jnp.float32)   # (B,28,28,C)
    bands = []
    for a in range(6):
        band = x[:, 4 * a:4 * a + 8, :, :].reshape(B, 8 * W * C)
        bands.append(jnp.pad(band, ((0, 0), (0, bpad - 8 * W * C))))
    return jnp.concatenate(bands, axis=1).astype(jnp.bfloat16)


# ------------------------------ forward pass -------------------------------

@functools.partial(jax.jit, static_argnames=("num_classes", "block_b"))
def cnn_mnist_forward(x_nchw, packed, *, num_classes, block_b=128):
    B = x_nchw.shape[0]
    bpad = packed["w1"].shape[0]
    qpad = packed["b1"].shape[1]
    cpad = packed["b2"].shape[1]
    hpad = packed["bf1"].shape[1]
    npad = packed["bf2"].shape[1]
    n_bands = packed["w2"].shape[0] // qpad               # 6

    bb = min(block_b, _round_up(B, 8))
    b_pad = _round_up(B, bb)
    n_blocks = b_pad // bb

    xband = _band_input(x_nchw, bpad)                     # (B, 6*bpad) bf16
    if b_pad != B:
        xband = jnp.pad(xband, ((0, b_pad - B), (0, 0)))

    flops_per_img = 2 * (n_bands * bpad * 4 * qpad + n_bands * qpad * 4 * cpad
                         + cpad * hpad + hpad * npad)
    param_bytes = sum(int(v.size) * v.dtype.itemsize for v in packed.values())
    cost = pl.CostEstimate(
        flops=int(b_pad * flops_per_img),
        transcendentals=int(b_pad * (npad + 1)),
        bytes_accessed=int(b_pad * n_bands * bpad * 2 + b_pad * npad * 4
                           + param_bytes),
    )

    def _const_spec(arr):
        nd = arr.ndim
        return pl.BlockSpec(arr.shape, lambda i: (0,) * nd)

    kernel = functools.partial(_cnn_mnist_kernel, n_bands=n_bands,
                               bpad=bpad, qpad=qpad, cpad=cpad)

    out = pl.pallas_call(
        kernel,
        out_shape=jax.ShapeDtypeStruct((b_pad, npad), jnp.float32),
        grid=(n_blocks,),
        in_specs=[pl.BlockSpec((bb, n_bands * bpad), lambda i: (i, 0)),
                  _const_spec(packed["w1"]), _const_spec(packed["b1"]),
                  _const_spec(packed["w2"]), _const_spec(packed["b2"]),
                  _const_spec(packed["wf1"]), _const_spec(packed["bf1"]),
                  _const_spec(packed["wf2"]), _const_spec(packed["bf2"])],
        out_specs=pl.BlockSpec((bb, npad), lambda i: (i, 0)),
        compiler_params=pltpu.CompilerParams(
            dimension_semantics=("parallel",)),
        cost_estimate=cost,
    )(xband, packed["w1"], packed["b1"], packed["w2"], packed["b2"],
      packed["wf1"], packed["bf1"], packed["wf2"], packed["bf2"])
    return out[:B, :num_classes]


# -------------------------- pure-JAX reference -----------------------------

def _reference_forward(x_nchw, raw):
    hi = jax.lax.Precision.HIGHEST
    dn = ("NCHW", "OIHW", "NCHW")
    c1 = jax.lax.conv_general_dilated(x_nchw, raw["conv1_w"], (1, 1), "VALID",
                                      dimension_numbers=dn, precision=hi)
    c1 = c1 + raw["conv1_b"].reshape(1, -1, 1, 1)
    p1 = jax.nn.relu(jax.lax.reduce_window(c1, -jnp.inf, jax.lax.max,
                                           (1, 1, 2, 2), (1, 1, 2, 2), "VALID"))
    c2 = jax.lax.conv_general_dilated(p1, raw["conv2_w"], (1, 1), "VALID",
                                      dimension_numbers=dn, precision=hi)
    c2 = c2 + raw["conv2_b"].reshape(1, -1, 1, 1)
    p2 = jax.nn.relu(jax.lax.reduce_window(c2, -jnp.inf, jax.lax.max,
                                           (1, 1, 2, 2), (1, 1, 2, 2), "VALID"))
    flat = p2.reshape(p2.shape[0], -1)
    h = jax.nn.relu(jnp.dot(flat, raw["fc1_w"].T, precision=hi) + raw["fc1_b"])
    logits = jnp.dot(h, raw["fc2_w"].T, precision=hi) + raw["fc2_b"]
    return jax.nn.log_softmax(logits, axis=-1)


if __name__ == "__main__":
    num_channels, num_classes = 1, 10
    key = jax.random.PRNGKey(0)
    ks = jax.random.split(key, 10)
    raw = {
        "conv1_w": 0.1 * jax.random.normal(ks[0], (10, num_channels, 5, 5), jnp.float32),
        "conv1_b": 0.1 * jax.random.normal(ks[1], (10,), jnp.float32),
        "conv2_w": 0.1 * jax.random.normal(ks[2], (20, 10, 5, 5), jnp.float32),
        "conv2_b": 0.1 * jax.random.normal(ks[3], (20,), jnp.float32),
        "fc1_w":   0.1 * jax.random.normal(ks[4], (50, 320), jnp.float32),
        "fc1_b":   0.1 * jax.random.normal(ks[5], (50,), jnp.float32),
        "fc2_w":   0.1 * jax.random.normal(ks[6], (num_classes, 50), jnp.float32),
        "fc2_b":   0.1 * jax.random.normal(ks[7], (num_classes,), jnp.float32),
    }
    packed = pack_params(raw)

    # Small-batch check (B=2, padded to one 8-row block inside the kernel).
    x = jax.random.normal(ks[8], (2, num_channels, 28, 28), jnp.float32)
    out = jax.block_until_ready(
        cnn_mnist_forward(x, packed, num_classes=num_classes))
    assert out.shape == (2, num_classes)
    assert bool(jnp.all(jnp.isfinite(out)))
    ref = jax.block_until_ready(_reference_forward(x, raw))
    max_diff = float(jnp.max(jnp.abs(out - ref)))
    assert max_diff < 5e-2, f"kernel/reference mismatch (B=2): {max_diff}"

    # Batch-blocked multi-step grid check (4 grid steps of 8 images each).
    xb = jax.random.normal(ks[9], (32, num_channels, 28, 28), jnp.float32)
    outb = jax.block_until_ready(
        cnn_mnist_forward(xb, packed, num_classes=num_classes, block_b=8))
    refb = jax.block_until_ready(_reference_forward(xb, raw))
    max_diff_b = float(jnp.max(jnp.abs(outb - refb)))
    assert max_diff_b < 5e-2, f"kernel/reference mismatch (B=32): {max_diff_b}"

    print("KERNEL_OK")
</pallas_src>

<mosaic_0001>
module attributes {stable_mosaic.version = 11 : i64} {
  func.func @_cnn_mnist_kernel(%arg0: i32, %arg1: memref<8x1536xbf16, #tpu.memory_space<vmem>>, %arg2: memref<256x1024xbf16, #tpu.memory_space<vmem>>, %arg3: memref<1x256xf32, #tpu.memory_space<vmem>>, %arg4: memref<1536x1536xbf16, #tpu.memory_space<vmem>>, %arg5: memref<1x384xf32, #tpu.memory_space<vmem>>, %arg6: memref<384x128xbf16, #tpu.memory_space<vmem>>, %arg7: memref<1x128xf32, #tpu.memory_space<vmem>>, %arg8: memref<128x128xbf16, #tpu.memory_space<vmem>>, %arg9: memref<1x128xf32, #tpu.memory_space<vmem>>, %arg10: memref<8x128xf32, #tpu.memory_space<vmem>>) attributes {dimension_semantics = [#tpu.dimension_semantics<parallel>], iteration_bounds = array<i64: 1>, scalar_prefetch = 0 : i64, scratch_operands = 0 : i64, tpu.core_type = #tpu.core_type<tc>, window_params = [{transform_indices = @transform_0, window_bounds = array<i64: 8, 1536>}, {pipeline_mode = #tpu.pipeline_mode<synchronous>, transform_indices = @transform_1, window_bounds = array<i64: 256, 1024>}, {pipeline_mode = #tpu.pipeline_mode<synchronous>, transform_indices = @transform_2, window_bounds = array<i64: 1, 256>}, {pipeline_mode = #tpu.pipeline_mode<synchronous>, transform_indices = @transform_3, window_bounds = array<i64: 1536, 1536>}, {pipeline_mode = #tpu.pipeline_mode<synchronous>, transform_indices = @transform_4, window_bounds = array<i64: 1, 384>}, {pipeline_mode = #tpu.pipeline_mode<synchronous>, transform_indices = @transform_5, window_bounds = array<i64: 384, 128>}, {pipeline_mode = #tpu.pipeline_mode<synchronous>, transform_indices = @transform_6, window_bounds = array<i64: 1, 128>}, {pipeline_mode = #tpu.pipeline_mode<synchronous>, transform_indices = @transform_7, window_bounds = array<i64: 128, 128>}, {pipeline_mode = #tpu.pipeline_mode<synchronous>, transform_indices = @transform_8, window_bounds = array<i64: 1, 128>}, {transform_indices = @transform_9, window_bounds = array<i64: 8, 128>}]} {
    %cst = arith.constant 0.000000e+00 : f32
    %0 = vector.broadcast %cst : f32 to vector<8x1536xf32>
    %c0 = arith.constant 0 : index
    %c0_0 = arith.constant 0 : index
    %1 = vector.load %arg3[%c0, %c0_0] : memref<1x256xf32, #tpu.memory_space<vmem>>, vector<1x256xf32>
    %c0_1 = arith.constant 0 : index
    %c0_2 = arith.constant 0 : index
    %2 = vector.load %arg1[%c0_1, %c0_2] : memref<8x1536xbf16, #tpu.memory_space<vmem>>, vector<8x256xbf16>
    %c0_3 = arith.constant 0 : index
    %c0_4 = arith.constant 0 : index
    %3 = vector.load %arg2[%c0_3, %c0_4] : memref<256x1024xbf16, #tpu.memory_space<vmem>>, vector<256x1024xbf16>
    %cst_5 = arith.constant dense<0.000000e+00> : vector<8x1024xf32>
    %4 = tpu.matmul %2, %3, %cst_5 {dimension_numbers = #tpu.dot_dimension_numbers<[1], [0], [0], [1], [0, 0, 1, 1], [], []>} : vector<8x256xbf16>, vector<256x1024xbf16>, vector<8x1024xf32> -> vector<8x1024xf32>
    %5 = vector.extract_strided_slice %4 {offsets = [0, 0], sizes = [8, 256], strides = [1, 1]} : vector<8x1024xf32> to vector<8x256xf32>
    %6 = vector.extract_strided_slice %4 {offsets = [0, 256], sizes = [8, 256], strides = [1, 1]} : vector<8x1024xf32> to vector<8x256xf32>
    %7 = arith.maximumf %5, %6 : vector<8x256xf32>
    %8 = vector.extract_strided_slice %4 {offsets = [0, 512], sizes = [8, 256], strides = [1, 1]} : vector<8x1024xf32> to vector<8x256xf32>
    %9 = vector.extract_strided_slice %4 {offsets = [0, 768], sizes = [8, 256], strides = [1, 1]} : vector<8x1024xf32> to vector<8x256xf32>
    %10 = arith.maximumf %8, %9 : vector<8x256xf32>
    %11 = arith.maximumf %7, %10 : vector<8x256xf32>
    %12 = vector.broadcast %1 : vector<1x256xf32> to vector<8x256xf32>
    %13 = arith.addf %11, %12 : vector<8x256xf32>
    %cst_6 = arith.constant 0.000000e+00 : f32
    %14 = vector.broadcast %cst_6 : f32 to vector<8x256xf32>
    %15 = arith.maximumf %13, %14 : vector<8x256xf32>
    %16 = arith.truncf %15 : vector<8x256xf32> to vector<8x256xbf16>
    %c0_7 = arith.constant 0 : index
    %c0_8 = arith.constant 0 : index
    %17 = vector.load %arg4[%c0_7, %c0_8] : memref<1536x1536xbf16, #tpu.memory_space<vmem>>, vector<256x1536xbf16>
    %cst_9 = arith.constant dense<0.000000e+00> : vector<8x1536xf32>
    %18 = tpu.matmul %16, %17, %cst_9 {dimension_numbers = #tpu.dot_dimension_numbers<[1], [0], [0], [1], [0, 0, 1, 1], [], []>} : vector<8x256xbf16>, vector<256x1536xbf16>, vector<8x1536xf32> -> vector<8x1536xf32>
    %19 = arith.addf %0, %18 : vector<8x1536xf32>
    %c0_10 = arith.constant 0 : index
    %c256 = arith.constant 256 : index
    %20 = vector.load %arg1[%c0_10, %c256] : memref<8x1536xbf16, #tpu.memory_space<vmem>>, vector<8x256xbf16>
    %c0_11 = arith.constant 0 : index
    %c0_12 = arith.constant 0 : index
    %21 = vector.load %arg2[%c0_11, %c0_12] : memref<256x1024xbf16, #tpu.memory_space<vmem>>, vector<256x1024xbf16>
    %cst_13 = arith.constant dense<0.000000e+00> : vector<8x1024xf32>
    %22 = tpu.matmul %20, %21, %cst_13 {dimension_numbers = #tpu.dot_dimension_numbers<[1], [0], [0], [1], [0, 0, 1, 1], [], []>} : vector<8x256xbf16>, vector<256x1024xbf16>, vector<8x1024xf32> -> vector<8x1024xf32>
    %23 = vector.extract_strided_slice %22 {offsets = [0, 0], sizes = [8, 256], strides = [1, 1]} : vector<8x1024xf32> to vector<8x256xf32>
    %24 = vector.extract_strided_slice %22 {offsets = [0, 256], sizes = [8, 256], strides = [1, 1]} : vector<8x1024xf32> to vector<8x256xf32>
    %25 = arith.maximumf %23, %24 : vector<8x256xf32>
    %26 = vector.extract_strided_slice %22 {offsets = [0, 512], sizes = [8, 256], strides = [1, 1]} : vector<8x1024xf32> to vector<8x256xf32>
    %27 = vector.extract_strided_slice %22 {offsets = [0, 768], sizes = [8, 256], strides = [1, 1]} : vector<8x1024xf32> to vector<8x256xf32>
    %28 = arith.maximumf %26, %27 : vector<8x256xf32>
    %29 = arith.maximumf %25, %28 : vector<8x256xf32>
    %30 = vector.broadcast %1 : vector<1x256xf32> to vector<8x256xf32>
    %31 = arith.addf %29, %30 : vector<8x256xf32>
    %cst_14 = arith.constant 0.000000e+00 : f32
    %32 = vector.broadcast %cst_14 : f32 to vector<8x256xf32>
    %33 = arith.maximumf %31, %32 : vector<8x256xf32>
    %34 = arith.truncf %33 : vector<8x256xf32> to vector<8x256xbf16>
    %c256_15 = arith.constant 256 : index
    %c0_16 = arith.constant 0 : index
    %35 = vector.load %arg4[%c256_15, %c0_16] : memref<1536x1536xbf16, #tpu.memory_space<vmem>>, vector<256x1536xbf16>
    %cst_17 = arith.constant dense<0.000000e+00> : vector<8x1536xf32>
    %36 = tpu.matmul %34, %35, %cst_17 {dimension_numbers = #tpu.dot_dimension_numbers<[1], [0], [0], [1], [0, 0, 1, 1], [], []>} : vector<8x256xbf16>, vector<256x1536xbf16>, vector<8x1536xf32> -> vector<8x1536xf32>
    %37 = arith.addf %19, %36 : vector<8x1536xf32>
    %c0_18 = arith.constant 0 : index
    %c512 = arith.constant 512 : index
    %38 = vector.load %arg1[%c0_18, %c512] : memref<8x1536xbf16, #tpu.memory_space<vmem>>, vector<8x256xbf16>
    %c0_19 = arith.constant 0 : index
    %c0_20 = arith.constant 0 : index
    %39 = vector.load %arg2[%c0_19, %c0_20] : memref<256x1024xbf16, #tpu.memory_space<vmem>>, vector<256x1024xbf16>
    %cst_21 = arith.constant dense<0.000000e+00> : vector<8x1024xf32>
    %40 = tpu.matmul %38, %39, %cst_21 {dimension_numbers = #tpu.dot_dimension_numbers<[1], [0], [0], [1], [0, 0, 1, 1], [], []>} : vector<8x256xbf16>, vector<256x1024xbf16>, vector<8x1024xf32> -> vector<8x1024xf32>
    %41 = vector.extract_strided_slice %40 {offsets = [0, 0], sizes = [8, 256], strides = [1, 1]} : vector<8x1024xf32> to vector<8x256xf32>
    %42 = vector.extract_strided_slice %40 {offsets = [0, 256], sizes = [8, 256], strides = [1, 1]} : vector<8x1024xf32> to vector<8x256xf32>
    %43 = arith.maximumf %41, %42 : vector<8x256xf32>
    %44 = vector.extract_strided_slice %40 {offsets = [0, 512], sizes = [8, 256], strides = [1, 1]} : vector<8x1024xf32> to vector<8x256xf32>
    %45 = vector.extract_strided_slice %40 {offsets = [0, 768], sizes = [8, 256], strides = [1, 1]} : vector<8x1024xf32> to vector<8x256xf32>
    %46 = arith.maximumf %44, %45 : vector<8x256xf32>
    %47 = arith.maximumf %43, %46 : vector<8x256xf32>
    %48 = vector.broadcast %1 : vector<1x256xf32> to vector<8x256xf32>
    %49 = arith.addf %47, %48 : vector<8x256xf32>
    %cst_22 = arith.constant 0.000000e+00 : f32
    %50 = vector.broadcast %cst_22 : f32 to vector<8x256xf32>
    %51 = arith.maximumf %49, %50 : vector<8x256xf32>
    %52 = arith.truncf %51 : vector<8x256xf32> to vector<8x256xbf16>
    %c512_23 = arith.constant 512 : index
    %c0_24 = arith.constant 0 : index
    %53 = vector.load %arg4[%c512_23, %c0_24] : memref<1536x1536xbf16, #tpu.memory_space<vmem>>, vector<256x1536xbf16>
    %cst_25 = arith.constant dense<0.000000e+00> : vector<8x1536xf32>
    %54 = tpu.matmul %52, %53, %cst_25 {dimension_numbers = #tpu.dot_dimension_numbers<[1], [0], [0], [1], [0, 0, 1, 1], [], []>} : vector<8x256xbf16>, vector<256x1536xbf16>, vector<8x1536xf32> -> vector<8x1536xf32>
    %55 = arith.addf %37, %54 : vector<8x1536xf32>
    %c0_26 = arith.constant 0 : index
    %c768 = arith.constant 768 : index
    %56 = vector.load %arg1[%c0_26, %c768] : memref<8x1536xbf16, #tpu.memory_space<vmem>>, vector<8x256xbf16>
    %c0_27 = arith.constant 0 : index
    %c0_28 = arith.constant 0 : index
    %57 = vector.load %arg2[%c0_27, %c0_28] : memref<256x1024xbf16, #tpu.memory_space<vmem>>, vector<256x1024xbf16>
    %cst_29 = arith.constant dense<0.000000e+00> : vector<8x1024xf32>
    %58 = tpu.matmul %56, %57, %cst_29 {dimension_numbers = #tpu.dot_dimension_numbers<[1], [0], [0], [1], [0, 0, 1, 1], [], []>} : vector<8x256xbf16>, vector<256x1024xbf16>, vector<8x1024xf32> -> vector<8x1024xf32>
    %59 = vector.extract_strided_slice %58 {offsets = [0, 0], sizes = [8, 256], strides = [1, 1]} : vector<8x1024xf32> to vector<8x256xf32>
    %60 = vector.extract_strided_slice %58 {offsets = [0, 256], sizes = [8, 256], strides = [1, 1]} : vector<8x1024xf32> to vector<8x256xf32>
    %61 = arith.maximumf %59, %60 : vector<8x256xf32>
    %62 = vector.extract_strided_slice %58 {offsets = [0, 512], sizes = [8, 256], strides = [1, 1]} : vector<8x1024xf32> to vector<8x256xf32>
    %63 = vector.extract_strided_slice %58 {offsets = [0, 768], sizes = [8, 256], strides = [1, 1]} : vector<8x1024xf32> to vector<8x256xf32>
    %64 = arith.maximumf %62, %63 : vector<8x256xf32>
    %65 = arith.maximumf %61, %64 : vector<8x256xf32>
    %66 = vector.broadcast %1 : vector<1x256xf32> to vector<8x256xf32>
    %67 = arith.addf %65, %66 : vector<8x256xf32>
    %cst_30 = arith.constant 0.000000e+00 : f32
    %68 = vector.broadcast %cst_30 : f32 to vector<8x256xf32>
    %69 = arith.maximumf %67, %68 : vector<8x256xf32>
    %70 = arith.truncf %69 : vector<8x256xf32> to vector<8x256xbf16>
    %c768_31 = arith.constant 768 : index
    %c0_32 = arith.constant 0 : index
    %71 = vector.load %arg4[%c768_31, %c0_32] : memref<1536x1536xbf16, #tpu.memory_space<vmem>>, vector<256x1536xbf16>
    %cst_33 = arith.constant dense<0.000000e+00> : vector<8x1536xf32>
    %72 = tpu.matmul %70, %71, %cst_33 {dimension_numbers = #tpu.dot_dimension_numbers<[1], [0], [0], [1], [0, 0, 1, 1], [], []>} : vector<8x256xbf16>, vector<256x1536xbf16>, vector<8x1536xf32> -> vector<8x1536xf32>
    %73 = arith.addf %55, %72 : vector<8x1536xf32>
    %c0_34 = arith.constant 0 : index
    %c1024 = arith.constant 1024 : index
    %74 = vector.load %arg1[%c0_34, %c1024] : memref<8x1536xbf16, #tpu.memory_space<vmem>>, vector<8x256xbf16>
    %c0_35 = arith.constant 0 : index
    %c0_36 = arith.constant 0 : index
    %75 = vector.load %arg2[%c0_35, %c0_36] : memref<256x1024xbf16, #tpu.memory_space<vmem>>, vector<256x1024xbf16>
    %cst_37 = arith.constant dense<0.000000e+00> : vector<8x1024xf32>
    %76 = tpu.matmul %74, %75, %cst_37 {dimension_numbers = #tpu.dot_dimension_numbers<[1], [0], [0], [1], [0, 0, 1, 1], [], []>} : vector<8x256xbf16>, vector<256x1024xbf16>, vector<8x1024xf32> -> vector<8x1024xf32>
    %77 = vector.extract_strided_slice %76 {offsets = [0, 0], sizes = [8, 256], strides = [1, 1]} : vector<8x1024xf32> to vector<8x256xf32>
    %78 = vector.extract_strided_slice %76 {offsets = [0, 256], sizes = [8, 256], strides = [1, 1]} : vector<8x1024xf32> to vector<8x256xf32>
    %79 = arith.maximumf %77, %78 : vector<8x256xf32>
    %80 = vector.extract_strided_slice %76 {offsets = [0, 512], sizes = [8, 256], strides = [1, 1]} : vector<8x1024xf32> to vector<8x256xf32>
    %81 = vector.extract_strided_slice %76 {offsets = [0, 768], sizes = [8, 256], strides = [1, 1]} : vector<8x1024xf32> to vector<8x256xf32>
    %82 = arith.maximumf %80, %81 : vector<8x256xf32>
    %83 = arith.maximumf %79, %82 : vector<8x256xf32>
    %84 = vector.broadcast %1 : vector<1x256xf32> to vector<8x256xf32>
    %85 = arith.addf %83, %84 : vector<8x256xf32>
    %cst_38 = arith.constant 0.000000e+00 : f32
    %86 = vector.broadcast %cst_38 : f32 to vector<8x256xf32>
    %87 = arith.maximumf %85, %86 : vector<8x256xf32>
    %88 = arith.truncf %87 : vector<8x256xf32> to vector<8x256xbf16>
    %c1024_39 = arith.constant 1024 : index
    %c0_40 = arith.constant 0 : index
    %89 = vector.load %arg4[%c1024_39, %c0_40] : memref<1536x1536xbf16, #tpu.memory_space<vmem>>, vector<256x1536xbf16>
    %cst_41 = arith.constant dense<0.000000e+00> : vector<8x1536xf32>
    %90 = tpu.matmul %88, %89, %cst_41 {dimension_numbers = #tpu.dot_dimension_numbers<[1], [0], [0], [1], [0, 0, 1, 1], [], []>} : vector<8x256xbf16>, vector<256x1536xbf16>, vector<8x1536xf32> -> vector<8x1536xf32>
    %91 = arith.addf %73, %90 : vector<8x1536xf32>
    %c0_42 = arith.constant 0 : index
    %c1280 = arith.constant 1280 : index
    %92 = vector.load %arg1[%c0_42, %c1280] : memref<8x1536xbf16, #tpu.memory_space<vmem>>, vector<8x256xbf16>
    %c0_43 = arith.constant 0 : index
    %c0_44 = arith.constant 0 : index
    %93 = vector.load %arg2[%c0_43, %c0_44] : memref<256x1024xbf16, #tpu.memory_space<vmem>>, vector<256x1024xbf16>
    %cst_45 = arith.constant dense<0.000000e+00> : vector<8x1024xf32>
    %94 = tpu.matmul %92, %93, %cst_45 {dimension_numbers = #tpu.dot_dimension_numbers<[1], [0], [0], [1], [0, 0, 1, 1], [], []>} : vector<8x256xbf16>, vector<256x1024xbf16>, vector<8x1024xf32> -> vector<8x1024xf32>
    %95 = vector.extract_strided_slice %94 {offsets = [0, 0], sizes = [8, 256], strides = [1, 1]} : vector<8x1024xf32> to vector<8x256xf32>
    %96 = vector.extract_strided_slice %94 {offsets = [0, 256], sizes = [8, 256], strides = [1, 1]} : vector<8x1024xf32> to vector<8x256xf32>
    %97 = arith.maximumf %95, %96 : vector<8x256xf32>
    %98 = vector.extract_strided_slice %94 {offsets = [0, 512], sizes = [8, 256], strides = [1, 1]} : vector<8x1024xf32> to vector<8x256xf32>
    %99 = vector.extract_strided_slice %94 {offsets = [0, 768], sizes = [8, 256], strides = [1, 1]} : vector<8x1024xf32> to vector<8x256xf32>
    %100 = arith.maximumf %98, %99 : vector<8x256xf32>
    %101 = arith.maximumf %97, %100 : vector<8x256xf32>
    %102 = vector.broadcast %1 : vector<1x256xf32> to vector<8x256xf32>
    %103 = arith.addf %101, %102 : vector<8x256xf32>
    %cst_46 = arith.constant 0.000000e+00 : f32
    %104 = vector.broadcast %cst_46 : f32 to vector<8x256xf32>
    %105 = arith.maximumf %103, %104 : vector<8x256xf32>
    %106 = arith.truncf %105 : vector<8x256xf32> to vector<8x256xbf16>
    %c1280_47 = arith.constant 1280 : index
    %c0_48 = arith.constant 0 : index
    %107 = vector.load %arg4[%c1280_47, %c0_48] : memref<1536x1536xbf16, #tpu.memory_space<vmem>>, vector<256x1536xbf16>
    %cst_49 = arith.constant dense<0.000000e+00> : vector<8x1536xf32>
    %108 = tpu.matmul %106, %107, %cst_49 {dimension_numbers = #tpu.dot_dimension_numbers<[1], [0], [0], [1], [0, 0, 1, 1], [], []>} : vector<8x256xbf16>, vector<256x1536xbf16>, vector<8x1536xf32> -> vector<8x1536xf32>
    %109 = arith.addf %91, %108 : vector<8x1536xf32>
    %110 = vector.extract_strided_slice %109 {offsets = [0, 0], sizes = [8, 384], strides = [1, 1]} : vector<8x1536xf32> to vector<8x384xf32>
    %111 = vector.extract_strided_slice %109 {offsets = [0, 384], sizes = [8, 384], strides = [1, 1]} : vector<8x1536xf32> to vector<8x384xf32>
    %112 = arith.maximumf %110, %111 : vector<8x384xf32>
    %113 = vector.extract_strided_slice %109 {offsets = [0, 768], sizes = [8, 384], strides = [1, 1]} : vector<8x1536xf32> to vector<8x384xf32>
    %114 = vector.extract_strided_slice %109 {offsets = [0, 1152], sizes = [8, 384], strides = [1, 1]} : vector<8x1536xf32> to vector<8x384xf32>
    %115 = arith.maximumf %113, %114 : vector<8x384xf32>
    %116 = arith.maximumf %112, %115 : vector<8x384xf32>
    %c0_50 = arith.constant 0 : index
    %c0_51 = arith.constant 0 : index
    %117 = vector.load %arg5[%c0_50, %c0_51] : memref<1x384xf32, #tpu.memory_space<vmem>>, vector<1x384xf32>
    %118 = vector.broadcast %117 : vector<1x384xf32> to vector<8x384xf32>
    %119 = arith.addf %116, %118 : vector<8x384xf32>
    %cst_52 = arith.constant 0.000000e+00 : f32
    %120 = vector.broadcast %cst_52 : f32 to vector<8x384xf32>
    %121 = arith.maximumf %119, %120 : vector<8x384xf32>
    %122 = arith.truncf %121 : vector<8x384xf32> to vector<8x384xbf16>
    %c0_53 = arith.constant 0 : index
    %c0_54 = arith.constant 0 : index
    %123 = vector.load %arg6[%c0_53, %c0_54] : memref<384x128xbf16, #tpu.memory_space<vmem>>, vector<384x128xbf16>
    %cst_55 = arith.constant dense<0.000000e+00> : vector<8x128xf32>
    %124 = tpu.matmul %122, %123, %cst_55 {dimension_numbers = #tpu.dot_dimension_numbers<[1], [0], [0], [1], [0, 0, 1, 1], [], []>} : vector<8x384xbf16>, vector<384x128xbf16>, vector<8x128xf32> -> vector<8x128xf32>
    %c0_56 = arith.constant 0 : index
    %c0_57 = arith.constant 0 : index
    %125 = vector.load %arg7[%c0_56, %c0_57] : memref<1x128xf32, #tpu.memory_space<vmem>>, vector<1x128xf32>
    %126 = vector.broadcast %125 : vector<1x128xf32> to vector<8x128xf32>
    %127 = arith.addf %124, %126 : vector<8x128xf32>
    %cst_58 = arith.constant 0.000000e+00 : f32
    %128 = vector.broadcast %cst_58 : f32 to vector<8x128xf32>
    %129 = arith.maximumf %127, %128 : vector<8x128xf32>
    %130 = arith.truncf %129 : vector<8x128xf32> to vector<8x128xbf16>
    %c0_59 = arith.constant 0 : index
    %c0_60 = arith.constant 0 : index
    %131 = vector.load %arg8[%c0_59, %c0_60] : memref<128x128xbf16, #tpu.memory_space<vmem>>, vector<128x128xbf16>
    %cst_61 = arith.constant dense<0.000000e+00> : vector<8x128xf32>
    %132 = tpu.matmul %130, %131, %cst_61 {dimension_numbers = #tpu.dot_dimension_numbers<[1], [0], [0], [1], [0, 0, 1, 1], [], []>} : vector<8x128xbf16>, vector<128x128xbf16>, vector<8x128xf32> -> vector<8x128xf32>
    %c0_62 = arith.constant 0 : index
    %c0_63 = arith.constant 0 : index
    %133 = vector.load %arg9[%c0_62, %c0_63] : memref<1x128xf32, #tpu.memory_space<vmem>>, vector<1x128xf32>
    %134 = vector.broadcast %133 : vector<1x128xf32> to vector<8x128xf32>
    %135 = arith.addf %132, %134 : vector<8x128xf32>
    %cst_64 = arith.constant dense<0xFF800000> : vector<8xf32>
    %136 = vector.multi_reduction <maximumf>, %135, %cst_64 [1] : vector<8x128xf32> to vector<8xf32>
    %137 = vector.shape_cast %136 : vector<8xf32> to vector<8x1xf32>
    %138 = vector.broadcast %137 : vector<8x1xf32> to vector<8x128xf32>
    %139 = arith.subf %135, %138 : vector<8x128xf32>
    %140 = math.exp %139 : vector<8x128xf32>
    %cst_65 = arith.constant dense<0.000000e+00> : vector<8xf32>
    %141 = vector.multi_reduction <add>, %140, %cst_65 [1] : vector<8x128xf32> to vector<8xf32>
    %142 = vector.shape_cast %141 : vector<8xf32> to vector<8x1xf32>
    %143 = math.log %142 : vector<8x1xf32>
    %144 = vector.broadcast %143 : vector<8x1xf32> to vector<8x128xf32>
    %145 = arith.subf %139, %144 : vector<8x128xf32>
    %c0_66 = arith.constant 0 : index
    %c0_67 = arith.constant 0 : index
    %146 = vector.load %arg10[%c0_66, %c0_67] : memref<8x128xf32, #tpu.memory_space<vmem>>, vector<8x128xf32>
    tpu.vector_store %arg10[%c0_66, %c0_67], %145 {strides = array<i32>} : memref<8x128xf32, #tpu.memory_space<vmem>>, vector<8x128xf32>,
    return
  }
  func.func @transform_0(%arg0: i32) -> (i32, i32) {
    %c0_i32 = arith.constant 0 : i32
    %c0_i32_0 = arith.constant 0 : i32
    return %arg0, %c0_i32 : i32, i32
  }
  func.func @transform_1(%arg0: i32) -> (i32, i32) {
    %c0_i32 = arith.constant 0 : i32
    %c0_i32_0 = arith.constant 0 : i32
    %c0_i32_1 = arith.constant 0 : i32
    return %c0_i32, %c0_i32_0 : i32, i32
  }
  func.func @transform_2(%arg0: i32) -> (i32, i32) {
    %c0_i32 = arith.constant 0 : i32
    %c0_i32_0 = arith.constant 0 : i32
    %c0_i32_1 = arith.constant 0 : i32
    return %c0_i32, %c0_i32_0 : i32, i32
  }
  func.func @transform_3(%arg0: i32) -> (i32, i32) {
    %c0_i32 = arith.constant 0 : i32
    %c0_i32_0 = arith.constant 0 : i32
    %c0_i32_1 = arith.constant 0 : i32
    return %c0_i32, %c0_i32_0 : i32, i32
  }
  func.func @transform_4(%arg0: i32) -> (i32, i32) {
    %c0_i32 = arith.constant 0 : i32
    %c0_i32_0 = arith.constant 0 : i32
    %c0_i32_1 = arith.constant 0 : i32
    return %c0_i32, %c0_i32_0 : i32, i32
  }
  func.func @transform_5(%arg0: i32) -> (i32, i32) {
    %c0_i32 = arith.constant 0 : i32
    %c0_i32_0 = arith.constant 0 : i32
    %c0_i32_1 = arith.constant 0 : i32
    return %c0_i32, %c0_i32_0 : i32, i32
  }
  func.func @transform_6(%arg0: i32) -> (i32, i32) {
    %c0_i32 = arith.constant 0 : i32
    %c0_i32_0 = arith.constant 0 : i32
    %c0_i32_1 = arith.constant 0 : i32
    return %c0_i32, %c0_i32_0 : i32, i32
  }
  func.func @transform_7(%arg0: i32) -> (i32, i32) {
    %c0_i32 = arith.constant 0 : i32
    %c0_i32_0 = arith.constant 0 : i32
    %c0_i32_1 = arith.constant 0 : i32
    return %c0_i32, %c0_i32_0 : i32, i32
  }
  func.func @transform_8(%arg0: i32) -> (i32, i32) {
    %c0_i32 = arith.constant 0 : i32
    %c0_i32_0 = arith.constant 0 : i32
    %c0_i32_1 = arith.constant 0 : i32
    return %c0_i32, %c0_i32_0 : i32, i32
  }
  func.func @transform_9(%arg0: i32) -> (i32, i32) {
    %c0_i32 = arith.constant 0 : i32
    %c0_i32_0 = arith.constant 0 : i32
    return %arg0, %c0_i32 : i32, i32
  }
}

</mosaic_0001>

<bundles_post_ra>
// kernel: cnn_mnist_forward.1
= control target key start
LH: loop header
LB: loop body
LE: loop exit
PB: predicated region body
PF: predicated region fallthrough
CT: control target
= control target key end

     0   :  { %14 = vsyncpa [#allocation3], 0  ;;  %s15896_s0 = inlined_call_operand.vmem [shape: bf16[8,1536], index: 0, kind: input, shape index: {}]   ;;  %s15897_s1 = inlined_call_operand.hbm [shape: bf16[256,1024], index: 1, kind: input, shape index: {}]   ;;  %s15898_s2 = inlined_call_operand.hbm [shape: f32[1,256], index: 2, kind: input, shape index: {}]   ;;  %s15899_s3 = inlined_call_operand.hbm [shape: bf16[1536,1536], index: 3, kind: input, shape index: {}]   ;;  %s15900_s4 = inlined_call_operand.hbm [shape: f32[1,384], index: 4, kind: input, shape index: {}]   ;;  %s15901_s5 = inlined_call_operand.hbm [shape: bf16[384,128], index: 5, kind: input, shape index: {}]   ;;  %s15902_s6 = inlined_call_operand.hbm [shape: f32[1,128], index: 6, kind: input, shape index: {}]   ;;  %s15903_s7 = inlined_call_operand.hbm [shape: bf16[128,128], index: 7, kind: input, shape index: {}]   ;;  %s15904_s8 = inlined_call_operand.hbm [shape: f32[1,128], index: 8, kind: input, shape index: {}]   ;;  %s15905_s9 = inlined_call_operand.vmem [shape: f32[8,128], index: 9, kind: output, shape index: {}]  }
   0x1   :  { %15 = vsyncpa [#allocation5], 0 }
   0x2   :  { %16 = vsyncpa [#allocation8], 0 }
   0x3   :  { %17 = vsyncpa [#allocation11], 0 }
   0x4   :  { %18 = vsyncpa [#allocation14], 0  ;;  %s14405_s30 = smov [#allocation4]   ;;  %s14406_s11 = smov [#allocation7]  }
   0x5   :  { %s39_s10 = sshll.u32 %s14405_s30, 4  ;;  %s61_s12 = sshll.u32 %s14406_s11, 4  ;;  %s40_s10 = int_to_ptr.vmem [resolvable:$true] %s39_s10  ;;  %s62_s12 = int_to_ptr.vmem [resolvable:$true] %s61_s12 }
   0x6   :  { %s14219_s15 = scalar_lea.hbm %s15898_s2, 32 }
   0x7   :  { %p14220_p0 = scmp.ne.s32.totalorder %s15898_s2, %s14219_s15  ;;  %p14223_p1 = scmp.lt.u32.totalorder %s14219_s15, %s15898_s2 }
   0x9   :  { %p14225_p2 = pnand %p14223_p1, %p14220_p0 }
   0xb   :  { %14228 = shalt.err (!%p14225_p2)
}
   0xc   :  { %s14229_s20 = scalar_lea.vmem %s40_s10, 32  ;;  %p14234_p4 = scmp.lt.s32.totalorder %s40_s10, %s40_s10 }
   0xd   :  { %p14230_p3 = scmp.ne.s32.totalorder %s40_s10, %s14229_s20  ;;  %p14235_p5 = scmp.lt.s32.totalorder %s14229_s20, %s14229_s20 }
   0xf   :  { %p14236_p6 = por %p14235_p5, %p14234_p4 }
  0x11   :  { %p14237_p7 = pnand %p14236_p6, %p14230_p3 }
  0x13   :  { %14240 = shalt.err (!%p14237_p7)
}
  0x14   :  { %42 = dma.hbm_to_vmem [thread:$0]  %s15898_s2, 32, %s40_s10, [#allocation5]  }
  0x15   :  { %s14241_s25 = scalar_lea.hbm %s15900_s4, 48 }
  0x16   :  { %p14242_p8 = scmp.ne.s32.totalorder %s15900_s4, %s14241_s25  ;;  %p14245_p9 = scmp.lt.u32.totalorder %s14241_s25, %s15900_s4 }
  0x18   :  { %p14247_p10 = pnand %p14245_p9, %p14242_p8 }
  0x1a   :  { %14250 = shalt.err (!%p14247_p10)
}
  0x1b   :  { %s14251_s30 = scalar_lea.vmem %s62_s12, 48  ;;  %s14255_s11 = scalar_lea.vmem %s62_s12, 64 }
  0x1c   :  { %p14252_p11 = scmp.ne.s32.totalorder %s62_s12, %s14251_s30  ;;  %p14256_p12 = scmp.lt.s32.totalorder %s62_s12, %s62_s12 }
  0x1d   :  { %p14257_p13 = scmp.lt.s32.totalorder %s14255_s11, %s14251_s30 }
  0x1f   :  { %p14258_p0 = por %p14257_p13, %p14256_p12 }
  0x21   :  { %p14259_p1 = pnand %p14258_p0, %p14252_p11 }
  0x23   :  { %14262 = shalt.err (!%p14259_p1)
}
  0x24   :  { %64 = dma.hbm_to_vmem [thread:$0]  %s15900_s4, 48, %s62_s12, [#allocation8]  }
  0x25   :  { %s14407_s13 = smov [#allocation10]   ;;  %s14408_s15 = smov [#allocation2]  }
  0x26   :  { %s83_s14 = sshll.u32 %s14407_s13, 4  ;;  %s26_s16 = sshll.u32 %s14408_s15, 4  ;;  %s84_s14 = int_to_ptr.vmem [resolvable:$true] %s83_s14  ;;  %s14495_s16 = int_to_ptr.vmem [resolvable:$true] %s26_s16 }
  0x27   :  { %s14263_s19 = scalar_lea.hbm %s15902_s6, 16 }
  0x28   :  { %p14264_p2 = scmp.ne.s32.totalorder %s15902_s6, %s14263_s19  ;;  %p14267_p3 = scmp.lt.u32.totalorder %s14263_s19, %s15902_s6 }
  0x2a   :  { %p14269_p4 = pnand %p14267_p3, %p14264_p2 }
  0x2c   :  { %14272 = shalt.err (!%p14269_p4)
}
  0x2d   :  { %s14273_s4 = scalar_lea.vmem %s84_s14, 16  ;;  %s14277_s12 = scalar_lea.vmem %s84_s14, 32 }
  0x2e   :  { %p14274_p5 = scmp.ne.s32.totalorder %s84_s14, %s14273_s4  ;;  %p14278_p6 = scmp.lt.s32.totalorder %s84_s14, %s84_s14 }
  0x2f   :  { %p14279_p7 = scmp.lt.s32.totalorder %s14277_s12, %s14273_s4 }
  0x31   :  { %p14280_p8 = por %p14279_p7, %p14278_p6 }
  0x33   :  { %p14281_p9 = pnand %p14280_p8, %p14274_p5 }
  0x35   :  { %14284 = shalt.err (!%p14281_p9)
}
  0x36   :  { %86 = dma.hbm_to_vmem [thread:$0]  %s15902_s6, 16, %s84_s14, [#allocation11]  }
  0x37   :  { %s14285_s28 = scalar_lea.hbm %s15897_s1, 16384 }
  0x38   :  { %p14286_p10 = scmp.ne.s32.totalorder %s15897_s1, %s14285_s28  ;;  %p14289_p11 = scmp.lt.u32.totalorder %s14285_s28, %s15897_s1 }
  0x3a   :  { %p14291_p12 = pnand %p14289_p11, %p14286_p10 }
  0x3c   :  { %14294 = shalt.err (!%p14291_p12)
}
  0x3d   :  { %s14295_s10 = scalar_lea.vmem %s14495_s16, 16384  ;;  %p14300_p0 = scmp.lt.s32.totalorder %s14495_s16, %s14495_s16 }
  0x3e   :  { %p14296_p13 = scmp.ne.s32.totalorder %s14495_s16, %s14295_s10  ;;  %p14301_p1 = scmp.lt.s32.totalorder %s14295_s10, %s14295_s10 }
  0x40   :  { %p14302_p2 = por %p14301_p1, %p14300_p0 }
  0x42   :  { %p14303_p3 = pnand %p14302_p2, %p14296_p13 }
  0x44   :  { %14306 = shalt.err (!%p14303_p3)
}
  0x45   :  { %s14409_s6 = smov 512   ;;  %s14410_s13 = smov 32  }
  0x46   :  { %32 = dma.hbm_to_vmem [thread:$0]  %s15897_s1, 16384, %s14495_s16, [#allocation3], %s14409_s6, %s14409_s6, %s14410_s13  }
  0x47   :  { %s14411_s17 = smov [#allocation6]   ;;  %s14307_s21 = scalar_lea.hbm %s15899_s3, 147456 }
  0x48   :  { %s48_s18 = sshll.u32 %s14411_s17, 4  ;;  %p14308_p4 = scmp.ne.s32.totalorder %s15899_s3, %s14307_s21  ;;  %s49_s18 = int_to_ptr.vmem [resolvable:$true] %s48_s18 }
  0x49   :  { %p14311_p5 = scmp.lt.u32.totalorder %s14307_s21, %s15899_s3 }
  0x4b   :  { %p14313_p6 = pnand %p14311_p5, %p14308_p4 }
  0x4d   :  { %14316 = shalt.err (!%p14313_p6)
}
  0x4e   :  { %s14317_s24 = scalar_lea.vmem %s49_s18, 147456  ;;  %p14322_p8 = scmp.lt.s32.totalorder %s49_s18, %s49_s18 }
  0x4f   :  { %p14318_p7 = scmp.ne.s32.totalorder %s49_s18, %s14317_s24  ;;  %p14323_p9 = scmp.lt.s32.totalorder %s14317_s24, %s14317_s24 }
  0x51   :  { %p14324_p10 = por %p14323_p9, %p14322_p8 }
  0x53   :  { %p14325_p11 = pnand %p14324_p10, %p14318_p7 }
  0x55   :  { %14328 = shalt.err (!%p14325_p11)
}
  0x56   :  { %s14412_s1 = smov 768   ;;  %s14413_s16 = smov 48  }
  0x57   :  { %54 = dma.hbm_to_vmem [thread:$0]  %s15899_s3, 147456, %s49_s18, [#allocation5], %s14412_s1, %s14412_s1, %s14413_s16  }
  0x58   :  { %s14414_s27 = smov [#allocation9]   ;;  %s14329_s11 = scalar_lea.hbm %s15901_s5, 3072 }
  0x59   :  { %s70_s28 = sshll.u32 %s14414_s27, 4  ;;  %p14330_p12 = scmp.ne.s32.totalorder %s15901_s5, %s14329_s11  ;;  %s71_s28 = int_to_ptr.vmem [resolvable:$true] %s70_s28 }
  0x5a   :  { %p14333_p13 = scmp.lt.u32.totalorder %s14329_s11, %s15901_s5 }
  0x5c   :  { %p14335_p0 = pnand %p14333_p13, %p14330_p12 }
  0x5e   :  { %14338 = shalt.err (!%p14335_p0)
}
  0x5f   :  { %s14339_s14 = scalar_lea.vmem %s71_s28, 3072  ;;  %p14344_p2 = scmp.lt.s32.totalorder %s71_s28, %s71_s28 }
  0x60   :  { %p14340_p1 = scmp.ne.s32.totalorder %s71_s28, %s14339_s14  ;;  %p14345_p3 = scmp.lt.s32.totalorder %s14339_s14, %s14339_s14 }
  0x62   :  { %p14346_p4 = por %p14345_p3, %p14344_p2 }
  0x64   :  { %p14347_p5 = pnand %p14346_p4, %p14340_p1 }
  0x66   :  { %14350 = shalt.err (!%p14347_p5)
}
  0x67   :  { %s14415_s3 = smov 64   ;;  %s14416_s15 = smov 4  }
  0x68   :  { %76 = dma.hbm_to_vmem [thread:$0]  %s15901_s5, 3072, %s71_s28, [#allocation8], %s14415_s3, %s14415_s3, %s14416_s15  }
  0x69   :  { %s14417_s19 = smov [#allocation12]   ;;  %s14418_s21 = smov [#allocation13]  }
  0x6a   :  { %s92_s20 = sshll.u32 %s14417_s19, 4  ;;  %s105_s22 = sshll.u32 %s14418_s21, 4  ;;  %s93_s20 = int_to_ptr.vmem [resolvable:$true] %s92_s20  ;;  %s106_s22 = int_to_ptr.vmem [resolvable:$true] %s105_s22 }
  0x6b   :  { %s14351_s12 = scalar_lea.hbm %s15903_s7, 1024 }
  0x6c   :  { %p14352_p6 = scmp.ne.s32.totalorder %s15903_s7, %s14351_s12  ;;  %p14355_p7 = scmp.lt.u32.totalorder %s14351_s12, %s15903_s7 }
  0x6e   :  { %p14357_p8 = pnand %p14355_p7, %p14352_p6 }
  0x70   :  { %14360 = shalt.err (!%p14357_p8)
}
  0x71   :  { %s14361_s5 = scalar_lea.vmem %s93_s20, 1024  ;;  %p14366_p10 = scmp.lt.s32.totalorder %s93_s20, %s93_s20 }
  0x72   :  { %p14362_p9 = scmp.ne.s32.totalorder %s93_s20, %s14361_s5  ;;  %p14367_p11 = scmp.lt.s32.totalorder %s14361_s5, %s14361_s5 }
  0x74   :  { %p14368_p12 = por %p14367_p11, %p14366_p10 }
  0x76   :  { %p14369_p13 = pnand %p14368_p12, %p14362_p9 }
  0x78   :  { %14372 = shalt.err (!%p14369_p13)
}
  0x79   :  { %98 = dma.hbm_to_vmem [thread:$0]  %s15903_s7, 1024, %s93_s20, [#allocation11], %s14415_s3, %s14415_s3, %s14416_s15  }
  0x7a   :  { %s14373_s30 = scalar_lea.hbm %s15904_s8, 16 }
  0x7b   :  { %p14374_p0 = scmp.ne.s32.totalorder %s15904_s8, %s14373_s30  ;;  %p14377_p1 = scmp.lt.u32.totalorder %s14373_s30, %s15904_s8 }
  0x7d   :  { %p14379_p2 = pnand %p14377_p1, %p14374_p0 }
  0x7f   :  { %14382 = shalt.err (!%p14379_p2)
}
  0x80   :  { %s14383_s13 = scalar_lea.vmem %s106_s22, 16  ;;  %s14387_s14 = scalar_lea.vmem %s106_s22, 32 }
  0x81   :  { %p14384_p3 = scmp.ne.s32.totalorder %s106_s22, %s14383_s13  ;;  %p14388_p4 = scmp.lt.s32.totalorder %s106_s22, %s106_s22 }
  0x82   :  { %p14389_p5 = scmp.lt.s32.totalorder %s14387_s14, %s14383_s13 }
  0x84   :  { %p14390_p6 = por %p14389_p5, %p14388_p4 }
  0x86   :  { %p14391_p7 = pnand %p14390_p6, %p14384_p3 }
  0x88   :  { %14394 = shalt.err (!%p14391_p7)
}
  0x89   :  { %108 = dma.hbm_to_vmem [thread:$0]  %s15904_s8, 16, %s106_s22, [#allocation14]  }
  0x8a   :  { %14395 = dma.done.wait [#allocation3], 16384  }
  0x8b   :  { %14396 = vsyncadd [#allocation3], 4294950912 }
  0x8c   :  { %14397 = dma.done.wait [#allocation5], 147488  }
  0x8d   :  { %14398 = vsyncadd [#allocation5], 4294819808 }
  0x8e   :  { %14399 = dma.done.wait [#allocation8], 3120  }
  0x8f   :  { %14400 = vsyncadd [#allocation8], 4294964176 }
  0x90   :  { %14401 = dma.done.wait [#allocation11], 1040  }
  0x91   :  { %14402 = vsyncadd [#allocation11], 4294966256 }
  0x92   :  { %14403 = dma.done.wait [#allocation14], 16  }
  0x93   :  { %14404 = vsyncadd [#allocation14], 4294967280  ;;  %v136_v0 = vld [vmem:[#allocation2] sm:$0xff]  ;;  %v137_v2 = vld [vmem:[#allocation2 + $0x8] sm:$0xff]  ;;  %vm14420_vm0 = vmmov 0  }
  0x94   :  { %v140_v1 = vld [vmem:[#allocation2 + $0x20] sm:$0xff]  ;;  %v141_v4 = vld [vmem:[#allocation2 + $0x28] sm:$0xff] }
  0x95   :  { %v14574_v3 = vcombine.high %v136_v0, %v140_v1  ;;  %v14576_v5 = vcombine.low %v136_v0, %v140_v1  ;;  %v144_v6 = vld [vmem:[#allocation2 + $0x40] sm:$0xff]  ;;  %v14578_v8 = vcombine.high %v137_v2, %v141_v4  ;;  %v14580_v9 = vcombine.low %v137_v2, %v141_v4  ;;  %v145_v11 = vld [vmem:[#allocation2 + $0x48] sm:$0xff] }
  0x96   :  { %v148_v7 = vld [vmem:[#allocation2 + $0x60] sm:$0xff]  ;;  %v149_v12 = vld [vmem:[#allocation2 + $0x68] sm:$0xff] }
  0x97   :  { %v14582_v10 = vcombine.high %v144_v6, %v148_v7  ;;  %v152_v13 = vld [vmem:[#allocation2 + $0x80] sm:$0xff]  ;;  %911 = vmatprep.subr.bf16.mxu0 %v14574_v3  ;;  %v14585_v14 = vcombine.high %v145_v11, %v149_v12  ;;  %v153_v16 = vld [vmem:[#allocation2 + $0x88] sm:$0xff]  ;;  %952 = vmatprep.subr.bf16.mxu1 %v14578_v8  ;;  %v14589_v18 = vcombine.low %v144_v6, %v148_v7 }
  0x98   :  { %v156_v15 = vld [vmem:[#allocation2 + $0xa0] sm:$0xff]  ;;  %v157_v17 = vld [vmem:[#allocation2 + $0xa8] sm:$0xff]  ;;  %912 = vmatpush1.bf16.msra.mxu0 %v14576_v5  ;;  %953 = vmatpush1.bf16.msra.mxu1 %v14580_v9  ;;  %v14593_v19 = vcombine.low %v145_v11, %v149_v12 }
  0x99   :  { %913 = vmatprep.subr.bf16.mxu0 %v14582_v10  ;;  %v14595_v20 = vcombine.high %v152_v13, %v156_v15  ;;  %954 = vmatprep.subr.bf16.mxu1 %v14585_v14  ;;  %v14598_v21 = vcombine.high %v153_v16, %v157_v17  ;;  %v160_v22 = vld [vmem:[#allocation2 + $0xc0] sm:$0xff]  ;;  %v161_v24 = vld [vmem:[#allocation2 + $0xc8] sm:$0xff]  ;;  %v14601_v26 = vcombine.low %v152_v13, %v156_v15 }
  0x9a   :  { %v164_v23 = vld [vmem:[#allocation2 + $0xe0] sm:$0xff]  ;;  %v165_v25 = vld [vmem:[#allocation2 + $0xe8] sm:$0xff]  ;;  %v14605_v27 = vcombine.low %v153_v16, %v157_v17 }
  0x9b   :  { %v14607_v28 = vcombine.high %v160_v22, %v164_v23  ;;  %v14610_v29 = vcombine.high %v161_v24, %v165_v25  ;;  %v168_v30 = vld [vmem:[#allocation2 + $0x100] sm:$0xff]  ;;  %v169_v32 = vld [vmem:[#allocation2 + $0x108] sm:$0xff]  ;;  %v14613_v34 = vcombine.low %v160_v22, %v164_v23  ;;  %v14617_v35 = vcombine.low %v161_v24, %v165_v25 }
  0x9c   :  { %914 = vmatpush1.bf16.msra.mxu0 %v14589_v18  ;;  %955 = vmatpush1.bf16.msra.mxu1 %v14593_v19  ;;  %v172_v31 = vld [vmem:[#allocation2 + $0x120] sm:$0xff]  ;;  %v173_v33 = vld [vmem:[#allocation2 + $0x128] sm:$0xff] }
  0x9d   :  { %915 = vmatprep.subr.bf16.mxu0 %v14595_v20  ;;  %956 = vmatprep.subr.bf16.mxu1 %v14598_v21  ;;  %v14619_v36 = vcombine.high %v168_v30, %v172_v31  ;;  %v14622_v37 = vcombine.high %v169_v32, %v173_v33  ;;  %v176_v38 = vld [vmem:[#allocation2 + $0x140] sm:$0xff]  ;;  %v177_v40 = vld [vmem:[#allocation2 + $0x148] sm:$0xff]  ;;  %v14625_v42 = vcombine.low %v168_v30, %v172_v31 }
  0x9e   :  { %v180_v39 = vld [vmem:[#allocation2 + $0x160] sm:$0xff]  ;;  %v181_v41 = vld [vmem:[#allocation2 + $0x168] sm:$0xff]  ;;  %v14629_v43 = vcombine.low %v169_v32, %v173_v33 }
  0x9f   :  { %v14631_v44 = vcombine.high %v176_v38, %v180_v39  ;;  %v14634_v45 = vcombine.high %v177_v40, %v181_v41  ;;  %v184_v46 = vld [vmem:[#allocation2 + $0x180] sm:$0xff]  ;;  %v185_v48 = vld [vmem:[#allocation2 + $0x188] sm:$0xff]  ;;  %v14637_v50 = vcombine.low %v176_v38, %v180_v39  ;;  %v14641_v51 = vcombine.low %v177_v40, %v181_v41 }
  0xa0   :  { %916 = vmatpush1.bf16.msra.mxu0 %v14601_v26  ;;  %957 = vmatpush1.bf16.msra.mxu1 %v14605_v27  ;;  %v188_v47 = vld [vmem:[#allocation2 + $0x1a0] sm:$0xff]  ;;  %v189_v49 = vld [vmem:[#allocation2 + $0x1a8] sm:$0xff] }
  0xa1   :  { %917 = vmatprep.subr.bf16.mxu0 %v14607_v28  ;;  %958 = vmatprep.subr.bf16.mxu1 %v14610_v29  ;;  %v14643_v52 = vcombine.high %v184_v46, %v188_v47  ;;  %v14648_v53 = vld [vmem:[%s15896_s0] sm:$0xff]  ;;  %v14651_v54 = vcombine.high %v185_v48, %v189_v49  ;;  %v193_v58 = vld [vmem:[#allocation2 + $0x1c8] sm:$0xff]  ;;  %v14658_v60 = vcombine.low %v184_v46, %v188_v47 }
  0xa2   :  { %v192_v55 = vld [vmem:[#allocation2 + $0x1c0] sm:$0xff]  ;;  %v14655_v57 = vcombine.high %v14648_v53, %v14648_v53  ;;  %v197_v59 = vld [vmem:[#allocation2 + $0x1e8] sm:$0xff]  ;;  %v14663_v61 = vcombine.low %v185_v48, %v189_v49 }
  0xa3   :  { %v196_v56 = vld [vmem:[#allocation2 + $0x1e0] sm:$0xff]  ;;  %v14668_v63 = vcombine.high %v193_v58, %v197_v59  ;;  %v201_v2 = vld [vmem:[#allocation2 + $0x208] sm:$0xff]  ;;  %v14676_v7 = vcombine.low %v193_v58, %v197_v59 }
  0xa4   :  { %918 = vmatpush1.bf16.msra.mxu0 %v14613_v34  ;;  %959 = vmatpush1.bf16.msra.mxu1 %v14617_v35  ;;  %v14665_v62 = vcombine.high %v192_v55, %v196_v56  ;;  %v200_v0 = vld [vmem:[#allocation2 + $0x200] sm:$0xff]  ;;  %v205_v4 = vld [vmem:[#allocation2 + $0x228] sm:$0xff]  ;;  %v14672_v6 = vcombine.low %v192_v55, %v196_v56 }
  0xa5   :  { %919 = vmatprep.subr.bf16.mxu0 %v14619_v36  ;;  %960 = vmatprep.subr.bf16.mxu1 %v14622_v37  ;;  %v204_v1 = vld [vmem:[#allocation2 + $0x220] sm:$0xff]  ;;  %v14681_v12 = vcombine.high %v201_v2, %v205_v4  ;;  %v209_v16 = vld [vmem:[#allocation2 + $0x248] sm:$0xff]  ;;  %v14688_v23 = vcombine.low %v201_v2, %v205_v4 }
  0xa6   :  { %943 = vmatprep.mubr.bf16.mxu0 %v14655_v57  ;;  %984 = vmatprep.mubr.bf16.mxu1 %v14655_v57  ;;  %v14678_v11 = vcombine.high %v200_v0, %v204_v1  ;;  %v208_v13 = vld [vmem:[#allocation2 + $0x240] sm:$0xff]  ;;  %v213_v17 = vld [vmem:[#allocation2 + $0x268] sm:$0xff]  ;;  %v14684_v22 = vcombine.low %v200_v0, %v204_v1 }
  0xa7   :  { %v212_v15 = vld [vmem:[#allocation2 + $0x260] sm:$0xff]  ;;  %v14693_v25 = vcombine.high %v209_v16, %v213_v17  ;;  %v217_v32 = vld [vmem:[#allocation2 + $0x288] sm:$0xff]  ;;  %v14700_v39 = vcombine.low %v209_v16, %v213_v17 }
  0xa8   :  { %920 = vmatpush1.bf16.msra.mxu0 %v14625_v42  ;;  %961 = vmatpush1.bf16.msra.mxu1 %v14629_v43  ;;  %v14690_v24 = vcombine.high %v208_v13, %v212_v15  ;;  %v216_v30 = vld [vmem:[#allocation2 + $0x280] sm:$0xff]  ;;  %v221_v33 = vld [vmem:[#allocation2 + $0x2a8] sm:$0xff]  ;;  %v14696_v38 = vcombine.low %v208_v13, %v212_v15 }
  0xa9   :  { %921 = vmatprep.subr.bf16.mxu0 %v14631_v44  ;;  %962 = vmatprep.subr.bf16.mxu1 %v14634_v45  ;;  %16095 = vst [vmem:[#allocation20_spill] sm:$0xff] %v14693_v25  ;;  %v220_v31 = vld [vmem:[#allocation2 + $0x2a0] sm:$0xff]  ;;  %16097 = vst [vmem:[#allocation22_spill] sm:$0xff] %v14700_v39  ;;  %v14705_v41 = vcombine.high %v217_v32, %v221_v33  ;;  %v225_v48 = vld [vmem:[#allocation2 + $0x2c8] sm:$0xff]  ;;  %v14712_v56 = vcombine.low %v217_v32, %v221_v33 }
  0xaa   :  { %16096 = vst [vmem:[#allocation21_spill] sm:$0xff] %v14696_v38  ;;  %v14702_v40 = vcombine.high %v216_v30, %v220_v31  ;;  %v224_v46 = vld [vmem:[#allocation2 + $0x2c0] sm:$0xff]  ;;  %v229_v49 = vld [vmem:[#allocation2 + $0x2e8] sm:$0xff]  ;;  %v14708_v55 = vcombine.low %v216_v30, %v220_v31 }
  0xab   :  { %16099 = vst [vmem:[#allocation24_spill] sm:$0xff] %v14705_v41  ;;  %v228_v47 = vld [vmem:[#allocation2 + $0x2e0] sm:$0xff]  ;;  %16101 = vst [vmem:[#allocation26_spill] sm:$0xff] %v14712_v56  ;;  %v14717_v0 = vcombine.high %v225_v48, %v229_v49  ;;  %v233_v2 = vld [vmem:[#allocation2 + $0x308] sm:$0xff]  ;;  %v14724_v17 = vcombine.low %v225_v48, %v229_v49 }
  0xac   :  { %922 = vmatpush1.bf16.msra.mxu0 %v14637_v50  ;;  %963 = vmatpush1.bf16.msra.mxu1 %v14641_v51  ;;  %16098 = vst [vmem:[#allocation23_spill] sm:$0xff] %v14702_v40  ;;  %16100 = vst [vmem:[#allocation25_spill] sm:$0xff] %v14708_v55  ;;  %v14714_v58 = vcombine.high %v224_v46, %v228_v47  ;;  %v232_v59 = vld [vmem:[#allocation2 + $0x300] sm:$0xff]  ;;  %v237_v4 = vld [vmem:[#allocation2 + $0x328] sm:$0xff]  ;;  %v14720_v13 = vcombine.low %v224_v46, %v228_v47 }
  0xad   :  { %923 = vmatprep.subr.bf16.mxu0 %v14643_v52  ;;  %964 = vmatprep.subr.bf16.mxu1 %v14651_v54  ;;  %16103 = vst [vmem:[#allocation28_spill] sm:$0xff] %v14717_v0  ;;  %v236_v1 = vld [vmem:[#allocation2 + $0x320] sm:$0xff]  ;;  %16105 = vst [vmem:[#allocation30_spill] sm:$0xff] %v14724_v17  ;;  %v241_v31 = vld [vmem:[#allocation2 + $0x348] sm:$0xff]  ;;  %v14729_v33 = vcombine.high %v233_v2, %v237_v4  ;;  %v14736_v48 = vcombine.low %v233_v2, %v237_v4 }
  0xae   :  { %16102 = vst [vmem:[#allocation27_spill] sm:$0xff] %v14714_v58  ;;  %16104 = vst [vmem:[#allocation29_spill] sm:$0xff] %v14720_v13  ;;  %v240_v15 = vld [vmem:[#allocation2 + $0x340] sm:$0xff]  ;;  %v14726_v30 = vcombine.high %v232_v59, %v236_v1  ;;  %v245_v32 = vld [vmem:[#allocation2 + $0x368] sm:$0xff]  ;;  %v14732_v46 = vcombine.low %v232_v59, %v236_v1 }
  0xaf   :  { %v244_v16 = vld [vmem:[#allocation2 + $0x360] sm:$0xff]  ;;  %16107 = vst [vmem:[#allocation32_spill] sm:$0xff] %v14729_v33  ;;  %16109 = vst [vmem:[#allocation34_spill] sm:$0xff] %v14736_v48  ;;  %v14748_v2 = vcombine.low %v241_v31, %v245_v32 }
  0xb0   :  { %924 = vmatpush1.bf16.msra.mxu0 %v14658_v60  ;;  %965 = vmatpush1.bf16.msra.mxu1 %v14663_v61  ;;  %16106 = vst [vmem:[#allocation31_spill] sm:$0xff] %v14726_v30  ;;  %16108 = vst [vmem:[#allocation33_spill] sm:$0xff] %v14732_v46  ;;  %v248_v47 = vld [vmem:[#allocation2 + $0x380] sm:$0xff]  ;;  %v14738_v49 = vcombine.high %v240_v15, %v244_v16  ;;  %v14744_v59 = vcombine.low %v240_v15, %v244_v16  ;;  %v138_v16 = vld [vmem:[#allocation2 + $0x10] sm:$0xff] }
  0xb1   :  { %925 = vmatprep.subr.bf16.mxu0 %v14665_v62  ;;  %966 = vmatprep.subr.bf16.mxu1 %v14668_v63  ;;  %v256_v1 = vld [vmem:[#allocation2 + $0x3c0] sm:$0xff]  ;;  %16113 = vst [vmem:[#allocation38_spill] sm:$0xff] %v14748_v2 }
  0xb2   :  { %16110 = vst [vmem:[#allocation35_spill] sm:$0xff] %v14738_v49  ;;  %16112 = vst [vmem:[#allocation37_spill] sm:$0xff] %v14744_v59 }
  0xb4   :  { %926 = vmatpush1.bf16.msra.mxu0 %v14672_v6  ;;  %967 = vmatpush1.bf16.msra.mxu1 %v14676_v7 }
  0xb5   :  { %927 = vmatprep.subr.bf16.mxu0 %v14678_v11  ;;  %968 = vmatprep.subr.bf16.mxu1 %v14681_v12 }
  0xb8   :  { %928 = vmatpush1.bf16.msra.mxu0 %v14684_v22  ;;  %969 = vmatpush1.bf16.msra.mxu1 %v14688_v23 }
  0xb9   :  { %929 = vmatprep.subr.bf16.mxu0 %v14690_v24  ;;  %970 = vmatprep.subr.bf16.mxu1 %v14693_v25 }
  0xbc   :  { %930 = vmatpush1.bf16.msra.mxu0 %v14696_v38  ;;  %971 = vmatpush1.bf16.msra.mxu1 %v14700_v39 }
  0xbd   :  { %931 = vmatprep.subr.bf16.mxu0 %v14702_v40  ;;  %972 = vmatprep.subr.bf16.mxu1 %v14705_v41 }
  0xc0   :  { %932 = vmatpush1.bf16.msra.mxu0 %v14708_v55  ;;  %973 = vmatpush1.bf16.msra.mxu1 %v14712_v56  ;;  %v252_v55 = vld [vmem:[#allocation2 + $0x3a0] sm:$0xff]  ;;  %v253_v56 = vld [vmem:[#allocation2 + $0x3a8] sm:$0xff] }
  0xc1   :  { %933 = vmatprep.subr.bf16.mxu0 %v14714_v58  ;;  %974 = vmatprep.subr.bf16.mxu1 %v14717_v0  ;;  %v249_v58 = vld [vmem:[#allocation2 + $0x388] sm:$0xff]  ;;  %v14741_v0 = vcombine.high %v241_v31, %v245_v32  ;;  %v14750_v4 = vcombine.high %v248_v47, %v252_v55  ;;  %v14756_v15 = vcombine.low %v248_v47, %v252_v55  ;;  %v146_v47 = vld [vmem:[#allocation2 + $0x50] sm:$0xff] }
  0xc2   :  { %v14760_v31 = vcombine.low %v249_v58, %v253_v56 }
  0xc3   :  { %16111 = vst [vmem:[#allocation36_spill] sm:$0xff] %v14741_v0  ;;  %16114 = vst [vmem:[#allocation39_spill] sm:$0xff] %v14750_v4 }
  0xc4   :  { %934 = vmatpush1.bf16.msra.mxu0 %v14720_v13  ;;  %975 = vmatpush1.bf16.msra.mxu1 %v14724_v17  ;;  %v260_v13 = vld [vmem:[#allocation2 + $0x3e0] sm:$0xff]  ;;  %v261_v17 = vld [vmem:[#allocation2 + $0x3e8] sm:$0xff]  ;;  %16116 = vst [vmem:[#allocation41_spill] sm:$0xff] %v14756_v15  ;;  %16117 = vst [vmem:[#allocation42_spill] sm:$0xff] %v14760_v31 }
  0xc5   :  { %935 = vmatprep.subr.bf16.mxu0 %v14726_v30  ;;  %976 = vmatprep.subr.bf16.mxu1 %v14729_v33  ;;  %v257_v30 = vld [vmem:[#allocation2 + $0x3c8] sm:$0xff]  ;;  %v14753_v33 = vcombine.high %v249_v58, %v253_v56  ;;  %v14762_v32 = vcombine.high %v256_v1, %v260_v13  ;;  %v14768_v55 = vcombine.low %v256_v1, %v260_v13 }
  0xc6   :  { %v14772_v56 = vcombine.low %v257_v30, %v261_v17  ;;  %v14781_v13 = vcombine.low %v14648_v53, %v14648_v53 }
  0xc7   :  { %16115 = vst [vmem:[#allocation40_spill] sm:$0xff] %v14753_v33  ;;  %16118 = vst [vmem:[#allocation43_spill] sm:$0xff] %v14762_v32 }
  0xc8   :  { %936 = vmatpush1.bf16.msra.mxu0 %v14732_v46  ;;  %977 = vmatpush1.bf16.msra.mxu1 %v14736_v48  ;;  %v142_v46 = vld [vmem:[#allocation2 + $0x30] sm:$0xff]  ;;  %v143_v48 = vld [vmem:[#allocation2 + $0x38] sm:$0xff]  ;;  %16120 = vst [vmem:[#allocation45_spill] sm:$0xff] %v14768_v55  ;;  %16121 = vst [vmem:[#allocation46_spill] sm:$0xff] %v14772_v56 }
  0xc9   :  { %937 = vmatprep.subr.bf16.mxu0 %v14738_v49  ;;  %978 = vmatprep.subr.bf16.mxu1 %v14741_v0  ;;  %v139_v49 = vld [vmem:[#allocation2 + $0x18] sm:$0xff]  ;;  %v14765_v0 = vcombine.high %v257_v30, %v261_v17  ;;  %v14774_v58 = vcombine.high %v138_v16, %v142_v46  ;;  %v14784_v1 = vcombine.low %v138_v16, %v142_v46  ;;  %v162_v16 = vld [vmem:[#allocation2 + $0xd0] sm:$0xff] }
  0xca   :  { %v14788_v17 = vcombine.low %v139_v49, %v143_v48 }
  0xcb   :  { %16119 = vst [vmem:[#allocation44_spill] sm:$0xff] %v14765_v0  ;;  %16122 = vst [vmem:[#allocation47_spill] sm:$0xff] %v14774_v58 }
  0xcc   :  { %938 = vmatpush1.bf16.msra.mxu0 %v14744_v59  ;;  %979 = vmatpush1.bf16.msra.mxu1 %v14748_v2  ;;  %v150_v59 = vld [vmem:[#allocation2 + $0x70] sm:$0xff]  ;;  %v151_v2 = vld [vmem:[#allocation2 + $0x78] sm:$0xff]  ;;  %16124 = vst [vmem:[#allocation49_spill] sm:$0xff] %v14784_v1  ;;  %16125 = vst [vmem:[#allocation50_spill] sm:$0xff] %v14788_v17 }
  0xcd   :  { %939 = vmatprep.subr.bf16.mxu0 %v14750_v4  ;;  %980 = vmatprep.subr.bf16.mxu1 %v14753_v33  ;;  %v147_v4 = vld [vmem:[#allocation2 + $0x58] sm:$0xff]  ;;  %v14777_v33 = vcombine.high %v139_v49, %v143_v48  ;;  %v14790_v30 = vcombine.high %v146_v47, %v150_v59  ;;  %v14798_v46 = vcombine.low %v146_v47, %v150_v59  ;;  %v170_v47 = vld [vmem:[#allocation2 + $0x110] sm:$0xff] }
  0xce   :  { %v14793_v53 = vcombine.high %v147_v4, %v151_v2  ;;  %v14802_v48 = vcombine.low %v147_v4, %v151_v2 }
  0xcf   :  { %16123 = vst [vmem:[#allocation48_spill] sm:$0xff] %v14777_v33  ;;  %16126 = vst [vmem:[#allocation51_spill] sm:$0xff] %v14790_v30 }
  0xd0   :  { %940 = vmatpush1.bf16.msra.mxu0 %v14756_v15  ;;  %981 = vmatpush1.bf16.msra.mxu1 %v14760_v31  ;;  %v154_v31 = vld [vmem:[#allocation2 + $0x90] sm:$0xff]  ;;  %v159_v15 = vld [vmem:[#allocation2 + $0xb8] sm:$0xff]  ;;  %16127 = vst [vmem:[#allocation52_spill] sm:$0xff] %v14793_v53  ;;  %16128 = vst [vmem:[#allocation53_spill] sm:$0xff] %v14798_v46 }
  0xd1   :  { %941 = vmatprep.subr.bf16.mxu0 %v14762_v32  ;;  %982 = vmatprep.subr.bf16.mxu1 %v14765_v0  ;;  %v158_v32 = vld [vmem:[#allocation2 + $0xb0] sm:$0xff]  ;;  %v155_v0 = vld [vmem:[#allocation2 + $0x98] sm:$0xff]  ;;  %16129 = vst [vmem:[#allocation54_spill] sm:$0xff] %v14802_v48 }
  0xd2   :  { %v14804_v49 = vcombine.high %v154_v31, %v158_v32  ;;  %v14812_v59 = vcombine.low %v154_v31, %v158_v32  ;;  %v14816_v2 = vcombine.low %v155_v0, %v159_v15  ;;  %v178_v31 = vld [vmem:[#allocation2 + $0x150] sm:$0xff] }
  0xd3   :  { %v182_v32 = vld [vmem:[#allocation2 + $0x170] sm:$0xff] }
  0xd4   :  { %942 = vmatpush1.bf16.msra.mxu0 %v14768_v55  ;;  %983 = vmatpush1.bf16.msra.mxu1 %v14772_v56  ;;  %16130 = vst [vmem:[#allocation55_spill] sm:$0xff] %v14804_v49  ;;  %v167_v56 = vld [vmem:[#allocation2 + $0xf8] sm:$0xff]  ;;  %v14807_v55 = vcombine.high %v155_v0, %v159_v15  ;;  %16132 = vst [vmem:[#allocation57_spill] sm:$0xff] %v14812_v59 }
  0xd5   :  { %993 = vmatprep.subr.bf16.mxu0 %v14774_v58  ;;  %1034 = vmatprep.subr.bf16.mxu1 %v14777_v33  ;;  %v166_v58 = vld [vmem:[#allocation2 + $0xf0] sm:$0xff]  ;;  %v163_v33 = vld [vmem:[#allocation2 + $0xd8] sm:$0xff]  ;;  %16133 = vst [vmem:[#allocation58_spill] sm:$0xff] %v14816_v2 }
  0xd6   :  { %16131 = vst [vmem:[#allocation56_spill] sm:$0xff] %v14807_v55  ;;  %v14818_v4 = vcombine.high %v162_v16, %v166_v58  ;;  %v14828_v0 = vcombine.low %v163_v33, %v167_v56 }
  0xd7   :  { %944 = vmatmul.mubr.bf16.vlgmr.msra.gmra.mrb[0].mxu0 %v14781_v13  ;;  %985 = vmatmul.mubr.bf16.vlgmr.msra.gmra.mrb[0].mxu1 %v14781_v13 }
  0xd8   :  { %994 = vmatpush1.bf16.msra.mxu0 %v14784_v1  ;;  %1035 = vmatpush1.bf16.msra.mxu1 %v14788_v17  ;;  %16134 = vst [vmem:[#allocation59_spill] sm:$0xff] %v14818_v4  ;;  %v175_v17 = vld [vmem:[#allocation2 + $0x138] sm:$0xff]  ;;  %v14821_v1 = vcombine.high %v163_v33, %v167_v56  ;;  %16137 = vst [vmem:[#allocation62_spill] sm:$0xff] %v14828_v0  ;;  %v14842_v56 = vcombine.high %v178_v31, %v182_v32 }
  0xd9   :  { %995 = vmatprep.subr.bf16.mxu0 %v14790_v30  ;;  %1036 = vmatprep.subr.bf16.mxu1 %v14793_v53  ;;  %v174_v30 = vld [vmem:[#allocation2 + $0x130] sm:$0xff]  ;;  %v171_v53 = vld [vmem:[#allocation2 + $0x118] sm:$0xff] }
  0xda   :  { %1025 = vmatprep.mubr.bf16.mxu0 %v14655_v57  ;;  %1066 = vmatprep.mubr.bf16.mxu1 %v14655_v57  ;;  %16135 = vst [vmem:[#allocation60_spill] sm:$0xff] %v14821_v1  ;;  %v14824_v57 = vcombine.low %v162_v16, %v166_v58  ;;  %v14830_v15 = vcombine.high %v170_v47, %v174_v30  ;;  %v186_v16 = vld [vmem:[#allocation2 + $0x190] sm:$0xff]  ;;  %16142 = vst [vmem:[#allocation67_spill] sm:$0xff] %v14842_v56 }
  0xdb   :  { %v14836_v58 = vcombine.low %v170_v47, %v174_v30  ;;  %v14840_v33 = vcombine.low %v171_v53, %v175_v17  ;;  %v14848_v30 = vcombine.low %v178_v31, %v182_v32  ;;  %v194_v47 = vld [vmem:[#allocation2 + $0x1d0] sm:$0xff] }
  0xdc   :  { %996 = vmatpush1.bf16.msra.mxu0 %v14798_v46  ;;  %1037 = vmatpush1.bf16.msra.mxu1 %v14802_v48  ;;  %16136 = vst [vmem:[#allocation61_spill] sm:$0xff] %v14824_v57  ;;  %16138 = vst [vmem:[#allocation63_spill] sm:$0xff] %v14830_v15  ;;  %v183_v48 = vld [vmem:[#allocation2 + $0x178] sm:$0xff]  ;;  %v202_v32 = vld [vmem:[#allocation2 + $0x210] sm:$0xff] }
  0xdd   :  { %997 = vmatprep.subr.bf16.mxu0 %v14804_v49  ;;  %1038 = vmatprep.subr.bf16.mxu1 %v14807_v55  ;;  %v179_v49 = vld [vmem:[#allocation2 + $0x158] sm:$0xff]  ;;  %v14833_v55 = vcombine.high %v171_v53, %v175_v17  ;;  %16140 = vst [vmem:[#allocation65_spill] sm:$0xff] %v14836_v58  ;;  %16141 = vst [vmem:[#allocation66_spill] sm:$0xff] %v14840_v33 }
  0xde   :  { %16144 = vst [vmem:[#allocation69_spill] sm:$0xff] %v14848_v30  ;;  %v14852_v17 = vcombine.low %v179_v49, %v183_v48 }
  0xdf   :  { %16139 = vst [vmem:[#allocation64_spill] sm:$0xff] %v14833_v55 }
  0xe0   :  { %998 = vmatpush1.bf16.msra.mxu0 %v14812_v59  ;;  %1039 = vmatpush1.bf16.msra.mxu1 %v14816_v2  ;;  %v190_v59 = vld [vmem:[#allocation2 + $0x1b0] sm:$0xff]  ;;  %v191_v2 = vld [vmem:[#allocation2 + $0x1b8] sm:$0xff]  ;;  %16145 = vst [vmem:[#allocation70_spill] sm:$0xff] %v14852_v17 }
  0xe1   :  { %999 = vmatprep.subr.bf16.mxu0 %v14818_v4  ;;  %1040 = vmatprep.subr.bf16.mxu1 %v14821_v1  ;;  %v187_v4 = vld [vmem:[#allocation2 + $0x198] sm:$0xff]  ;;  %v14845_v1 = vcombine.high %v179_v49, %v183_v48  ;;  %v14854_v53 = vcombine.high %v186_v16, %v190_v59  ;;  %v14860_v31 = vcombine.low %v186_v16, %v190_v59  ;;  %v210_v16 = vld [vmem:[#allocation2 + $0x250] sm:$0xff] }
  0xe2   :  { %v14864_v48 = vcombine.low %v187_v4, %v191_v2 }
  0xe3   :  { %16143 = vst [vmem:[#allocation68_spill] sm:$0xff] %v14845_v1  ;;  %16146 = vst [vmem:[#allocation71_spill] sm:$0xff] %v14854_v53 }
  0xe4   :  { %1000 = vmatpush1.bf16.msra.mxu0 %v14824_v57  ;;  %1041 = vmatpush1.bf16.msra.mxu1 %v14828_v0  ;;  %v198_v57 = vld [vmem:[#allocation2 + $0x1f0] sm:$0xff]  ;;  %v199_v0 = vld [vmem:[#allocation2 + $0x1f8] sm:$0xff]  ;;  %16148 = vst [vmem:[#allocation73_spill] sm:$0xff] %v14860_v31  ;;  %16149 = vst [vmem:[#allocation74_spill] sm:$0xff] %v14864_v48 }
  0xe5   :  { %1001 = vmatprep.subr.bf16.mxu0 %v14830_v15  ;;  %1042 = vmatprep.subr.bf16.mxu1 %v14833_v55  ;;  %v195_v15 = vld [vmem:[#allocation2 + $0x1d8] sm:$0xff]  ;;  %v14857_v55 = vcombine.high %v187_v4, %v191_v2  ;;  %v14866_v49 = vcombine.high %v194_v47, %v198_v57  ;;  %v14872_v59 = vcombine.low %v194_v47, %v198_v57  ;;  %v218_v47 = vld [vmem:[#allocation2 + $0x290] sm:$0xff] }
  0xe6   :  { %v14876_v2 = vcombine.low %v195_v15, %v199_v0 }
  0xe7   :  { %16147 = vst [vmem:[#allocation72_spill] sm:$0xff] %v14857_v55  ;;  %16150 = vst [vmem:[#allocation75_spill] sm:$0xff] %v14866_v49 }
  0xe8   :  { %1002 = vmatpush1.bf16.msra.mxu0 %v14836_v58  ;;  %1043 = vmatpush1.bf16.msra.mxu1 %v14840_v33  ;;  %v206_v58 = vld [vmem:[#allocation2 + $0x230] sm:$0xff]  ;;  %v207_v33 = vld [vmem:[#allocation2 + $0x238] sm:$0xff]  ;;  %16152 = vst [vmem:[#allocation77_spill] sm:$0xff] %v14872_v59  ;;  %16153 = vst [vmem:[#allocation78_spill] sm:$0xff] %v14876_v2 }
  0xe9   :  { %1003 = vmatprep.subr.bf16.mxu0 %v14842_v56  ;;  %1044 = vmatprep.subr.bf16.mxu1 %v14845_v1  ;;  %v203_v56 = vld [vmem:[#allocation2 + $0x218] sm:$0xff]  ;;  %v14869_v1 = vcombine.high %v195_v15, %v199_v0  ;;  %v14878_v4 = vcombine.high %v202_v32, %v206_v58  ;;  %v14884_v57 = vcombine.low %v202_v32, %v206_v58  ;;  %v226_v32 = vld [vmem:[#allocation2 + $0x2d0] sm:$0xff] }
  0xea   :  { %v14888_v0 = vcombine.low %v203_v56, %v207_v33 }
  0xeb   :  { %16151 = vst [vmem:[#allocation76_spill] sm:$0xff] %v14869_v1  ;;  %16154 = vst [vmem:[#allocation79_spill] sm:$0xff] %v14878_v4 }
  0xec   :  { %1004 = vmatpush1.bf16.msra.mxu0 %v14848_v30  ;;  %1045 = vmatpush1.bf16.msra.mxu1 %v14852_v17  ;;  %v214_v30 = vld [vmem:[#allocation2 + $0x270] sm:$0xff]  ;;  %v215_v17 = vld [vmem:[#allocation2 + $0x278] sm:$0xff]  ;;  %16156 = vst [vmem:[#allocation81_spill] sm:$0xff] %v14884_v57  ;;  %16157 = vst [vmem:[#allocation82_spill] sm:$0xff] %v14888_v0 }
  0xed   :  { %1005 = vmatprep.subr.bf16.mxu0 %v14854_v53  ;;  %1046 = vmatprep.subr.bf16.mxu1 %v14857_v55  ;;  %v211_v53 = vld [vmem:[#allocation2 + $0x258] sm:$0xff]  ;;  %v14881_v55 = vcombine.high %v203_v56, %v207_v33  ;;  %v14890_v15 = vcombine.high %v210_v16, %v214_v30  ;;  %v14896_v58 = vcombine.low %v210_v16, %v214_v30  ;;  %v234_v16 = vld [vmem:[#allocation2 + $0x310] sm:$0xff] }
  0xee   :  { %v14900_v33 = vcombine.low %v211_v53, %v215_v17 }
  0xef   :  { %16155 = vst [vmem:[#allocation80_spill] sm:$0xff] %v14881_v55  ;;  %16158 = vst [vmem:[#allocation83_spill] sm:$0xff] %v14890_v15 }
  0xf0   :  { %1006 = vmatpush1.bf16.msra.mxu0 %v14860_v31  ;;  %1047 = vmatpush1.bf16.msra.mxu1 %v14864_v48  ;;  %v222_v31 = vld [vmem:[#allocation2 + $0x2b0] sm:$0xff]  ;;  %v223_v48 = vld [vmem:[#allocation2 + $0x2b8] sm:$0xff]  ;;  %16160 = vst [vmem:[#allocation85_spill] sm:$0xff] %v14896_v58  ;;  %16161 = vst [vmem:[#allocation86_spill] sm:$0xff] %v14900_v33 }
  0xf1   :  { %1007 = vmatprep.subr.bf16.mxu0 %v14866_v49  ;;  %1048 = vmatprep.subr.bf16.mxu1 %v14869_v1  ;;  %v219_v49 = vld [vmem:[#allocation2 + $0x298] sm:$0xff]  ;;  %v14893_v1 = vcombine.high %v211_v53, %v215_v17  ;;  %v14902_v56 = vcombine.high %v218_v47, %v222_v31  ;;  %v14908_v30 = vcombine.low %v218_v47, %v222_v31  ;;  %v242_v47 = vld [vmem:[#allocation2 + $0x350] sm:$0xff] }
  0xf2   :  { %v14912_v17 = vcombine.low %v219_v49, %v223_v48 }
  0xf3   :  { %16159 = vst [vmem:[#allocation84_spill] sm:$0xff] %v14893_v1  ;;  %16162 = vst [vmem:[#allocation87_spill] sm:$0xff] %v14902_v56 }
  0xf4   :  { %1008 = vmatpush1.bf16.msra.mxu0 %v14872_v59  ;;  %1049 = vmatpush1.bf16.msra.mxu1 %v14876_v2  ;;  %v230_v59 = vld [vmem:[#allocation2 + $0x2f0] sm:$0xff]  ;;  %v231_v2 = vld [vmem:[#allocation2 + $0x2f8] sm:$0xff]  ;;  %16164 = vst [vmem:[#allocation89_spill] sm:$0xff] %v14908_v30  ;;  %16165 = vst [vmem:[#allocation90_spill] sm:$0xff] %v14912_v17 }
  0xf5   :  { %1009 = vmatprep.subr.bf16.mxu0 %v14878_v4  ;;  %1050 = vmatprep.subr.bf16.mxu1 %v14881_v55  ;;  %v227_v4 = vld [vmem:[#allocation2 + $0x2d8] sm:$0xff]  ;;  %v14905_v55 = vcombine.high %v219_v49, %v223_v48  ;;  %v14914_v53 = vcombine.high %v226_v32, %v230_v59  ;;  %v14920_v31 = vcombine.low %v226_v32, %v230_v59  ;;  %v250_v32 = vld [vmem:[#allocation2 + $0x390] sm:$0xff] }
  0xf6   :  { %v14924_v48 = vcombine.low %v227_v4, %v231_v2 }
  0xf7   :  { %16163 = vst [vmem:[#allocation88_spill] sm:$0xff] %v14905_v55  ;;  %16166 = vst [vmem:[#allocation91_spill] sm:$0xff] %v14914_v53 }
  0xf8   :  { %1010 = vmatpush1.bf16.msra.mxu0 %v14884_v57  ;;  %1051 = vmatpush1.bf16.msra.mxu1 %v14888_v0  ;;  %v238_v57 = vld [vmem:[#allocation2 + $0x330] sm:$0xff]  ;;  %v239_v0 = vld [vmem:[#allocation2 + $0x338] sm:$0xff]  ;;  %16168 = vst [vmem:[#allocation93_spill] sm:$0xff] %v14920_v31  ;;  %16169 = vst [vmem:[#allocation94_spill] sm:$0xff] %v14924_v48 }
  0xf9   :  { %1011 = vmatprep.subr.bf16.mxu0 %v14890_v15  ;;  %1052 = vmatprep.subr.bf16.mxu1 %v14893_v1  ;;  %v235_v15 = vld [vmem:[#allocation2 + $0x318] sm:$0xff]  ;;  %v14917_v1 = vcombine.high %v227_v4, %v231_v2  ;;  %v14926_v49 = vcombine.high %v234_v16, %v238_v57  ;;  %v14932_v59 = vcombine.low %v234_v16, %v238_v57  ;;  %v258_v16 = vld [vmem:[#allocation2 + $0x3d0] sm:$0xff] }
  0xfa   :  { %v14936_v2 = vcombine.low %v235_v15, %v239_v0 }
  0xfb   :  { %16167 = vst [vmem:[#allocation92_spill] sm:$0xff] %v14917_v1  ;;  %16170 = vst [vmem:[#allocation95_spill] sm:$0xff] %v14926_v49 }
  0xfc   :  { %1012 = vmatpush1.bf16.msra.mxu0 %v14896_v58  ;;  %1053 = vmatpush1.bf16.msra.mxu1 %v14900_v33  ;;  %v246_v58 = vld [vmem:[#allocation2 + $0x370] sm:$0xff]  ;;  %v247_v33 = vld [vmem:[#allocation2 + $0x378] sm:$0xff]  ;;  %16172 = vst [vmem:[#allocation97_spill] sm:$0xff] %v14932_v59  ;;  %16173 = vst [vmem:[#allocation98_spill] sm:$0xff] %v14936_v2 }
  0xfd   :  { %1013 = vmatprep.subr.bf16.mxu0 %v14902_v56  ;;  %1054 = vmatprep.subr.bf16.mxu1 %v14905_v55  ;;  %v243_v56 = vld [vmem:[#allocation2 + $0x358] sm:$0xff]  ;;  %v14929_v55 = vcombine.high %v235_v15, %v239_v0  ;;  %v14938_v4 = vcombine.high %v242_v47, %v246_v58  ;;  %v14944_v57 = vcombine.low %v242_v47, %v246_v58 }
  0xfe   :  { %v14948_v0 = vcombine.low %v243_v56, %v247_v33 }
  0xff   :  { %16171 = vst [vmem:[#allocation96_spill] sm:$0xff] %v14929_v55  ;;  %16174 = vst [vmem:[#allocation99_spill] sm:$0xff] %v14938_v4 }
 0x100   :  { %1014 = vmatpush1.bf16.msra.mxu0 %v14908_v30  ;;  %1055 = vmatpush1.bf16.msra.mxu1 %v14912_v17  ;;  %v254_v30 = vld [vmem:[#allocation2 + $0x3b0] sm:$0xff]  ;;  %v255_v17 = vld [vmem:[#allocation2 + $0x3b8] sm:$0xff]  ;;  %16176 = vst [vmem:[#allocation101_spill] sm:$0xff] %v14944_v57  ;;  %16177 = vst [vmem:[#allocation102_spill] sm:$0xff] %v14948_v0 }
 0x101   :  { %1015 = vmatprep.subr.bf16.mxu0 %v14914_v53  ;;  %1056 = vmatprep.subr.bf16.mxu1 %v14917_v1  ;;  %v251_v53 = vld [vmem:[#allocation2 + $0x398] sm:$0xff]  ;;  %v14941_v1 = vcombine.high %v243_v56, %v247_v33  ;;  %v14950_v15 = vcombine.high %v250_v32, %v254_v30  ;;  %v14956_v58 = vcombine.low %v250_v32, %v254_v30 }
 0x102   :  { %v14960_v47 = vcombine.low %v251_v53, %v255_v17  ;;  %v16190_v32 = vld [vmem:[#allocation29_spill] sm:$0xff] }
 0x103   :  { %16175 = vst [vmem:[#allocation100_spill] sm:$0xff] %v14941_v1  ;;  %16178 = vst [vmem:[#allocation103_spill] sm:$0xff] %v14950_v15 }
 0x104   :  { %1016 = vmatpush1.bf16.msra.mxu0 %v14920_v31  ;;  %1057 = vmatpush1.bf16.msra.mxu1 %v14924_v48  ;;  %v262_v31 = vld [vmem:[#allocation2 + $0x3f0] sm:$0xff]  ;;  %v263_v48 = vld [vmem:[#allocation2 + $0x3f8] sm:$0xff]  ;;  %16180 = vst [vmem:[#allocation105_spill] sm:$0xff] %v14956_v58  ;;  %16181 = vst [vmem:[#allocation106_spill] sm:$0xff] %v14960_v47 }
 0x105   :  { %1017 = vmatprep.subr.bf16.mxu0 %v14926_v49  ;;  %1058 = vmatprep.subr.bf16.mxu1 %v14929_v55  ;;  %v259_v49 = vld [vmem:[#allocation2 + $0x3d8] sm:$0xff]  ;;  %v14953_v55 = vcombine.high %v251_v53, %v255_v17  ;;  %v14962_v33 = vcombine.high %v258_v16, %v262_v31  ;;  %v14977_v17 = vld [vmem:[%s15896_s0 + $0x8] sm:$0xff] }
 0x106   :  { %v14965_v56 = vcombine.high %v259_v49, %v263_v48  ;;  %v14972_v30 = vcombine.low %v259_v49, %v263_v48  ;;  %v14986_v53 = vcombine.high %v14977_v17, %v14977_v17  ;;  %v16188_v48 = vld [vmem:[#allocation27_spill] sm:$0xff]  ;;  %v16189_v49 = vld [vmem:[#allocation28_spill] sm:$0xff] }
 0x107   :  { %16179 = vst [vmem:[#allocation104_spill] sm:$0xff] %v14953_v55  ;;  %16182 = vst [vmem:[#allocation107_spill] sm:$0xff] %v14962_v33 }
 0x108   :  { %1018 = vmatpush1.bf16.msra.mxu0 %v14932_v59  ;;  %1059 = vmatpush1.bf16.msra.mxu1 %v14936_v2  ;;  %16183 = vst [vmem:[#allocation108_spill] sm:$0xff] %v14965_v56  ;;  %16185 = vst [vmem:[#allocation110_spill] sm:$0xff] %v14972_v30 }
 0x109   :  { %1019 = vmatprep.subr.bf16.mxu0 %v14938_v4  ;;  %1060 = vmatprep.subr.bf16.mxu1 %v14941_v1  ;;  %v14968_v1 = vcombine.low %v258_v16, %v262_v31  ;;  %v16187_v31 = vld [vmem:[#allocation26_spill] sm:$0xff] }
 0x10a   :  { %v16191_v16 = vld [vmem:[#allocation30_spill] sm:$0xff] }
 0x10b   :  { %16184 = vst [vmem:[#allocation109_spill] sm:$0xff] %v14968_v1 }
 0x10c   :  { %1020 = vmatpush1.bf16.msra.mxu0 %v14944_v57  ;;  %1061 = vmatpush1.bf16.msra.mxu1 %v14948_v0 }
 0x10d   :  { %1021 = vmatprep.subr.bf16.mxu0 %v14950_v15  ;;  %1062 = vmatprep.subr.bf16.mxu1 %v14953_v55 }
 0x110   :  { %1022 = vmatpush1.bf16.msra.mxu0 %v14956_v58  ;;  %1063 = vmatpush1.bf16.msra.mxu1 %v14960_v47 }
 0x111   :  { %1023 = vmatprep.subr.bf16.mxu0 %v14962_v33  ;;  %1064 = vmatprep.subr.bf16.mxu1 %v14965_v56 }
 0x114   :  { %1024 = vmatpush1.bf16.msra.mxu0 %v14968_v1  ;;  %1065 = vmatpush1.bf16.msra.mxu1 %v14972_v30 }
 0x115   :  { %1298 = vmatprep.subr.bf16.mxu0 %v14574_v3  ;;  %1339 = vmatprep.subr.bf16.mxu1 %v14578_v8 }
 0x117   :  { %1026 = vmatmul.mubr.bf16.vlgmr.msra.gmra.mrb[4].mxu0 %v14781_v13  ;;  %1067 = vmatmul.mubr.bf16.vlgmr.msra.gmra.mrb[4].mxu1 %v14781_v13  ;;  %v16186_v13 = vld [vmem:[#allocation25_spill] sm:$0xff] }
 0x118   :  { %1299 = vmatpush1.bf16.msra.mxu0 %v14576_v5  ;;  %1340 = vmatpush1.bf16.msra.mxu1 %v14580_v9 }
 0x119   :  { %1300 = vmatprep.subr.bf16.mxu0 %v14582_v10  ;;  %1341 = vmatprep.subr.bf16.mxu1 %v14585_v14 }
 0x11a   :  { %1330 = vmatprep.mubr.bf16.mxu0 %v14986_v53  ;;  %1371 = vmatprep.mubr.bf16.mxu1 %v14986_v53 }
 0x11c   :  { %1301 = vmatpush1.bf16.msra.mxu0 %v14589_v18  ;;  %1342 = vmatpush1.bf16.msra.mxu1 %v14593_v19 }
 0x11d   :  { %1302 = vmatprep.subr.bf16.mxu0 %v14595_v20  ;;  %1343 = vmatprep.subr.bf16.mxu1 %v14598_v21 }
 0x120   :  { %1303 = vmatpush1.bf16.msra.mxu0 %v14601_v26  ;;  %1344 = vmatpush1.bf16.msra.mxu1 %v14605_v27 }
 0x121   :  { %1304 = vmatprep.subr.bf16.mxu0 %v14607_v28  ;;  %1345 = vmatprep.subr.bf16.mxu1 %v14610_v29 }
 0x124   :  { %1305 = vmatpush1.bf16.msra.mxu0 %v14613_v34  ;;  %1346 = vmatpush1.bf16.msra.mxu1 %v14617_v35 }
 0x125   :  { %1306 = vmatprep.subr.bf16.mxu0 %v14619_v36  ;;  %1347 = vmatprep.subr.bf16.mxu1 %v14622_v37 }
 0x128   :  { %1307 = vmatpush1.bf16.msra.mxu0 %v14625_v42  ;;  %1348 = vmatpush1.bf16.msra.mxu1 %v14629_v43 }
 0x129   :  { %1308 = vmatprep.subr.bf16.mxu0 %v14631_v44  ;;  %1349 = vmatprep.subr.bf16.mxu1 %v14634_v45 }
 0x12c   :  { %1309 = vmatpush1.bf16.msra.mxu0 %v14637_v50  ;;  %1350 = vmatpush1.bf16.msra.mxu1 %v14641_v51 }
 0x12d   :  { %1310 = vmatprep.subr.bf16.mxu0 %v14643_v52  ;;  %1351 = vmatprep.subr.bf16.mxu1 %v14651_v54 }
 0x130   :  { %1311 = vmatpush1.bf16.msra.mxu0 %v14658_v60  ;;  %1352 = vmatpush1.bf16.msra.mxu1 %v14663_v61 }
 0x131   :  { %1312 = vmatprep.subr.bf16.mxu0 %v14665_v62  ;;  %1353 = vmatprep.subr.bf16.mxu1 %v14668_v63 }
 0x134   :  { %1313 = vmatpush1.bf16.msra.mxu0 %v14672_v6  ;;  %1354 = vmatpush1.bf16.msra.mxu1 %v14676_v7 }
 0x135   :  { %1314 = vmatprep.subr.bf16.mxu0 %v14678_v11  ;;  %1355 = vmatprep.subr.bf16.mxu1 %v14681_v12 }
 0x138   :  { %1315 = vmatpush1.bf16.msra.mxu0 %v14684_v22  ;;  %1356 = vmatpush1.bf16.msra.mxu1 %v14688_v23 }
 0x139   :  { %1316 = vmatprep.subr.bf16.mxu0 %v14690_v24  ;;  %1357 = vmatprep.subr.bf16.mxu1 %v14693_v25  ;;  %v16192_v25 = vld [vmem:[#allocation31_spill] sm:$0xff] }
 0x13c   :  { %1317 = vmatpush1.bf16.msra.mxu0 %v14696_v38  ;;  %1358 = vmatpush1.bf16.msra.mxu1 %v14700_v39  ;;  %v16193_v38 = vld [vmem:[#allocation32_spill] sm:$0xff]  ;;  %v16194_v39 = vld [vmem:[#allocation33_spill] sm:$0xff] }
 0x13d   :  { %1318 = vmatprep.subr.bf16.mxu0 %v14702_v40  ;;  %1359 = vmatprep.subr.bf16.mxu1 %v14705_v41  ;;  %v16195_v40 = vld [vmem:[#allocation34_spill] sm:$0xff]  ;;  %v16196_v41 = vld [vmem:[#allocation35_spill] sm:$0xff] }
 0x140   :  { %1319 = vmatpush1.bf16.msra.mxu0 %v16186_v13  ;;  %1360 = vmatpush1.bf16.msra.mxu1 %v16187_v31  ;;  %v16197_v13 = vld [vmem:[#allocation36_spill] sm:$0xff]  ;;  %v16198_v31 = vld [vmem:[#allocation37_spill] sm:$0xff] }
 0x141   :  { %1320 = vmatprep.subr.bf16.mxu0 %v16188_v48  ;;  %1361 = vmatprep.subr.bf16.mxu1 %v16189_v49  ;;  %v16199_v48 = vld [vmem:[#allocation38_spill] sm:$0xff]  ;;  %v16200_v49 = vld [vmem:[#allocation39_spill] sm:$0xff] }
 0x144   :  { %1321 = vmatpush1.bf16.msra.mxu0 %v16190_v32  ;;  %1362 = vmatpush1.bf16.msra.mxu1 %v16191_v16  ;;  %v16201_v32 = vld [vmem:[#allocation40_spill] sm:$0xff]  ;;  %v16202_v16 = vld [vmem:[#allocation41_spill] sm:$0xff] }
 0x145   :  { %1322 = vmatprep.subr.bf16.mxu0 %v16192_v25  ;;  %1363 = vmatprep.subr.bf16.mxu1 %v16193_v38  ;;  %v16203_v25 = vld [vmem:[#allocation42_spill] sm:$0xff]  ;;  %v16204_v38 = vld [vmem:[#allocation43_spill] sm:$0xff] }
 0x148   :  { %1323 = vmatpush1.bf16.msra.mxu0 %v16194_v39  ;;  %1364 = vmatpush1.bf16.msra.mxu1 %v16195_v40  ;;  %v16205_v39 = vld [vmem:[#allocation44_spill] sm:$0xff] }
 0x149   :  { %1324 = vmatprep.subr.bf16.mxu0 %v16196_v41  ;;  %1365 = vmatprep.subr.bf16.mxu1 %v16197_v13  ;;  %v15054_v41 = vcombine.low %v14977_v17, %v14977_v17  ;;  %v16206_v13 = vld [vmem:[#allocation45_spill] sm:$0xff]  ;;  %v16213_v17 = vld [vmem:[#allocation52_spill] sm:$0xff] }
 0x14c   :  { %1325 = vmatpush1.bf16.msra.mxu0 %v16198_v31  ;;  %1366 = vmatpush1.bf16.msra.mxu1 %v16199_v48  ;;  %v16207_v31 = vld [vmem:[#allocation46_spill] sm:$0xff]  ;;  %v16208_v48 = vld [vmem:[#allocation47_spill] sm:$0xff] }
 0x14d   :  { %1326 = vmatprep.subr.bf16.mxu0 %v16200_v49  ;;  %1367 = vmatprep.subr.bf16.mxu1 %v16201_v32  ;;  %v16209_v49 = vld [vmem:[#allocation48_spill] sm:$0xff] }
 0x150   :  { %1327 = vmatpush1.bf16.msra.mxu0 %v16202_v16  ;;  %1368 = vmatpush1.bf16.msra.mxu1 %v16203_v25  ;;  %v16210_v25 = vld [vmem:[#allocation49_spill] sm:$0xff]  ;;  %v16222_v16 = vld [vmem:[#allocation62_spill] sm:$0xff] }
 0x151   :  { %1328 = vmatprep.subr.bf16.mxu0 %v16204_v38  ;;  %1369 = vmatprep.subr.bf16.mxu1 %v16205_v39  ;;  %v16211_v38 = vld [vmem:[#allocation50_spill] sm:$0xff]  ;;  %v16212_v39 = vld [vmem:[#allocation51_spill] sm:$0xff] }
 0x154   :  { %1329 = vmatpush1.bf16.msra.mxu0 %v16206_v13  ;;  %1370 = vmatpush1.bf16.msra.mxu1 %v16207_v31  ;;  %v16216_v31 = vld [vmem:[#allocation56_spill] sm:$0xff]  ;;  %v16217_v13 = vld [vmem:[#allocation57_spill] sm:$0xff] }
 0x155   :  { %1380 = vmatprep.subr.bf16.mxu0 %v16208_v48  ;;  %1421 = vmatprep.subr.bf16.mxu1 %v16209_v49  ;;  %v16214_v48 = vld [vmem:[#allocation54_spill] sm:$0xff]  ;;  %v16215_v49 = vld [vmem:[#allocation55_spill] sm:$0xff] }
 0x157   :  { %1331 = vmatmul.mubr.bf16.vlgmr.msra.gmra.mrb[8].mxu0 %v15054_v41  ;;  %1372 = vmatmul.mubr.bf16.vlgmr.msra.gmra.mrb[8].mxu1 %v15054_v41 }
 0x158   :  { %1381 = vmatpush1.bf16.msra.mxu0 %v16210_v25  ;;  %1422 = vmatpush1.bf16.msra.mxu1 %v16211_v38  ;;  %v16218_v25 = vld [vmem:[#allocation58_spill] sm:$0xff]  ;;  %v16219_v38 = vld [vmem:[#allocation59_spill] sm:$0xff] }
 0x159   :  { %1382 = vmatprep.subr.bf16.mxu0 %v16212_v39  ;;  %1423 = vmatprep.subr.bf16.mxu1 %v16213_v17  ;;  %v16220_v39 = vld [vmem:[#allocation60_spill] sm:$0xff]  ;;  %v16221_v17 = vld [vmem:[#allocation61_spill] sm:$0xff] }
 0x15a   :  { %1412 = vmatprep.mubr.bf16.mxu0 %v14986_v53  ;;  %1453 = vmatprep.mubr.bf16.mxu1 %v14986_v53  ;;  %v16223_v53 = vld [vmem:[#allocation63_spill] sm:$0xff] }
 0x15c   :  { %1383 = vmatpush1.bf16.msra.mxu0 %v14798_v46  ;;  %1424 = vmatpush1.bf16.msra.mxu1 %v16214_v48  ;;  %v16224_v46 = vld [vmem:[#allocation64_spill] sm:$0xff]  ;;  %v16225_v48 = vld [vmem:[#allocation65_spill] sm:$0xff] }
 0x15d   :  { %1384 = vmatprep.subr.bf16.mxu0 %v16215_v49  ;;  %1425 = vmatprep.subr.bf16.mxu1 %v16216_v31  ;;  %v16226_v49 = vld [vmem:[#allocation66_spill] sm:$0xff]  ;;  %v16227_v31 = vld [vmem:[#allocation67_spill] sm:$0xff] }
 0x160   :  { %1385 = vmatpush1.bf16.msra.mxu0 %v16217_v13  ;;  %1426 = vmatpush1.bf16.msra.mxu1 %v16218_v25  ;;  %v16228_v13 = vld [vmem:[#allocation68_spill] sm:$0xff]  ;;  %v16229_v25 = vld [vmem:[#allocation69_spill] sm:$0xff] }
 0x161   :  { %1386 = vmatprep.subr.bf16.mxu0 %v16219_v38  ;;  %1427 = vmatprep.subr.bf16.mxu1 %v16220_v39  ;;  %v16230_v38 = vld [vmem:[#allocation70_spill] sm:$0xff]  ;;  %v16231_v39 = vld [vmem:[#allocation71_spill] sm:$0xff] }
 0x164   :  { %1387 = vmatpush1.bf16.msra.mxu0 %v16221_v17  ;;  %1428 = vmatpush1.bf16.msra.mxu1 %v16222_v16  ;;  %v16232_v17 = vld [vmem:[#allocation72_spill] sm:$0xff]  ;;  %v16233_v16 = vld [vmem:[#allocation73_spill] sm:$0xff] }
 0x165   :  { %1388 = vmatprep.subr.bf16.mxu0 %v16223_v53  ;;  %1429 = vmatprep.subr.bf16.mxu1 %v16224_v46  ;;  %v16234_v53 = vld [vmem:[#allocation74_spill] sm:$0xff]  ;;  %v16235_v46 = vld [vmem:[#allocation75_spill] sm:$0xff] }
 0x168   :  { %1389 = vmatpush1.bf16.msra.mxu0 %v16225_v48  ;;  %1430 = vmatpush1.bf16.msra.mxu1 %v16226_v49  ;;  %v16236_v48 = vld [vmem:[#allocation76_spill] sm:$0xff]  ;;  %v16237_v49 = vld [vmem:[#allocation77_spill] sm:$0xff] }
 0x169   :  { %1390 = vmatprep.subr.bf16.mxu0 %v16227_v31  ;;  %1431 = vmatprep.subr.bf16.mxu1 %v16228_v13  ;;  %v16238_v31 = vld [vmem:[#allocation78_spill] sm:$0xff]  ;;  %v16239_v13 = vld [vmem:[#allocation79_spill] sm:$0xff] }
 0x16c   :  { %1391 = vmatpush1.bf16.msra.mxu0 %v16229_v25  ;;  %1432 = vmatpush1.bf16.msra.mxu1 %v16230_v38  ;;  %v16240_v25 = vld [vmem:[#allocation80_spill] sm:$0xff]  ;;  %v16241_v38 = vld [vmem:[#allocation81_spill] sm:$0xff] }
 0x16d   :  { %1392 = vmatprep.subr.bf16.mxu0 %v16231_v39  ;;  %1433 = vmatprep.subr.bf16.mxu1 %v16232_v17  ;;  %v16242_v39 = vld [vmem:[#allocation82_spill] sm:$0xff]  ;;  %v16243_v17 = vld [vmem:[#allocation83_spill] sm:$0xff] }
 0x170   :  { %1393 = vmatpush1.bf16.msra.mxu0 %v16233_v16  ;;  %1434 = vmatpush1.bf16.msra.mxu1 %v16234_v53  ;;  %v16244_v16 = vld [vmem:[#allocation84_spill] sm:$0xff]  ;;  %v16245_v53 = vld [vmem:[#allocation85_spill] sm:$0xff] }
 0x171   :  { %1394 = vmatprep.subr.bf16.mxu0 %v16235_v46  ;;  %1435 = vmatprep.subr.bf16.mxu1 %v16236_v48  ;;  %v16246_v46 = vld [vmem:[#allocation86_spill] sm:$0xff]  ;;  %v16247_v48 = vld [vmem:[#allocation87_spill] sm:$0xff] }
 0x174   :  { %1395 = vmatpush1.bf16.msra.mxu0 %v16237_v49  ;;  %1436 = vmatpush1.bf16.msra.mxu1 %v16238_v31  ;;  %v16248_v49 = vld [vmem:[#allocation88_spill] sm:$0xff]  ;;  %v16249_v31 = vld [vmem:[#allocation89_spill] sm:$0xff] }
 0x175   :  { %1396 = vmatprep.subr.bf16.mxu0 %v16239_v13  ;;  %1437 = vmatprep.subr.bf16.mxu1 %v16240_v25  ;;  %v16250_v13 = vld [vmem:[#allocation90_spill] sm:$0xff]  ;;  %v16251_v25 = vld [vmem:[#allocation91_spill] sm:$0xff] }
 0x178   :  { %1397 = vmatpush1.bf16.msra.mxu0 %v16241_v38  ;;  %1438 = vmatpush1.bf16.msra.mxu1 %v16242_v39  ;;  %v16252_v38 = vld [vmem:[#allocation92_spill] sm:$0xff]  ;;  %v16253_v39 = vld [vmem:[#allocation93_spill] sm:$0xff] }
 0x179   :  { %1398 = vmatprep.subr.bf16.mxu0 %v16243_v17  ;;  %1439 = vmatprep.subr.bf16.mxu1 %v16244_v16  ;;  %v16254_v17 = vld [vmem:[#allocation94_spill] sm:$0xff]  ;;  %v16255_v16 = vld [vmem:[#allocation95_spill] sm:$0xff] }
 0x17c   :  { %1399 = vmatpush1.bf16.msra.mxu0 %v16245_v53  ;;  %1440 = vmatpush1.bf16.msra.mxu1 %v16246_v46  ;;  %v16256_v53 = vld [vmem:[#allocation96_spill] sm:$0xff] }
 0x17d   :  { %1400 = vmatprep.subr.bf16.mxu0 %v16247_v48  ;;  %1441 = vmatprep.subr.bf16.mxu1 %v16248_v49  ;;  %v12531_v49 = vld [vmem:[#allocation6 + $0xb40] ss:$48 sps:$4 sm:$0xff]   ;;  %v12534_v48 = vld [vmem:[#allocation6 + $0xb48] ss:$48 sps:$4 sm:$0xff]  }
 0x180   :  { %1401 = vmatpush1.bf16.msra.mxu0 %v16249_v31  ;;  %1442 = vmatpush1.bf16.msra.mxu1 %v16250_v13  ;;  %v16257_v31 = vld [vmem:[#allocation100_spill] sm:$0xff] }
 0x181   :  { %1402 = vmatprep.subr.bf16.mxu0 %v16251_v25  ;;  %1443 = vmatprep.subr.bf16.mxu1 %v16252_v38  ;;  %v12500_v38 = vld [vmem:[#allocation6 + $0x90c] ss:$48 sps:$4 sm:$0xff]  }
 0x184   :  { %1403 = vmatpush1.bf16.msra.mxu0 %v16253_v39  ;;  %1444 = vmatpush1.bf16.msra.mxu1 %v16254_v17  ;;  %v12464_v17 = vld [vmem:[#allocation6 + $0x6cc] ss:$48 sps:$4 sm:$0xff]   ;;  %v12480_v39 = vld [vmem:[#allocation6 + $0x7e8] ss:$48 sps:$4 sm:$0xff]  }
 0x185   :  { %1404 = vmatprep.subr.bf16.mxu0 %v16255_v16  ;;  %1445 = vmatprep.subr.bf16.mxu1 %v16256_v53  ;;  %v12458_v53 = vld [vmem:[#allocation6 + $0x66c] ss:$48 sps:$4 sm:$0xff]   ;;  %v12453_v16 = vld [vmem:[#allocation6 + $0x660] ss:$48 sps:$4 sm:$0xff]  }
 0x188   :  { %1405 = vmatpush1.bf16.msra.mxu0 %v14932_v59  ;;  %1446 = vmatpush1.bf16.msra.mxu1 %v14936_v2  ;;  %v12452_v2 = vld [vmem:[#allocation6 + $0x60c] ss:$48 sps:$4 sm:$0xff]   ;;  %v12455_v59 = vld [vmem:[#allocation6 + $0x664] ss:$48 sps:$4 sm:$0xff]  }
 0x189   :  { %1406 = vmatprep.subr.bf16.mxu0 %v14938_v4  ;;  %1447 = vmatprep.subr.bf16.mxu1 %v16257_v31  ;;  %v12447_v31 = vld [vmem:[#allocation6 + $0x600] ss:$48 sps:$4 sm:$0xff]   ;;  %v12450_v4 = vld [vmem:[#allocation6 + $0x608] ss:$48 sps:$4 sm:$0xff]  }
 0x18c   :  { %1407 = vmatpush1.bf16.msra.mxu0 %v14944_v57  ;;  %1448 = vmatpush1.bf16.msra.mxu1 %v14948_v0 }
 0x18d   :  { %1408 = vmatprep.subr.bf16.mxu0 %v14950_v15  ;;  %1449 = vmatprep.subr.bf16.mxu1 %v14953_v55 }
 0x190   :  { %1409 = vmatpush1.bf16.msra.mxu0 %v14956_v58  ;;  %1450 = vmatpush1.bf16.msra.mxu1 %v14960_v47  ;;  %v12456_v47 = vld [vmem:[#allocation6 + $0x668] ss:$48 sps:$4 sm:$0xff]  }
 0x191   :  { %1410 = vmatprep.subr.bf16.mxu0 %v14962_v33  ;;  %1451 = vmatprep.subr.bf16.mxu1 %v14965_v56 }
 0x194   :  { %1411 = vmatpush1.bf16.msra.mxu0 %v14968_v1  ;;  %1452 = vmatpush1.bf16.msra.mxu1 %v14972_v30  ;;  %v12470_v1 = vld [vmem:[#allocation6 + $0x72c] ss:$48 sps:$4 sm:$0xff]  }
 0x195   :  { %2667 = vmatprep.subr.bf16.mxu1 %v12452_v2  ;;  %v12468_v2 = vld [vmem:[#allocation6 + $0x728] ss:$48 sps:$4 sm:$0xff]  }
 0x197   :  { %1413 = vmatmul.mubr.bf16.vlgmr.msra.gmra.mrb[12].mxu0 %v15054_v41  ;;  %1454 = vmatmul.mubr.bf16.vlgmr.msra.gmra.mrb[12].mxu1 %v15054_v41  ;;  %v12449_v41 = vld [vmem:[#allocation6 + $0x604] ss:$48 sps:$4 sm:$0xff]  }
 0x198   :  { %2626 = vmatprep.subr.bf16.mxu0 %v12449_v41  ;;  %2668 = vmatpush1.bf16.msra.mxu1 %v12450_v4  ;;  %v12465_v41 = vld [vmem:[#allocation6 + $0x720] ss:$48 sps:$4 sm:$0xff]  }
 0x199   :  { %2627 = vmatpush1.bf16.msra.mxu0 %v12447_v31  ;;  %2669 = vmatprep.subr.bf16.mxu1 %v12458_v53  ;;  %v12473_v31 = vld [vmem:[#allocation6 + $0x784] ss:$48 sps:$4 sm:$0xff]   ;;  %v12471_v4 = vld [vmem:[#allocation6 + $0x780] ss:$48 sps:$4 sm:$0xff]  }
 0x19a   :  { %2628 = vmatprep.subr.bf16.mxu0 %v12455_v59  ;;  %v12476_v59 = vld [vmem:[#allocation6 + $0x78c] ss:$48 sps:$4 sm:$0xff]   ;;  %v12479_v53 = vld [vmem:[#allocation6 + $0x7e4] ss:$48 sps:$4 sm:$0xff]  }
 0x19c   :  { %2670 = vmatpush1.bf16.msra.mxu1 %v12456_v47  ;;  %v12477_v47 = vld [vmem:[#allocation6 + $0x7e0] ss:$48 sps:$4 sm:$0xff]  }
 0x19d   :  { %2629 = vmatpush1.bf16.msra.mxu0 %v12453_v16  ;;  %2671 = vmatprep.subr.bf16.mxu1 %v12464_v17  ;;  %v12474_v16 = vld [vmem:[#allocation6 + $0x788] ss:$48 sps:$4 sm:$0xff]   ;;  %v12485_v17 = vld [vmem:[#allocation6 + $0x844] ss:$48 sps:$4 sm:$0xff]  }
 0x1aa   :  { %v15128_v0 = vpop.f32.mrb[0].mxu0  ;;  %v15130_v15 = vpop.f32.mrb[0].mxu1 }
 0x1ab   :  { %v15132_v55 = vpop.f32.mrb[1].mxu0  ;;  %v15136_v33 = vpop.f32.mrb[1].mxu1 }
 0x1ac   :  { %v949_v56 = vpop.f32.mrb[2].mxu0  ;;  %v990_v30 = vpop.f32.mrb[2].mxu1 }
 0x1ad   :  { %v950_v58 = vpop.f32.mrb[3].mxu0  ;;  %v991_v57 = vpop.f32.mrb[3].mxu1  ;;  %v12461_v56 = vld [vmem:[#allocation6 + $0x6c4] ss:$48 sps:$4 sm:$0xff]   ;;  %v12459_v30 = vld [vmem:[#allocation6 + $0x6c0] ss:$48 sps:$4 sm:$0xff]  }
 0x1ae   :  { %2630 = vmatprep.subr.bf16.mxu0 %v12461_v56  ;;  %v12462_v57 = vld [vmem:[#allocation6 + $0x6c8] ss:$48 sps:$4 sm:$0xff]   ;;  %v12467_v58 = vld [vmem:[#allocation6 + $0x724] ss:$48 sps:$4 sm:$0xff]   ;;  %v12482_v56 = vld [vmem:[#allocation6 + $0x7ec] ss:$48 sps:$4 sm:$0xff]  }
 0x1af   :  { %2631 = vmatpush1.bf16.msra.mxu0 %v12459_v30  ;;  %2672 = vmatpush1.bf16.msra.mxu1 %v12462_v57  ;;  %v12488_v30 = vld [vmem:[#allocation6 + $0x84c] ss:$48 sps:$4 sm:$0xff]   ;;  %v12483_v57 = vld [vmem:[#allocation6 + $0x840] ss:$48 sps:$4 sm:$0xff]  }
 0x1b0   :  { %2632 = vmatprep.subr.bf16.mxu0 %v12467_v58  ;;  %2673 = vmatprep.subr.bf16.mxu1 %v12470_v1  ;;  %v12486_v58 = vld [vmem:[#allocation6 + $0x848] ss:$48 sps:$4 sm:$0xff]   ;;  %v12491_v1 = vld [vmem:[#allocation6 + $0x8a4] ss:$48 sps:$4 sm:$0xff]  }
 0x1b3   :  { %2633 = vmatpush1.bf16.msra.mxu0 %v12465_v41  ;;  %2674 = vmatpush1.bf16.msra.mxu1 %v12468_v2  ;;  %v12494_v41 = vld [vmem:[#allocation6 + $0x8ac] ss:$48 sps:$4 sm:$0xff]   ;;  %v12489_v2 = vld [vmem:[#allocation6 + $0x8a0] ss:$48 sps:$4 sm:$0xff]  }
 0x1b4   :  { %2634 = vmatprep.subr.bf16.mxu0 %v12473_v31  ;;  %2675 = vmatprep.subr.bf16.mxu1 %v12476_v59  ;;  %v12492_v31 = vld [vmem:[#allocation6 + $0x8a8] ss:$48 sps:$4 sm:$0xff]   ;;  %v12497_v59 = vld [vmem:[#allocation6 + $0x904] ss:$48 sps:$4 sm:$0xff]  }
 0x1b7   :  { %2635 = vmatpush1.bf16.msra.mxu0 %v12471_v4  ;;  %2676 = vmatpush1.bf16.msra.mxu1 %v12474_v16  ;;  %v12495_v4 = vld [vmem:[#allocation6 + $0x900] ss:$48 sps:$4 sm:$0xff]   ;;  %v12498_v16 = vld [vmem:[#allocation6 + $0x908] ss:$48 sps:$4 sm:$0xff]  }
 0x1b8   :  { %2636 = vmatprep.subr.bf16.mxu0 %v12479_v53  ;;  %2677 = vmatprep.subr.bf16.mxu1 %v12482_v56  ;;  %v12503_v53 = vld [vmem:[#allocation6 + $0x964] ss:$48 sps:$4 sm:$0xff]   ;;  %v12506_v56 = vld [vmem:[#allocation6 + $0x96c] ss:$48 sps:$4 sm:$0xff]  }
 0x1bb   :  { %2637 = vmatpush1.bf16.msra.mxu0 %v12477_v47  ;;  %2678 = vmatpush1.bf16.msra.mxu1 %v12480_v39  ;;  %v12501_v47 = vld [vmem:[#allocation6 + $0x960] ss:$48 sps:$4 sm:$0xff]   ;;  %v12504_v39 = vld [vmem:[#allocation6 + $0x968] ss:$48 sps:$4 sm:$0xff]  }
 0x1bc   :  { %2638 = vmatprep.subr.bf16.mxu0 %v12485_v17  ;;  %2679 = vmatprep.subr.bf16.mxu1 %v12488_v30  ;;  %v12509_v17 = vld [vmem:[#allocation6 + $0x9c4] ss:$48 sps:$4 sm:$0xff]   ;;  %v12512_v30 = vld [vmem:[#allocation6 + $0x9cc] ss:$48 sps:$4 sm:$0xff]  }
 0x1bf   :  { %2639 = vmatpush1.bf16.msra.mxu0 %v12483_v57  ;;  %2680 = vmatpush1.bf16.msra.mxu1 %v12486_v58  ;;  %v12507_v57 = vld [vmem:[#allocation6 + $0x9c0] ss:$48 sps:$4 sm:$0xff]   ;;  %v12510_v58 = vld [vmem:[#allocation6 + $0x9c8] ss:$48 sps:$4 sm:$0xff]  }
 0x1c0   :  { %2640 = vmatprep.subr.bf16.mxu0 %v12491_v1  ;;  %2681 = vmatprep.subr.bf16.mxu1 %v12494_v41  ;;  %v12515_v1 = vld [vmem:[#allocation6 + $0xa24] ss:$48 sps:$4 sm:$0xff]   ;;  %v12518_v41 = vld [vmem:[#allocation6 + $0xa2c] ss:$48 sps:$4 sm:$0xff]  }
 0x1c3   :  { %2641 = vmatpush1.bf16.msra.mxu0 %v12489_v2  ;;  %2682 = vmatpush1.bf16.msra.mxu1 %v12492_v31  ;;  %v12513_v2 = vld [vmem:[#allocation6 + $0xa20] ss:$48 sps:$4 sm:$0xff]   ;;  %v12516_v31 = vld [vmem:[#allocation6 + $0xa28] ss:$48 sps:$4 sm:$0xff]  }
 0x1c4   :  { %2642 = vmatprep.subr.bf16.mxu0 %v12497_v59  ;;  %2683 = vmatprep.subr.bf16.mxu1 %v12500_v38  ;;  %v12521_v59 = vld [vmem:[#allocation6 + $0xa84] ss:$48 sps:$4 sm:$0xff]   ;;  %v12524_v38 = vld [vmem:[#allocation6 + $0xa8c] ss:$48 sps:$4 sm:$0xff]  }
 0x1c7   :  { %2643 = vmatpush1.bf16.msra.mxu0 %v12495_v4  ;;  %2684 = vmatpush1.bf16.msra.mxu1 %v12498_v16  ;;  %v12519_v4 = vld [vmem:[#allocation6 + $0xa80] ss:$48 sps:$4 sm:$0xff]   ;;  %v12522_v16 = vld [vmem:[#allocation6 + $0xa88] ss:$48 sps:$4 sm:$0xff]  }
 0x1c8   :  { %2644 = vmatprep.subr.bf16.mxu0 %v12503_v53  ;;  %2685 = vmatprep.subr.bf16.mxu1 %v12506_v56  ;;  %v12527_v53 = vld [vmem:[#allocation6 + $0xae4] ss:$48 sps:$4 sm:$0xff]   ;;  %v12530_v56 = vld [vmem:[#allocation6 + $0xaec] ss:$48 sps:$4 sm:$0xff]  }
 0x1cb   :  { %2645 = vmatpush1.bf16.msra.mxu0 %v12501_v47  ;;  %2686 = vmatpush1.bf16.msra.mxu1 %v12504_v39  ;;  %v12525_v39 = vld [vmem:[#allocation6 + $0xae0] ss:$48 sps:$4 sm:$0xff]  }
 0x1cc   :  { %2646 = vmatprep.subr.bf16.mxu0 %v12509_v17  ;;  %2687 = vmatprep.subr.bf16.mxu1 %v12512_v30  ;;  %v12528_v17 = vld [vmem:[#allocation6 + $0xae8] ss:$48 sps:$4 sm:$0xff]  }
 0x1cf   :  { %2647 = vmatpush1.bf16.msra.mxu0 %v12507_v57  ;;  %2688 = vmatpush1.bf16.msra.mxu1 %v12510_v58 }
 0x1d0   :  { %2648 = vmatprep.subr.bf16.mxu0 %v12515_v1  ;;  %2689 = vmatprep.subr.bf16.mxu1 %v12518_v41 }
 0x1d3   :  { %2649 = vmatpush1.bf16.msra.mxu0 %v12513_v2  ;;  %2690 = vmatpush1.bf16.msra.mxu1 %v12516_v31 }
 0x1d4   :  { %2650 = vmatprep.subr.bf16.mxu0 %v12521_v59  ;;  %2691 = vmatprep.subr.bf16.mxu1 %v12524_v38  ;;  %v12533_v59 = vld [vmem:[#allocation6 + $0xb44] ss:$48 sps:$4 sm:$0xff]   ;;  %v12536_v38 = vld [vmem:[#allocation6 + $0xb4c] ss:$48 sps:$4 sm:$0xff]  }
 0x1d7   :  { %2651 = vmatpush1.bf16.msra.mxu0 %v12519_v4  ;;  %2692 = vmatpush1.bf16.msra.mxu1 %v12522_v16  ;;  %v16258_v4 = vmax.f32 %v15128_v0, %v15130_v15  ;;  %v12545_v0 = vld [vmem:[#allocation6 + $0x614] ss:$48 sps:$4 sm:$0xff]   ;;  %v12548_v15 = vld [vmem:[#allocation6 + $0x61c] ss:$48 sps:$4 sm:$0xff]  }
 0x1d8   :  { %2652 = vmatprep.subr.bf16.mxu0 %v12527_v53  ;;  %2693 = vmatprep.subr.bf16.mxu1 %v12530_v56  ;;  %v16259_v53 = vmax.f32 %v15132_v55, %v15136_v33 }
 0x1db   :  { %2653 = vmatpush1.bf16.msra.mxu0 %v12525_v39  ;;  %2694 = vmatpush1.bf16.msra.mxu1 %v12528_v17  ;;  %v12537_v39 = vld [vmem:[#allocation6 + $0xba0] ss:$48 sps:$4 sm:$0xff]   ;;  %v12540_v17 = vld [vmem:[#allocation6 + $0xba8] ss:$48 sps:$4 sm:$0xff]  }
 0x1dc   :  { %2654 = vmatprep.subr.bf16.mxu0 %v12533_v59  ;;  %2695 = vmatprep.subr.bf16.mxu1 %v12536_v38 }
 0x1df   :  { %2655 = vmatpush1.bf16.msra.mxu0 %v12531_v49  ;;  %2696 = vmatpush1.bf16.msra.mxu1 %v12534_v48 }
 0x1ea   :  { %v1027_v47 = vpop.f32.mrb[4].mxu0  ;;  %v1068_v30 = vpop.f32.mrb[4].mxu1 }
 0x1eb   :  { %v1029_v25 = vpop.f32.mrb[5].mxu0  ;;  %v1077_v57 = vmax.f32 %v1027_v47, %v1068_v30  ;;  %v1070_v58 = vpop.f32.mrb[5].mxu1  ;;  %v12542_v47 = vld [vmem:[#allocation6 + $0xbac] ss:$48 sps:$4 sm:$0xff]  }
 0x1ec   :  { %v1031_v1 = vpop.f32.mrb[6].mxu0  ;;  %v1078_v41 = vmax.f32 %v1029_v25, %v1070_v58  ;;  %v1072_v2 = vpop.f32.mrb[6].mxu1  ;;  %v12539_v25 = vld [vmem:[#allocation6 + $0xba4] ss:$48 sps:$4 sm:$0xff]   ;;  %2697 = vmatprep.subr.bf16.mxu1 %v12542_v47 }
 0x1ed   :  { %v1032_v31 = vpop.f32.mrb[7].mxu0  ;;  %v15143_v16 = vmax.f32 %v16258_v4, %v1077_v57  ;;  %v1073_v13 = vpop.f32.mrb[7].mxu1  ;;  %2656 = vmatprep.subr.bf16.mxu0 %v12539_v25  ;;  %2698 = vmatpush1.bf16.msra.mxu1 %v12540_v17  ;;  %v1082_v2 = vlaneseq  ;;  %v134_v4 = vld [vmem:[#allocation4] sm:$0x3] }
 0x1ee   :  { %v15148_v56 = vmax.f32 %v16259_v53, %v1078_v41  ;;  %2657 = vmatpush1.bf16.msra.mxu0 %v12537_v39  ;;  %2749 = vmatprep.subr.bf16.mxu1 %v12548_v15 }
 0x1ef   :  { %2708 = vmatprep.subr.bf16.mxu0 %v12545_v0  ;;  %v15150_v31 = vshrl.u32 %v1082_v2, 7 }
 0x1f1   :  { %16260 = vst [vmem:[#allocation111_spill] sm:$0xff] %v15150_v31  ;;  %v16088_v59 = vsub.s32 0, %v15150_v31  ;;  %v16089_v53 = vsub.s32 1, %v15150_v31  ;;  %v16280_v31 = vld [vmem:[#allocation41_spill] sm:$0xff] }
 0x22a   :  { %v1332_v13 = vpop.f32.mrb[8].mxu0  ;;  %v1373_v55 = vpop.f32.mrb[8].mxu1 }
 0x22b   :  { %v1334_v33 = vpop.f32.mrb[9].mxu0  ;;  %v1462_v30 = vmax.f32 %v1332_v13, %v1373_v55  ;;  %v1375_v57 = vpop.f32.mrb[9].mxu1 }
 0x22c   :  { %v1336_v58 = vpop.f32.mrb[10].mxu0  ;;  %v1463_v49 = vmax.f32 %v1334_v33, %v1375_v57  ;;  %v1377_v48 = vpop.f32.mrb[10].mxu1  ;;  %v15156_v33 = vrot.slane %v134_v4, %v16088_v59  ;;  %v12570_v59 = vld [vmem:[#allocation6 + $0x798] ss:$48 sps:$4 sm:$0xff]  }
 0x22d   :  { %v1337_v1 = vpop.f32.mrb[11].mxu0  ;;  %v1378_v41 = vpop.f32.mrb[11].mxu1  ;;  %v15160_v48 = vrot.slane %v134_v4, %v16089_v53  ;;  %v12552_v4 = vld [vmem:[#allocation6 + $0x678] ss:$48 sps:$4 sm:$0xff]   ;;  %v16279_v53 = vld [vmem:[#allocation39_spill] sm:$0xff] }
 0x26a   :  { %v1414_v38 = vpop.f32.mrb[12].mxu0  ;;  %v1455_v25 = vpop.f32.mrb[12].mxu1 }
 0x26b   :  { %v1416_v47 = vpop.f32.mrb[13].mxu0  ;;  %v1464_v39 = vmax.f32 %v1414_v38, %v1455_v25  ;;  %v1457_v17 = vpop.f32.mrb[13].mxu1 }
 0x26c   :  { %v1418_v0 = vpop.f32.mrb[14].mxu0  ;;  %v1465_v15 = vmax.f32 %v1416_v47, %v1457_v17  ;;  %v1459_v13 = vpop.f32.mrb[14].mxu1  ;;  %v12543_v47 = vld [vmem:[#allocation6 + $0x610] ss:$48 sps:$4 sm:$0xff]   ;;  %v12546_v17 = vld [vmem:[#allocation6 + $0x618] ss:$48 sps:$4 sm:$0xff]  }
 0x26d   :  { %v1419_v55 = vpop.f32.mrb[15].mxu0  ;;  %v1466_v57 = vmax.f32 %v1462_v30, %v1464_v39  ;;  %v1460_v58 = vpop.f32.mrb[15].mxu1  ;;  %v12551_v13 = vld [vmem:[#allocation6 + $0x674] ss:$48 sps:$4 sm:$0xff]   ;;  %v12549_v30 = vld [vmem:[#allocation6 + $0x670] ss:$48 sps:$4 sm:$0xff]  }
 0x26e   :  { %v1467_v1 = vmax.f32 %v1463_v49, %v1465_v15  ;;  %v12554_v49 = vld [vmem:[#allocation6 + $0x67c] ss:$48 sps:$4 sm:$0xff]   ;;  %v12557_v39 = vld [vmem:[#allocation6 + $0x6d4] ss:$48 sps:$4 sm:$0xff]   ;;  %v12558_v58 = vld [vmem:[#allocation6 + $0x6d8] ss:$48 sps:$4 sm:$0xff]  }
 0x26f   :  { %v1468_v41 = vadd.f32 %v1466_v57, %v15156_v33  ;;  %v12560_v15 = vld [vmem:[#allocation6 + $0x6dc] ss:$48 sps:$4 sm:$0xff]   ;;  %v12555_v57 = vld [vmem:[#allocation6 + $0x6d0] ss:$48 sps:$4 sm:$0xff]  }
 0x270   :  { %v1469_v2 = vadd.f32 %v1467_v1, %v15160_v48  ;;  %v12563_v1 = vld [vmem:[#allocation6 + $0x734] ss:$48 sps:$4 sm:$0xff]  }
 0x271   :  { %v1470_v38 = vmax.f32 %v1468_v41, 0.0  ;;  %v12566_v41 = vld [vmem:[#allocation6 + $0x73c] ss:$48 sps:$4 sm:$0xff]  }
 0x272   :  { %v1471_v25 = vmax.f32 %v1469_v2, 0.0  ;;  %v12561_v2 = vld [vmem:[#allocation6 + $0x730] ss:$48 sps:$4 sm:$0xff]  }
 0x273   :  { %v15166_v55 = vpack.c.bf16 %v1470_v38, %v1470_v38  ;;  %v12564_v38 = vld [vmem:[#allocation6 + $0x738] ss:$48 sps:$4 sm:$0xff]  }
 0x274   :  { %v15164_v0 = vpack.c.bf16 %v1471_v25, %v1471_v25  ;;  %v12569_v25 = vld [vmem:[#allocation6 + $0x794] ss:$48 sps:$4 sm:$0xff]  }
 0x276   :  { %2658 = vmatprep.mubr.bf16.mxu0 %v15164_v0  ;;  %2699 = vmatprep.mubr.bf16.mxu1 %v15164_v0 }
 0x277   :  { %2659 = vmatmul.mubr.bf16.vlgmr.msra.gmra.mrb[16].mxu0 %v15166_v55  ;;  %2700 = vmatmul.mubr.bf16.vlgmr.msra.gmra.mrb[16].mxu1 %v15166_v55 }
 0x278   :  { %2709 = vmatpush1.bf16.msra.mxu0 %v12543_v47  ;;  %2750 = vmatpush1.bf16.msra.mxu1 %v12546_v17  ;;  %v12572_v47 = vld [vmem:[#allocation6 + $0x79c] ss:$48 sps:$4 sm:$0xff]   ;;  %v12567_v17 = vld [vmem:[#allocation6 + $0x790] ss:$48 sps:$4 sm:$0xff]  }
 0x279   :  { %2740 = vmatprep.mubr.bf16.mxu0 %v15164_v0  ;;  %2781 = vmatprep.mubr.bf16.mxu1 %v15164_v0 }
 0x27a   :  { %2710 = vmatprep.subr.bf16.mxu0 %v12551_v13  ;;  %2751 = vmatprep.subr.bf16.mxu1 %v12554_v49  ;;  %v12575_v13 = vld [vmem:[#allocation6 + $0x7f4] ss:$48 sps:$4 sm:$0xff]   ;;  %v12576_v49 = vld [vmem:[#allocation6 + $0x7f8] ss:$48 sps:$4 sm:$0xff]  }
 0x27c   :  { %2711 = vmatpush1.bf16.msra.mxu0 %v12549_v30  ;;  %2752 = vmatpush1.bf16.msra.mxu1 %v12552_v4  ;;  %v12578_v30 = vld [vmem:[#allocation6 + $0x7fc] ss:$48 sps:$4 sm:$0xff]   ;;  %v12573_v4 = vld [vmem:[#allocation6 + $0x7f0] ss:$48 sps:$4 sm:$0xff]  }
 0x27d   :  { %2712 = vmatprep.subr.bf16.mxu0 %v12557_v39  ;;  %2753 = vmatprep.subr.bf16.mxu1 %v12560_v15  ;;  %v12581_v39 = vld [vmem:[#allocation6 + $0x854] ss:$48 sps:$4 sm:$0xff]   ;;  %v12584_v15 = vld [vmem:[#allocation6 + $0x85c] ss:$48 sps:$4 sm:$0xff]  }
 0x280   :  { %2713 = vmatpush1.bf16.msra.mxu0 %v12555_v57  ;;  %2754 = vmatpush1.bf16.msra.mxu1 %v12558_v58  ;;  %v12579_v57 = vld [vmem:[#allocation6 + $0x850] ss:$48 sps:$4 sm:$0xff]   ;;  %v12582_v58 = vld [vmem:[#allocation6 + $0x858] ss:$48 sps:$4 sm:$0xff]  }
 0x281   :  { %2714 = vmatprep.subr.bf16.mxu0 %v12563_v1  ;;  %2755 = vmatprep.subr.bf16.mxu1 %v12566_v41  ;;  %v12587_v1 = vld [vmem:[#allocation6 + $0x8b4] ss:$48 sps:$4 sm:$0xff]   ;;  %v12590_v41 = vld [vmem:[#allocation6 + $0x8bc] ss:$48 sps:$4 sm:$0xff]  }
 0x284   :  { %2715 = vmatpush1.bf16.msra.mxu0 %v12561_v2  ;;  %2756 = vmatpush1.bf16.msra.mxu1 %v12564_v38  ;;  %v12585_v2 = vld [vmem:[#allocation6 + $0x8b0] ss:$48 sps:$4 sm:$0xff]   ;;  %v12588_v38 = vld [vmem:[#allocation6 + $0x8b8] ss:$48 sps:$4 sm:$0xff]  }
 0x285   :  { %2716 = vmatprep.subr.bf16.mxu0 %v12569_v25  ;;  %2757 = vmatprep.subr.bf16.mxu1 %v12572_v47  ;;  %v12593_v25 = vld [vmem:[#allocation6 + $0x914] ss:$48 sps:$4 sm:$0xff]   ;;  %v12591_v47 = vld [vmem:[#allocation6 + $0x910] ss:$48 sps:$4 sm:$0xff]  }
 0x288   :  { %2717 = vmatpush1.bf16.msra.mxu0 %v12567_v17  ;;  %2758 = vmatpush1.bf16.msra.mxu1 %v12570_v59  ;;  %v12596_v59 = vld [vmem:[#allocation6 + $0x91c] ss:$48 sps:$4 sm:$0xff]   ;;  %v12594_v17 = vld [vmem:[#allocation6 + $0x918] ss:$48 sps:$4 sm:$0xff]  }
 0x289   :  { %2718 = vmatprep.subr.bf16.mxu0 %v12575_v13  ;;  %2759 = vmatprep.subr.bf16.mxu1 %v12578_v30  ;;  %v12599_v13 = vld [vmem:[#allocation6 + $0x974] ss:$48 sps:$4 sm:$0xff]   ;;  %v12602_v30 = vld [vmem:[#allocation6 + $0x97c] ss:$48 sps:$4 sm:$0xff]  }
 0x28c   :  { %2719 = vmatpush1.bf16.msra.mxu0 %v12573_v4  ;;  %2760 = vmatpush1.bf16.msra.mxu1 %v12576_v49  ;;  %v12597_v4 = vld [vmem:[#allocation6 + $0x970] ss:$48 sps:$4 sm:$0xff]   ;;  %v12600_v49 = vld [vmem:[#allocation6 + $0x978] ss:$48 sps:$4 sm:$0xff]  }
 0x28d   :  { %2720 = vmatprep.subr.bf16.mxu0 %v12581_v39  ;;  %2761 = vmatprep.subr.bf16.mxu1 %v12584_v15  ;;  %v12605_v39 = vld [vmem:[#allocation6 + $0x9d4] ss:$48 sps:$4 sm:$0xff]   ;;  %v12608_v15 = vld [vmem:[#allocation6 + $0x9dc] ss:$48 sps:$4 sm:$0xff]  }
 0x290   :  { %2721 = vmatpush1.bf16.msra.mxu0 %v12579_v57  ;;  %2762 = vmatpush1.bf16.msra.mxu1 %v12582_v58  ;;  %v12603_v57 = vld [vmem:[#allocation6 + $0x9d0] ss:$48 sps:$4 sm:$0xff]   ;;  %v12606_v58 = vld [vmem:[#allocation6 + $0x9d8] ss:$48 sps:$4 sm:$0xff]  }
 0x291   :  { %2722 = vmatprep.subr.bf16.mxu0 %v12587_v1  ;;  %2763 = vmatprep.subr.bf16.mxu1 %v12590_v41  ;;  %v12611_v1 = vld [vmem:[#allocation6 + $0xa34] ss:$48 sps:$4 sm:$0xff]   ;;  %v12614_v41 = vld [vmem:[#allocation6 + $0xa3c] ss:$48 sps:$4 sm:$0xff]  }
 0x294   :  { %2723 = vmatpush1.bf16.msra.mxu0 %v12585_v2  ;;  %2764 = vmatpush1.bf16.msra.mxu1 %v12588_v38  ;;  %v12609_v2 = vld [vmem:[#allocation6 + $0xa30] ss:$48 sps:$4 sm:$0xff]   ;;  %v12612_v38 = vld [vmem:[#allocation6 + $0xa38] ss:$48 sps:$4 sm:$0xff]  }
 0x295   :  { %2724 = vmatprep.subr.bf16.mxu0 %v12593_v25  ;;  %2765 = vmatprep.subr.bf16.mxu1 %v12596_v59  ;;  %v12617_v25 = vld [vmem:[#allocation6 + $0xa94] ss:$48 sps:$4 sm:$0xff]   ;;  %v12620_v59 = vld [vmem:[#allocation6 + $0xa9c] ss:$48 sps:$4 sm:$0xff]  }
 0x298   :  { %2725 = vmatpush1.bf16.msra.mxu0 %v12591_v47  ;;  %2766 = vmatpush1.bf16.msra.mxu1 %v12594_v17  ;;  %v12615_v47 = vld [vmem:[#allocation6 + $0xa90] ss:$48 sps:$4 sm:$0xff]   ;;  %v12618_v17 = vld [vmem:[#allocation6 + $0xa98] ss:$48 sps:$4 sm:$0xff]  }
 0x299   :  { %2726 = vmatprep.subr.bf16.mxu0 %v12599_v13  ;;  %2767 = vmatprep.subr.bf16.mxu1 %v12602_v30  ;;  %v12623_v13 = vld [vmem:[#allocation6 + $0xaf4] ss:$48 sps:$4 sm:$0xff]   ;;  %v12626_v30 = vld [vmem:[#allocation6 + $0xafc] ss:$48 sps:$4 sm:$0xff]  }
 0x29c   :  { %2727 = vmatpush1.bf16.msra.mxu0 %v12597_v4  ;;  %2768 = vmatpush1.bf16.msra.mxu1 %v12600_v49  ;;  %v12621_v4 = vld [vmem:[#allocation6 + $0xaf0] ss:$48 sps:$4 sm:$0xff]   ;;  %v12624_v49 = vld [vmem:[#allocation6 + $0xaf8] ss:$48 sps:$4 sm:$0xff]  }
 0x29d   :  { %2728 = vmatprep.subr.bf16.mxu0 %v12605_v39  ;;  %2769 = vmatprep.subr.bf16.mxu1 %v12608_v15  ;;  %v12629_v39 = vld [vmem:[#allocation6 + $0xb54] ss:$48 sps:$4 sm:$0xff]   ;;  %v12632_v15 = vld [vmem:[#allocation6 + $0xb5c] ss:$48 sps:$4 sm:$0xff]  }
 0x2a0   :  { %2729 = vmatpush1.bf16.msra.mxu0 %v12603_v57  ;;  %2770 = vmatpush1.bf16.msra.mxu1 %v12606_v58  ;;  %v12627_v57 = vld [vmem:[#allocation6 + $0xb50] ss:$48 sps:$4 sm:$0xff]   ;;  %v12630_v58 = vld [vmem:[#allocation6 + $0xb58] ss:$48 sps:$4 sm:$0xff]  }
 0x2a1   :  { %2730 = vmatprep.subr.bf16.mxu0 %v12611_v1  ;;  %2771 = vmatprep.subr.bf16.mxu1 %v12614_v41  ;;  %v12635_v1 = vld [vmem:[#allocation6 + $0xbb4] ss:$48 sps:$4 sm:$0xff]   ;;  %v12638_v41 = vld [vmem:[#allocation6 + $0xbbc] ss:$48 sps:$4 sm:$0xff]  }
 0x2a4   :  { %2731 = vmatpush1.bf16.msra.mxu0 %v12609_v2  ;;  %2772 = vmatpush1.bf16.msra.mxu1 %v12612_v38  ;;  %v12633_v2 = vld [vmem:[#allocation6 + $0xbb0] ss:$48 sps:$4 sm:$0xff]   ;;  %v12636_v38 = vld [vmem:[#allocation6 + $0xbb8] ss:$48 sps:$4 sm:$0xff]  }
 0x2a5   :  { %2732 = vmatprep.subr.bf16.mxu0 %v12617_v25  ;;  %2773 = vmatprep.subr.bf16.mxu1 %v12620_v59  ;;  %v12641_v25 = vld [vmem:[#allocation6 + $0x624] ss:$48 sps:$4 sm:$0xff]   ;;  %v12644_v59 = vld [vmem:[#allocation6 + $0x62c] ss:$48 sps:$4 sm:$0xff]  }
 0x2a8   :  { %2733 = vmatpush1.bf16.msra.mxu0 %v12615_v47  ;;  %2774 = vmatpush1.bf16.msra.mxu1 %v12618_v17  ;;  %v12639_v47 = vld [vmem:[#allocation6 + $0x620] ss:$48 sps:$4 sm:$0xff]   ;;  %v12642_v17 = vld [vmem:[#allocation6 + $0x628] ss:$48 sps:$4 sm:$0xff]  }
 0x2a9   :  { %2734 = vmatprep.subr.bf16.mxu0 %v12623_v13  ;;  %2775 = vmatprep.subr.bf16.mxu1 %v12626_v30  ;;  %v12647_v13 = vld [vmem:[#allocation6 + $0x684] ss:$48 sps:$4 sm:$0xff]   ;;  %v12650_v30 = vld [vmem:[#allocation6 + $0x68c] ss:$48 sps:$4 sm:$0xff]  }
 0x2ac   :  { %2735 = vmatpush1.bf16.msra.mxu0 %v12621_v4  ;;  %2776 = vmatpush1.bf16.msra.mxu1 %v12624_v49  ;;  %v12645_v4 = vld [vmem:[#allocation6 + $0x680] ss:$48 sps:$4 sm:$0xff]   ;;  %v12648_v49 = vld [vmem:[#allocation6 + $0x688] ss:$48 sps:$4 sm:$0xff]  }
 0x2ad   :  { %2736 = vmatprep.subr.bf16.mxu0 %v12629_v39  ;;  %2777 = vmatprep.subr.bf16.mxu1 %v12632_v15  ;;  %v12653_v39 = vld [vmem:[#allocation6 + $0x6e4] ss:$48 sps:$4 sm:$0xff]   ;;  %v12656_v15 = vld [vmem:[#allocation6 + $0x6ec] ss:$48 sps:$4 sm:$0xff]  }
 0x2b0   :  { %2737 = vmatpush1.bf16.msra.mxu0 %v12627_v57  ;;  %2778 = vmatpush1.bf16.msra.mxu1 %v12630_v58  ;;  %v12651_v57 = vld [vmem:[#allocation6 + $0x6e0] ss:$48 sps:$4 sm:$0xff]   ;;  %v12654_v58 = vld [vmem:[#allocation6 + $0x6e8] ss:$48 sps:$4 sm:$0xff]  }
 0x2b1   :  { %2738 = vmatprep.subr.bf16.mxu0 %v12635_v1  ;;  %2779 = vmatprep.subr.bf16.mxu1 %v12638_v41  ;;  %v12659_v1 = vld [vmem:[#allocation6 + $0x744] ss:$48 sps:$4 sm:$0xff]   ;;  %v12662_v41 = vld [vmem:[#allocation6 + $0x74c] ss:$48 sps:$4 sm:$0xff]  }
 0x2b4   :  { %2739 = vmatpush1.bf16.msra.mxu0 %v12633_v2  ;;  %2780 = vmatpush1.bf16.msra.mxu1 %v12636_v38  ;;  %v12657_v2 = vld [vmem:[#allocation6 + $0x740] ss:$48 sps:$4 sm:$0xff]   ;;  %v12660_v38 = vld [vmem:[#allocation6 + $0x748] ss:$48 sps:$4 sm:$0xff]  }
 0x2b5   :  { %2790 = vmatprep.subr.bf16.mxu0 %v12641_v25  ;;  %2831 = vmatprep.subr.bf16.mxu1 %v12644_v59  ;;  %v12665_v25 = vld [vmem:[#allocation6 + $0x7a4] ss:$48 sps:$4 sm:$0xff]   ;;  %v12663_v59 = vld [vmem:[#allocation6 + $0x7a0] ss:$48 sps:$4 sm:$0xff]  }
 0x2b7   :  { %2741 = vmatmul.mubr.bf16.vlgmr.msra.gmra.mrb[20].mxu0 %v15166_v55  ;;  %2782 = vmatmul.mubr.bf16.vlgmr.msra.gmra.mrb[20].mxu1 %v15166_v55 }
 0x2b8   :  { %2791 = vmatpush1.bf16.msra.mxu0 %v12639_v47  ;;  %2822 = vmatprep.mubr.bf16.mxu0 %v15164_v0  ;;  %v12666_v47 = vld [vmem:[#allocation6 + $0x7a8] ss:$48 sps:$4 sm:$0xff]  }
 0x2b9   :  { %2832 = vmatpush1.bf16.msra.mxu1 %v12642_v17  ;;  %2863 = vmatprep.mubr.bf16.mxu1 %v15164_v0  ;;  %v12668_v0 = vld [vmem:[#allocation6 + $0x7ac] ss:$48 sps:$4 sm:$0xff]   ;;  %v12671_v17 = vld [vmem:[#allocation6 + $0x804] ss:$48 sps:$4 sm:$0xff]  }
 0x2ba   :  { %2792 = vmatprep.subr.bf16.mxu0 %v12647_v13  ;;  %2833 = vmatprep.subr.bf16.mxu1 %v12650_v30  ;;  %v12674_v13 = vld [vmem:[#allocation6 + $0x80c] ss:$48 sps:$4 sm:$0xff]   ;;  %v12669_v30 = vld [vmem:[#allocation6 + $0x800] ss:$48 sps:$4 sm:$0xff]  }
 0x2bc   :  { %2793 = vmatpush1.bf16.msra.mxu0 %v12645_v4  ;;  %v12672_v4 = vld [vmem:[#allocation6 + $0x808] ss:$48 sps:$4 sm:$0xff]  }
 0x2bd   :  { %2834 = vmatpush1.bf16.msra.mxu1 %v12648_v49  ;;  %2794 = vmatprep.subr.bf16.mxu0 %v12653_v39  ;;  %v12677_v49 = vld [vmem:[#allocation6 + $0x864] ss:$48 sps:$4 sm:$0xff]   ;;  %v12680_v39 = vld [vmem:[#allocation6 + $0x86c] ss:$48 sps:$4 sm:$0xff]  }
 0x2be   :  { %2835 = vmatprep.subr.bf16.mxu1 %v12656_v15  ;;  %v12675_v15 = vld [vmem:[#allocation6 + $0x860] ss:$48 sps:$4 sm:$0xff]  }
 0x2c0   :  { %2795 = vmatpush1.bf16.msra.mxu0 %v12651_v57  ;;  %v12678_v57 = vld [vmem:[#allocation6 + $0x868] ss:$48 sps:$4 sm:$0xff]  }
 0x2c1   :  { %2836 = vmatpush1.bf16.msra.mxu1 %v12654_v58  ;;  %2796 = vmatprep.subr.bf16.mxu0 %v12659_v1  ;;  %v12683_v58 = vld [vmem:[#allocation6 + $0x8c4] ss:$48 sps:$4 sm:$0xff]   ;;  %v12686_v1 = vld [vmem:[#allocation6 + $0x8cc] ss:$48 sps:$4 sm:$0xff]  }
 0x2c2   :  { %2837 = vmatprep.subr.bf16.mxu1 %v12662_v41  ;;  %v12681_v41 = vld [vmem:[#allocation6 + $0x8c0] ss:$48 sps:$4 sm:$0xff]  }
 0x2c4   :  { %2797 = vmatpush1.bf16.msra.mxu0 %v12657_v2  ;;  %v12684_v2 = vld [vmem:[#allocation6 + $0x8c8] ss:$48 sps:$4 sm:$0xff]  }
 0x2c5   :  { %2838 = vmatpush1.bf16.msra.mxu1 %v12660_v38  ;;  %2798 = vmatprep.subr.bf16.mxu0 %v12665_v25  ;;  %v12689_v38 = vld [vmem:[#allocation6 + $0x924] ss:$48 sps:$4 sm:$0xff]   ;;  %v12692_v25 = vld [vmem:[#allocation6 + $0x92c] ss:$48 sps:$4 sm:$0xff]  }
 0x2c6   :  { %2839 = vmatprep.subr.bf16.mxu1 %v12668_v0  ;;  %v12687_v0 = vld [vmem:[#allocation6 + $0x920] ss:$48 sps:$4 sm:$0xff]  }
 0x2c8   :  { %2799 = vmatpush1.bf16.msra.mxu0 %v12663_v59  ;;  %v12690_v59 = vld [vmem:[#allocation6 + $0x928] ss:$48 sps:$4 sm:$0xff]  }
 0x2c9   :  { %2840 = vmatpush1.bf16.msra.mxu1 %v12666_v47  ;;  %2800 = vmatprep.subr.bf16.mxu0 %v12671_v17  ;;  %v12695_v47 = vld [vmem:[#allocation6 + $0x984] ss:$48 sps:$4 sm:$0xff]   ;;  %v12698_v17 = vld [vmem:[#allocation6 + $0x98c] ss:$48 sps:$4 sm:$0xff]  }
 0x2ca   :  { %2841 = vmatprep.subr.bf16.mxu1 %v12674_v13  ;;  %v12693_v13 = vld [vmem:[#allocation6 + $0x980] ss:$48 sps:$4 sm:$0xff]  }
 0x2cc   :  { %2801 = vmatpush1.bf16.msra.mxu0 %v12669_v30  ;;  %v12696_v30 = vld [vmem:[#allocation6 + $0x988] ss:$48 sps:$4 sm:$0xff]  }
 0x2cd   :  { %2842 = vmatpush1.bf16.msra.mxu1 %v12672_v4  ;;  %2802 = vmatprep.subr.bf16.mxu0 %v12677_v49  ;;  %v12701_v4 = vld [vmem:[#allocation6 + $0x9e4] ss:$48 sps:$4 sm:$0xff]   ;;  %v12704_v49 = vld [vmem:[#allocation6 + $0x9ec] ss:$48 sps:$4 sm:$0xff]  }
 0x2ce   :  { %2843 = vmatprep.subr.bf16.mxu1 %v12680_v39  ;;  %v12699_v39 = vld [vmem:[#allocation6 + $0x9e0] ss:$48 sps:$4 sm:$0xff]  }
 0x2d0   :  { %2803 = vmatpush1.bf16.msra.mxu0 %v12675_v15  ;;  %v12702_v15 = vld [vmem:[#allocation6 + $0x9e8] ss:$48 sps:$4 sm:$0xff]  }
 0x2d1   :  { %2844 = vmatpush1.bf16.msra.mxu1 %v12678_v57  ;;  %2804 = vmatprep.subr.bf16.mxu0 %v12683_v58  ;;  %v12707_v57 = vld [vmem:[#allocation6 + $0xa44] ss:$48 sps:$4 sm:$0xff]   ;;  %v12710_v58 = vld [vmem:[#allocation6 + $0xa4c] ss:$48 sps:$4 sm:$0xff]  }
 0x2d2   :  { %2845 = vmatprep.subr.bf16.mxu1 %v12686_v1  ;;  %v12705_v1 = vld [vmem:[#allocation6 + $0xa40] ss:$48 sps:$4 sm:$0xff]  }
 0x2d4   :  { %2805 = vmatpush1.bf16.msra.mxu0 %v12681_v41  ;;  %v12708_v41 = vld [vmem:[#allocation6 + $0xa48] ss:$48 sps:$4 sm:$0xff]  }
 0x2d5   :  { %2846 = vmatpush1.bf16.msra.mxu1 %v12684_v2  ;;  %2806 = vmatprep.subr.bf16.mxu0 %v12689_v38  ;;  %v12713_v2 = vld [vmem:[#allocation6 + $0xaa4] ss:$48 sps:$4 sm:$0xff]   ;;  %v12716_v38 = vld [vmem:[#allocation6 + $0xaac] ss:$48 sps:$4 sm:$0xff]  }
 0x2d6   :  { %2847 = vmatprep.subr.bf16.mxu1 %v12692_v25  ;;  %v12711_v25 = vld [vmem:[#allocation6 + $0xaa0] ss:$48 sps:$4 sm:$0xff]  }
 0x2d8   :  { %2807 = vmatpush1.bf16.msra.mxu0 %v12687_v0  ;;  %v12714_v0 = vld [vmem:[#allocation6 + $0xaa8] ss:$48 sps:$4 sm:$0xff]  }
 0x2d9   :  { %2848 = vmatpush1.bf16.msra.mxu1 %v12690_v59  ;;  %2808 = vmatprep.subr.bf16.mxu0 %v12695_v47  ;;  %v12719_v59 = vld [vmem:[#allocation6 + $0xb04] ss:$48 sps:$4 sm:$0xff]   ;;  %v12722_v47 = vld [vmem:[#allocation6 + $0xb0c] ss:$48 sps:$4 sm:$0xff]  }
 0x2da   :  { %2849 = vmatprep.subr.bf16.mxu1 %v12698_v17  ;;  %v12717_v17 = vld [vmem:[#allocation6 + $0xb00] ss:$48 sps:$4 sm:$0xff]  }
 0x2dc   :  { %2809 = vmatpush1.bf16.msra.mxu0 %v12693_v13  ;;  %v12720_v13 = vld [vmem:[#allocation6 + $0xb08] ss:$48 sps:$4 sm:$0xff]  }
 0x2dd   :  { %2850 = vmatpush1.bf16.msra.mxu1 %v12696_v30  ;;  %2810 = vmatprep.subr.bf16.mxu0 %v12701_v4  ;;  %v12725_v30 = vld [vmem:[#allocation6 + $0xb64] ss:$48 sps:$4 sm:$0xff]   ;;  %v12728_v4 = vld [vmem:[#allocation6 + $0xb6c] ss:$48 sps:$4 sm:$0xff]  }
 0x2de   :  { %2851 = vmatprep.subr.bf16.mxu1 %v12704_v49  ;;  %v12723_v49 = vld [vmem:[#allocation6 + $0xb60] ss:$48 sps:$4 sm:$0xff]  }
 0x2e0   :  { %2811 = vmatpush1.bf16.msra.mxu0 %v12699_v39  ;;  %v12726_v39 = vld [vmem:[#allocation6 + $0xb68] ss:$48 sps:$4 sm:$0xff]  }
 0x2e1   :  { %2852 = vmatpush1.bf16.msra.mxu1 %v12702_v15  ;;  %2812 = vmatprep.subr.bf16.mxu0 %v12707_v57  ;;  %v12731_v15 = vld [vmem:[#allocation6 + $0xbc4] ss:$48 sps:$4 sm:$0xff]   ;;  %v12734_v57 = vld [vmem:[#allocation6 + $0xbcc] ss:$48 sps:$4 sm:$0xff]  }
 0x2e2   :  { %2853 = vmatprep.subr.bf16.mxu1 %v12710_v58  ;;  %v1093_v58 = vadd.f32 %v15160_v48, %v15148_v56  ;;  %v12746_v56 = vld [vmem:[#allocation6 + $0x6c] ss:$48 sps:$4 sm:$0xff]  }
 0x2e4   :  { %2813 = vmatpush1.bf16.msra.mxu0 %v12705_v1  ;;  %v12729_v1 = vld [vmem:[#allocation6 + $0xbc0] ss:$48 sps:$4 sm:$0xff]  }
 0x2e5   :  { %2854 = vmatpush1.bf16.msra.mxu1 %v12708_v41  ;;  %2814 = vmatprep.subr.bf16.mxu0 %v12713_v2  ;;  %v12732_v41 = vld [vmem:[#allocation6 + $0xbc8] ss:$48 sps:$4 sm:$0xff]   ;;  %v12737_v2 = vld [vmem:[#allocation6 + $0x4] ss:$48 sps:$4 sm:$0xff]  }
 0x2e6   :  { %2855 = vmatprep.subr.bf16.mxu1 %v12716_v38  ;;  %v12740_v38 = vld [vmem:[#allocation6 + $0xc] ss:$48 sps:$4 sm:$0xff]  }
 0x2e8   :  { %2815 = vmatpush1.bf16.msra.mxu0 %v12711_v25  ;;  %v1095_v25 = vmax.f32 %v1093_v58, 0.0  ;;  %v12753_v58 = vld [vmem:[#allocation6 + $0x120] ss:$48 sps:$4 sm:$0xff]  }
 0x2e9   :  { %2856 = vmatpush1.bf16.msra.mxu1 %v12714_v0  ;;  %2816 = vmatprep.subr.bf16.mxu0 %v12719_v59  ;;  %v12735_v0 = vld [vmem:[#allocation6] ss:$48 sps:$4 sm:$0xff]   ;;  %v12738_v59 = vld [vmem:[#allocation6 + $0x8] ss:$48 sps:$4 sm:$0xff]  }
 0x2ea   :  { %2857 = vmatprep.subr.bf16.mxu1 %v12722_v47  ;;  %v12743_v47 = vld [vmem:[#allocation6 + $0x64] ss:$48 sps:$4 sm:$0xff]  }
 0x2ec   :  { %2817 = vmatpush1.bf16.msra.mxu0 %v12717_v17  ;;  %v15180_v17 = vpack.c.bf16 %v1095_v25, %v1095_v25  ;;  %v12762_v25 = vld [vmem:[#allocation6 + $0x188] ss:$48 sps:$4 sm:$0xff]  }
 0x2ed   :  { %2858 = vmatpush1.bf16.msra.mxu1 %v12720_v13  ;;  %2818 = vmatprep.subr.bf16.mxu0 %v12725_v30  ;;  %v12741_v13 = vld [vmem:[#allocation6 + $0x60] ss:$48 sps:$4 sm:$0xff]   ;;  %v12744_v30 = vld [vmem:[#allocation6 + $0x68] ss:$48 sps:$4 sm:$0xff]  }
 0x2ee   :  { %2859 = vmatprep.subr.bf16.mxu1 %v12728_v4  ;;  %v12749_v4 = vld [vmem:[#allocation6 + $0xc4] ss:$48 sps:$4 sm:$0xff]  }
 0x2f0   :  { %2819 = vmatpush1.bf16.msra.mxu0 %v12723_v49  ;;  %v12752_v49 = vld [vmem:[#allocation6 + $0xcc] ss:$48 sps:$4 sm:$0xff]  }
 0x2f1   :  { %2860 = vmatpush1.bf16.msra.mxu1 %v12726_v39  ;;  %2820 = vmatprep.subr.bf16.mxu0 %v12731_v15  ;;  %v12747_v39 = vld [vmem:[#allocation6 + $0xc0] ss:$48 sps:$4 sm:$0xff]   ;;  %v12750_v15 = vld [vmem:[#allocation6 + $0xc8] ss:$48 sps:$4 sm:$0xff]  }
 0x2f2   :  { %2861 = vmatprep.subr.bf16.mxu1 %v12734_v57  ;;  %v12755_v57 = vld [vmem:[#allocation6 + $0x124] ss:$48 sps:$4 sm:$0xff]  }
 0x2f4   :  { %2821 = vmatpush1.bf16.msra.mxu0 %v12729_v1  ;;  %v12756_v1 = vld [vmem:[#allocation6 + $0x128] ss:$48 sps:$4 sm:$0xff]  }
 0x2f5   :  { %2862 = vmatpush1.bf16.msra.mxu1 %v12732_v41  ;;  %3832 = vmatprep.subr.bf16.mxu0 %v12737_v2  ;;  %v12761_v41 = vld [vmem:[#allocation6 + $0x184] ss:$48 sps:$4 sm:$0xff]   ;;  %v12764_v2 = vld [vmem:[#allocation6 + $0x18c] ss:$48 sps:$4 sm:$0xff]  }
 0x2f6   :  { %3873 = vmatprep.subr.bf16.mxu1 %v12740_v38  ;;  %v12759_v38 = vld [vmem:[#allocation6 + $0x180] ss:$48 sps:$4 sm:$0xff]  }
 0x2f7   :  { %2823 = vmatmul.mubr.bf16.vlgmr.msra.gmra.mrb[24].mxu0 %v15166_v55 }
 0x2f8   :  { %2864 = vmatmul.mubr.bf16.vlgmr.msra.gmra.mrb[24].mxu1 %v15166_v55  ;;  %3833 = vmatpush1.bf16.msra.mxu0 %v12735_v0  ;;  %v12758_v55 = vld [vmem:[#allocation6 + $0x12c] ss:$48 sps:$4 sm:$0xff]   ;;  %v12767_v0 = vld [vmem:[#allocation6 + $0x1e4] ss:$48 sps:$4 sm:$0xff]  }
 0x2f9   :  { %3864 = vmatprep.mubr.bf16.mxu0 %v15180_v17  ;;  %3874 = vmatpush1.bf16.msra.mxu1 %v12738_v59  ;;  %v12770_v59 = vld [vmem:[#allocation6 + $0x1ec] ss:$48 sps:$4 sm:$0xff]  }
 0x2fa   :  { %3905 = vmatprep.mubr.bf16.mxu1 %v15180_v17  ;;  %3834 = vmatprep.subr.bf16.mxu0 %v12743_v47  ;;  %v12765_v47 = vld [vmem:[#allocation6 + $0x1e0] ss:$48 sps:$4 sm:$0xff]  }
 0x2fb   :  { %3875 = vmatprep.subr.bf16.mxu1 %v12746_v56  ;;  %v12768_v56 = vld [vmem:[#allocation6 + $0x1e8] ss:$48 sps:$4 sm:$0xff]  }
 0x2fc   :  { %3835 = vmatpush1.bf16.msra.mxu0 %v12741_v13  ;;  %v12773_v13 = vld [vmem:[#allocation6 + $0x244] ss:$48 sps:$4 sm:$0xff]  }
 0x2fd   :  { %3876 = vmatpush1.bf16.msra.mxu1 %v12744_v30  ;;  %3836 = vmatprep.subr.bf16.mxu0 %v12749_v4  ;;  %v12776_v30 = vld [vmem:[#allocation6 + $0x24c] ss:$48 sps:$4 sm:$0xff]   ;;  %v12771_v4 = vld [vmem:[#allocation6 + $0x240] ss:$48 sps:$4 sm:$0xff]  }
 0x2fe   :  { %3877 = vmatprep.subr.bf16.mxu1 %v12752_v49  ;;  %v12774_v49 = vld [vmem:[#allocation6 + $0x248] ss:$48 sps:$4 sm:$0xff]  }
 0x300   :  { %3837 = vmatpush1.bf16.msra.mxu0 %v12747_v39  ;;  %v12779_v39 = vld [vmem:[#allocation6 + $0x2a4] ss:$48 sps:$4 sm:$0xff]  }
 0x301   :  { %3878 = vmatpush1.bf16.msra.mxu1 %v12750_v15  ;;  %3838 = vmatprep.subr.bf16.mxu0 %v12755_v57  ;;  %v12782_v15 = vld [vmem:[#allocation6 + $0x2ac] ss:$48 sps:$4 sm:$0xff]   ;;  %v12777_v57 = vld [vmem:[#allocation6 + $0x2a0] ss:$48 sps:$4 sm:$0xff]  }
 0x302   :  { %3879 = vmatprep.subr.bf16.mxu1 %v12758_v55  ;;  %v12780_v55 = vld [vmem:[#allocation6 + $0x2a8] ss:$48 sps:$4 sm:$0xff]  }
 0x304   :  { %3839 = vmatpush1.bf16.msra.mxu0 %v12753_v58  ;;  %v12785_v58 = vld [vmem:[#allocation6 + $0x304] ss:$48 sps:$4 sm:$0xff]  }
 0x305   :  { %3880 = vmatpush1.bf16.msra.mxu1 %v12756_v1  ;;  %3840 = vmatprep.subr.bf16.mxu0 %v12761_v41  ;;  %v12788_v1 = vld [vmem:[#allocation6 + $0x30c] ss:$48 sps:$4 sm:$0xff]   ;;  %v12783_v41 = vld [vmem:[#allocation6 + $0x300] ss:$48 sps:$4 sm:$0xff]  }
 0x306   :  { %3881 = vmatprep.subr.bf16.mxu1 %v12764_v2  ;;  %v12786_v2 = vld [vmem:[#allocation6 + $0x308] ss:$48 sps:$4 sm:$0xff]  }
 0x308   :  { %3841 = vmatpush1.bf16.msra.mxu0 %v12759_v38  ;;  %v12791_v38 = vld [vmem:[#allocation6 + $0x364] ss:$48 sps:$4 sm:$0xff]  }
 0x309   :  { %3882 = vmatpush1.bf16.msra.mxu1 %v12762_v25  ;;  %3842 = vmatprep.subr.bf16.mxu0 %v12767_v0  ;;  %v12794_v25 = vld [vmem:[#allocation6 + $0x36c] ss:$48 sps:$4 sm:$0xff]   ;;  %v12789_v0 = vld [vmem:[#allocation6 + $0x360] ss:$48 sps:$4 sm:$0xff]  }
 0x30a   :  { %3883 = vmatprep.subr.bf16.mxu1 %v12770_v59  ;;  %v12792_v59 = vld [vmem:[#allocation6 + $0x368] ss:$48 sps:$4 sm:$0xff]  }
 0x30c   :  { %3843 = vmatpush1.bf16.msra.mxu0 %v12765_v47  ;;  %v12797_v47 = vld [vmem:[#allocation6 + $0x3c4] ss:$48 sps:$4 sm:$0xff]  }
 0x30d   :  { %3884 = vmatpush1.bf16.msra.mxu1 %v12768_v56  ;;  %3844 = vmatprep.subr.bf16.mxu0 %v12773_v13  ;;  %v12800_v56 = vld [vmem:[#allocation6 + $0x3cc] ss:$48 sps:$4 sm:$0xff]   ;;  %v12795_v13 = vld [vmem:[#allocation6 + $0x3c0] ss:$48 sps:$4 sm:$0xff]  }
 0x30e   :  { %3885 = vmatprep.subr.bf16.mxu1 %v12776_v30  ;;  %v12798_v30 = vld [vmem:[#allocation6 + $0x3c8] ss:$48 sps:$4 sm:$0xff]  }
 0x310   :  { %3845 = vmatpush1.bf16.msra.mxu0 %v12771_v4  ;;  %v12803_v4 = vld [vmem:[#allocation6 + $0x424] ss:$48 sps:$4 sm:$0xff]  }
 0x311   :  { %3886 = vmatpush1.bf16.msra.mxu1 %v12774_v49  ;;  %3846 = vmatprep.subr.bf16.mxu0 %v12779_v39  ;;  %v12806_v49 = vld [vmem:[#allocation6 + $0x42c] ss:$48 sps:$4 sm:$0xff]   ;;  %v12801_v39 = vld [vmem:[#allocation6 + $0x420] ss:$48 sps:$4 sm:$0xff]  }
 0x312   :  { %3887 = vmatprep.subr.bf16.mxu1 %v12782_v15  ;;  %v12804_v15 = vld [vmem:[#allocation6 + $0x428] ss:$48 sps:$4 sm:$0xff]  }
 0x314   :  { %3847 = vmatpush1.bf16.msra.mxu0 %v12777_v57  ;;  %v12809_v57 = vld [vmem:[#allocation6 + $0x484] ss:$48 sps:$4 sm:$0xff]  }
 0x315   :  { %3888 = vmatpush1.bf16.msra.mxu1 %v12780_v55  ;;  %3848 = vmatprep.subr.bf16.mxu0 %v12785_v58  ;;  %v12812_v55 = vld [vmem:[#allocation6 + $0x48c] ss:$48 sps:$4 sm:$0xff]   ;;  %v12807_v58 = vld [vmem:[#allocation6 + $0x480] ss:$48 sps:$4 sm:$0xff]  }
 0x316   :  { %3889 = vmatprep.subr.bf16.mxu1 %v12788_v1  ;;  %v12810_v1 = vld [vmem:[#allocation6 + $0x488] ss:$48 sps:$4 sm:$0xff]  }
 0x318   :  { %3849 = vmatpush1.bf16.msra.mxu0 %v12783_v41  ;;  %v12815_v41 = vld [vmem:[#allocation6 + $0x4e4] ss:$48 sps:$4 sm:$0xff]  }
 0x319   :  { %3890 = vmatpush1.bf16.msra.mxu1 %v12786_v2  ;;  %3850 = vmatprep.subr.bf16.mxu0 %v12791_v38  ;;  %v12818_v2 = vld [vmem:[#allocation6 + $0x4ec] ss:$48 sps:$4 sm:$0xff]   ;;  %v12813_v38 = vld [vmem:[#allocation6 + $0x4e0] ss:$48 sps:$4 sm:$0xff]  }
 0x31a   :  { %3891 = vmatprep.subr.bf16.mxu1 %v12794_v25  ;;  %v12816_v25 = vld [vmem:[#allocation6 + $0x4e8] ss:$48 sps:$4 sm:$0xff]  }
 0x31c   :  { %3851 = vmatpush1.bf16.msra.mxu0 %v12789_v0  ;;  %v12821_v0 = vld [vmem:[#allocation6 + $0x544] ss:$48 sps:$4 sm:$0xff]  }
 0x31d   :  { %3892 = vmatpush1.bf16.msra.mxu1 %v12792_v59  ;;  %3852 = vmatprep.subr.bf16.mxu0 %v12797_v47  ;;  %v12824_v59 = vld [vmem:[#allocation6 + $0x54c] ss:$48 sps:$4 sm:$0xff]   ;;  %v12819_v47 = vld [vmem:[#allocation6 + $0x540] ss:$48 sps:$4 sm:$0xff]  }
 0x31e   :  { %3893 = vmatprep.subr.bf16.mxu1 %v12800_v56  ;;  %v1092_v56 = vadd.f32 %v15156_v33, %v15143_v16  ;;  %v12834_v16 = vld [vmem:[#allocation6 + $0x18] ss:$48 sps:$4 sm:$0xff]  }
 0x320   :  { %3853 = vmatpush1.bf16.msra.mxu0 %v12795_v13  ;;  %v12822_v13 = vld [vmem:[#allocation6 + $0x548] ss:$48 sps:$4 sm:$0xff]  }
 0x321   :  { %3894 = vmatpush1.bf16.msra.mxu1 %v12798_v30  ;;  %3854 = vmatprep.subr.bf16.mxu0 %v12803_v4  ;;  %v12827_v30 = vld [vmem:[#allocation6 + $0x5a4] ss:$48 sps:$4 sm:$0xff]   ;;  %v12830_v4 = vld [vmem:[#allocation6 + $0x5ac] ss:$48 sps:$4 sm:$0xff]  }
 0x322   :  { %3895 = vmatprep.subr.bf16.mxu1 %v12806_v49  ;;  %v12825_v49 = vld [vmem:[#allocation6 + $0x5a0] ss:$48 sps:$4 sm:$0xff]  }
 0x324   :  { %3855 = vmatpush1.bf16.msra.mxu0 %v12801_v39  ;;  %v1094_v39 = vmax.f32 %v1092_v56, 0.0  ;;  %v12846_v56 = vld [vmem:[#allocation6 + $0xd8] ss:$48 sps:$4 sm:$0xff]  }
 0x325   :  { %3896 = vmatpush1.bf16.msra.mxu1 %v12804_v15  ;;  %3856 = vmatprep.subr.bf16.mxu0 %v12809_v57  ;;  %v12828_v15 = vld [vmem:[#allocation6 + $0x5a8] ss:$48 sps:$4 sm:$0xff]   ;;  %v12833_v57 = vld [vmem:[#allocation6 + $0x14] ss:$48 sps:$4 sm:$0xff]  }
 0x326   :  { %3897 = vmatprep.subr.bf16.mxu1 %v12812_v55  ;;  %v12836_v55 = vld [vmem:[#allocation6 + $0x1c] ss:$48 sps:$4 sm:$0xff]  }
 0x328   :  { %3857 = vmatpush1.bf16.msra.mxu0 %v12807_v58  ;;  %v12831_v58 = vld [vmem:[#allocation6 + $0x10] ss:$48 sps:$4 sm:$0xff]  }
 0x329   :  { %3898 = vmatpush1.bf16.msra.mxu1 %v12810_v1  ;;  %3858 = vmatprep.subr.bf16.mxu0 %v12815_v41  ;;  %v15188_v1 = vpack.c.bf16 %v1094_v39, %v1094_v39  ;;  %v12839_v41 = vld [vmem:[#allocation6 + $0x74] ss:$48 sps:$4 sm:$0xff]  }
 0x32a   :  { %3899 = vmatprep.subr.bf16.mxu1 %v12818_v2  ;;  %v12842_v2 = vld [vmem:[#allocation6 + $0x7c] ss:$48 sps:$4 sm:$0xff]   ;;  %v12857_v39 = vld [vmem:[#allocation6 + $0x194] ss:$48 sps:$4 sm:$0xff]  }
 0x32c   :  { %3859 = vmatpush1.bf16.msra.mxu0 %v12813_v38  ;;  %v12837_v38 = vld [vmem:[#allocation6 + $0x70] ss:$48 sps:$4 sm:$0xff]  }
 0x32d   :  { %3900 = vmatpush1.bf16.msra.mxu1 %v12816_v25  ;;  %3860 = vmatprep.subr.bf16.mxu0 %v12821_v0  ;;  %v12840_v25 = vld [vmem:[#allocation6 + $0x78] ss:$48 sps:$4 sm:$0xff]   ;;  %v12845_v0 = vld [vmem:[#allocation6 + $0xd4] ss:$48 sps:$4 sm:$0xff]  }
 0x32e   :  { %3901 = vmatprep.subr.bf16.mxu1 %v12824_v59  ;;  %v12848_v59 = vld [vmem:[#allocation6 + $0xdc] ss:$48 sps:$4 sm:$0xff]  }
 0x330   :  { %3861 = vmatpush1.bf16.msra.mxu0 %v12819_v47  ;;  %v12843_v47 = vld [vmem:[#allocation6 + $0xd0] ss:$48 sps:$4 sm:$0xff]  }
 0x331   :  { %3902 = vmatpush1.bf16.msra.mxu1 %v12822_v13  ;;  %3862 = vmatprep.subr.bf16.mxu0 %v12827_v30  ;;  %v12851_v13 = vld [vmem:[#allocation6 + $0x134] ss:$48 sps:$4 sm:$0xff]   ;;  %v12854_v30 = vld [vmem:[#allocation6 + $0x13c] ss:$48 sps:$4 sm:$0xff]  }
 0x332   :  { %3903 = vmatprep.subr.bf16.mxu1 %v12830_v4  ;;  %v12849_v4 = vld [vmem:[#allocation6 + $0x130] ss:$48 sps:$4 sm:$0xff]  }
 0x334   :  { %3863 = vmatpush1.bf16.msra.mxu0 %v12825_v49  ;;  %v12852_v49 = vld [vmem:[#allocation6 + $0x138] ss:$48 sps:$4 sm:$0xff]  }
 0x335   :  { %3904 = vmatpush1.bf16.msra.mxu1 %v12828_v15  ;;  %3914 = vmatprep.subr.bf16.mxu0 %v12833_v57  ;;  %v12860_v15 = vld [vmem:[#allocation6 + $0x19c] ss:$48 sps:$4 sm:$0xff]   ;;  %v12855_v57 = vld [vmem:[#allocation6 + $0x190] ss:$48 sps:$4 sm:$0xff]  }
 0x336   :  { %3955 = vmatprep.subr.bf16.mxu1 %v12836_v55  ;;  %v12858_v55 = vld [vmem:[#allocation6 + $0x198] ss:$48 sps:$4 sm:$0xff]  }
 0x337   :  { %3865 = vmatmul.mubr.bf16.vlgmr.msra.gmra.mrb[16].mxu0 %v15188_v1 }
 0x338   :  { %3906 = vmatmul.mubr.bf16.vlgmr.msra.gmra.mrb[16].mxu1 %v15188_v1  ;;  %3915 = vmatpush1.bf16.msra.mxu0 %v12831_v58  ;;  %v12863_v58 = vld [vmem:[#allocation6 + $0x1f4] ss:$48 sps:$4 sm:$0xff]  }
 0x339   :  { %3946 = vmatprep.mubr.bf16.mxu0 %v15180_v17  ;;  %3956 = vmatpush1.bf16.msra.mxu1 %v12834_v16  ;;  %v12866_v16 = vld [vmem:[#allocation6 + $0x1fc] ss:$48 sps:$4 sm:$0xff]  }
 0x33a   :  { %3987 = vmatprep.mubr.bf16.mxu1 %v15180_v17  ;;  %3916 = vmatprep.subr.bf16.mxu0 %v12839_v41  ;;  %v12861_v41 = vld [vmem:[#allocation6 + $0x1f0] ss:$48 sps:$4 sm:$0xff]  }
 0x33b   :  { %3957 = vmatprep.subr.bf16.mxu1 %v12842_v2  ;;  %v12864_v2 = vld [vmem:[#allocation6 + $0x1f8] ss:$48 sps:$4 sm:$0xff]  }
 0x33c   :  { %3917 = vmatpush1.bf16.msra.mxu0 %v12837_v38  ;;  %v12869_v38 = vld [vmem:[#allocation6 + $0x254] ss:$48 sps:$4 sm:$0xff]  }
 0x33d   :  { %3958 = vmatpush1.bf16.msra.mxu1 %v12840_v25  ;;  %3918 = vmatprep.subr.bf16.mxu0 %v12845_v0  ;;  %v12872_v25 = vld [vmem:[#allocation6 + $0x25c] ss:$48 sps:$4 sm:$0xff]   ;;  %v12867_v0 = vld [vmem:[#allocation6 + $0x250] ss:$48 sps:$4 sm:$0xff]  }
 0x33e   :  { %3959 = vmatprep.subr.bf16.mxu1 %v12848_v59  ;;  %v12870_v59 = vld [vmem:[#allocation6 + $0x258] ss:$48 sps:$4 sm:$0xff]  }
 0x340   :  { %3919 = vmatpush1.bf16.msra.mxu0 %v12843_v47  ;;  %v12875_v47 = vld [vmem:[#allocation6 + $0x2b4] ss:$48 sps:$4 sm:$0xff]  }
 0x341   :  { %3960 = vmatpush1.bf16.msra.mxu1 %v12846_v56  ;;  %3920 = vmatprep.subr.bf16.mxu0 %v12851_v13  ;;  %v12878_v56 = vld [vmem:[#allocation6 + $0x2bc] ss:$48 sps:$4 sm:$0xff]   ;;  %v12873_v13 = vld [vmem:[#allocation6 + $0x2b0] ss:$48 sps:$4 sm:$0xff]  }
 0x342   :  { %3961 = vmatprep.subr.bf16.mxu1 %v12854_v30  ;;  %v12876_v30 = vld [vmem:[#allocation6 + $0x2b8] ss:$48 sps:$4 sm:$0xff]  }
 0x344   :  { %3921 = vmatpush1.bf16.msra.mxu0 %v12849_v4  ;;  %v12881_v4 = vld [vmem:[#allocation6 + $0x314] ss:$48 sps:$4 sm:$0xff]  }
 0x345   :  { %3962 = vmatpush1.bf16.msra.mxu1 %v12852_v49  ;;  %3922 = vmatprep.subr.bf16.mxu0 %v12857_v39  ;;  %v12884_v49 = vld [vmem:[#allocation6 + $0x31c] ss:$48 sps:$4 sm:$0xff]   ;;  %v12879_v39 = vld [vmem:[#allocation6 + $0x310] ss:$48 sps:$4 sm:$0xff]  }
 0x346   :  { %3963 = vmatprep.subr.bf16.mxu1 %v12860_v15  ;;  %v12882_v15 = vld [vmem:[#allocation6 + $0x318] ss:$48 sps:$4 sm:$0xff]  }
 0x348   :  { %3923 = vmatpush1.bf16.msra.mxu0 %v12855_v57  ;;  %v12887_v57 = vld [vmem:[#allocation6 + $0x374] ss:$48 sps:$4 sm:$0xff]  }
 0x349   :  { %3964 = vmatpush1.bf16.msra.mxu1 %v12858_v55  ;;  %3924 = vmatprep.subr.bf16.mxu0 %v12863_v58  ;;  %v12890_v55 = vld [vmem:[#allocation6 + $0x37c] ss:$48 sps:$4 sm:$0xff]   ;;  %v12885_v58 = vld [vmem:[#allocation6 + $0x370] ss:$48 sps:$4 sm:$0xff]  }
 0x34a   :  { %3965 = vmatprep.subr.bf16.mxu1 %v12866_v16  ;;  %v12888_v16 = vld [vmem:[#allocation6 + $0x378] ss:$48 sps:$4 sm:$0xff]  }
 0x34c   :  { %3925 = vmatpush1.bf16.msra.mxu0 %v12861_v41  ;;  %v12893_v41 = vld [vmem:[#allocation6 + $0x3d4] ss:$48 sps:$4 sm:$0xff]  }
 0x34d   :  { %3966 = vmatpush1.bf16.msra.mxu1 %v12864_v2  ;;  %3926 = vmatprep.subr.bf16.mxu0 %v12869_v38  ;;  %v12896_v2 = vld [vmem:[#allocation6 + $0x3dc] ss:$48 sps:$4 sm:$0xff]   ;;  %v12891_v38 = vld [vmem:[#allocation6 + $0x3d0] ss:$48 sps:$4 sm:$0xff]  }
 0x34e   :  { %3967 = vmatprep.subr.bf16.mxu1 %v12872_v25  ;;  %v12894_v25 = vld [vmem:[#allocation6 + $0x3d8] ss:$48 sps:$4 sm:$0xff]  }
 0x350   :  { %3927 = vmatpush1.bf16.msra.mxu0 %v12867_v0  ;;  %v12899_v0 = vld [vmem:[#allocation6 + $0x434] ss:$48 sps:$4 sm:$0xff]  }
 0x351   :  { %3968 = vmatpush1.bf16.msra.mxu1 %v12870_v59  ;;  %3928 = vmatprep.subr.bf16.mxu0 %v12875_v47  ;;  %v12902_v59 = vld [vmem:[#allocation6 + $0x43c] ss:$48 sps:$4 sm:$0xff]   ;;  %v12897_v47 = vld [vmem:[#allocation6 + $0x430] ss:$48 sps:$4 sm:$0xff]  }
 0x352   :  { %3969 = vmatprep.subr.bf16.mxu1 %v12878_v56  ;;  %v12900_v56 = vld [vmem:[#allocation6 + $0x438] ss:$48 sps:$4 sm:$0xff]  }
 0x354   :  { %3929 = vmatpush1.bf16.msra.mxu0 %v12873_v13  ;;  %v12905_v13 = vld [vmem:[#allocation6 + $0x494] ss:$48 sps:$4 sm:$0xff]  }
 0x355   :  { %3970 = vmatpush1.bf16.msra.mxu1 %v12876_v30  ;;  %3930 = vmatprep.subr.bf16.mxu0 %v12881_v4  ;;  %v12908_v30 = vld [vmem:[#allocation6 + $0x49c] ss:$48 sps:$4 sm:$0xff]   ;;  %v12903_v4 = vld [vmem:[#allocation6 + $0x490] ss:$48 sps:$4 sm:$0xff]  }
 0x356   :  { %3971 = vmatprep.subr.bf16.mxu1 %v12884_v49  ;;  %v12906_v49 = vld [vmem:[#allocation6 + $0x498] ss:$48 sps:$4 sm:$0xff]  }
 0x358   :  { %3931 = vmatpush1.bf16.msra.mxu0 %v12879_v39  ;;  %v12911_v39 = vld [vmem:[#allocation6 + $0x4f4] ss:$48 sps:$4 sm:$0xff]  }
 0x359   :  { %3972 = vmatpush1.bf16.msra.mxu1 %v12882_v15  ;;  %3932 = vmatprep.subr.bf16.mxu0 %v12887_v57  ;;  %v12914_v15 = vld [vmem:[#allocation6 + $0x4fc] ss:$48 sps:$4 sm:$0xff]   ;;  %v12909_v57 = vld [vmem:[#allocation6 + $0x4f0] ss:$48 sps:$4 sm:$0xff]  }
 0x35a   :  { %3973 = vmatprep.subr.bf16.mxu1 %v12890_v55  ;;  %v12912_v55 = vld [vmem:[#allocation6 + $0x4f8] ss:$48 sps:$4 sm:$0xff]  }
 0x35c   :  { %3933 = vmatpush1.bf16.msra.mxu0 %v12885_v58  ;;  %v12917_v58 = vld [vmem:[#allocation6 + $0x554] ss:$48 sps:$4 sm:$0xff]  }
 0x35d   :  { %3974 = vmatpush1.bf16.msra.mxu1 %v12888_v16  ;;  %3934 = vmatprep.subr.bf16.mxu0 %v12893_v41  ;;  %v12920_v16 = vld [vmem:[#allocation6 + $0x55c] ss:$48 sps:$4 sm:$0xff]   ;;  %v12915_v41 = vld [vmem:[#allocation6 + $0x550] ss:$48 sps:$4 sm:$0xff]  }
 0x35e   :  { %3975 = vmatprep.subr.bf16.mxu1 %v12896_v2  ;;  %v12918_v2 = vld [vmem:[#allocation6 + $0x558] ss:$48 sps:$4 sm:$0xff]  }
 0x360   :  { %3935 = vmatpush1.bf16.msra.mxu0 %v12891_v38  ;;  %v12923_v38 = vld [vmem:[#allocation6 + $0x5b4] ss:$48 sps:$4 sm:$0xff]  }
 0x361   :  { %3976 = vmatpush1.bf16.msra.mxu1 %v12894_v25  ;;  %3936 = vmatprep.subr.bf16.mxu0 %v12899_v0  ;;  %v12926_v25 = vld [vmem:[#allocation6 + $0x5bc] ss:$48 sps:$4 sm:$0xff]   ;;  %v12921_v0 = vld [vmem:[#allocation6 + $0x5b0] ss:$48 sps:$4 sm:$0xff]  }
 0x362   :  { %3977 = vmatprep.subr.bf16.mxu1 %v12902_v59  ;;  %v12924_v59 = vld [vmem:[#allocation6 + $0x5b8] ss:$48 sps:$4 sm:$0xff]  }
 0x364   :  { %3937 = vmatpush1.bf16.msra.mxu0 %v12897_v47  ;;  %v12929_v47 = vld [vmem:[#allocation6 + $0x24] ss:$48 sps:$4 sm:$0xff]  }
 0x365   :  { %3978 = vmatpush1.bf16.msra.mxu1 %v12900_v56  ;;  %3938 = vmatprep.subr.bf16.mxu0 %v12905_v13  ;;  %v12932_v56 = vld [vmem:[#allocation6 + $0x2c] ss:$48 sps:$4 sm:$0xff]   ;;  %v12927_v13 = vld [vmem:[#allocation6 + $0x20] ss:$48 sps:$4 sm:$0xff]  }
 0x366   :  { %3979 = vmatprep.subr.bf16.mxu1 %v12908_v30  ;;  %v12930_v30 = vld [vmem:[#allocation6 + $0x28] ss:$48 sps:$4 sm:$0xff]  }
 0x368   :  { %3939 = vmatpush1.bf16.msra.mxu0 %v12903_v4  ;;  %v12935_v4 = vld [vmem:[#allocation6 + $0x84] ss:$48 sps:$4 sm:$0xff]  }
 0x369   :  { %3980 = vmatpush1.bf16.msra.mxu1 %v12906_v49  ;;  %3940 = vmatprep.subr.bf16.mxu0 %v12911_v39  ;;  %v12938_v49 = vld [vmem:[#allocation6 + $0x8c] ss:$48 sps:$4 sm:$0xff]   ;;  %v12933_v39 = vld [vmem:[#allocation6 + $0x80] ss:$48 sps:$4 sm:$0xff]  }
 0x36a   :  { %3981 = vmatprep.subr.bf16.mxu1 %v12914_v15  ;;  %v12936_v15 = vld [vmem:[#allocation6 + $0x88] ss:$48 sps:$4 sm:$0xff]  }
 0x36c   :  { %3941 = vmatpush1.bf16.msra.mxu0 %v12909_v57  ;;  %v12941_v57 = vld [vmem:[#allocation6 + $0xe4] ss:$48 sps:$4 sm:$0xff]  }
 0x36d   :  { %3982 = vmatpush1.bf16.msra.mxu1 %v12912_v55  ;;  %3942 = vmatprep.subr.bf16.mxu0 %v12917_v58  ;;  %v12944_v55 = vld [vmem:[#allocation6 + $0xec] ss:$48 sps:$4 sm:$0xff]   ;;  %v12939_v58 = vld [vmem:[#allocation6 + $0xe0] ss:$48 sps:$4 sm:$0xff]  }
 0x36e   :  { %3983 = vmatprep.subr.bf16.mxu1 %v12920_v16  ;;  %v12942_v16 = vld [vmem:[#allocation6 + $0xe8] ss:$48 sps:$4 sm:$0xff]  }
 0x370   :  { %3943 = vmatpush1.bf16.msra.mxu0 %v12915_v41  ;;  %v12947_v41 = vld [vmem:[#allocation6 + $0x144] ss:$48 sps:$4 sm:$0xff]  }
 0x371   :  { %3984 = vmatpush1.bf16.msra.mxu1 %v12918_v2  ;;  %3944 = vmatprep.subr.bf16.mxu0 %v12923_v38  ;;  %v12950_v2 = vld [vmem:[#allocation6 + $0x14c] ss:$48 sps:$4 sm:$0xff]   ;;  %v12945_v38 = vld [vmem:[#allocation6 + $0x140] ss:$48 sps:$4 sm:$0xff]  }
 0x372   :  { %3985 = vmatprep.subr.bf16.mxu1 %v12926_v25  ;;  %v12948_v25 = vld [vmem:[#allocation6 + $0x148] ss:$48 sps:$4 sm:$0xff]  }
 0x374   :  { %3945 = vmatpush1.bf16.msra.mxu0 %v12921_v0  ;;  %v12953_v0 = vld [vmem:[#allocation6 + $0x1a4] ss:$48 sps:$4 sm:$0xff]  }
 0x375   :  { %3986 = vmatpush1.bf16.msra.mxu1 %v12924_v59  ;;  %3996 = vmatprep.subr.bf16.mxu0 %v12929_v47  ;;  %v12956_v59 = vld [vmem:[#allocation6 + $0x1ac] ss:$48 sps:$4 sm:$0xff]   ;;  %v12954_v47 = vld [vmem:[#allocation6 + $0x1a8] ss:$48 sps:$4 sm:$0xff]  }
 0x376   :  { %4037 = vmatprep.subr.bf16.mxu1 %v12932_v56  ;;  %v12959_v56 = vld [vmem:[#allocation6 + $0x204] ss:$48 sps:$4 sm:$0xff]  }
 0x377   :  { %3947 = vmatmul.mubr.bf16.vlgmr.msra.gmra.mrb[20].mxu0 %v15188_v1 }
 0x378   :  { %3988 = vmatmul.mubr.bf16.vlgmr.msra.gmra.mrb[20].mxu1 %v15188_v1  ;;  %3997 = vmatpush1.bf16.msra.mxu0 %v12927_v13  ;;  %v12962_v13 = vld [vmem:[#allocation6 + $0x20c] ss:$48 sps:$4 sm:$0xff]  }
 0x379   :  { %4028 = vmatprep.mubr.bf16.mxu0 %v15180_v17  ;;  %4038 = vmatpush1.bf16.msra.mxu1 %v12930_v30  ;;  %v12957_v30 = vld [vmem:[#allocation6 + $0x200] ss:$48 sps:$4 sm:$0xff]  }
 0x37a   :  { %4069 = vmatprep.mubr.bf16.mxu1 %v15180_v17  ;;  %3998 = vmatprep.subr.bf16.mxu0 %v12935_v4  ;;  %v12951_v17 = vld [vmem:[#allocation6 + $0x1a0] ss:$48 sps:$4 sm:$0xff]   ;;  %v12960_v4 = vld [vmem:[#allocation6 + $0x208] ss:$48 sps:$4 sm:$0xff]  }
 0x37b   :  { %4039 = vmatprep.subr.bf16.mxu1 %v12938_v49  ;;  %v12965_v49 = vld [vmem:[#allocation6 + $0x264] ss:$48 sps:$4 sm:$0xff]  }
 0x37c   :  { %3999 = vmatpush1.bf16.msra.mxu0 %v12933_v39  ;;  %v12968_v39 = vld [vmem:[#allocation6 + $0x26c] ss:$48 sps:$4 sm:$0xff]  }
 0x37d   :  { %4040 = vmatpush1.bf16.msra.mxu1 %v12936_v15  ;;  %4000 = vmatprep.subr.bf16.mxu0 %v12941_v57  ;;  %v12963_v15 = vld [vmem:[#allocation6 + $0x260] ss:$48 sps:$4 sm:$0xff]   ;;  %v12966_v57 = vld [vmem:[#allocation6 + $0x268] ss:$48 sps:$4 sm:$0xff]  }
 0x37e   :  { %4041 = vmatprep.subr.bf16.mxu1 %v12944_v55  ;;  %v12971_v55 = vld [vmem:[#allocation6 + $0x2c4] ss:$48 sps:$4 sm:$0xff]  }
 0x380   :  { %4001 = vmatpush1.bf16.msra.mxu0 %v12939_v58  ;;  %v12974_v58 = vld [vmem:[#allocation6 + $0x2cc] ss:$48 sps:$4 sm:$0xff]  }
 0x381   :  { %4042 = vmatpush1.bf16.msra.mxu1 %v12942_v16  ;;  %4002 = vmatprep.subr.bf16.mxu0 %v12947_v41  ;;  %v12969_v16 = vld [vmem:[#allocation6 + $0x2c0] ss:$48 sps:$4 sm:$0xff]   ;;  %v12972_v41 = vld [vmem:[#allocation6 + $0x2c8] ss:$48 sps:$4 sm:$0xff]  }
 0x382   :  { %4043 = vmatprep.subr.bf16.mxu1 %v12950_v2  ;;  %v12977_v2 = vld [vmem:[#allocation6 + $0x324] ss:$48 sps:$4 sm:$0xff]  }
 0x384   :  { %4003 = vmatpush1.bf16.msra.mxu0 %v12945_v38  ;;  %v12980_v38 = vld [vmem:[#allocation6 + $0x32c] ss:$48 sps:$4 sm:$0xff]  }
 0x385   :  { %4044 = vmatpush1.bf16.msra.mxu1 %v12948_v25  ;;  %4004 = vmatprep.subr.bf16.mxu0 %v12953_v0  ;;  %v12975_v25 = vld [vmem:[#allocation6 + $0x320] ss:$48 sps:$4 sm:$0xff]   ;;  %v12978_v0 = vld [vmem:[#allocation6 + $0x328] ss:$48 sps:$4 sm:$0xff]  }
 0x386   :  { %4045 = vmatprep.subr.bf16.mxu1 %v12956_v59  ;;  %v12983_v59 = vld [vmem:[#allocation6 + $0x384] ss:$48 sps:$4 sm:$0xff]  }
 0x388   :  { %4005 = vmatpush1.bf16.msra.mxu0 %v12951_v17  ;;  %v12986_v17 = vld [vmem:[#allocation6 + $0x38c] ss:$48 sps:$4 sm:$0xff]  }
 0x389   :  { %4046 = vmatpush1.bf16.msra.mxu1 %v12954_v47  ;;  %4006 = vmatprep.subr.bf16.mxu0 %v12959_v56  ;;  %v12981_v47 = vld [vmem:[#allocation6 + $0x380] ss:$48 sps:$4 sm:$0xff]   ;;  %v12984_v56 = vld [vmem:[#allocation6 + $0x388] ss:$48 sps:$4 sm:$0xff]  }
 0x38a   :  { %4047 = vmatprep.subr.bf16.mxu1 %v12962_v13  ;;  %v12989_v13 = vld [vmem:[#allocation6 + $0x3e4] ss:$48 sps:$4 sm:$0xff]  }
 0x38c   :  { %4007 = vmatpush1.bf16.msra.mxu0 %v12957_v30  ;;  %v12992_v30 = vld [vmem:[#allocation6 + $0x3ec] ss:$48 sps:$4 sm:$0xff]  }
 0x38d   :  { %4048 = vmatpush1.bf16.msra.mxu1 %v12960_v4  ;;  %4008 = vmatprep.subr.bf16.mxu0 %v12965_v49  ;;  %v12987_v4 = vld [vmem:[#allocation6 + $0x3e0] ss:$48 sps:$4 sm:$0xff]   ;;  %v12990_v49 = vld [vmem:[#allocation6 + $0x3e8] ss:$48 sps:$4 sm:$0xff]  }
 0x38e   :  { %4049 = vmatprep.subr.bf16.mxu1 %v12968_v39  ;;  %v12995_v39 = vld [vmem:[#allocation6 + $0x444] ss:$48 sps:$4 sm:$0xff]  }
 0x390   :  { %4009 = vmatpush1.bf16.msra.mxu0 %v12963_v15  ;;  %v12998_v15 = vld [vmem:[#allocation6 + $0x44c] ss:$48 sps:$4 sm:$0xff]  }
 0x391   :  { %4050 = vmatpush1.bf16.msra.mxu1 %v12966_v57  ;;  %4010 = vmatprep.subr.bf16.mxu0 %v12971_v55  ;;  %v12993_v57 = vld [vmem:[#allocation6 + $0x440] ss:$48 sps:$4 sm:$0xff]   ;;  %v12996_v55 = vld [vmem:[#allocation6 + $0x448] ss:$48 sps:$4 sm:$0xff]  }
 0x392   :  { %4051 = vmatprep.subr.bf16.mxu1 %v12974_v58  ;;  %v13001_v58 = vld [vmem:[#allocation6 + $0x4a4] ss:$48 sps:$4 sm:$0xff]  }
 0x394   :  { %4011 = vmatpush1.bf16.msra.mxu0 %v12969_v16  ;;  %v13004_v16 = vld [vmem:[#allocation6 + $0x4ac] ss:$48 sps:$4 sm:$0xff]  }
 0x395   :  { %4052 = vmatpush1.bf16.msra.mxu1 %v12972_v41  ;;  %4012 = vmatprep.subr.bf16.mxu0 %v12977_v2  ;;  %v12999_v41 = vld [vmem:[#allocation6 + $0x4a0] ss:$48 sps:$4 sm:$0xff]   ;;  %v13002_v2 = vld [vmem:[#allocation6 + $0x4a8] ss:$48 sps:$4 sm:$0xff]  }
 0x396   :  { %4053 = vmatprep.subr.bf16.mxu1 %v12980_v38  ;;  %v13007_v38 = vld [vmem:[#allocation6 + $0x504] ss:$48 sps:$4 sm:$0xff]  }
 0x398   :  { %4013 = vmatpush1.bf16.msra.mxu0 %v12975_v25  ;;  %v13010_v25 = vld [vmem:[#allocation6 + $0x50c] ss:$48 sps:$4 sm:$0xff]  }
 0x399   :  { %4054 = vmatpush1.bf16.msra.mxu1 %v12978_v0  ;;  %4014 = vmatprep.subr.bf16.mxu0 %v12983_v59  ;;  %v13005_v0 = vld [vmem:[#allocation6 + $0x500] ss:$48 sps:$4 sm:$0xff]   ;;  %v13008_v59 = vld [vmem:[#allocation6 + $0x508] ss:$48 sps:$4 sm:$0xff]  }
 0x39a   :  { %4055 = vmatprep.subr.bf16.mxu1 %v12986_v17  ;;  %v13013_v17 = vld [vmem:[#allocation6 + $0x564] ss:$48 sps:$4 sm:$0xff]  }
 0x39c   :  { %4015 = vmatpush1.bf16.msra.mxu0 %v12981_v47  ;;  %v13016_v47 = vld [vmem:[#allocation6 + $0x56c] ss:$48 sps:$4 sm:$0xff]  }
 0x39d   :  { %4056 = vmatpush1.bf16.msra.mxu1 %v12984_v56  ;;  %4016 = vmatprep.subr.bf16.mxu0 %v12989_v13  ;;  %v13011_v56 = vld [vmem:[#allocation6 + $0x560] ss:$48 sps:$4 sm:$0xff]   ;;  %v13014_v13 = vld [vmem:[#allocation6 + $0x568] ss:$48 sps:$4 sm:$0xff]  }
 0x39e   :  { %4057 = vmatprep.subr.bf16.mxu1 %v12992_v30  ;;  %v13019_v30 = vld [vmem:[#allocation6 + $0x5c4] ss:$48 sps:$4 sm:$0xff]  }
 0x3a0   :  { %4017 = vmatpush1.bf16.msra.mxu0 %v12987_v4  ;;  %v13022_v4 = vld [vmem:[#allocation6 + $0x5cc] ss:$48 sps:$4 sm:$0xff]  }
 0x3a1   :  { %4058 = vmatpush1.bf16.msra.mxu1 %v12990_v49  ;;  %4018 = vmatprep.subr.bf16.mxu0 %v12995_v39  ;;  %v13017_v49 = vld [vmem:[#allocation6 + $0x5c0] ss:$48 sps:$4 sm:$0xff]   ;;  %v13020_v39 = vld [vmem:[#allocation6 + $0x5c8] ss:$48 sps:$4 sm:$0xff]  }
 0x3a2   :  { %4059 = vmatprep.subr.bf16.mxu1 %v12998_v15  ;;  %v15201_v15 = vld [vmem:[%s15896_s0 + $0x10] sm:$0xff] }
 0x3a4   :  { %4019 = vmatpush1.bf16.msra.mxu0 %v12993_v57  ;;  %v15207_v57 = vcombine.high %v15201_v15, %v15201_v15 }
 0x3a5   :  { %4060 = vmatpush1.bf16.msra.mxu1 %v12996_v55  ;;  %4020 = vmatprep.subr.bf16.mxu0 %v13001_v58  ;;  %v16262_v55 = vld [vmem:[#allocation21_spill] sm:$0xff]  ;;  %v16263_v58 = vld [vmem:[#allocation22_spill] sm:$0xff] }
 0x3a6   :  { %4061 = vmatprep.subr.bf16.mxu1 %v13004_v16  ;;  %v16264_v16 = vld [vmem:[#allocation23_spill] sm:$0xff] }
 0x3a8   :  { %4021 = vmatpush1.bf16.msra.mxu0 %v12999_v41  ;;  %v16265_v41 = vld [vmem:[#allocation24_spill] sm:$0xff] }
 0x3a9   :  { %4062 = vmatpush1.bf16.msra.mxu1 %v13002_v2  ;;  %4022 = vmatprep.subr.bf16.mxu0 %v13007_v38  ;;  %v16266_v2 = vld [vmem:[#allocation25_spill] sm:$0xff]  ;;  %v16267_v38 = vld [vmem:[#allocation26_spill] sm:$0xff] }
 0x3aa   :  { %4063 = vmatprep.subr.bf16.mxu1 %v13010_v25  ;;  %v16268_v25 = vld [vmem:[#allocation27_spill] sm:$0xff] }
 0x3ac   :  { %4023 = vmatpush1.bf16.msra.mxu0 %v13005_v0  ;;  %v16269_v0 = vld [vmem:[#allocation28_spill] sm:$0xff] }
 0x3ad   :  { %4064 = vmatpush1.bf16.msra.mxu1 %v13008_v59  ;;  %4024 = vmatprep.subr.bf16.mxu0 %v13013_v17  ;;  %v16270_v59 = vld [vmem:[#allocation29_spill] sm:$0xff]  ;;  %v16271_v17 = vld [vmem:[#allocation30_spill] sm:$0xff] }
 0x3ae   :  { %4065 = vmatprep.subr.bf16.mxu1 %v13016_v47  ;;  %v16272_v47 = vld [vmem:[#allocation31_spill] sm:$0xff] }
 0x3b0   :  { %4025 = vmatpush1.bf16.msra.mxu0 %v13011_v56  ;;  %v16273_v56 = vld [vmem:[#allocation32_spill] sm:$0xff] }
 0x3b1   :  { %4066 = vmatpush1.bf16.msra.mxu1 %v13014_v13  ;;  %4026 = vmatprep.subr.bf16.mxu0 %v13019_v30  ;;  %v16274_v13 = vld [vmem:[#allocation33_spill] sm:$0xff]  ;;  %v16275_v30 = vld [vmem:[#allocation35_spill] sm:$0xff] }
 0x3b2   :  { %4067 = vmatprep.subr.bf16.mxu1 %v13022_v4  ;;  %v16276_v4 = vld [vmem:[#allocation36_spill] sm:$0xff] }
 0x3b4   :  { %4027 = vmatpush1.bf16.msra.mxu0 %v13017_v49  ;;  %v16277_v49 = vld [vmem:[#allocation37_spill] sm:$0xff] }
 0x3b5   :  { %4068 = vmatpush1.bf16.msra.mxu1 %v13020_v39  ;;  %4086 = vmatprep.subr.bf16.mxu0 %v14574_v3  ;;  %v16278_v39 = vld [vmem:[#allocation38_spill] sm:$0xff] }
 0x3b6   :  { %4127 = vmatprep.subr.bf16.mxu1 %v14578_v8 }
 0x3b7   :  { %4029 = vmatmul.mubr.bf16.vlgmr.msra.gmra.mrb[24].mxu0 %v15188_v1 }
 0x3b8   :  { %4070 = vmatmul.mubr.bf16.vlgmr.msra.gmra.mrb[24].mxu1 %v15188_v1  ;;  %4087 = vmatpush1.bf16.msra.mxu0 %v14576_v5  ;;  %v16261_v1 = vld [vmem:[#allocation20_spill] sm:$0xff] }
 0x3b9   :  { %4128 = vmatpush1.bf16.msra.mxu1 %v14580_v9  ;;  %4088 = vmatprep.subr.bf16.mxu0 %v14582_v10 }
 0x3ba   :  { %4129 = vmatprep.subr.bf16.mxu1 %v14585_v14  ;;  %4118 = vmatprep.mubr.bf16.mxu0 %v15207_v57 }
 0x3bb   :  { %4159 = vmatprep.mubr.bf16.mxu1 %v15207_v57 }
 0x3bc   :  { %4089 = vmatpush1.bf16.msra.mxu0 %v14589_v18 }
 0x3bd   :  { %4130 = vmatpush1.bf16.msra.mxu1 %v14593_v19  ;;  %4090 = vmatprep.subr.bf16.mxu0 %v14595_v20 }
 0x3be   :  { %4131 = vmatprep.subr.bf16.mxu1 %v14598_v21 }
 0x3c0   :  { %4091 = vmatpush1.bf16.msra.mxu0 %v14601_v26 }
 0x3c1   :  { %4132 = vmatpush1.bf16.msra.mxu1 %v14605_v27  ;;  %4092 = vmatprep.subr.bf16.mxu0 %v14607_v28 }
 0x3c2   :  { %4133 = vmatprep.subr.bf16.mxu1 %v14610_v29 }
 0x3c4   :  { %4093 = vmatpush1.bf16.msra.mxu0 %v14613_v34 }
 0x3c5   :  { %4134 = vmatpush1.bf16.msra.mxu1 %v14617_v35  ;;  %4094 = vmatprep.subr.bf16.mxu0 %v14619_v36 }
 0x3c6   :  { %4135 = vmatprep.subr.bf16.mxu1 %v14622_v37 }
 0x3c8   :  { %4095 = vmatpush1.bf16.msra.mxu0 %v14625_v42 }
 0x3c9   :  { %4136 = vmatpush1.bf16.msra.mxu1 %v14629_v43  ;;  %4096 = vmatprep.subr.bf16.mxu0 %v14631_v44 }
 0x3ca   :  { %4137 = vmatprep.subr.bf16.mxu1 %v14634_v45 }
 0x3cc   :  { %4097 = vmatpush1.bf16.msra.mxu0 %v14637_v50 }
 0x3cd   :  { %4138 = vmatpush1.bf16.msra.mxu1 %v14641_v51  ;;  %4098 = vmatprep.subr.bf16.mxu0 %v14643_v52 }
 0x3ce   :  { %4139 = vmatprep.subr.bf16.mxu1 %v14651_v54 }
 0x3d0   :  { %4099 = vmatpush1.bf16.msra.mxu0 %v14658_v60 }
 0x3d1   :  { %4140 = vmatpush1.bf16.msra.mxu1 %v14663_v61  ;;  %4100 = vmatprep.subr.bf16.mxu0 %v14665_v62 }
 0x3d2   :  { %4141 = vmatprep.subr.bf16.mxu1 %v14668_v63 }
 0x3d4   :  { %4101 = vmatpush1.bf16.msra.mxu0 %v14672_v6 }
 0x3d5   :  { %4142 = vmatpush1.bf16.msra.mxu1 %v14676_v7  ;;  %4102 = vmatprep.subr.bf16.mxu0 %v14678_v11 }
 0x3d6   :  { %4143 = vmatprep.subr.bf16.mxu1 %v14681_v12 }
 0x3d8   :  { %4103 = vmatpush1.bf16.msra.mxu0 %v14684_v22 }
 0x3d9   :  { %4144 = vmatpush1.bf16.msra.mxu1 %v14688_v23  ;;  %4104 = vmatprep.subr.bf16.mxu0 %v14690_v24 }
 0x3da   :  { %4145 = vmatprep.subr.bf16.mxu1 %v16261_v1 }
 0x3dc   :  { %4105 = vmatpush1.bf16.msra.mxu0 %v16262_v55 }
 0x3dd   :  { %4146 = vmatpush1.bf16.msra.mxu1 %v16263_v58  ;;  %4106 = vmatprep.subr.bf16.mxu0 %v16264_v16 }
 0x3de   :  { %4147 = vmatprep.subr.bf16.mxu1 %v16265_v41 }
 0x3e0   :  { %4107 = vmatpush1.bf16.msra.mxu0 %v16266_v2 }
 0x3e1   :  { %4148 = vmatpush1.bf16.msra.mxu1 %v16267_v38  ;;  %4108 = vmatprep.subr.bf16.mxu0 %v16268_v25 }
 0x3e2   :  { %4149 = vmatprep.subr.bf16.mxu1 %v16269_v0 }
 0x3e4   :  { %4109 = vmatpush1.bf16.msra.mxu0 %v16270_v59 }
 0x3e5   :  { %4150 = vmatpush1.bf16.msra.mxu1 %v16271_v17  ;;  %4110 = vmatprep.subr.bf16.mxu0 %v16272_v47  ;;  %v16281_v47 = vld [vmem:[#allocation42_spill] sm:$0xff] }
 0x3e6   :  { %4151 = vmatprep.subr.bf16.mxu1 %v16273_v56  ;;  %v16282_v56 = vld [vmem:[#allocation43_spill] sm:$0xff] }
 0x3e8   :  { %4111 = vmatpush1.bf16.msra.mxu0 %v16274_v13  ;;  %v16283_v13 = vld [vmem:[#allocation44_spill] sm:$0xff] }
 0x3e9   :  { %4152 = vmatpush1.bf16.msra.mxu1 %v16195_v40  ;;  %4112 = vmatprep.subr.bf16.mxu0 %v16275_v30  ;;  %v15275_v30 = vcombine.low %v15201_v15, %v15201_v15  ;;  %v16291_v15 = vld [vmem:[#allocation52_spill] sm:$0xff] }
 0x3ea   :  { %4153 = vmatprep.subr.bf16.mxu1 %v16276_v4  ;;  %v16284_v4 = vld [vmem:[#allocation45_spill] sm:$0xff]  ;;  %v13048_v40 = vld [vmem:[#allocation6 + $0xd2c] ss:$48 sps:$4 sm:$0xff]  }
 0x3ec   :  { %4113 = vmatpush1.bf16.msra.mxu0 %v16277_v49  ;;  %v16285_v49 = vld [vmem:[#allocation46_spill] sm:$0xff] }
 0x3ed   :  { %4154 = vmatpush1.bf16.msra.mxu1 %v16278_v39  ;;  %4114 = vmatprep.subr.bf16.mxu0 %v16279_v53  ;;  %v16286_v39 = vld [vmem:[#allocation47_spill] sm:$0xff]  ;;  %v16287_v53 = vld [vmem:[#allocation48_spill] sm:$0xff] }
 0x3ee   :  { %4155 = vmatprep.subr.bf16.mxu1 %v16201_v32  ;;  %v16301_v32 = vld [vmem:[#allocation62_spill] sm:$0xff] }
 0x3f0   :  { %4115 = vmatpush1.bf16.msra.mxu0 %v16280_v31  ;;  %v16296_v31 = vld [vmem:[#allocation57_spill] sm:$0xff] }
 0x3f1   :  { %4156 = vmatpush1.bf16.msra.mxu1 %v16281_v47  ;;  %4116 = vmatprep.subr.bf16.mxu0 %v16282_v56  ;;  %v16288_v47 = vld [vmem:[#allocation49_spill] sm:$0xff]  ;;  %v16289_v56 = vld [vmem:[#allocation50_spill] sm:$0xff] }
 0x3f2   :  { %4157 = vmatprep.subr.bf16.mxu1 %v16283_v13  ;;  %v16290_v13 = vld [vmem:[#allocation51_spill] sm:$0xff] }
 0x3f4   :  { %4117 = vmatpush1.bf16.msra.mxu0 %v16284_v4  ;;  %v16295_v4 = vld [vmem:[#allocation56_spill] sm:$0xff] }
 0x3f5   :  { %4158 = vmatpush1.bf16.msra.mxu1 %v16285_v49  ;;  %4168 = vmatprep.subr.bf16.mxu0 %v16286_v39  ;;  %v16292_v49 = vld [vmem:[#allocation53_spill] sm:$0xff]  ;;  %v16293_v39 = vld [vmem:[#allocation54_spill] sm:$0xff] }
 0x3f6   :  { %4209 = vmatprep.subr.bf16.mxu1 %v16287_v53  ;;  %v16294_v53 = vld [vmem:[#allocation55_spill] sm:$0xff] }
 0x3f7   :  { %4119 = vmatmul.mubr.bf16.vlgmr.msra.gmra.mrb[28].mxu0 %v15275_v30 }
 0x3f8   :  { %4160 = vmatmul.mubr.bf16.vlgmr.msra.gmra.mrb[28].mxu1 %v15275_v30  ;;  %4169 = vmatpush1.bf16.msra.mxu0 %v16288_v47  ;;  %v16297_v47 = vld [vmem:[#allocation58_spill] sm:$0xff] }
 0x3f9   :  { %4210 = vmatpush1.bf16.msra.mxu1 %v16289_v56  ;;  %4170 = vmatprep.subr.bf16.mxu0 %v16290_v13  ;;  %v16298_v56 = vld [vmem:[#allocation59_spill] sm:$0xff]  ;;  %v16299_v13 = vld [vmem:[#allocation60_spill] sm:$0xff] }
 0x3fa   :  { %4211 = vmatprep.subr.bf16.mxu1 %v16291_v15  ;;  %4200 = vmatprep.mubr.bf16.mxu0 %v15207_v57  ;;  %v16300_v15 = vld [vmem:[#allocation61_spill] sm:$0xff] }
 0x3fb   :  { %4241 = vmatprep.mubr.bf16.mxu1 %v15207_v57  ;;  %v16302_v57 = vld [vmem:[#allocation63_spill] sm:$0xff] }
 0x3fc   :  { %4171 = vmatpush1.bf16.msra.mxu0 %v16292_v49  ;;  %v16303_v49 = vld [vmem:[#allocation64_spill] sm:$0xff] }
 0x3fd   :  { %4212 = vmatpush1.bf16.msra.mxu1 %v16293_v39  ;;  %4172 = vmatprep.subr.bf16.mxu0 %v16294_v53  ;;  %v16304_v39 = vld [vmem:[#allocation65_spill] sm:$0xff]  ;;  %v16305_v53 = vld [vmem:[#allocation66_spill] sm:$0xff] }
 0x3fe   :  { %4213 = vmatprep.subr.bf16.mxu1 %v16295_v4  ;;  %v16306_v4 = vld [vmem:[#allocation67_spill] sm:$0xff] }
 0x400   :  { %4173 = vmatpush1.bf16.msra.mxu0 %v16296_v31  ;;  %v16307_v31 = vld [vmem:[#allocation68_spill] sm:$0xff] }
 0x401   :  { %4214 = vmatpush1.bf16.msra.mxu1 %v16297_v47  ;;  %4174 = vmatprep.subr.bf16.mxu0 %v16298_v56  ;;  %v16308_v47 = vld [vmem:[#allocation69_spill] sm:$0xff]  ;;  %v16309_v56 = vld [vmem:[#allocation70_spill] sm:$0xff] }
 0x402   :  { %4215 = vmatprep.subr.bf16.mxu1 %v16299_v13  ;;  %v16310_v13 = vld [vmem:[#allocation71_spill] sm:$0xff] }
 0x404   :  { %4175 = vmatpush1.bf16.msra.mxu0 %v16300_v15  ;;  %v16311_v15 = vld [vmem:[#allocation72_spill] sm:$0xff] }
 0x405   :  { %4216 = vmatpush1.bf16.msra.mxu1 %v16301_v32  ;;  %4176 = vmatprep.subr.bf16.mxu0 %v16302_v57  ;;  %v16312_v32 = vld [vmem:[#allocation73_spill] sm:$0xff]  ;;  %v16313_v57 = vld [vmem:[#allocation74_spill] sm:$0xff] }
 0x406   :  { %4217 = vmatprep.subr.bf16.mxu1 %v16303_v49  ;;  %v16314_v49 = vld [vmem:[#allocation75_spill] sm:$0xff] }
 0x408   :  { %4177 = vmatpush1.bf16.msra.mxu0 %v16304_v39  ;;  %v16315_v39 = vld [vmem:[#allocation76_spill] sm:$0xff] }
 0x409   :  { %4218 = vmatpush1.bf16.msra.mxu1 %v16305_v53  ;;  %4178 = vmatprep.subr.bf16.mxu0 %v16306_v4  ;;  %v16316_v53 = vld [vmem:[#allocation77_spill] sm:$0xff]  ;;  %v16317_v4 = vld [vmem:[#allocation78_spill] sm:$0xff] }
 0x40a   :  { %4219 = vmatprep.subr.bf16.mxu1 %v16307_v31  ;;  %v16318_v31 = vld [vmem:[#allocation79_spill] sm:$0xff] }
 0x40c   :  { %4179 = vmatpush1.bf16.msra.mxu0 %v16308_v47  ;;  %v16319_v47 = vld [vmem:[#allocation80_spill] sm:$0xff] }
 0x40d   :  { %4220 = vmatpush1.bf16.msra.mxu1 %v16309_v56  ;;  %4180 = vmatprep.subr.bf16.mxu0 %v16310_v13  ;;  %v16320_v56 = vld [vmem:[#allocation81_spill] sm:$0xff]  ;;  %v16321_v13 = vld [vmem:[#allocation82_spill] sm:$0xff] }
 0x40e   :  { %4221 = vmatprep.subr.bf16.mxu1 %v16311_v15  ;;  %v16322_v15 = vld [vmem:[#allocation83_spill] sm:$0xff] }
 0x410   :  { %4181 = vmatpush1.bf16.msra.mxu0 %v16312_v32  ;;  %v16323_v32 = vld [vmem:[#allocation84_spill] sm:$0xff] }
 0x411   :  { %4222 = vmatpush1.bf16.msra.mxu1 %v16313_v57  ;;  %4182 = vmatprep.subr.bf16.mxu0 %v16314_v49  ;;  %v16324_v57 = vld [vmem:[#allocation85_spill] sm:$0xff] }
 0x412   :  { %4223 = vmatprep.subr.bf16.mxu1 %v16315_v39  ;;  %v16325_v39 = vld [vmem:[#allocation87_spill] sm:$0xff] }
 0x413   :  { %v13045_v49 = vld [vmem:[#allocation6 + $0xd24] ss:$48 sps:$4 sm:$0xff]  }
 0x414   :  { %4183 = vmatpush1.bf16.msra.mxu0 %v16316_v53  ;;  %v16326_v53 = vld [vmem:[#allocation88_spill] sm:$0xff] }
 0x415   :  { %4224 = vmatpush1.bf16.msra.mxu1 %v16317_v4  ;;  %4184 = vmatprep.subr.bf16.mxu0 %v16318_v31  ;;  %v16327_v4 = vld [vmem:[#allocation89_spill] sm:$0xff]  ;;  %v16328_v31 = vld [vmem:[#allocation90_spill] sm:$0xff] }
 0x416   :  { %4225 = vmatprep.subr.bf16.mxu1 %v16319_v47  ;;  %v16329_v47 = vld [vmem:[#allocation91_spill] sm:$0xff] }
 0x418   :  { %4185 = vmatpush1.bf16.msra.mxu0 %v16320_v56  ;;  %v16330_v56 = vld [vmem:[#allocation92_spill] sm:$0xff] }
 0x419   :  { %4226 = vmatpush1.bf16.msra.mxu1 %v16321_v13  ;;  %4186 = vmatprep.subr.bf16.mxu0 %v16322_v15  ;;  %v16331_v13 = vld [vmem:[#allocation93_spill] sm:$0xff]  ;;  %v16332_v15 = vld [vmem:[#allocation94_spill] sm:$0xff] }
 0x41a   :  { %4227 = vmatprep.subr.bf16.mxu1 %v16323_v32  ;;  %v16333_v32 = vld [vmem:[#allocation95_spill] sm:$0xff] }
 0x41c   :  { %4187 = vmatpush1.bf16.msra.mxu0 %v16324_v57  ;;  %v16334_v57 = vld [vmem:[#allocation96_spill] sm:$0xff] }
 0x41d   :  { %4228 = vmatpush1.bf16.msra.mxu1 %v16246_v46  ;;  %4188 = vmatprep.subr.bf16.mxu0 %v16325_v39  ;;  %v16335_v46 = vld [vmem:[#allocation97_spill] sm:$0xff]  ;;  %v16336_v39 = vld [vmem:[#allocation98_spill] sm:$0xff] }
 0x41e   :  { %4229 = vmatprep.subr.bf16.mxu1 %v16326_v53  ;;  %v16337_v53 = vld [vmem:[#allocation99_spill] sm:$0xff] }
 0x420   :  { %4189 = vmatpush1.bf16.msra.mxu0 %v16327_v4  ;;  %v16338_v4 = vld [vmem:[#allocation100_spill] sm:$0xff] }
 0x421   :  { %4230 = vmatpush1.bf16.msra.mxu1 %v16328_v31  ;;  %4190 = vmatprep.subr.bf16.mxu0 %v16329_v47  ;;  %v16339_v31 = vld [vmem:[#allocation101_spill] sm:$0xff]  ;;  %v16340_v47 = vld [vmem:[#allocation102_spill] sm:$0xff] }
 0x422   :  { %4231 = vmatprep.subr.bf16.mxu1 %v16330_v56  ;;  %v16341_v56 = vld [vmem:[#allocation103_spill] sm:$0xff] }
 0x424   :  { %4191 = vmatpush1.bf16.msra.mxu0 %v16331_v13  ;;  %v16342_v13 = vld [vmem:[#allocation104_spill] sm:$0xff] }
 0x425   :  { %4232 = vmatpush1.bf16.msra.mxu1 %v16332_v15  ;;  %4192 = vmatprep.subr.bf16.mxu0 %v16333_v32  ;;  %v16343_v15 = vld [vmem:[#allocation105_spill] sm:$0xff]  ;;  %v16344_v32 = vld [vmem:[#allocation106_spill] sm:$0xff] }
 0x426   :  { %4233 = vmatprep.subr.bf16.mxu1 %v16334_v57  ;;  %v16345_v57 = vld [vmem:[#allocation107_spill] sm:$0xff] }
 0x428   :  { %4193 = vmatpush1.bf16.msra.mxu0 %v16335_v46  ;;  %v16346_v46 = vld [vmem:[#allocation108_spill] sm:$0xff] }
 0x429   :  { %4234 = vmatpush1.bf16.msra.mxu1 %v16336_v39  ;;  %4194 = vmatprep.subr.bf16.mxu0 %v16337_v53  ;;  %v16347_v39 = vld [vmem:[#allocation109_spill] sm:$0xff]  ;;  %v16348_v53 = vld [vmem:[#allocation110_spill] sm:$0xff] }
 0x42a   :  { %4235 = vmatprep.subr.bf16.mxu1 %v16338_v4  ;;  %v13033_v4 = vld [vmem:[#allocation6 + $0xc64] ss:$48 sps:$4 sm:$0xff]  }
 0x42c   :  { %4195 = vmatpush1.bf16.msra.mxu0 %v16339_v31  ;;  %v13028_v31 = vld [vmem:[#allocation6 + $0xc08] ss:$48 sps:$4 sm:$0xff]  }
 0x42d   :  { %4236 = vmatpush1.bf16.msra.mxu1 %v16340_v47  ;;  %4196 = vmatprep.subr.bf16.mxu0 %v16341_v56  ;;  %v13025_v47 = vld [vmem:[#allocation6 + $0xc00] ss:$48 sps:$4 sm:$0xff]   ;;  %v13027_v56 = vld [vmem:[#allocation6 + $0xc04] ss:$48 sps:$4 sm:$0xff]  }
 0x42e   :  { %4237 = vmatprep.subr.bf16.mxu1 %v16342_v13  ;;  %v13030_v13 = vld [vmem:[#allocation6 + $0xc0c] ss:$48 sps:$4 sm:$0xff]  }
 0x430   :  { %4197 = vmatpush1.bf16.msra.mxu0 %v16343_v15  ;;  %v13036_v15 = vld [vmem:[#allocation6 + $0xc6c] ss:$48 sps:$4 sm:$0xff]  }
 0x431   :  { %4238 = vmatpush1.bf16.msra.mxu1 %v16344_v32  ;;  %4198 = vmatprep.subr.bf16.mxu0 %v16345_v57  ;;  %v13031_v57 = vld [vmem:[#allocation6 + $0xc60] ss:$48 sps:$4 sm:$0xff]  }
 0x432   :  { %4239 = vmatprep.subr.bf16.mxu1 %v16346_v46  ;;  %v13034_v46 = vld [vmem:[#allocation6 + $0xc68] ss:$48 sps:$4 sm:$0xff]   ;;  %v13037_v32 = vld [vmem:[#allocation6 + $0xcc0] ss:$48 sps:$4 sm:$0xff]  }
 0x434   :  { %4199 = vmatpush1.bf16.msra.mxu0 %v16347_v39  ;;  %v13039_v39 = vld [vmem:[#allocation6 + $0xcc4] ss:$48 sps:$4 sm:$0xff]  }
 0x435   :  { %4240 = vmatpush1.bf16.msra.mxu1 %v16348_v53  ;;  %5414 = vmatprep.subr.bf16.mxu0 %v13027_v56  ;;  %v13042_v53 = vld [vmem:[#allocation6 + $0xccc] ss:$48 sps:$4 sm:$0xff]   ;;  %v13043_v56 = vld [vmem:[#allocation6 + $0xd20] ss:$48 sps:$4 sm:$0xff]  }
 0x436   :  { %5455 = vmatprep.subr.bf16.mxu1 %v13030_v13  ;;  %v13051_v13 = vld [vmem:[#allocation6 + $0xd84] ss:$48 sps:$4 sm:$0xff]  }
 0x437   :  { %4201 = vmatmul.mubr.bf16.vlgmr.msra.gmra.mrb[32].mxu0 %v15275_v30 }
 0x438   :  { %4242 = vmatmul.mubr.bf16.vlgmr.msra.gmra.mrb[32].mxu1 %v15275_v30  ;;  %5415 = vmatpush1.bf16.msra.mxu0 %v13025_v47  ;;  %v13040_v30 = vld [vmem:[#allocation6 + $0xcc8] ss:$48 sps:$4 sm:$0xff]  }
 0x439   :  { %5456 = vmatpush1.bf16.msra.mxu1 %v13028_v31  ;;  %5416 = vmatprep.subr.bf16.mxu0 %v13033_v4  ;;  %v13046_v47 = vld [vmem:[#allocation6 + $0xd28] ss:$48 sps:$4 sm:$0xff]   ;;  %v13054_v31 = vld [vmem:[#allocation6 + $0xd8c] ss:$48 sps:$4 sm:$0xff]   ;;  %v13049_v4 = vld [vmem:[#allocation6 + $0xd80] ss:$48 sps:$4 sm:$0xff]  }
 0x43a   :  { %5457 = vmatprep.subr.bf16.mxu1 %v13036_v15  ;;  %v13052_v15 = vld [vmem:[#allocation6 + $0xd88] ss:$48 sps:$4 sm:$0xff]  }
 0x43c   :  { %5417 = vmatpush1.bf16.msra.mxu0 %v13031_v57  ;;  %v13057_v57 = vld [vmem:[#allocation6 + $0xde4] ss:$48 sps:$4 sm:$0xff]  }
 0x43d   :  { %5458 = vmatpush1.bf16.msra.mxu1 %v13034_v46  ;;  %5418 = vmatprep.subr.bf16.mxu0 %v13039_v39  ;;  %v13060_v46 = vld [vmem:[#allocation6 + $0xdec] ss:$48 sps:$4 sm:$0xff]   ;;  %v13055_v39 = vld [vmem:[#allocation6 + $0xde0] ss:$48 sps:$4 sm:$0xff]  }
 0x43e   :  { %5459 = vmatprep.subr.bf16.mxu1 %v13042_v53  ;;  %v13063_v53 = vld [vmem:[#allocation6 + $0xe44] ss:$48 sps:$4 sm:$0xff]  }
 0x440   :  { %5419 = vmatpush1.bf16.msra.mxu0 %v13037_v32  ;;  %v13058_v32 = vld [vmem:[#allocation6 + $0xde8] ss:$48 sps:$4 sm:$0xff]  }
 0x441   :  { %5460 = vmatpush1.bf16.msra.mxu1 %v13040_v30  ;;  %5420 = vmatprep.subr.bf16.mxu0 %v13045_v49  ;;  %v13066_v49 = vld [vmem:[#allocation6 + $0xe4c] ss:$48 sps:$4 sm:$0xff]   ;;  %v13061_v30 = vld [vmem:[#allocation6 + $0xe40] ss:$48 sps:$4 sm:$0xff]  }
 0x442   :  { %5461 = vmatprep.subr.bf16.mxu1 %v13048_v40  ;;  %v13064_v40 = vld [vmem:[#allocation6 + $0xe48] ss:$48 sps:$4 sm:$0xff]  }
 0x444   :  { %5421 = vmatpush1.bf16.msra.mxu0 %v13043_v56  ;;  %v13069_v56 = vld [vmem:[#allocation6 + $0xea4] ss:$48 sps:$4 sm:$0xff]  }
 0x445   :  { %5462 = vmatpush1.bf16.msra.mxu1 %v13046_v47  ;;  %5422 = vmatprep.subr.bf16.mxu0 %v13051_v13  ;;  %v13072_v47 = vld [vmem:[#allocation6 + $0xeac] ss:$48 sps:$4 sm:$0xff]   ;;  %v13067_v13 = vld [vmem:[#allocation6 + $0xea0] ss:$48 sps:$4 sm:$0xff]  }
 0x446   :  { %5463 = vmatprep.subr.bf16.mxu1 %v13054_v31  ;;  %v13070_v31 = vld [vmem:[#allocation6 + $0xea8] ss:$48 sps:$4 sm:$0xff]  }
 0x448   :  { %5423 = vmatpush1.bf16.msra.mxu0 %v13049_v4  ;;  %v13075_v4 = vld [vmem:[#allocation6 + $0xf04] ss:$48 sps:$4 sm:$0xff]  }
 0x449   :  { %5464 = vmatpush1.bf16.msra.mxu1 %v13052_v15  ;;  %5424 = vmatprep.subr.bf16.mxu0 %v13057_v57  ;;  %v13078_v15 = vld [vmem:[#allocation6 + $0xf0c] ss:$48 sps:$4 sm:$0xff]   ;;  %v13073_v57 = vld [vmem:[#allocation6 + $0xf00] ss:$48 sps:$4 sm:$0xff]  }
 0x44a   :  { %5465 = vmatprep.subr.bf16.mxu1 %v13060_v46  ;;  %v13076_v46 = vld [vmem:[#allocation6 + $0xf08] ss:$48 sps:$4 sm:$0xff]  }
 0x44c   :  { %5425 = vmatpush1.bf16.msra.mxu0 %v13055_v39  ;;  %v13081_v39 = vld [vmem:[#allocation6 + $0xf64] ss:$48 sps:$4 sm:$0xff]  }
 0x44d   :  { %5466 = vmatpush1.bf16.msra.mxu1 %v13058_v32  ;;  %5426 = vmatprep.subr.bf16.mxu0 %v13063_v53  ;;  %v13084_v32 = vld [vmem:[#allocation6 + $0xf6c] ss:$48 sps:$4 sm:$0xff]   ;;  %v13079_v53 = vld [vmem:[#allocation6 + $0xf60] ss:$48 sps:$4 sm:$0xff]  }
 0x44e   :  { %5467 = vmatprep.subr.bf16.mxu1 %v13066_v49  ;;  %v13082_v49 = vld [vmem:[#allocation6 + $0xf68] ss:$48 sps:$4 sm:$0xff]  }
 0x450   :  { %5427 = vmatpush1.bf16.msra.mxu0 %v13061_v30  ;;  %v13087_v30 = vld [vmem:[#allocation6 + $0xfc4] ss:$48 sps:$4 sm:$0xff]  }
 0x451   :  { %5468 = vmatpush1.bf16.msra.mxu1 %v13064_v40  ;;  %5428 = vmatprep.subr.bf16.mxu0 %v13069_v56  ;;  %v13090_v40 = vld [vmem:[#allocation6 + $0xfcc] ss:$48 sps:$4 sm:$0xff]   ;;  %v13085_v56 = vld [vmem:[#allocation6 + $0xfc0] ss:$48 sps:$4 sm:$0xff]  }
 0x452   :  { %5469 = vmatprep.subr.bf16.mxu1 %v13072_v47  ;;  %v13088_v47 = vld [vmem:[#allocation6 + $0xfc8] ss:$48 sps:$4 sm:$0xff]  }
 0x454   :  { %5429 = vmatpush1.bf16.msra.mxu0 %v13067_v13  ;;  %v13093_v13 = vld [vmem:[#allocation6 + $0x1024] ss:$48 sps:$4 sm:$0xff]  }
 0x455   :  { %5470 = vmatpush1.bf16.msra.mxu1 %v13070_v31  ;;  %5430 = vmatprep.subr.bf16.mxu0 %v13075_v4  ;;  %v13096_v31 = vld [vmem:[#allocation6 + $0x102c] ss:$48 sps:$4 sm:$0xff]   ;;  %v13091_v4 = vld [vmem:[#allocation6 + $0x1020] ss:$48 sps:$4 sm:$0xff]  }
 0x456   :  { %5471 = vmatprep.subr.bf16.mxu1 %v13078_v15  ;;  %v13094_v15 = vld [vmem:[#allocation6 + $0x1028] ss:$48 sps:$4 sm:$0xff]  }
 0x458   :  { %5431 = vmatpush1.bf16.msra.mxu0 %v13073_v57  ;;  %v13099_v57 = vld [vmem:[#allocation6 + $0x1084] ss:$48 sps:$4 sm:$0xff]  }
 0x459   :  { %5472 = vmatpush1.bf16.msra.mxu1 %v13076_v46  ;;  %5432 = vmatprep.subr.bf16.mxu0 %v13081_v39  ;;  %v13102_v46 = vld [vmem:[#allocation6 + $0x108c] ss:$48 sps:$4 sm:$0xff]   ;;  %v13097_v39 = vld [vmem:[#allocation6 + $0x1080] ss:$48 sps:$4 sm:$0xff]  }
 0x45a   :  { %5473 = vmatprep.subr.bf16.mxu1 %v13084_v32  ;;  %v13100_v32 = vld [vmem:[#allocation6 + $0x1088] ss:$48 sps:$4 sm:$0xff]  }
 0x45c   :  { %5433 = vmatpush1.bf16.msra.mxu0 %v13079_v53  ;;  %v13105_v53 = vld [vmem:[#allocation6 + $0x10e4] ss:$48 sps:$4 sm:$0xff]  }
 0x45d   :  { %5474 = vmatpush1.bf16.msra.mxu1 %v13082_v49  ;;  %5434 = vmatprep.subr.bf16.mxu0 %v13087_v30  ;;  %v13108_v49 = vld [vmem:[#allocation6 + $0x10ec] ss:$48 sps:$4 sm:$0xff]   ;;  %v13103_v30 = vld [vmem:[#allocation6 + $0x10e0] ss:$48 sps:$4 sm:$0xff]  }
 0x45e   :  { %5475 = vmatprep.subr.bf16.mxu1 %v13090_v40  ;;  %v13106_v40 = vld [vmem:[#allocation6 + $0x10e8] ss:$48 sps:$4 sm:$0xff]  }
 0x460   :  { %5435 = vmatpush1.bf16.msra.mxu0 %v13085_v56  ;;  %v13111_v56 = vld [vmem:[#allocation6 + $0x1144] ss:$48 sps:$4 sm:$0xff]  }
 0x461   :  { %5476 = vmatpush1.bf16.msra.mxu1 %v13088_v47  ;;  %5436 = vmatprep.subr.bf16.mxu0 %v13093_v13  ;;  %v13114_v47 = vld [vmem:[#allocation6 + $0x114c] ss:$48 sps:$4 sm:$0xff]   ;;  %v13109_v13 = vld [vmem:[#allocation6 + $0x1140] ss:$48 sps:$4 sm:$0xff]  }
 0x462   :  { %5477 = vmatprep.subr.bf16.mxu1 %v13096_v31  ;;  %v13112_v31 = vld [vmem:[#allocation6 + $0x1148] ss:$48 sps:$4 sm:$0xff]  }
 0x464   :  { %5437 = vmatpush1.bf16.msra.mxu0 %v13091_v4  ;;  %v13117_v4 = vld [vmem:[#allocation6 + $0x11a4] ss:$48 sps:$4 sm:$0xff]  }
 0x465   :  { %5478 = vmatpush1.bf16.msra.mxu1 %v13094_v15  ;;  %5438 = vmatprep.subr.bf16.mxu0 %v13099_v57  ;;  %v13120_v15 = vld [vmem:[#allocation6 + $0x11ac] ss:$48 sps:$4 sm:$0xff]   ;;  %v13115_v57 = vld [vmem:[#allocation6 + $0x11a0] ss:$48 sps:$4 sm:$0xff]  }
 0x466   :  { %5479 = vmatprep.subr.bf16.mxu1 %v13102_v46  ;;  %v13118_v46 = vld [vmem:[#allocation6 + $0x11a8] ss:$48 sps:$4 sm:$0xff]  }
 0x468   :  { %5439 = vmatpush1.bf16.msra.mxu0 %v13097_v39  ;;  %v13123_v39 = vld [vmem:[#allocation6 + $0xc14] ss:$48 sps:$4 sm:$0xff]  }
 0x469   :  { %5480 = vmatpush1.bf16.msra.mxu1 %v13100_v32  ;;  %5440 = vmatprep.subr.bf16.mxu0 %v13105_v53  ;;  %v13126_v32 = vld [vmem:[#allocation6 + $0xc1c] ss:$48 sps:$4 sm:$0xff]  }
 0x46a   :  { %5481 = vmatprep.subr.bf16.mxu1 %v13108_v49 }
 0x46c   :  { %5441 = vmatpush1.bf16.msra.mxu0 %v13103_v30 }
 0x46d   :  { %5482 = vmatpush1.bf16.msra.mxu1 %v13106_v40  ;;  %5442 = vmatprep.subr.bf16.mxu0 %v13111_v56 }
 0x46e   :  { %5483 = vmatprep.subr.bf16.mxu1 %v13114_v47 }
 0x470   :  { %5443 = vmatpush1.bf16.msra.mxu0 %v13109_v13 }
 0x471   :  { %5484 = vmatpush1.bf16.msra.mxu1 %v13112_v31  ;;  %5444 = vmatprep.subr.bf16.mxu0 %v13117_v4 }
 0x472   :  { %5485 = vmatprep.subr.bf16.mxu1 %v13120_v15 }
 0x474   :  { %5445 = vmatpush1.bf16.msra.mxu0 %v13115_v57 }
 0x475   :  { %5486 = vmatpush1.bf16.msra.mxu1 %v13118_v46  ;;  %5496 = vmatprep.subr.bf16.mxu0 %v13123_v39 }
 0x476   :  { %5537 = vmatprep.subr.bf16.mxu1 %v13126_v32 }
 0x4ca   :  { %v4120_v53 = vpop.f32.mrb[28].mxu0 }
 0x4cb   :  { %v4161_v49 = vpop.f32.mrb[28].mxu1  ;;  %v4122_v30 = vpop.f32.mrb[29].mxu0 }
 0x4cc   :  { %v4250_v40 = vmax.f32 %v4120_v53, %v4161_v49  ;;  %v4163_v56 = vpop.f32.mrb[29].mxu1  ;;  %v4124_v47 = vpop.f32.mrb[30].mxu0 }
 0x4cd   :  { %v4251_v13 = vmax.f32 %v4122_v30, %v4163_v56  ;;  %v4165_v31 = vpop.f32.mrb[30].mxu1  ;;  %v4125_v17 = vpop.f32.mrb[31].mxu0  ;;  %v13124_v47 = vld [vmem:[#allocation6 + $0xc18] ss:$48 sps:$4 sm:$0xff]  }
 0x4ce   :  { %v4166_v59 = vpop.f32.mrb[31].mxu1 }
 0x4cf   :  { %v13121_v59 = vld [vmem:[#allocation6 + $0xc10] ss:$48 sps:$4 sm:$0xff]  }
 0x50a   :  { %v4202_v0 = vpop.f32.mrb[32].mxu0 }
 0x50b   :  { %v4243_v25 = vpop.f32.mrb[32].mxu1  ;;  %v4204_v4 = vpop.f32.mrb[33].mxu0 }
 0x50c   :  { %v4252_v15 = vmax.f32 %v4202_v0, %v4243_v25  ;;  %v4245_v57 = vpop.f32.mrb[33].mxu1  ;;  %v4206_v46 = vpop.f32.mrb[34].mxu0  ;;  %v13132_v25 = vld [vmem:[#allocation6 + $0xc7c] ss:$48 sps:$4 sm:$0xff]  }
 0x50d   :  { %v4253_v38 = vmax.f32 %v4204_v4, %v4245_v57  ;;  %v4247_v2 = vpop.f32.mrb[34].mxu1  ;;  %v4207_v39 = vpop.f32.mrb[35].mxu0  ;;  %v13138_v0 = vld [vmem:[#allocation6 + $0xcdc] ss:$48 sps:$4 sm:$0xff]   ;;  %v13141_v4 = vld [vmem:[#allocation6 + $0xd34] ss:$48 sps:$4 sm:$0xff]  }
 0x50e   :  { %v4254_v32 = vmax.f32 %v4250_v40, %v4252_v15  ;;  %v4248_v41 = vpop.f32.mrb[35].mxu1  ;;  %v13129_v2 = vld [vmem:[#allocation6 + $0xc74] ss:$48 sps:$4 sm:$0xff]   ;;  %v13133_v40 = vld [vmem:[#allocation6 + $0xcd0] ss:$48 sps:$4 sm:$0xff]  }
 0x50f   :  { %v4255_v16 = vmax.f32 %v4251_v13, %v4253_v38  ;;  %v13130_v41 = vld [vmem:[#allocation6 + $0xc78] ss:$48 sps:$4 sm:$0xff]   ;;  %v13135_v38 = vld [vmem:[#allocation6 + $0xcd4] ss:$48 sps:$4 sm:$0xff]   ;;  %v13144_v15 = vld [vmem:[#allocation6 + $0xd3c] ss:$48 sps:$4 sm:$0xff]  }
 0x510   :  { %v4256_v53 = vadd.f32 %v4254_v32, %v15156_v33  ;;  %v13136_v13 = vld [vmem:[#allocation6 + $0xcd8] ss:$48 sps:$4 sm:$0xff]   ;;  %v13139_v57 = vld [vmem:[#allocation6 + $0xd30] ss:$48 sps:$4 sm:$0xff]   ;;  %v13147_v39 = vld [vmem:[#allocation6 + $0xd94] ss:$48 sps:$4 sm:$0xff]  }
 0x511   :  { %v4257_v49 = vadd.f32 %v4255_v16, %v15160_v48  ;;  %v13127_v16 = vld [vmem:[#allocation6 + $0xc70] ss:$48 sps:$4 sm:$0xff]   ;;  %v13142_v46 = vld [vmem:[#allocation6 + $0xd38] ss:$48 sps:$4 sm:$0xff]   ;;  %v13150_v32 = vld [vmem:[#allocation6 + $0xd9c] ss:$48 sps:$4 sm:$0xff]  }
 0x512   :  { %v4258_v30 = vmax.f32 %v4256_v53, 0.0  ;;  %v13145_v53 = vld [vmem:[#allocation6 + $0xd90] ss:$48 sps:$4 sm:$0xff]  }
 0x513   :  { %v4259_v56 = vmax.f32 %v4257_v49, 0.0  ;;  %v13148_v49 = vld [vmem:[#allocation6 + $0xd98] ss:$48 sps:$4 sm:$0xff]  }
 0x514   :  { %v15353_v31 = vpack.c.bf16 %v4258_v30, %v4258_v30  ;;  %v13153_v30 = vld [vmem:[#allocation6 + $0xdf4] ss:$48 sps:$4 sm:$0xff]  }
 0x515   :  { %v15351_v17 = vpack.c.bf16 %v4259_v56, %v4259_v56  ;;  %v13156_v56 = vld [vmem:[#allocation6 + $0xdfc] ss:$48 sps:$4 sm:$0xff]  }
 0x517   :  { %5446 = vmatprep.mubr.bf16.mxu0 %v15351_v17  ;;  %5487 = vmatprep.mubr.bf16.mxu1 %v15351_v17 }
 0x518   :  { %5447 = vmatmul.mubr.bf16.vlgmr.msra.gmra.mrb[16].mxu0 %v15353_v31  ;;  %5488 = vmatmul.mubr.bf16.vlgmr.msra.gmra.mrb[16].mxu1 %v15353_v31 }
 0x519   :  { %5497 = vmatpush1.bf16.msra.mxu0 %v13121_v59  ;;  %5538 = vmatpush1.bf16.msra.mxu1 %v13124_v47  ;;  %v13151_v59 = vld [vmem:[#allocation6 + $0xdf0] ss:$48 sps:$4 sm:$0xff]   ;;  %v13154_v47 = vld [vmem:[#allocation6 + $0xdf8] ss:$48 sps:$4 sm:$0xff]  }
 0x51a   :  { %5528 = vmatprep.mubr.bf16.mxu0 %v15351_v17  ;;  %5569 = vmatprep.mubr.bf16.mxu1 %v15351_v17 }
 0x51b   :  { %5498 = vmatprep.subr.bf16.mxu0 %v13129_v2  ;;  %5539 = vmatprep.subr.bf16.mxu1 %v13132_v25  ;;  %v13159_v2 = vld [vmem:[#allocation6 + $0xe54] ss:$48 sps:$4 sm:$0xff]   ;;  %v13162_v25 = vld [vmem:[#allocation6 + $0xe5c] ss:$48 sps:$4 sm:$0xff]  }
 0x51d   :  { %5499 = vmatpush1.bf16.msra.mxu0 %v13127_v16  ;;  %5540 = vmatpush1.bf16.msra.mxu1 %v13130_v41  ;;  %v13157_v16 = vld [vmem:[#allocation6 + $0xe50] ss:$48 sps:$4 sm:$0xff]   ;;  %v13160_v41 = vld [vmem:[#allocation6 + $0xe58] ss:$48 sps:$4 sm:$0xff]  }
 0x51e   :  { %5500 = vmatprep.subr.bf16.mxu0 %v13135_v38  ;;  %5541 = vmatprep.subr.bf16.mxu1 %v13138_v0  ;;  %v13165_v38 = vld [vmem:[#allocation6 + $0xeb4] ss:$48 sps:$4 sm:$0xff]   ;;  %v13168_v0 = vld [vmem:[#allocation6 + $0xebc] ss:$48 sps:$4 sm:$0xff]  }
 0x521   :  { %5501 = vmatpush1.bf16.msra.mxu0 %v13133_v40  ;;  %5542 = vmatpush1.bf16.msra.mxu1 %v13136_v13  ;;  %v13163_v40 = vld [vmem:[#allocation6 + $0xeb0] ss:$48 sps:$4 sm:$0xff]   ;;  %v13166_v13 = vld [vmem:[#allocation6 + $0xeb8] ss:$48 sps:$4 sm:$0xff]  }
 0x522   :  { %5502 = vmatprep.subr.bf16.mxu0 %v13141_v4  ;;  %5543 = vmatprep.subr.bf16.mxu1 %v13144_v15  ;;  %v13171_v4 = vld [vmem:[#allocation6 + $0xf14] ss:$48 sps:$4 sm:$0xff]   ;;  %v13174_v15 = vld [vmem:[#allocation6 + $0xf1c] ss:$48 sps:$4 sm:$0xff]  }
 0x525   :  { %5503 = vmatpush1.bf16.msra.mxu0 %v13139_v57  ;;  %5544 = vmatpush1.bf16.msra.mxu1 %v13142_v46  ;;  %v13169_v57 = vld [vmem:[#allocation6 + $0xf10] ss:$48 sps:$4 sm:$0xff]   ;;  %v13172_v46 = vld [vmem:[#allocation6 + $0xf18] ss:$48 sps:$4 sm:$0xff]  }
 0x526   :  { %5504 = vmatprep.subr.bf16.mxu0 %v13147_v39  ;;  %5545 = vmatprep.subr.bf16.mxu1 %v13150_v32  ;;  %v13177_v39 = vld [vmem:[#allocation6 + $0xf74] ss:$48 sps:$4 sm:$0xff]   ;;  %v13180_v32 = vld [vmem:[#allocation6 + $0xf7c] ss:$48 sps:$4 sm:$0xff]  }
 0x529   :  { %5505 = vmatpush1.bf16.msra.mxu0 %v13145_v53  ;;  %5546 = vmatpush1.bf16.msra.mxu1 %v13148_v49  ;;  %v13175_v53 = vld [vmem:[#allocation6 + $0xf70] ss:$48 sps:$4 sm:$0xff]   ;;  %v13178_v49 = vld [vmem:[#allocation6 + $0xf78] ss:$48 sps:$4 sm:$0xff]  }
 0x52a   :  { %5506 = vmatprep.subr.bf16.mxu0 %v13153_v30  ;;  %5547 = vmatprep.subr.bf16.mxu1 %v13156_v56  ;;  %v13183_v30 = vld [vmem:[#allocation6 + $0xfd4] ss:$48 sps:$4 sm:$0xff]   ;;  %v13186_v56 = vld [vmem:[#allocation6 + $0xfdc] ss:$48 sps:$4 sm:$0xff]  }
 0x52d   :  { %5507 = vmatpush1.bf16.msra.mxu0 %v13151_v59  ;;  %5548 = vmatpush1.bf16.msra.mxu1 %v13154_v47  ;;  %v13181_v59 = vld [vmem:[#allocation6 + $0xfd0] ss:$48 sps:$4 sm:$0xff]   ;;  %v13184_v47 = vld [vmem:[#allocation6 + $0xfd8] ss:$48 sps:$4 sm:$0xff]  }
 0x52e   :  { %5508 = vmatprep.subr.bf16.mxu0 %v13159_v2  ;;  %5549 = vmatprep.subr.bf16.mxu1 %v13162_v25  ;;  %v13189_v2 = vld [vmem:[#allocation6 + $0x1034] ss:$48 sps:$4 sm:$0xff]   ;;  %v13192_v25 = vld [vmem:[#allocation6 + $0x103c] ss:$48 sps:$4 sm:$0xff]  }
 0x531   :  { %5509 = vmatpush1.bf16.msra.mxu0 %v13157_v16  ;;  %5550 = vmatpush1.bf16.msra.mxu1 %v13160_v41  ;;  %v13187_v16 = vld [vmem:[#allocation6 + $0x1030] ss:$48 sps:$4 sm:$0xff]   ;;  %v13190_v41 = vld [vmem:[#allocation6 + $0x1038] ss:$48 sps:$4 sm:$0xff]  }
 0x532   :  { %5510 = vmatprep.subr.bf16.mxu0 %v13165_v38  ;;  %5551 = vmatprep.subr.bf16.mxu1 %v13168_v0  ;;  %v13195_v38 = vld [vmem:[#allocation6 + $0x1094] ss:$48 sps:$4 sm:$0xff]   ;;  %v13198_v0 = vld [vmem:[#allocation6 + $0x109c] ss:$48 sps:$4 sm:$0xff]  }
 0x535   :  { %5511 = vmatpush1.bf16.msra.mxu0 %v13163_v40  ;;  %5552 = vmatpush1.bf16.msra.mxu1 %v13166_v13  ;;  %v13193_v40 = vld [vmem:[#allocation6 + $0x1090] ss:$48 sps:$4 sm:$0xff]   ;;  %v13196_v13 = vld [vmem:[#allocation6 + $0x1098] ss:$48 sps:$4 sm:$0xff]  }
 0x536   :  { %5512 = vmatprep.subr.bf16.mxu0 %v13171_v4  ;;  %5553 = vmatprep.subr.bf16.mxu1 %v13174_v15  ;;  %v13201_v4 = vld [vmem:[#allocation6 + $0x10f4] ss:$48 sps:$4 sm:$0xff]   ;;  %v13204_v15 = vld [vmem:[#allocation6 + $0x10fc] ss:$48 sps:$4 sm:$0xff]  }
 0x539   :  { %5513 = vmatpush1.bf16.msra.mxu0 %v13169_v57  ;;  %5554 = vmatpush1.bf16.msra.mxu1 %v13172_v46  ;;  %v13199_v57 = vld [vmem:[#allocation6 + $0x10f0] ss:$48 sps:$4 sm:$0xff]   ;;  %v13202_v46 = vld [vmem:[#allocation6 + $0x10f8] ss:$48 sps:$4 sm:$0xff]  }
 0x53a   :  { %5514 = vmatprep.subr.bf16.mxu0 %v13177_v39  ;;  %5555 = vmatprep.subr.bf16.mxu1 %v13180_v32  ;;  %v13207_v39 = vld [vmem:[#allocation6 + $0x1154] ss:$48 sps:$4 sm:$0xff]   ;;  %v13210_v32 = vld [vmem:[#allocation6 + $0x115c] ss:$48 sps:$4 sm:$0xff]  }
 0x53d   :  { %5515 = vmatpush1.bf16.msra.mxu0 %v13175_v53  ;;  %5556 = vmatpush1.bf16.msra.mxu1 %v13178_v49  ;;  %v13205_v53 = vld [vmem:[#allocation6 + $0x1150] ss:$48 sps:$4 sm:$0xff]   ;;  %v13208_v49 = vld [vmem:[#allocation6 + $0x1158] ss:$48 sps:$4 sm:$0xff]  }
 0x53e   :  { %5516 = vmatprep.subr.bf16.mxu0 %v13183_v30  ;;  %5557 = vmatprep.subr.bf16.mxu1 %v13186_v56  ;;  %v13213_v30 = vld [vmem:[#allocation6 + $0x11b4] ss:$48 sps:$4 sm:$0xff]   ;;  %v13216_v56 = vld [vmem:[#allocation6 + $0x11bc] ss:$48 sps:$4 sm:$0xff]  }
 0x541   :  { %5517 = vmatpush1.bf16.msra.mxu0 %v13181_v59  ;;  %5558 = vmatpush1.bf16.msra.mxu1 %v13184_v47  ;;  %v13211_v59 = vld [vmem:[#allocation6 + $0x11b0] ss:$48 sps:$4 sm:$0xff]   ;;  %v13214_v47 = vld [vmem:[#allocation6 + $0x11b8] ss:$48 sps:$4 sm:$0xff]  }
 0x542   :  { %5518 = vmatprep.subr.bf16.mxu0 %v13189_v2  ;;  %5559 = vmatprep.subr.bf16.mxu1 %v13192_v25  ;;  %v13219_v2 = vld [vmem:[#allocation6 + $0xc24] ss:$48 sps:$4 sm:$0xff]   ;;  %v13222_v25 = vld [vmem:[#allocation6 + $0xc2c] ss:$48 sps:$4 sm:$0xff]  }
 0x545   :  { %5519 = vmatpush1.bf16.msra.mxu0 %v13187_v16  ;;  %5560 = vmatpush1.bf16.msra.mxu1 %v13190_v41  ;;  %v13217_v16 = vld [vmem:[#allocation6 + $0xc20] ss:$48 sps:$4 sm:$0xff]   ;;  %v13220_v41 = vld [vmem:[#allocation6 + $0xc28] ss:$48 sps:$4 sm:$0xff]  }
 0x546   :  { %5520 = vmatprep.subr.bf16.mxu0 %v13195_v38  ;;  %5561 = vmatprep.subr.bf16.mxu1 %v13198_v0  ;;  %v13225_v38 = vld [vmem:[#allocation6 + $0xc84] ss:$48 sps:$4 sm:$0xff]   ;;  %v13228_v0 = vld [vmem:[#allocation6 + $0xc8c] ss:$48 sps:$4 sm:$0xff]  }
 0x549   :  { %5521 = vmatpush1.bf16.msra.mxu0 %v13193_v40  ;;  %5562 = vmatpush1.bf16.msra.mxu1 %v13196_v13  ;;  %v13223_v40 = vld [vmem:[#allocation6 + $0xc80] ss:$48 sps:$4 sm:$0xff]   ;;  %v13226_v13 = vld [vmem:[#allocation6 + $0xc88] ss:$48 sps:$4 sm:$0xff]  }
 0x54a   :  { %5522 = vmatprep.subr.bf16.mxu0 %v13201_v4  ;;  %5563 = vmatprep.subr.bf16.mxu1 %v13204_v15  ;;  %v13231_v4 = vld [vmem:[#allocation6 + $0xce4] ss:$48 sps:$4 sm:$0xff]   ;;  %v13234_v15 = vld [vmem:[#allocation6 + $0xcec] ss:$48 sps:$4 sm:$0xff]  }
 0x54d   :  { %5523 = vmatpush1.bf16.msra.mxu0 %v13199_v57  ;;  %5564 = vmatpush1.bf16.msra.mxu1 %v13202_v46  ;;  %v13229_v57 = vld [vmem:[#allocation6 + $0xce0] ss:$48 sps:$4 sm:$0xff]   ;;  %v13232_v46 = vld [vmem:[#allocation6 + $0xce8] ss:$48 sps:$4 sm:$0xff]  }
 0x54e   :  { %5524 = vmatprep.subr.bf16.mxu0 %v13207_v39  ;;  %5565 = vmatprep.subr.bf16.mxu1 %v13210_v32  ;;  %v13237_v39 = vld [vmem:[#allocation6 + $0xd44] ss:$48 sps:$4 sm:$0xff]   ;;  %v13240_v32 = vld [vmem:[#allocation6 + $0xd4c] ss:$48 sps:$4 sm:$0xff]  }
 0x551   :  { %5525 = vmatpush1.bf16.msra.mxu0 %v13205_v53  ;;  %5566 = vmatpush1.bf16.msra.mxu1 %v13208_v49  ;;  %v13235_v53 = vld [vmem:[#allocation6 + $0xd40] ss:$48 sps:$4 sm:$0xff]   ;;  %v13238_v49 = vld [vmem:[#allocation6 + $0xd48] ss:$48 sps:$4 sm:$0xff]  }
 0x552   :  { %5526 = vmatprep.subr.bf16.mxu0 %v13213_v30  ;;  %5567 = vmatprep.subr.bf16.mxu1 %v13216_v56  ;;  %v13243_v30 = vld [vmem:[#allocation6 + $0xda4] ss:$48 sps:$4 sm:$0xff]   ;;  %v13241_v56 = vld [vmem:[#allocation6 + $0xda0] ss:$48 sps:$4 sm:$0xff]  }
 0x555   :  { %5527 = vmatpush1.bf16.msra.mxu0 %v13211_v59  ;;  %5568 = vmatpush1.bf16.msra.mxu1 %v13214_v47  ;;  %v13244_v59 = vld [vmem:[#allocation6 + $0xda8] ss:$48 sps:$4 sm:$0xff]   ;;  %v13249_v47 = vld [vmem:[#allocation6 + $0xe04] ss:$48 sps:$4 sm:$0xff]  }
 0x556   :  { %5578 = vmatprep.subr.bf16.mxu0 %v13219_v2  ;;  %5619 = vmatprep.subr.bf16.mxu1 %v13222_v25  ;;  %v13252_v2 = vld [vmem:[#allocation6 + $0xe0c] ss:$48 sps:$4 sm:$0xff]   ;;  %v13247_v25 = vld [vmem:[#allocation6 + $0xe00] ss:$48 sps:$4 sm:$0xff]  }
 0x558   :  { %5529 = vmatmul.mubr.bf16.vlgmr.msra.gmra.mrb[20].mxu0 %v15353_v31  ;;  %5570 = vmatmul.mubr.bf16.vlgmr.msra.gmra.mrb[20].mxu1 %v15353_v31 }
 0x559   :  { %5579 = vmatpush1.bf16.msra.mxu0 %v13217_v16  ;;  %5610 = vmatprep.mubr.bf16.mxu0 %v15351_v17  ;;  %v13250_v16 = vld [vmem:[#allocation6 + $0xe08] ss:$48 sps:$4 sm:$0xff]  }
 0x55a   :  { %5620 = vmatpush1.bf16.msra.mxu1 %v13220_v41  ;;  %5651 = vmatprep.mubr.bf16.mxu1 %v15351_v17  ;;  %v13246_v17 = vld [vmem:[#allocation6 + $0xdac] ss:$48 sps:$4 sm:$0xff]   ;;  %v13255_v41 = vld [vmem:[#allocation6 + $0xe64] ss:$48 sps:$4 sm:$0xff]  }
 0x55b   :  { %5580 = vmatprep.subr.bf16.mxu0 %v13225_v38  ;;  %5621 = vmatprep.subr.bf16.mxu1 %v13228_v0  ;;  %v13258_v38 = vld [vmem:[#allocation6 + $0xe6c] ss:$48 sps:$4 sm:$0xff]   ;;  %v13253_v0 = vld [vmem:[#allocation6 + $0xe60] ss:$48 sps:$4 sm:$0xff]  }
 0x55d   :  { %5581 = vmatpush1.bf16.msra.mxu0 %v13223_v40  ;;  %v13256_v40 = vld [vmem:[#allocation6 + $0xe68] ss:$48 sps:$4 sm:$0xff]  }
 0x55e   :  { %5622 = vmatpush1.bf16.msra.mxu1 %v13226_v13  ;;  %5582 = vmatprep.subr.bf16.mxu0 %v13231_v4  ;;  %v13261_v13 = vld [vmem:[#allocation6 + $0xec4] ss:$48 sps:$4 sm:$0xff]   ;;  %v13264_v4 = vld [vmem:[#allocation6 + $0xecc] ss:$48 sps:$4 sm:$0xff]  }
 0x55f   :  { %5623 = vmatprep.subr.bf16.mxu1 %v13234_v15  ;;  %v13259_v15 = vld [vmem:[#allocation6 + $0xec0] ss:$48 sps:$4 sm:$0xff]  }
 0x561   :  { %5583 = vmatpush1.bf16.msra.mxu0 %v13229_v57  ;;  %v13262_v57 = vld [vmem:[#allocation6 + $0xec8] ss:$48 sps:$4 sm:$0xff]  }
 0x562   :  { %5624 = vmatpush1.bf16.msra.mxu1 %v13232_v46  ;;  %5584 = vmatprep.subr.bf16.mxu0 %v13237_v39  ;;  %v13267_v46 = vld [vmem:[#allocation6 + $0xf24] ss:$48 sps:$4 sm:$0xff]   ;;  %v13270_v39 = vld [vmem:[#allocation6 + $0xf2c] ss:$48 sps:$4 sm:$0xff]  }
 0x563   :  { %5625 = vmatprep.subr.bf16.mxu1 %v13240_v32  ;;  %v13265_v32 = vld [vmem:[#allocation6 + $0xf20] ss:$48 sps:$4 sm:$0xff]  }
 0x565   :  { %5585 = vmatpush1.bf16.msra.mxu0 %v13235_v53  ;;  %v13268_v53 = vld [vmem:[#allocation6 + $0xf28] ss:$48 sps:$4 sm:$0xff]  }
 0x566   :  { %5626 = vmatpush1.bf16.msra.mxu1 %v13238_v49  ;;  %5586 = vmatprep.subr.bf16.mxu0 %v13243_v30  ;;  %v13273_v49 = vld [vmem:[#allocation6 + $0xf84] ss:$48 sps:$4 sm:$0xff]   ;;  %v13276_v30 = vld [vmem:[#allocation6 + $0xf8c] ss:$48 sps:$4 sm:$0xff]  }
 0x567   :  { %5627 = vmatprep.subr.bf16.mxu1 %v13246_v17  ;;  %v13271_v17 = vld [vmem:[#allocation6 + $0xf80] ss:$48 sps:$4 sm:$0xff]  }
 0x569   :  { %5587 = vmatpush1.bf16.msra.mxu0 %v13241_v56  ;;  %v13274_v56 = vld [vmem:[#allocation6 + $0xf88] ss:$48 sps:$4 sm:$0xff]  }
 0x56a   :  { %5628 = vmatpush1.bf16.msra.mxu1 %v13244_v59  ;;  %5588 = vmatprep.subr.bf16.mxu0 %v13249_v47  ;;  %v13279_v59 = vld [vmem:[#allocation6 + $0xfe4] ss:$48 sps:$4 sm:$0xff]   ;;  %v13282_v47 = vld [vmem:[#allocation6 + $0xfec] ss:$48 sps:$4 sm:$0xff]  }
 0x56b   :  { %5629 = vmatprep.subr.bf16.mxu1 %v13252_v2  ;;  %v13277_v2 = vld [vmem:[#allocation6 + $0xfe0] ss:$48 sps:$4 sm:$0xff]  }
 0x56d   :  { %5589 = vmatpush1.bf16.msra.mxu0 %v13247_v25  ;;  %v13280_v25 = vld [vmem:[#allocation6 + $0xfe8] ss:$48 sps:$4 sm:$0xff]  }
 0x56e   :  { %5630 = vmatpush1.bf16.msra.mxu1 %v13250_v16  ;;  %5590 = vmatprep.subr.bf16.mxu0 %v13255_v41  ;;  %v13285_v16 = vld [vmem:[#allocation6 + $0x1044] ss:$48 sps:$4 sm:$0xff]   ;;  %v13288_v41 = vld [vmem:[#allocation6 + $0x104c] ss:$48 sps:$4 sm:$0xff]  }
 0x56f   :  { %5631 = vmatprep.subr.bf16.mxu1 %v13258_v38  ;;  %v13283_v38 = vld [vmem:[#allocation6 + $0x1040] ss:$48 sps:$4 sm:$0xff]  }
 0x571   :  { %5591 = vmatpush1.bf16.msra.mxu0 %v13253_v0  ;;  %v13286_v0 = vld [vmem:[#allocation6 + $0x1048] ss:$48 sps:$4 sm:$0xff]  }
 0x572   :  { %5632 = vmatpush1.bf16.msra.mxu1 %v13256_v40  ;;  %5592 = vmatprep.subr.bf16.mxu0 %v13261_v13  ;;  %v13291_v40 = vld [vmem:[#allocation6 + $0x10a4] ss:$48 sps:$4 sm:$0xff]   ;;  %v13294_v13 = vld [vmem:[#allocation6 + $0x10ac] ss:$48 sps:$4 sm:$0xff]  }
 0x573   :  { %5633 = vmatprep.subr.bf16.mxu1 %v13264_v4  ;;  %v13289_v4 = vld [vmem:[#allocation6 + $0x10a0] ss:$48 sps:$4 sm:$0xff]  }
 0x575   :  { %5593 = vmatpush1.bf16.msra.mxu0 %v13259_v15  ;;  %v13292_v15 = vld [vmem:[#allocation6 + $0x10a8] ss:$48 sps:$4 sm:$0xff]  }
 0x576   :  { %5634 = vmatpush1.bf16.msra.mxu1 %v13262_v57  ;;  %5594 = vmatprep.subr.bf16.mxu0 %v13267_v46  ;;  %v13297_v57 = vld [vmem:[#allocation6 + $0x1104] ss:$48 sps:$4 sm:$0xff]   ;;  %v13300_v46 = vld [vmem:[#allocation6 + $0x110c] ss:$48 sps:$4 sm:$0xff]  }
 0x577   :  { %5635 = vmatprep.subr.bf16.mxu1 %v13270_v39  ;;  %v13295_v39 = vld [vmem:[#allocation6 + $0x1100] ss:$48 sps:$4 sm:$0xff]  }
 0x579   :  { %5595 = vmatpush1.bf16.msra.mxu0 %v13265_v32  ;;  %v13298_v32 = vld [vmem:[#allocation6 + $0x1108] ss:$48 sps:$4 sm:$0xff]  }
 0x57a   :  { %5636 = vmatpush1.bf16.msra.mxu1 %v13268_v53  ;;  %5596 = vmatprep.subr.bf16.mxu0 %v13273_v49  ;;  %v13303_v53 = vld [vmem:[#allocation6 + $0x1164] ss:$48 sps:$4 sm:$0xff]   ;;  %v13306_v49 = vld [vmem:[#allocation6 + $0x116c] ss:$48 sps:$4 sm:$0xff]  }
 0x57b   :  { %5637 = vmatprep.subr.bf16.mxu1 %v13276_v30  ;;  %v13301_v30 = vld [vmem:[#allocation6 + $0x1160] ss:$48 sps:$4 sm:$0xff]  }
 0x57d   :  { %5597 = vmatpush1.bf16.msra.mxu0 %v13271_v17  ;;  %v13304_v17 = vld [vmem:[#allocation6 + $0x1168] ss:$48 sps:$4 sm:$0xff]  }
 0x57e   :  { %5638 = vmatpush1.bf16.msra.mxu1 %v13274_v56  ;;  %5598 = vmatprep.subr.bf16.mxu0 %v13279_v59  ;;  %v13309_v56 = vld [vmem:[#allocation6 + $0x11c4] ss:$48 sps:$4 sm:$0xff]   ;;  %v13312_v59 = vld [vmem:[#allocation6 + $0x11cc] ss:$48 sps:$4 sm:$0xff]  }
 0x57f   :  { %5639 = vmatprep.subr.bf16.mxu1 %v13282_v47  ;;  %v13307_v47 = vld [vmem:[#allocation6 + $0x11c0] ss:$48 sps:$4 sm:$0xff]  }
 0x581   :  { %5599 = vmatpush1.bf16.msra.mxu0 %v13277_v2  ;;  %v13310_v2 = vld [vmem:[#allocation6 + $0x11c8] ss:$48 sps:$4 sm:$0xff]  }
 0x582   :  { %5640 = vmatpush1.bf16.msra.mxu1 %v13280_v25  ;;  %5600 = vmatprep.subr.bf16.mxu0 %v13285_v16  ;;  %v15368_v25 = vld [vmem:[%s15896_s0 + $0x18] sm:$0xff] }
 0x583   :  { %5641 = vmatprep.subr.bf16.mxu1 %v13288_v41  ;;  %v15374_v16 = vcombine.high %v15368_v25, %v15368_v25  ;;  %v16350_v41 = vld [vmem:[#allocation24_spill] sm:$0xff] }
 0x585   :  { %5601 = vmatpush1.bf16.msra.mxu0 %v13283_v38  ;;  %v16351_v38 = vld [vmem:[#allocation25_spill] sm:$0xff] }
 0x586   :  { %5642 = vmatpush1.bf16.msra.mxu1 %v13286_v0  ;;  %5602 = vmatprep.subr.bf16.mxu0 %v13291_v40  ;;  %v16352_v0 = vld [vmem:[#allocation26_spill] sm:$0xff]  ;;  %v16353_v40 = vld [vmem:[#allocation27_spill] sm:$0xff] }
 0x587   :  { %5643 = vmatprep.subr.bf16.mxu1 %v13294_v13  ;;  %v16354_v13 = vld [vmem:[#allocation28_spill] sm:$0xff] }
 0x589   :  { %5603 = vmatpush1.bf16.msra.mxu0 %v13289_v4  ;;  %v16355_v4 = vld [vmem:[#allocation29_spill] sm:$0xff] }
 0x58a   :  { %5644 = vmatpush1.bf16.msra.mxu1 %v13292_v15  ;;  %5604 = vmatprep.subr.bf16.mxu0 %v13297_v57  ;;  %v16356_v15 = vld [vmem:[#allocation30_spill] sm:$0xff]  ;;  %v16357_v57 = vld [vmem:[#allocation31_spill] sm:$0xff] }
 0x58b   :  { %5645 = vmatprep.subr.bf16.mxu1 %v13300_v46  ;;  %v16358_v46 = vld [vmem:[#allocation32_spill] sm:$0xff] }
 0x58d   :  { %5605 = vmatpush1.bf16.msra.mxu0 %v13295_v39  ;;  %v16359_v39 = vld [vmem:[#allocation33_spill] sm:$0xff] }
 0x58e   :  { %5646 = vmatpush1.bf16.msra.mxu1 %v13298_v32  ;;  %5606 = vmatprep.subr.bf16.mxu0 %v13303_v53  ;;  %v16360_v32 = vld [vmem:[#allocation34_spill] sm:$0xff]  ;;  %v16361_v53 = vld [vmem:[#allocation35_spill] sm:$0xff] }
 0x58f   :  { %5647 = vmatprep.subr.bf16.mxu1 %v13306_v49  ;;  %v16362_v49 = vld [vmem:[#allocation36_spill] sm:$0xff] }
 0x591   :  { %5607 = vmatpush1.bf16.msra.mxu0 %v13301_v30  ;;  %v16363_v30 = vld [vmem:[#allocation37_spill] sm:$0xff] }
 0x592   :  { %5648 = vmatpush1.bf16.msra.mxu1 %v13304_v17  ;;  %5608 = vmatprep.subr.bf16.mxu0 %v13309_v56  ;;  %v16364_v17 = vld [vmem:[#allocation38_spill] sm:$0xff]  ;;  %v16365_v56 = vld [vmem:[#allocation39_spill] sm:$0xff] }
 0x593   :  { %5649 = vmatprep.subr.bf16.mxu1 %v13312_v59  ;;  %v16366_v59 = vld [vmem:[#allocation40_spill] sm:$0xff] }
 0x595   :  { %5609 = vmatpush1.bf16.msra.mxu0 %v13307_v47  ;;  %v16367_v47 = vld [vmem:[#allocation41_spill] sm:$0xff] }
 0x596   :  { %5650 = vmatpush1.bf16.msra.mxu1 %v13310_v2  ;;  %5680 = vmatprep.subr.bf16.mxu0 %v14574_v3  ;;  %v16368_v2 = vld [vmem:[#allocation42_spill] sm:$0xff] }
 0x597   :  { %5721 = vmatprep.subr.bf16.mxu1 %v14578_v8 }
 0x598   :  { %5611 = vmatmul.mubr.bf16.vlgmr.msra.gmra.mrb[24].mxu0 %v15353_v31 }
 0x599   :  { %5652 = vmatmul.mubr.bf16.vlgmr.msra.gmra.mrb[24].mxu1 %v15353_v31  ;;  %5681 = vmatpush1.bf16.msra.mxu0 %v14576_v5  ;;  %v16349_v31 = vld [vmem:[#allocation23_spill] sm:$0xff] }
 0x59a   :  { %5722 = vmatpush1.bf16.msra.mxu1 %v14580_v9  ;;  %5682 = vmatprep.subr.bf16.mxu0 %v14582_v10 }
 0x59b   :  { %5723 = vmatprep.subr.bf16.mxu1 %v14585_v14  ;;  %5712 = vmatprep.mubr.bf16.mxu0 %v15374_v16 }
 0x59c   :  { %5753 = vmatprep.mubr.bf16.mxu1 %v15374_v16 }
 0x59d   :  { %5683 = vmatpush1.bf16.msra.mxu0 %v14589_v18 }
 0x59e   :  { %5724 = vmatpush1.bf16.msra.mxu1 %v14593_v19  ;;  %5684 = vmatprep.subr.bf16.mxu0 %v14595_v20 }
 0x59f   :  { %5725 = vmatprep.subr.bf16.mxu1 %v14598_v21 }
 0x5a1   :  { %5685 = vmatpush1.bf16.msra.mxu0 %v14601_v26 }
 0x5a2   :  { %5726 = vmatpush1.bf16.msra.mxu1 %v14605_v27  ;;  %5686 = vmatprep.subr.bf16.mxu0 %v14607_v28 }
 0x5a3   :  { %5727 = vmatprep.subr.bf16.mxu1 %v14610_v29 }
 0x5a5   :  { %5687 = vmatpush1.bf16.msra.mxu0 %v14613_v34 }
 0x5a6   :  { %5728 = vmatpush1.bf16.msra.mxu1 %v14617_v35  ;;  %5688 = vmatprep.subr.bf16.mxu0 %v14619_v36 }
 0x5a7   :  { %5729 = vmatprep.subr.bf16.mxu1 %v14622_v37 }
 0x5a9   :  { %5689 = vmatpush1.bf16.msra.mxu0 %v14625_v42 }
 0x5aa   :  { %5730 = vmatpush1.bf16.msra.mxu1 %v14629_v43  ;;  %5690 = vmatprep.subr.bf16.mxu0 %v14631_v44 }
 0x5ab   :  { %5731 = vmatprep.subr.bf16.mxu1 %v14634_v45 }
 0x5ad   :  { %5691 = vmatpush1.bf16.msra.mxu0 %v14637_v50 }
 0x5ae   :  { %5732 = vmatpush1.bf16.msra.mxu1 %v14641_v51  ;;  %5692 = vmatprep.subr.bf16.mxu0 %v14643_v52 }
 0x5af   :  { %5733 = vmatprep.subr.bf16.mxu1 %v14651_v54 }
 0x5b1   :  { %5693 = vmatpush1.bf16.msra.mxu0 %v14658_v60 }
 0x5b2   :  { %5734 = vmatpush1.bf16.msra.mxu1 %v14663_v61  ;;  %5694 = vmatprep.subr.bf16.mxu0 %v14665_v62 }
 0x5b3   :  { %5735 = vmatprep.subr.bf16.mxu1 %v14668_v63 }
 0x5b5   :  { %5695 = vmatpush1.bf16.msra.mxu0 %v14672_v6 }
 0x5b6   :  { %5736 = vmatpush1.bf16.msra.mxu1 %v14676_v7  ;;  %5696 = vmatprep.subr.bf16.mxu0 %v14678_v11 }
 0x5b7   :  { %5737 = vmatprep.subr.bf16.mxu1 %v14681_v12 }
 0x5b9   :  { %5697 = vmatpush1.bf16.msra.mxu0 %v14684_v22 }
 0x5ba   :  { %5738 = vmatpush1.bf16.msra.mxu1 %v14688_v23  ;;  %5698 = vmatprep.subr.bf16.mxu0 %v14690_v24 }
 0x5bb   :  { %5739 = vmatprep.subr.bf16.mxu1 %v16261_v1 }
 0x5bd   :  { %5699 = vmatpush1.bf16.msra.mxu0 %v16262_v55 }
 0x5be   :  { %5740 = vmatpush1.bf16.msra.mxu1 %v16263_v58  ;;  %5700 = vmatprep.subr.bf16.mxu0 %v16349_v31 }
 0x5bf   :  { %5741 = vmatprep.subr.bf16.mxu1 %v16350_v41 }
 0x5c1   :  { %5701 = vmatpush1.bf16.msra.mxu0 %v16351_v38 }
 0x5c2   :  { %5742 = vmatpush1.bf16.msra.mxu1 %v16352_v0  ;;  %5702 = vmatprep.subr.bf16.mxu0 %v16353_v40 }
 0x5c3   :  { %5743 = vmatprep.subr.bf16.mxu1 %v16354_v13 }
 0x5c5   :  { %5703 = vmatpush1.bf16.msra.mxu0 %v16355_v4 }
 0x5c6   :  { %5744 = vmatpush1.bf16.msra.mxu1 %v16356_v15  ;;  %5704 = vmatprep.subr.bf16.mxu0 %v16357_v57  ;;  %v13338_v57 = vld [vmem:[#allocation6 + $0x132c] ss:$48 sps:$4 sm:$0xff]  }
 0x5c7   :  { %5745 = vmatprep.subr.bf16.mxu1 %v16358_v46  ;;  %v16369_v46 = vld [vmem:[#allocation43_spill] sm:$0xff] }
 0x5c9   :  { %5705 = vmatpush1.bf16.msra.mxu0 %v16359_v39  ;;  %v16370_v39 = vld [vmem:[#allocation44_spill] sm:$0xff] }
 0x5ca   :  { %5746 = vmatpush1.bf16.msra.mxu1 %v16360_v32  ;;  %5706 = vmatprep.subr.bf16.mxu0 %v16361_v53  ;;  %v15442_v53 = vcombine.low %v15368_v25, %v15368_v25  ;;  %v16378_v25 = vld [vmem:[#allocation52_spill] sm:$0xff]  ;;  %v13335_v32 = vld [vmem:[#allocation6 + $0x1324] ss:$48 sps:$4 sm:$0xff]  }
 0x5cb   :  { %5747 = vmatprep.subr.bf16.mxu1 %v16362_v49  ;;  %v16371_v49 = vld [vmem:[#allocation45_spill] sm:$0xff] }
 0x5cd   :  { %5707 = vmatpush1.bf16.msra.mxu0 %v16363_v30  ;;  %v16372_v30 = vld [vmem:[#allocation46_spill] sm:$0xff] }
 0x5ce   :  { %5748 = vmatpush1.bf16.msra.mxu1 %v16364_v17  ;;  %5708 = vmatprep.subr.bf16.mxu0 %v16365_v56  ;;  %v16373_v17 = vld [vmem:[#allocation47_spill] sm:$0xff]  ;;  %v16374_v56 = vld [vmem:[#allocation48_spill] sm:$0xff] }
 0x5cf   :  { %5749 = vmatprep.subr.bf16.mxu1 %v16366_v59  ;;  %v16388_v59 = vld [vmem:[#allocation62_spill] sm:$0xff] }
 0x5d1   :  { %5709 = vmatpush1.bf16.msra.mxu0 %v16367_v47  ;;  %v16383_v47 = vld [vmem:[#allocation57_spill] sm:$0xff] }
 0x5d2   :  { %5750 = vmatpush1.bf16.msra.mxu1 %v16368_v2  ;;  %5710 = vmatprep.subr.bf16.mxu0 %v16369_v46  ;;  %v16375_v2 = vld [vmem:[#allocation49_spill] sm:$0xff]  ;;  %v16376_v46 = vld [vmem:[#allocation50_spill] sm:$0xff] }
 0x5d3   :  { %5751 = vmatprep.subr.bf16.mxu1 %v16370_v39  ;;  %v16377_v39 = vld [vmem:[#allocation51_spill] sm:$0xff] }
 0x5d5   :  { %5711 = vmatpush1.bf16.msra.mxu0 %v16371_v49  ;;  %v16382_v49 = vld [vmem:[#allocation56_spill] sm:$0xff] }
 0x5d6   :  { %5752 = vmatpush1.bf16.msra.mxu1 %v16372_v30  ;;  %5762 = vmatprep.subr.bf16.mxu0 %v16373_v17  ;;  %v16379_v30 = vld [vmem:[#allocation53_spill] sm:$0xff]  ;;  %v16380_v17 = vld [vmem:[#allocation54_spill] sm:$0xff] }
 0x5d7   :  { %5803 = vmatprep.subr.bf16.mxu1 %v16374_v56  ;;  %v16381_v56 = vld [vmem:[#allocation55_spill] sm:$0xff] }
 0x5d8   :  { %5713 = vmatmul.mubr.bf16.vlgmr.msra.gmra.mrb[36].mxu0 %v15442_v53 }
 0x5d9   :  { %5754 = vmatmul.mubr.bf16.vlgmr.msra.gmra.mrb[36].mxu1 %v15442_v53  ;;  %5763 = vmatpush1.bf16.msra.mxu0 %v16375_v2  ;;  %v16384_v2 = vld [vmem:[#allocation58_spill] sm:$0xff] }
 0x5da   :  { %5804 = vmatpush1.bf16.msra.mxu1 %v16376_v46  ;;  %5764 = vmatprep.subr.bf16.mxu0 %v16377_v39  ;;  %v16385_v46 = vld [vmem:[#allocation59_spill] sm:$0xff]  ;;  %v16386_v39 = vld [vmem:[#allocation60_spill] sm:$0xff] }
 0x5db   :  { %5805 = vmatprep.subr.bf16.mxu1 %v16378_v25  ;;  %5794 = vmatprep.mubr.bf16.mxu0 %v15374_v16  ;;  %v16387_v25 = vld [vmem:[#allocation61_spill] sm:$0xff] }
 0x5dc   :  { %5835 = vmatprep.mubr.bf16.mxu1 %v15374_v16  ;;  %v16389_v16 = vld [vmem:[#allocation63_spill] sm:$0xff] }
 0x5dd   :  { %5765 = vmatpush1.bf16.msra.mxu0 %v16379_v30  ;;  %v16390_v30 = vld [vmem:[#allocation64_spill] sm:$0xff] }
 0x5de   :  { %5806 = vmatpush1.bf16.msra.mxu1 %v16380_v17  ;;  %5766 = vmatprep.subr.bf16.mxu0 %v16381_v56  ;;  %v16391_v17 = vld [vmem:[#allocation65_spill] sm:$0xff]  ;;  %v16392_v56 = vld [vmem:[#allocation66_spill] sm:$0xff] }
 0x5df   :  { %5807 = vmatprep.subr.bf16.mxu1 %v16382_v49  ;;  %v16393_v49 = vld [vmem:[#allocation67_spill] sm:$0xff] }
 0x5e1   :  { %5767 = vmatpush1.bf16.msra.mxu0 %v16383_v47  ;;  %v16394_v47 = vld [vmem:[#allocation68_spill] sm:$0xff] }
 0x5e2   :  { %5808 = vmatpush1.bf16.msra.mxu1 %v16384_v2  ;;  %5768 = vmatprep.subr.bf16.mxu0 %v16385_v46  ;;  %v16395_v2 = vld [vmem:[#allocation69_spill] sm:$0xff]  ;;  %v16396_v46 = vld [vmem:[#allocation70_spill] sm:$0xff] }
 0x5e3   :  { %5809 = vmatprep.subr.bf16.mxu1 %v16386_v39  ;;  %v16397_v39 = vld [vmem:[#allocation71_spill] sm:$0xff] }
 0x5e5   :  { %5769 = vmatpush1.bf16.msra.mxu0 %v16387_v25  ;;  %v16398_v25 = vld [vmem:[#allocation72_spill] sm:$0xff] }
 0x5e6   :  { %5810 = vmatpush1.bf16.msra.mxu1 %v16388_v59  ;;  %5770 = vmatprep.subr.bf16.mxu0 %v16389_v16  ;;  %v16399_v59 = vld [vmem:[#allocation73_spill] sm:$0xff]  ;;  %v16400_v16 = vld [vmem:[#allocation74_spill] sm:$0xff] }
 0x5e7   :  { %5811 = vmatprep.subr.bf16.mxu1 %v16390_v30  ;;  %v16401_v30 = vld [vmem:[#allocation75_spill] sm:$0xff] }
 0x5e9   :  { %5771 = vmatpush1.bf16.msra.mxu0 %v16391_v17  ;;  %v16402_v17 = vld [vmem:[#allocation76_spill] sm:$0xff] }
 0x5ea   :  { %5812 = vmatpush1.bf16.msra.mxu1 %v16392_v56  ;;  %5772 = vmatprep.subr.bf16.mxu0 %v16393_v49  ;;  %v16403_v56 = vld [vmem:[#allocation77_spill] sm:$0xff]  ;;  %v16404_v49 = vld [vmem:[#allocation78_spill] sm:$0xff] }
 0x5eb   :  { %5813 = vmatprep.subr.bf16.mxu1 %v16394_v47  ;;  %v16405_v47 = vld [vmem:[#allocation79_spill] sm:$0xff] }
 0x5ed   :  { %5773 = vmatpush1.bf16.msra.mxu0 %v16395_v2  ;;  %v16406_v2 = vld [vmem:[#allocation80_spill] sm:$0xff] }
 0x5ee   :  { %5814 = vmatpush1.bf16.msra.mxu1 %v16396_v46  ;;  %5774 = vmatprep.subr.bf16.mxu0 %v16397_v39  ;;  %v16407_v46 = vld [vmem:[#allocation81_spill] sm:$0xff]  ;;  %v16408_v39 = vld [vmem:[#allocation82_spill] sm:$0xff] }
 0x5ef   :  { %5815 = vmatprep.subr.bf16.mxu1 %v16398_v25  ;;  %v16409_v25 = vld [vmem:[#allocation83_spill] sm:$0xff] }
 0x5f1   :  { %5775 = vmatpush1.bf16.msra.mxu0 %v16399_v59  ;;  %v16410_v59 = vld [vmem:[#allocation84_spill] sm:$0xff] }
 0x5f2   :  { %5816 = vmatpush1.bf16.msra.mxu1 %v16400_v16  ;;  %5776 = vmatprep.subr.bf16.mxu0 %v16401_v30  ;;  %v16411_v16 = vld [vmem:[#allocation85_spill] sm:$0xff]  ;;  %v16412_v30 = vld [vmem:[#allocation86_spill] sm:$0xff] }
 0x5f3   :  { %5817 = vmatprep.subr.bf16.mxu1 %v16402_v17  ;;  %v16413_v17 = vld [vmem:[#allocation87_spill] sm:$0xff] }
 0x5f5   :  { %5777 = vmatpush1.bf16.msra.mxu0 %v16403_v56  ;;  %v16414_v56 = vld [vmem:[#allocation88_spill] sm:$0xff] }
 0x5f6   :  { %5818 = vmatpush1.bf16.msra.mxu1 %v16404_v49  ;;  %5778 = vmatprep.subr.bf16.mxu0 %v16405_v47  ;;  %v16415_v49 = vld [vmem:[#allocation89_spill] sm:$0xff]  ;;  %v16416_v47 = vld [vmem:[#allocation90_spill] sm:$0xff] }
 0x5f7   :  { %5819 = vmatprep.subr.bf16.mxu1 %v16406_v2  ;;  %v16417_v2 = vld [vmem:[#allocation91_spill] sm:$0xff] }
 0x5f9   :  { %5779 = vmatpush1.bf16.msra.mxu0 %v16407_v46  ;;  %v16418_v46 = vld [vmem:[#allocation92_spill] sm:$0xff] }
 0x5fa   :  { %5820 = vmatpush1.bf16.msra.mxu1 %v16408_v39  ;;  %5780 = vmatprep.subr.bf16.mxu0 %v16409_v25  ;;  %v16419_v39 = vld [vmem:[#allocation93_spill] sm:$0xff]  ;;  %v16420_v25 = vld [vmem:[#allocation94_spill] sm:$0xff] }
 0x5fb   :  { %5821 = vmatprep.subr.bf16.mxu1 %v16410_v59  ;;  %v16421_v59 = vld [vmem:[#allocation95_spill] sm:$0xff] }
 0x5fd   :  { %5781 = vmatpush1.bf16.msra.mxu0 %v16411_v16  ;;  %v16422_v16 = vld [vmem:[#allocation96_spill] sm:$0xff] }
 0x5fe   :  { %5822 = vmatpush1.bf16.msra.mxu1 %v16412_v30  ;;  %5782 = vmatprep.subr.bf16.mxu0 %v16413_v17  ;;  %v16423_v30 = vld [vmem:[#allocation97_spill] sm:$0xff]  ;;  %v16424_v17 = vld [vmem:[#allocation98_spill] sm:$0xff] }
 0x5ff   :  { %5823 = vmatprep.subr.bf16.mxu1 %v16414_v56  ;;  %v16425_v56 = vld [vmem:[#allocation99_spill] sm:$0xff] }
 0x601   :  { %5783 = vmatpush1.bf16.msra.mxu0 %v16415_v49  ;;  %v16426_v49 = vld [vmem:[#allocation100_spill] sm:$0xff] }
 0x602   :  { %5824 = vmatpush1.bf16.msra.mxu1 %v16416_v47  ;;  %5784 = vmatprep.subr.bf16.mxu0 %v16417_v2  ;;  %v16427_v47 = vld [vmem:[#allocation101_spill] sm:$0xff]  ;;  %v16428_v2 = vld [vmem:[#allocation102_spill] sm:$0xff] }
 0x603   :  { %5825 = vmatprep.subr.bf16.mxu1 %v16418_v46  ;;  %v16429_v46 = vld [vmem:[#allocation103_spill] sm:$0xff] }
 0x605   :  { %5785 = vmatpush1.bf16.msra.mxu0 %v16419_v39  ;;  %v16430_v39 = vld [vmem:[#allocation104_spill] sm:$0xff] }
 0x606   :  { %5826 = vmatpush1.bf16.msra.mxu1 %v16420_v25  ;;  %5786 = vmatprep.subr.bf16.mxu0 %v16421_v59  ;;  %v16431_v25 = vld [vmem:[#allocation105_spill] sm:$0xff]  ;;  %v16432_v59 = vld [vmem:[#allocation106_spill] sm:$0xff] }
 0x607   :  { %5827 = vmatprep.subr.bf16.mxu1 %v16422_v16  ;;  %v16433_v16 = vld [vmem:[#allocation107_spill] sm:$0xff] }
 0x609   :  { %5787 = vmatpush1.bf16.msra.mxu0 %v16423_v30  ;;  %v16434_v30 = vld [vmem:[#allocation108_spill] sm:$0xff] }
 0x60a   :  { %5828 = vmatpush1.bf16.msra.mxu1 %v16424_v17  ;;  %5788 = vmatprep.subr.bf16.mxu0 %v16425_v56  ;;  %v16435_v17 = vld [vmem:[#allocation109_spill] sm:$0xff]  ;;  %v16436_v56 = vld [vmem:[#allocation110_spill] sm:$0xff] }
 0x60b   :  { %5829 = vmatprep.subr.bf16.mxu1 %v16426_v49  ;;  %v13323_v49 = vld [vmem:[#allocation6 + $0x1264] ss:$48 sps:$4 sm:$0xff]  }
 0x60d   :  { %5789 = vmatpush1.bf16.msra.mxu0 %v16427_v47  ;;  %v13318_v47 = vld [vmem:[#allocation6 + $0x1208] ss:$48 sps:$4 sm:$0xff]  }
 0x60e   :  { %5830 = vmatpush1.bf16.msra.mxu1 %v16428_v2  ;;  %5790 = vmatprep.subr.bf16.mxu0 %v16429_v46  ;;  %v13315_v2 = vld [vmem:[#allocation6 + $0x1200] ss:$48 sps:$4 sm:$0xff]   ;;  %v13317_v46 = vld [vmem:[#allocation6 + $0x1204] ss:$48 sps:$4 sm:$0xff]  }
 0x60f   :  { %5831 = vmatprep.subr.bf16.mxu1 %v16430_v39  ;;  %v13320_v39 = vld [vmem:[#allocation6 + $0x120c] ss:$48 sps:$4 sm:$0xff]  }
 0x611   :  { %5791 = vmatpush1.bf16.msra.mxu0 %v16431_v25  ;;  %v13326_v25 = vld [vmem:[#allocation6 + $0x126c] ss:$48 sps:$4 sm:$0xff]  }
 0x612   :  { %5832 = vmatpush1.bf16.msra.mxu1 %v16432_v59  ;;  %5792 = vmatprep.subr.bf16.mxu0 %v16433_v16  ;;  %v13321_v16 = vld [vmem:[#allocation6 + $0x1260] ss:$48 sps:$4 sm:$0xff]  }
 0x613   :  { %5833 = vmatprep.subr.bf16.mxu1 %v16434_v30  ;;  %v13324_v30 = vld [vmem:[#allocation6 + $0x1268] ss:$48 sps:$4 sm:$0xff]   ;;  %v13327_v59 = vld [vmem:[#allocation6 + $0x12c0] ss:$48 sps:$4 sm:$0xff]  }
 0x615   :  { %5793 = vmatpush1.bf16.msra.mxu0 %v16435_v17  ;;  %v13329_v17 = vld [vmem:[#allocation6 + $0x12c4] ss:$48 sps:$4 sm:$0xff]  }
 0x616   :  { %5834 = vmatpush1.bf16.msra.mxu1 %v16436_v56  ;;  %7008 = vmatprep.subr.bf16.mxu0 %v13317_v46  ;;  %v13332_v56 = vld [vmem:[#allocation6 + $0x12cc] ss:$48 sps:$4 sm:$0xff]   ;;  %v13333_v46 = vld [vmem:[#allocation6 + $0x1320] ss:$48 sps:$4 sm:$0xff]  }
 0x617   :  { %7049 = vmatprep.subr.bf16.mxu1 %v13320_v39  ;;  %v13336_v39 = vld [vmem:[#allocation6 + $0x1328] ss:$48 sps:$4 sm:$0xff]  }
 0x618   :  { %5795 = vmatmul.mubr.bf16.vlgmr.msra.gmra.mrb[40].mxu0 %v15442_v53 }
 0x619   :  { %5836 = vmatmul.mubr.bf16.vlgmr.msra.gmra.mrb[40].mxu1 %v15442_v53  ;;  %7009 = vmatpush1.bf16.msra.mxu0 %v13315_v2  ;;  %v13330_v53 = vld [vmem:[#allocation6 + $0x12c8] ss:$48 sps:$4 sm:$0xff]   ;;  %v13341_v2 = vld [vmem:[#allocation6 + $0x1384] ss:$48 sps:$4 sm:$0xff]  }
 0x61a   :  { %7050 = vmatpush1.bf16.msra.mxu1 %v13318_v47  ;;  %7010 = vmatprep.subr.bf16.mxu0 %v13323_v49  ;;  %v13344_v49 = vld [vmem:[#allocation6 + $0x138c] ss:$48 sps:$4 sm:$0xff]   ;;  %v13339_v47 = vld [vmem:[#allocation6 + $0x1380] ss:$48 sps:$4 sm:$0xff]  }
 0x61b   :  { %7051 = vmatprep.subr.bf16.mxu1 %v13326_v25  ;;  %v13342_v25 = vld [vmem:[#allocation6 + $0x1388] ss:$48 sps:$4 sm:$0xff]  }
 0x61d   :  { %7011 = vmatpush1.bf16.msra.mxu0 %v13321_v16  ;;  %v13347_v16 = vld [vmem:[#allocation6 + $0x13e4] ss:$48 sps:$4 sm:$0xff]  }
 0x61e   :  { %7052 = vmatpush1.bf16.msra.mxu1 %v13324_v30  ;;  %7012 = vmatprep.subr.bf16.mxu0 %v13329_v17  ;;  %v13350_v30 = vld [vmem:[#allocation6 + $0x13ec] ss:$48 sps:$4 sm:$0xff]   ;;  %v13345_v17 = vld [vmem:[#allocation6 + $0x13e0] ss:$48 sps:$4 sm:$0xff]  }
 0x61f   :  { %7053 = vmatprep.subr.bf16.mxu1 %v13332_v56  ;;  %v13348_v56 = vld [vmem:[#allocation6 + $0x13e8] ss:$48 sps:$4 sm:$0xff]  }
 0x621   :  { %7013 = vmatpush1.bf16.msra.mxu0 %v13327_v59  ;;  %v13353_v59 = vld [vmem:[#allocation6 + $0x1444] ss:$48 sps:$4 sm:$0xff]  }
 0x622   :  { %7054 = vmatpush1.bf16.msra.mxu1 %v13330_v53  ;;  %7014 = vmatprep.subr.bf16.mxu0 %v13335_v32  ;;  %v13356_v32 = vld [vmem:[#allocation6 + $0x144c] ss:$48 sps:$4 sm:$0xff]   ;;  %v13351_v53 = vld [vmem:[#allocation6 + $0x1440] ss:$48 sps:$4 sm:$0xff]  }
 0x623   :  { %7055 = vmatprep.subr.bf16.mxu1 %v13338_v57  ;;  %v13354_v57 = vld [vmem:[#allocation6 + $0x1448] ss:$48 sps:$4 sm:$0xff]  }
 0x625   :  { %7015 = vmatpush1.bf16.msra.mxu0 %v13333_v46  ;;  %v13359_v46 = vld [vmem:[#allocation6 + $0x14a4] ss:$48 sps:$4 sm:$0xff]  }
 0x626   :  { %7056 = vmatpush1.bf16.msra.mxu1 %v13336_v39  ;;  %7016 = vmatprep.subr.bf16.mxu0 %v13341_v2  ;;  %v13362_v39 = vld [vmem:[#allocation6 + $0x14ac] ss:$48 sps:$4 sm:$0xff]   ;;  %v13357_v2 = vld [vmem:[#allocation6 + $0x14a0] ss:$48 sps:$4 sm:$0xff]  }
 0x627   :  { %7057 = vmatprep.subr.bf16.mxu1 %v13344_v49  ;;  %v13360_v49 = vld [vmem:[#allocation6 + $0x14a8] ss:$48 sps:$4 sm:$0xff]  }
 0x629   :  { %7017 = vmatpush1.bf16.msra.mxu0 %v13339_v47  ;;  %v13365_v47 = vld [vmem:[#allocation6 + $0x1504] ss:$48 sps:$4 sm:$0xff]  }
 0x62a   :  { %7058 = vmatpush1.bf16.msra.mxu1 %v13342_v25  ;;  %7018 = vmatprep.subr.bf16.mxu0 %v13347_v16  ;;  %v13368_v25 = vld [vmem:[#allocation6 + $0x150c] ss:$48 sps:$4 sm:$0xff]   ;;  %v13363_v16 = vld [vmem:[#allocation6 + $0x1500] ss:$48 sps:$4 sm:$0xff]  }
 0x62b   :  { %7059 = vmatprep.subr.bf16.mxu1 %v13350_v30  ;;  %v13366_v30 = vld [vmem:[#allocation6 + $0x1508] ss:$48 sps:$4 sm:$0xff]  }
 0x62d   :  { %7019 = vmatpush1.bf16.msra.mxu0 %v13345_v17  ;;  %v13371_v17 = vld [vmem:[#allocation6 + $0x1564] ss:$48 sps:$4 sm:$0xff]  }
 0x62e   :  { %7060 = vmatpush1.bf16.msra.mxu1 %v13348_v56  ;;  %7020 = vmatprep.subr.bf16.mxu0 %v13353_v59  ;;  %v13374_v56 = vld [vmem:[#allocation6 + $0x156c] ss:$48 sps:$4 sm:$0xff]   ;;  %v13369_v59 = vld [vmem:[#allocation6 + $0x1560] ss:$48 sps:$4 sm:$0xff]  }
 0x62f   :  { %7061 = vmatprep.subr.bf16.mxu1 %v13356_v32  ;;  %v13372_v32 = vld [vmem:[#allocation6 + $0x1568] ss:$48 sps:$4 sm:$0xff]  }
 0x631   :  { %7021 = vmatpush1.bf16.msra.mxu0 %v13351_v53  ;;  %v13377_v53 = vld [vmem:[#allocation6 + $0x15c4] ss:$48 sps:$4 sm:$0xff]  }
 0x632   :  { %7062 = vmatpush1.bf16.msra.mxu1 %v13354_v57  ;;  %7022 = vmatprep.subr.bf16.mxu0 %v13359_v46  ;;  %v13380_v57 = vld [vmem:[#allocation6 + $0x15cc] ss:$48 sps:$4 sm:$0xff]   ;;  %v13375_v46 = vld [vmem:[#allocation6 + $0x15c0] ss:$48 sps:$4 sm:$0xff]  }
 0x633   :  { %7063 = vmatprep.subr.bf16.mxu1 %v13362_v39  ;;  %v13378_v39 = vld [vmem:[#allocation6 + $0x15c8] ss:$48 sps:$4 sm:$0xff]  }
 0x635   :  { %7023 = vmatpush1.bf16.msra.mxu0 %v13357_v2  ;;  %v13383_v2 = vld [vmem:[#allocation6 + $0x1624] ss:$48 sps:$4 sm:$0xff]  }
 0x636   :  { %7064 = vmatpush1.bf16.msra.mxu1 %v13360_v49  ;;  %7024 = vmatprep.subr.bf16.mxu0 %v13365_v47  ;;  %v13386_v49 = vld [vmem:[#allocation6 + $0x162c] ss:$48 sps:$4 sm:$0xff]   ;;  %v13381_v47 = vld [vmem:[#allocation6 + $0x1620] ss:$48 sps:$4 sm:$0xff]  }
 0x637   :  { %7065 = vmatprep.subr.bf16.mxu1 %v13368_v25  ;;  %v13384_v25 = vld [vmem:[#allocation6 + $0x1628] ss:$48 sps:$4 sm:$0xff]  }
 0x639   :  { %7025 = vmatpush1.bf16.msra.mxu0 %v13363_v16  ;;  %v13389_v16 = vld [vmem:[#allocation6 + $0x1684] ss:$48 sps:$4 sm:$0xff]  }
 0x63a   :  { %7066 = vmatpush1.bf16.msra.mxu1 %v13366_v30  ;;  %7026 = vmatprep.subr.bf16.mxu0 %v13371_v17  ;;  %v13392_v30 = vld [vmem:[#allocation6 + $0x168c] ss:$48 sps:$4 sm:$0xff]   ;;  %v13387_v17 = vld [vmem:[#allocation6 + $0x1680] ss:$48 sps:$4 sm:$0xff]  }
 0x63b   :  { %7067 = vmatprep.subr.bf16.mxu1 %v13374_v56  ;;  %v13390_v56 = vld [vmem:[#allocation6 + $0x1688] ss:$48 sps:$4 sm:$0xff]  }
 0x63d   :  { %7027 = vmatpush1.bf16.msra.mxu0 %v13369_v59  ;;  %v13395_v59 = vld [vmem:[#allocation6 + $0x16e4] ss:$48 sps:$4 sm:$0xff]  }
 0x63e   :  { %7068 = vmatpush1.bf16.msra.mxu1 %v13372_v32  ;;  %7028 = vmatprep.subr.bf16.mxu0 %v13377_v53  ;;  %v13398_v32 = vld [vmem:[#allocation6 + $0x16ec] ss:$48 sps:$4 sm:$0xff]   ;;  %v13393_v53 = vld [vmem:[#allocation6 + $0x16e0] ss:$48 sps:$4 sm:$0xff]  }
 0x63f   :  { %7069 = vmatprep.subr.bf16.mxu1 %v13380_v57  ;;  %v13396_v57 = vld [vmem:[#allocation6 + $0x16e8] ss:$48 sps:$4 sm:$0xff]  }
 0x641   :  { %7029 = vmatpush1.bf16.msra.mxu0 %v13375_v46  ;;  %v13401_v46 = vld [vmem:[#allocation6 + $0x1744] ss:$48 sps:$4 sm:$0xff]  }
 0x642   :  { %7070 = vmatpush1.bf16.msra.mxu1 %v13378_v39  ;;  %7030 = vmatprep.subr.bf16.mxu0 %v13383_v2  ;;  %v13404_v39 = vld [vmem:[#allocation6 + $0x174c] ss:$48 sps:$4 sm:$0xff]   ;;  %v13399_v2 = vld [vmem:[#allocation6 + $0x1740] ss:$48 sps:$4 sm:$0xff]  }
 0x643   :  { %7071 = vmatprep.subr.bf16.mxu1 %v13386_v49  ;;  %v13402_v49 = vld [vmem:[#allocation6 + $0x1748] ss:$48 sps:$4 sm:$0xff]  }
 0x645   :  { %7031 = vmatpush1.bf16.msra.mxu0 %v13381_v47  ;;  %v13407_v47 = vld [vmem:[#allocation6 + $0x17a4] ss:$48 sps:$4 sm:$0xff]  }
 0x646   :  { %7072 = vmatpush1.bf16.msra.mxu1 %v13384_v25  ;;  %7032 = vmatprep.subr.bf16.mxu0 %v13389_v16  ;;  %v13410_v25 = vld [vmem:[#allocation6 + $0x17ac] ss:$48 sps:$4 sm:$0xff]   ;;  %v13405_v16 = vld [vmem:[#allocation6 + $0x17a0] ss:$48 sps:$4 sm:$0xff]  }
 0x647   :  { %7073 = vmatprep.subr.bf16.mxu1 %v13392_v30  ;;  %v13408_v30 = vld [vmem:[#allocation6 + $0x17a8] ss:$48 sps:$4 sm:$0xff]  }
 0x649   :  { %7033 = vmatpush1.bf16.msra.mxu0 %v13387_v17  ;;  %v13413_v17 = vld [vmem:[#allocation6 + $0x1214] ss:$48 sps:$4 sm:$0xff]  }
 0x64a   :  { %7074 = vmatpush1.bf16.msra.mxu1 %v13390_v56  ;;  %7034 = vmatprep.subr.bf16.mxu0 %v13395_v59  ;;  %v13416_v56 = vld [vmem:[#allocation6 + $0x121c] ss:$48 sps:$4 sm:$0xff]  }
 0x64b   :  { %7075 = vmatprep.subr.bf16.mxu1 %v13398_v32 }
 0x64d   :  { %7035 = vmatpush1.bf16.msra.mxu0 %v13393_v53 }
 0x64e   :  { %7076 = vmatpush1.bf16.msra.mxu1 %v13396_v57  ;;  %7036 = vmatprep.subr.bf16.mxu0 %v13401_v46 }
 0x64f   :  { %7077 = vmatprep.subr.bf16.mxu1 %v13404_v39 }
 0x651   :  { %7037 = vmatpush1.bf16.msra.mxu0 %v13399_v2 }
 0x652   :  { %7078 = vmatpush1.bf16.msra.mxu1 %v13402_v49  ;;  %7038 = vmatprep.subr.bf16.mxu0 %v13407_v47 }
 0x653   :  { %7079 = vmatprep.subr.bf16.mxu1 %v13410_v25 }
 0x655   :  { %7039 = vmatpush1.bf16.msra.mxu0 %v13405_v16 }
 0x656   :  { %7080 = vmatpush1.bf16.msra.mxu1 %v13408_v30  ;;  %7090 = vmatprep.subr.bf16.mxu0 %v13413_v17 }
 0x657   :  { %7131 = vmatprep.subr.bf16.mxu1 %v13416_v56 }
 0x6ab   :  { %v5714_v59 = vpop.f32.mrb[36].mxu0 }
 0x6ac   :  { %v5755_v32 = vpop.f32.mrb[36].mxu1  ;;  %v5716_v53 = vpop.f32.mrb[37].mxu0 }
 0x6ad   :  { %v5844_v57 = vmax.f32 %v5714_v59, %v5755_v32  ;;  %v5757_v46 = vpop.f32.mrb[37].mxu1  ;;  %v5718_v39 = vpop.f32.mrb[38].mxu0 }
 0x6ae   :  { %v5845_v2 = vmax.f32 %v5716_v53, %v5757_v46  ;;  %v5759_v49 = vpop.f32.mrb[38].mxu1  ;;  %v5719_v15 = vpop.f32.mrb[39].mxu0  ;;  %v13414_v39 = vld [vmem:[#allocation6 + $0x1218] ss:$48 sps:$4 sm:$0xff]  }
 0x6af   :  { %v5760_v4 = vpop.f32.mrb[39].mxu1 }
 0x6b0   :  { %v13411_v4 = vld [vmem:[#allocation6 + $0x1210] ss:$48 sps:$4 sm:$0xff]  }
 0x6eb   :  { %v5796_v13 = vpop.f32.mrb[40].mxu0 }
 0x6ec   :  { %v5837_v40 = vpop.f32.mrb[40].mxu1  ;;  %v5798_v47 = vpop.f32.mrb[41].mxu0 }
 0x6ed   :  { %v5846_v25 = vmax.f32 %v5796_v13, %v5837_v40  ;;  %v5839_v16 = vpop.f32.mrb[41].mxu1  ;;  %v5800_v30 = vpop.f32.mrb[42].mxu0  ;;  %v13422_v40 = vld [vmem:[#allocation6 + $0x127c] ss:$48 sps:$4 sm:$0xff]  }
 0x6ee   :  { %v5847_v0 = vmax.f32 %v5798_v47, %v5839_v16  ;;  %v5841_v38 = vpop.f32.mrb[42].mxu1  ;;  %v5801_v17 = vpop.f32.mrb[43].mxu0  ;;  %v13428_v13 = vld [vmem:[#allocation6 + $0x12dc] ss:$48 sps:$4 sm:$0xff]   ;;  %v13431_v47 = vld [vmem:[#allocation6 + $0x1334] ss:$48 sps:$4 sm:$0xff]  }
 0x6ef   :  { %v5848_v56 = vmax.f32 %v5844_v57, %v5846_v25  ;;  %v5842_v41 = vpop.f32.mrb[43].mxu1  ;;  %v13419_v38 = vld [vmem:[#allocation6 + $0x1274] ss:$48 sps:$4 sm:$0xff]   ;;  %v13423_v57 = vld [vmem:[#allocation6 + $0x12d0] ss:$48 sps:$4 sm:$0xff]  }
 0x6f0   :  { %v5849_v31 = vmax.f32 %v5845_v2, %v5847_v0  ;;  %v13420_v41 = vld [vmem:[#allocation6 + $0x1278] ss:$48 sps:$4 sm:$0xff]   ;;  %v13425_v0 = vld [vmem:[#allocation6 + $0x12d4] ss:$48 sps:$4 sm:$0xff]   ;;  %v13434_v25 = vld [vmem:[#allocation6 + $0x133c] ss:$48 sps:$4 sm:$0xff]  }
 0x6f1   :  { %v5850_v59 = vadd.f32 %v5848_v56, %v15156_v33  ;;  %v13426_v2 = vld [vmem:[#allocation6 + $0x12d8] ss:$48 sps:$4 sm:$0xff]   ;;  %v13429_v16 = vld [vmem:[#allocation6 + $0x1330] ss:$48 sps:$4 sm:$0xff]   ;;  %v13437_v17 = vld [vmem:[#allocation6 + $0x1394] ss:$48 sps:$4 sm:$0xff]  }
 0x6f2   :  { %v5851_v32 = vadd.f32 %v5849_v31, %v15160_v48  ;;  %v13417_v31 = vld [vmem:[#allocation6 + $0x1270] ss:$48 sps:$4 sm:$0xff]   ;;  %v13432_v30 = vld [vmem:[#allocation6 + $0x1338] ss:$48 sps:$4 sm:$0xff]   ;;  %v13440_v56 = vld [vmem:[#allocation6 + $0x139c] ss:$48 sps:$4 sm:$0xff]  }
 0x6f3   :  { %v5852_v53 = vmax.f32 %v5850_v59, 0.0  ;;  %v13435_v59 = vld [vmem:[#allocation6 + $0x1390] ss:$48 sps:$4 sm:$0xff]  }
 0x6f4   :  { %v5853_v46 = vmax.f32 %v5851_v32, 0.0  ;;  %v13438_v32 = vld [vmem:[#allocation6 + $0x1398] ss:$48 sps:$4 sm:$0xff]  }
 0x6f5   :  { %v15520_v49 = vpack.c.bf16 %v5852_v53, %v5852_v53  ;;  %v13443_v53 = vld [vmem:[#allocation6 + $0x13f4] ss:$48 sps:$4 sm:$0xff]  }
 0x6f6   :  { %v15518_v15 = vpack.c.bf16 %v5853_v46, %v5853_v46  ;;  %v13446_v46 = vld [vmem:[#allocation6 + $0x13fc] ss:$48 sps:$4 sm:$0xff]  }
 0x6f8   :  { %7040 = vmatprep.mubr.bf16.mxu0 %v15518_v15  ;;  %7081 = vmatprep.mubr.bf16.mxu1 %v15518_v15 }
 0x6f9   :  { %7041 = vmatmul.mubr.bf16.vlgmr.msra.gmra.mrb[16].mxu0 %v15520_v49  ;;  %7082 = vmatmul.mubr.bf16.vlgmr.msra.gmra.mrb[16].mxu1 %v15520_v49 }
 0x6fa   :  { %7091 = vmatpush1.bf16.msra.mxu0 %v13411_v4  ;;  %7132 = vmatpush1.bf16.msra.mxu1 %v13414_v39  ;;  %v13441_v4 = vld [vmem:[#allocation6 + $0x13f0] ss:$48 sps:$4 sm:$0xff]   ;;  %v13444_v39 = vld [vmem:[#allocation6 + $0x13f8] ss:$48 sps:$4 sm:$0xff]  }
 0x6fb   :  { %7122 = vmatprep.mubr.bf16.mxu0 %v15518_v15  ;;  %7163 = vmatprep.mubr.bf16.mxu1 %v15518_v15 }
 0x6fc   :  { %7092 = vmatprep.subr.bf16.mxu0 %v13419_v38  ;;  %7133 = vmatprep.subr.bf16.mxu1 %v13422_v40  ;;  %v13449_v38 = vld [vmem:[#allocation6 + $0x1454] ss:$48 sps:$4 sm:$0xff]   ;;  %v13452_v40 = vld [vmem:[#allocation6 + $0x145c] ss:$48 sps:$4 sm:$0xff]  }
 0x6fe   :  { %7093 = vmatpush1.bf16.msra.mxu0 %v13417_v31  ;;  %7134 = vmatpush1.bf16.msra.mxu1 %v13420_v41  ;;  %v13447_v31 = vld [vmem:[#allocation6 + $0x1450] ss:$48 sps:$4 sm:$0xff]   ;;  %v13450_v41 = vld [vmem:[#allocation6 + $0x1458] ss:$48 sps:$4 sm:$0xff]  }
 0x6ff   :  { %7094 = vmatprep.subr.bf16.mxu0 %v13425_v0  ;;  %7135 = vmatprep.subr.bf16.mxu1 %v13428_v13  ;;  %v13455_v0 = vld [vmem:[#allocation6 + $0x14b4] ss:$48 sps:$4 sm:$0xff]   ;;  %v13458_v13 = vld [vmem:[#allocation6 + $0x14bc] ss:$48 sps:$4 sm:$0xff]  }
 0x702   :  { %7095 = vmatpush1.bf16.msra.mxu0 %v13423_v57  ;;  %7136 = vmatpush1.bf16.msra.mxu1 %v13426_v2  ;;  %v13453_v57 = vld [vmem:[#allocation6 + $0x14b0] ss:$48 sps:$4 sm:$0xff]   ;;  %v13456_v2 = vld [vmem:[#allocation6 + $0x14b8] ss:$48 sps:$4 sm:$0xff]  }
 0x703   :  { %7096 = vmatprep.subr.bf16.mxu0 %v13431_v47  ;;  %7137 = vmatprep.subr.bf16.mxu1 %v13434_v25  ;;  %v13461_v47 = vld [vmem:[#allocation6 + $0x1514] ss:$48 sps:$4 sm:$0xff]   ;;  %v13464_v25 = vld [vmem:[#allocation6 + $0x151c] ss:$48 sps:$4 sm:$0xff]  }
 0x706   :  { %7097 = vmatpush1.bf16.msra.mxu0 %v13429_v16  ;;  %7138 = vmatpush1.bf16.msra.mxu1 %v13432_v30  ;;  %v13459_v16 = vld [vmem:[#allocation6 + $0x1510] ss:$48 sps:$4 sm:$0xff]   ;;  %v13462_v30 = vld [vmem:[#allocation6 + $0x1518] ss:$48 sps:$4 sm:$0xff]  }
 0x707   :  { %7098 = vmatprep.subr.bf16.mxu0 %v13437_v17  ;;  %7139 = vmatprep.subr.bf16.mxu1 %v13440_v56  ;;  %v13467_v17 = vld [vmem:[#allocation6 + $0x1574] ss:$48 sps:$4 sm:$0xff]   ;;  %v13470_v56 = vld [vmem:[#allocation6 + $0x157c] ss:$48 sps:$4 sm:$0xff]  }
 0x70a   :  { %7099 = vmatpush1.bf16.msra.mxu0 %v13435_v59  ;;  %7140 = vmatpush1.bf16.msra.mxu1 %v13438_v32  ;;  %v13465_v59 = vld [vmem:[#allocation6 + $0x1570] ss:$48 sps:$4 sm:$0xff]   ;;  %v13468_v32 = vld [vmem:[#allocation6 + $0x1578] ss:$48 sps:$4 sm:$0xff]  }
 0x70b   :  { %7100 = vmatprep.subr.bf16.mxu0 %v13443_v53  ;;  %7141 = vmatprep.subr.bf16.mxu1 %v13446_v46  ;;  %v13473_v53 = vld [vmem:[#allocation6 + $0x15d4] ss:$48 sps:$4 sm:$0xff]   ;;  %v13476_v46 = vld [vmem:[#allocation6 + $0x15dc] ss:$48 sps:$4 sm:$0xff]  }
 0x70e   :  { %7101 = vmatpush1.bf16.msra.mxu0 %v13441_v4  ;;  %7142 = vmatpush1.bf16.msra.mxu1 %v13444_v39  ;;  %v13471_v4 = vld [vmem:[#allocation6 + $0x15d0] ss:$48 sps:$4 sm:$0xff]   ;;  %v13474_v39 = vld [vmem:[#allocation6 + $0x15d8] ss:$48 sps:$4 sm:$0xff]  }
 0x70f   :  { %7102 = vmatprep.subr.bf16.mxu0 %v13449_v38  ;;  %7143 = vmatprep.subr.bf16.mxu1 %v13452_v40  ;;  %v13479_v38 = vld [vmem:[#allocation6 + $0x1634] ss:$48 sps:$4 sm:$0xff]   ;;  %v13482_v40 = vld [vmem:[#allocation6 + $0x163c] ss:$48 sps:$4 sm:$0xff]  }
 0x712   :  { %7103 = vmatpush1.bf16.msra.mxu0 %v13447_v31  ;;  %7144 = vmatpush1.bf16.msra.mxu1 %v13450_v41  ;;  %v13477_v31 = vld [vmem:[#allocation6 + $0x1630] ss:$48 sps:$4 sm:$0xff]   ;;  %v13480_v41 = vld [vmem:[#allocation6 + $0x1638] ss:$48 sps:$4 sm:$0xff]  }
 0x713   :  { %7104 = vmatprep.subr.bf16.mxu0 %v13455_v0  ;;  %7145 = vmatprep.subr.bf16.mxu1 %v13458_v13  ;;  %v13485_v0 = vld [vmem:[#allocation6 + $0x1694] ss:$48 sps:$4 sm:$0xff]   ;;  %v13488_v13 = vld [vmem:[#allocation6 + $0x169c] ss:$48 sps:$4 sm:$0xff]  }
 0x716   :  { %7105 = vmatpush1.bf16.msra.mxu0 %v13453_v57  ;;  %7146 = vmatpush1.bf16.msra.mxu1 %v13456_v2  ;;  %v13483_v57 = vld [vmem:[#allocation6 + $0x1690] ss:$48 sps:$4 sm:$0xff]   ;;  %v13486_v2 = vld [vmem:[#allocation6 + $0x1698] ss:$48 sps:$4 sm:$0xff]  }
 0x717   :  { %7106 = vmatprep.subr.bf16.mxu0 %v13461_v47  ;;  %7147 = vmatprep.subr.bf16.mxu1 %v13464_v25  ;;  %v13491_v47 = vld [vmem:[#allocation6 + $0x16f4] ss:$48 sps:$4 sm:$0xff]   ;;  %v13494_v25 = vld [vmem:[#allocation6 + $0x16fc] ss:$48 sps:$4 sm:$0xff]  }
 0x71a   :  { %7107 = vmatpush1.bf16.msra.mxu0 %v13459_v16  ;;  %7148 = vmatpush1.bf16.msra.mxu1 %v13462_v30  ;;  %v13489_v16 = vld [vmem:[#allocation6 + $0x16f0] ss:$48 sps:$4 sm:$0xff]   ;;  %v13492_v30 = vld [vmem:[#allocation6 + $0x16f8] ss:$48 sps:$4 sm:$0xff]  }
 0x71b   :  { %7108 = vmatprep.subr.bf16.mxu0 %v13467_v17  ;;  %7149 = vmatprep.subr.bf16.mxu1 %v13470_v56  ;;  %v13497_v17 = vld [vmem:[#allocation6 + $0x1754] ss:$48 sps:$4 sm:$0xff]   ;;  %v13500_v56 = vld [vmem:[#allocation6 + $0x175c] ss:$48 sps:$4 sm:$0xff]  }
 0x71e   :  { %7109 = vmatpush1.bf16.msra.mxu0 %v13465_v59  ;;  %7150 = vmatpush1.bf16.msra.mxu1 %v13468_v32  ;;  %v13495_v59 = vld [vmem:[#allocation6 + $0x1750] ss:$48 sps:$4 sm:$0xff]   ;;  %v13498_v32 = vld [vmem:[#allocation6 + $0x1758] ss:$48 sps:$4 sm:$0xff]  }
 0x71f   :  { %7110 = vmatprep.subr.bf16.mxu0 %v13473_v53  ;;  %7151 = vmatprep.subr.bf16.mxu1 %v13476_v46  ;;  %v13503_v53 = vld [vmem:[#allocation6 + $0x17b4] ss:$48 sps:$4 sm:$0xff]   ;;  %v13506_v46 = vld [vmem:[#allocation6 + $0x17bc] ss:$48 sps:$4 sm:$0xff]  }
 0x722   :  { %7111 = vmatpush1.bf16.msra.mxu0 %v13471_v4  ;;  %7152 = vmatpush1.bf16.msra.mxu1 %v13474_v39  ;;  %v13501_v4 = vld [vmem:[#allocation6 + $0x17b0] ss:$48 sps:$4 sm:$0xff]   ;;  %v13504_v39 = vld [vmem:[#allocation6 + $0x17b8] ss:$48 sps:$4 sm:$0xff]  }
 0x723   :  { %7112 = vmatprep.subr.bf16.mxu0 %v13479_v38  ;;  %7153 = vmatprep.subr.bf16.mxu1 %v13482_v40  ;;  %v13509_v38 = vld [vmem:[#allocation6 + $0x1224] ss:$48 sps:$4 sm:$0xff]   ;;  %v13512_v40 = vld [vmem:[#allocation6 + $0x122c] ss:$48 sps:$4 sm:$0xff]  }
 0x726   :  { %7113 = vmatpush1.bf16.msra.mxu0 %v13477_v31  ;;  %7154 = vmatpush1.bf16.msra.mxu1 %v13480_v41  ;;  %v13507_v31 = vld [vmem:[#allocation6 + $0x1220] ss:$48 sps:$4 sm:$0xff]   ;;  %v13510_v41 = vld [vmem:[#allocation6 + $0x1228] ss:$48 sps:$4 sm:$0xff]  }
 0x727   :  { %7114 = vmatprep.subr.bf16.mxu0 %v13485_v0  ;;  %7155 = vmatprep.subr.bf16.mxu1 %v13488_v13  ;;  %v13515_v0 = vld [vmem:[#allocation6 + $0x1284] ss:$48 sps:$4 sm:$0xff]   ;;  %v13518_v13 = vld [vmem:[#allocation6 + $0x128c] ss:$48 sps:$4 sm:$0xff]  }
 0x72a   :  { %7115 = vmatpush1.bf16.msra.mxu0 %v13483_v57  ;;  %7156 = vmatpush1.bf16.msra.mxu1 %v13486_v2  ;;  %v13513_v57 = vld [vmem:[#allocation6 + $0x1280] ss:$48 sps:$4 sm:$0xff]   ;;  %v13516_v2 = vld [vmem:[#allocation6 + $0x1288] ss:$48 sps:$4 sm:$0xff]  }
 0x72b   :  { %7116 = vmatprep.subr.bf16.mxu0 %v13491_v47  ;;  %7157 = vmatprep.subr.bf16.mxu1 %v13494_v25  ;;  %v13521_v47 = vld [vmem:[#allocation6 + $0x12e4] ss:$48 sps:$4 sm:$0xff]   ;;  %v13524_v25 = vld [vmem:[#allocation6 + $0x12ec] ss:$48 sps:$4 sm:$0xff]  }
 0x72e   :  { %7117 = vmatpush1.bf16.msra.mxu0 %v13489_v16  ;;  %7158 = vmatpush1.bf16.msra.mxu1 %v13492_v30  ;;  %v13519_v16 = vld [vmem:[#allocation6 + $0x12e0] ss:$48 sps:$4 sm:$0xff]   ;;  %v13522_v30 = vld [vmem:[#allocation6 + $0x12e8] ss:$48 sps:$4 sm:$0xff]  }
 0x72f   :  { %7118 = vmatprep.subr.bf16.mxu0 %v13497_v17  ;;  %7159 = vmatprep.subr.bf16.mxu1 %v13500_v56  ;;  %v13527_v17 = vld [vmem:[#allocation6 + $0x1344] ss:$48 sps:$4 sm:$0xff]   ;;  %v13530_v56 = vld [vmem:[#allocation6 + $0x134c] ss:$48 sps:$4 sm:$0xff]  }
 0x732   :  { %7119 = vmatpush1.bf16.msra.mxu0 %v13495_v59  ;;  %7160 = vmatpush1.bf16.msra.mxu1 %v13498_v32  ;;  %v13525_v59 = vld [vmem:[#allocation6 + $0x1340] ss:$48 sps:$4 sm:$0xff]   ;;  %v13528_v32 = vld [vmem:[#allocation6 + $0x1348] ss:$48 sps:$4 sm:$0xff]  }
 0x733   :  { %7120 = vmatprep.subr.bf16.mxu0 %v13503_v53  ;;  %7161 = vmatprep.subr.bf16.mxu1 %v13506_v46  ;;  %v13533_v53 = vld [vmem:[#allocation6 + $0x13a4] ss:$48 sps:$4 sm:$0xff]   ;;  %v13531_v46 = vld [vmem:[#allocation6 + $0x13a0] ss:$48 sps:$4 sm:$0xff]  }
 0x736   :  { %7121 = vmatpush1.bf16.msra.mxu0 %v13501_v4  ;;  %7162 = vmatpush1.bf16.msra.mxu1 %v13504_v39  ;;  %v13534_v4 = vld [vmem:[#allocation6 + $0x13a8] ss:$48 sps:$4 sm:$0xff]   ;;  %v13539_v39 = vld [vmem:[#allocation6 + $0x1404] ss:$48 sps:$4 sm:$0xff]  }
 0x737   :  { %7172 = vmatprep.subr.bf16.mxu0 %v13509_v38  ;;  %7213 = vmatprep.subr.bf16.mxu1 %v13512_v40  ;;  %v13542_v38 = vld [vmem:[#allocation6 + $0x140c] ss:$48 sps:$4 sm:$0xff]   ;;  %v13537_v40 = vld [vmem:[#allocation6 + $0x1400] ss:$48 sps:$4 sm:$0xff]  }
 0x739   :  { %7123 = vmatmul.mubr.bf16.vlgmr.msra.gmra.mrb[20].mxu0 %v15520_v49  ;;  %7164 = vmatmul.mubr.bf16.vlgmr.msra.gmra.mrb[20].mxu1 %v15520_v49 }
 0x73a   :  { %7173 = vmatpush1.bf16.msra.mxu0 %v13507_v31  ;;  %7204 = vmatprep.mubr.bf16.mxu0 %v15518_v15  ;;  %v13540_v31 = vld [vmem:[#allocation6 + $0x1408] ss:$48 sps:$4 sm:$0xff]  }
 0x73b   :  { %7214 = vmatpush1.bf16.msra.mxu1 %v13510_v41  ;;  %7245 = vmatprep.mubr.bf16.mxu1 %v15518_v15  ;;  %v13536_v15 = vld [vmem:[#allocation6 + $0x13ac] ss:$48 sps:$4 sm:$0xff]   ;;  %v13545_v41 = vld [vmem:[#allocation6 + $0x1464] ss:$48 sps:$4 sm:$0xff]  }
 0x73c   :  { %7174 = vmatprep.subr.bf16.mxu0 %v13515_v0  ;;  %7215 = vmatprep.subr.bf16.mxu1 %v13518_v13  ;;  %v13548_v0 = vld [vmem:[#allocation6 + $0x146c] ss:$48 sps:$4 sm:$0xff]   ;;  %v13543_v13 = vld [vmem:[#allocation6 + $0x1460] ss:$48 sps:$4 sm:$0xff]  }
 0x73e   :  { %7175 = vmatpush1.bf16.msra.mxu0 %v13513_v57  ;;  %v13546_v57 = vld [vmem:[#allocation6 + $0x1468] ss:$48 sps:$4 sm:$0xff]  }
 0x73f   :  { %7216 = vmatpush1.bf16.msra.mxu1 %v13516_v2  ;;  %7176 = vmatprep.subr.bf16.mxu0 %v13521_v47  ;;  %v13551_v2 = vld [vmem:[#allocation6 + $0x14c4] ss:$48 sps:$4 sm:$0xff]   ;;  %v13554_v47 = vld [vmem:[#allocation6 + $0x14cc] ss:$48 sps:$4 sm:$0xff]  }
 0x740   :  { %7217 = vmatprep.subr.bf16.mxu1 %v13524_v25  ;;  %v13549_v25 = vld [vmem:[#allocation6 + $0x14c0] ss:$48 sps:$4 sm:$0xff]  }
 0x742   :  { %7177 = vmatpush1.bf16.msra.mxu0 %v13519_v16  ;;  %v13552_v16 = vld [vmem:[#allocation6 + $0x14c8] ss:$48 sps:$4 sm:$0xff]  }
 0x743   :  { %7218 = vmatpush1.bf16.msra.mxu1 %v13522_v30  ;;  %7178 = vmatprep.subr.bf16.mxu0 %v13527_v17  ;;  %v13557_v30 = vld [vmem:[#allocation6 + $0x1524] ss:$48 sps:$4 sm:$0xff]   ;;  %v13560_v17 = vld [vmem:[#allocation6 + $0x152c] ss:$48 sps:$4 sm:$0xff]  }
 0x744   :  { %7219 = vmatprep.subr.bf16.mxu1 %v13530_v56  ;;  %v13555_v56 = vld [vmem:[#allocation6 + $0x1520] ss:$48 sps:$4 sm:$0xff]  }
 0x746   :  { %7179 = vmatpush1.bf16.msra.mxu0 %v13525_v59  ;;  %v13558_v59 = vld [vmem:[#allocation6 + $0x1528] ss:$48 sps:$4 sm:$0xff]  }
 0x747   :  { %7220 = vmatpush1.bf16.msra.mxu1 %v13528_v32  ;;  %7180 = vmatprep.subr.bf16.mxu0 %v13533_v53  ;;  %v13563_v32 = vld [vmem:[#allocation6 + $0x1584] ss:$48 sps:$4 sm:$0xff]   ;;  %v13566_v53 = vld [vmem:[#allocation6 + $0x158c] ss:$48 sps:$4 sm:$0xff]  }
 0x748   :  { %7221 = vmatprep.subr.bf16.mxu1 %v13536_v15  ;;  %v13561_v15 = vld [vmem:[#allocation6 + $0x1580] ss:$48 sps:$4 sm:$0xff]  }
 0x74a   :  { %7181 = vmatpush1.bf16.msra.mxu0 %v13531_v46  ;;  %v13564_v46 = vld [vmem:[#allocation6 + $0x1588] ss:$48 sps:$4 sm:$0xff]  }
 0x74b   :  { %7222 = vmatpush1.bf16.msra.mxu1 %v13534_v4  ;;  %7182 = vmatprep.subr.bf16.mxu0 %v13539_v39  ;;  %v13569_v4 = vld [vmem:[#allocation6 + $0x15e4] ss:$48 sps:$4 sm:$0xff]   ;;  %v13572_v39 = vld [vmem:[#allocation6 + $0x15ec] ss:$48 sps:$4 sm:$0xff]  }
 0x74c   :  { %7223 = vmatprep.subr.bf16.mxu1 %v13542_v38  ;;  %v13567_v38 = vld [vmem:[#allocation6 + $0x15e0] ss:$48 sps:$4 sm:$0xff]  }
 0x74e   :  { %7183 = vmatpush1.bf16.msra.mxu0 %v13537_v40  ;;  %v13570_v40 = vld [vmem:[#allocation6 + $0x15e8] ss:$48 sps:$4 sm:$0xff]  }
 0x74f   :  { %7224 = vmatpush1.bf16.msra.mxu1 %v13540_v31  ;;  %7184 = vmatprep.subr.bf16.mxu0 %v13545_v41  ;;  %v13575_v31 = vld [vmem:[#allocation6 + $0x1644] ss:$48 sps:$4 sm:$0xff]   ;;  %v13578_v41 = vld [vmem:[#allocation6 + $0x164c] ss:$48 sps:$4 sm:$0xff]  }
 0x750   :  { %7225 = vmatprep.subr.bf16.mxu1 %v13548_v0  ;;  %v13573_v0 = vld [vmem:[#allocation6 + $0x1640] ss:$48 sps:$4 sm:$0xff]  }
 0x752   :  { %7185 = vmatpush1.bf16.msra.mxu0 %v13543_v13  ;;  %v13576_v13 = vld [vmem:[#allocation6 + $0x1648] ss:$48 sps:$4 sm:$0xff]  }
 0x753   :  { %7226 = vmatpush1.bf16.msra.mxu1 %v13546_v57  ;;  %7186 = vmatprep.subr.bf16.mxu0 %v13551_v2  ;;  %v13581_v57 = vld [vmem:[#allocation6 + $0x16a4] ss:$48 sps:$4 sm:$0xff]   ;;  %v13584_v2 = vld [vmem:[#allocation6 + $0x16ac] ss:$48 sps:$4 sm:$0xff]  }
 0x754   :  { %7227 = vmatprep.subr.bf16.mxu1 %v13554_v47  ;;  %v13579_v47 = vld [vmem:[#allocation6 + $0x16a0] ss:$48 sps:$4 sm:$0xff]  }
 0x756   :  { %7187 = vmatpush1.bf16.msra.mxu0 %v13549_v25  ;;  %v13582_v25 = vld [vmem:[#allocation6 + $0x16a8] ss:$48 sps:$4 sm:$0xff]  }
 0x757   :  { %7228 = vmatpush1.bf16.msra.mxu1 %v13552_v16  ;;  %7188 = vmatprep.subr.bf16.mxu0 %v13557_v30  ;;  %v13587_v16 = vld [vmem:[#allocation6 + $0x1704] ss:$48 sps:$4 sm:$0xff]   ;;  %v13590_v30 = vld [vmem:[#allocation6 + $0x170c] ss:$48 sps:$4 sm:$0xff]  }
 0x758   :  { %7229 = vmatprep.subr.bf16.mxu1 %v13560_v17  ;;  %v13585_v17 = vld [vmem:[#allocation6 + $0x1700] ss:$48 sps:$4 sm:$0xff]  }
 0x75a   :  { %7189 = vmatpush1.bf16.msra.mxu0 %v13555_v56  ;;  %v13588_v56 = vld [vmem:[#allocation6 + $0x1708] ss:$48 sps:$4 sm:$0xff]  }
 0x75b   :  { %7230 = vmatpush1.bf16.msra.mxu1 %v13558_v59  ;;  %7190 = vmatprep.subr.bf16.mxu0 %v13563_v32  ;;  %v13593_v59 = vld [vmem:[#allocation6 + $0x1764] ss:$48 sps:$4 sm:$0xff]   ;;  %v13596_v32 = vld [vmem:[#allocation6 + $0x176c] ss:$48 sps:$4 sm:$0xff]  }
 0x75c   :  { %7231 = vmatprep.subr.bf16.mxu1 %v13566_v53  ;;  %v13591_v53 = vld [vmem:[#allocation6 + $0x1760] ss:$48 sps:$4 sm:$0xff]  }
 0x75e   :  { %7191 = vmatpush1.bf16.msra.mxu0 %v13561_v15  ;;  %v13594_v15 = vld [vmem:[#allocation6 + $0x1768] ss:$48 sps:$4 sm:$0xff]  }
 0x75f   :  { %7232 = vmatpush1.bf16.msra.mxu1 %v13564_v46  ;;  %7192 = vmatprep.subr.bf16.mxu0 %v13569_v4  ;;  %v13599_v46 = vld [vmem:[#allocation6 + $0x17c4] ss:$48 sps:$4 sm:$0xff]   ;;  %v13602_v4 = vld [vmem:[#allocation6 + $0x17cc] ss:$48 sps:$4 sm:$0xff]  }
 0x760   :  { %7233 = vmatprep.subr.bf16.mxu1 %v13572_v39  ;;  %v13597_v39 = vld [vmem:[#allocation6 + $0x17c0] ss:$48 sps:$4 sm:$0xff]  }
 0x762   :  { %7193 = vmatpush1.bf16.msra.mxu0 %v13567_v38  ;;  %v13600_v38 = vld [vmem:[#allocation6 + $0x17c8] ss:$48 sps:$4 sm:$0xff]  }
 0x763   :  { %7234 = vmatpush1.bf16.msra.mxu1 %v13570_v40  ;;  %7194 = vmatprep.subr.bf16.mxu0 %v13575_v31  ;;  %v15535_v40 = vld [vmem:[%s15896_s0 + $0x20] sm:$0xff] }
 0x764   :  { %7235 = vmatprep.subr.bf16.mxu1 %v13578_v41  ;;  %v15541_v31 = vcombine.high %v15535_v40, %v15535_v40  ;;  %v16438_v41 = vld [vmem:[#allocation24_spill] sm:$0xff] }
 0x766   :  { %7195 = vmatpush1.bf16.msra.mxu0 %v13573_v0  ;;  %v16439_v0 = vld [vmem:[#allocation25_spill] sm:$0xff] }
 0x767   :  { %7236 = vmatpush1.bf16.msra.mxu1 %v13576_v13  ;;  %7196 = vmatprep.subr.bf16.mxu0 %v13581_v57  ;;  %v16440_v13 = vld [vmem:[#allocation26_spill] sm:$0xff]  ;;  %v16441_v57 = vld [vmem:[#allocation27_spill] sm:$0xff] }
 0x768   :  { %7237 = vmatprep.subr.bf16.mxu1 %v13584_v2  ;;  %v16442_v2 = vld [vmem:[#allocation28_spill] sm:$0xff] }
 0x76a   :  { %7197 = vmatpush1.bf16.msra.mxu0 %v13579_v47  ;;  %v16443_v47 = vld [vmem:[#allocation29_spill] sm:$0xff] }
 0x76b   :  { %7238 = vmatpush1.bf16.msra.mxu1 %v13582_v25  ;;  %7198 = vmatprep.subr.bf16.mxu0 %v13587_v16  ;;  %v16444_v25 = vld [vmem:[#allocation30_spill] sm:$0xff]  ;;  %v16445_v16 = vld [vmem:[#allocation31_spill] sm:$0xff] }
 0x76c   :  { %7239 = vmatprep.subr.bf16.mxu1 %v13590_v30  ;;  %v16446_v30 = vld [vmem:[#allocation32_spill] sm:$0xff] }
 0x76e   :  { %7199 = vmatpush1.bf16.msra.mxu0 %v13585_v17  ;;  %v16447_v17 = vld [vmem:[#allocation33_spill] sm:$0xff] }
 0x76f   :  { %7240 = vmatpush1.bf16.msra.mxu1 %v13588_v56  ;;  %7200 = vmatprep.subr.bf16.mxu0 %v13593_v59  ;;  %v16448_v56 = vld [vmem:[#allocation34_spill] sm:$0xff]  ;;  %v16449_v59 = vld [vmem:[#allocation35_spill] sm:$0xff] }
 0x770   :  { %7241 = vmatprep.subr.bf16.mxu1 %v13596_v32  ;;  %v16450_v32 = vld [vmem:[#allocation36_spill] sm:$0xff] }
 0x772   :  { %7201 = vmatpush1.bf16.msra.mxu0 %v13591_v53  ;;  %v16451_v53 = vld [vmem:[#allocation37_spill] sm:$0xff] }
 0x773   :  { %7242 = vmatpush1.bf16.msra.mxu1 %v13594_v15  ;;  %7202 = vmatprep.subr.bf16.mxu0 %v13599_v46  ;;  %v16452_v15 = vld [vmem:[#allocation38_spill] sm:$0xff]  ;;  %v16453_v46 = vld [vmem:[#allocation39_spill] sm:$0xff] }
 0x774   :  { %7243 = vmatprep.subr.bf16.mxu1 %v13602_v4  ;;  %v16454_v4 = vld [vmem:[#allocation40_spill] sm:$0xff] }
 0x776   :  { %7203 = vmatpush1.bf16.msra.mxu0 %v13597_v39  ;;  %v16455_v39 = vld [vmem:[#allocation41_spill] sm:$0xff] }
 0x777   :  { %7244 = vmatpush1.bf16.msra.mxu1 %v13600_v38  ;;  %7274 = vmatprep.subr.bf16.mxu0 %v14574_v3  ;;  %v16456_v38 = vld [vmem:[#allocation42_spill] sm:$0xff] }
 0x778   :  { %7315 = vmatprep.subr.bf16.mxu1 %v14578_v8 }
 0x779   :  { %7205 = vmatmul.mubr.bf16.vlgmr.msra.gmra.mrb[24].mxu0 %v15520_v49 }
 0x77a   :  { %7246 = vmatmul.mubr.bf16.vlgmr.msra.gmra.mrb[24].mxu1 %v15520_v49  ;;  %7275 = vmatpush1.bf16.msra.mxu0 %v14576_v5  ;;  %v16437_v49 = vld [vmem:[#allocation23_spill] sm:$0xff] }
 0x77b   :  { %7316 = vmatpush1.bf16.msra.mxu1 %v14580_v9  ;;  %7276 = vmatprep.subr.bf16.mxu0 %v14582_v10 }
 0x77c   :  { %7317 = vmatprep.subr.bf16.mxu1 %v14585_v14  ;;  %7306 = vmatprep.mubr.bf16.mxu0 %v15541_v31 }
 0x77d   :  { %7347 = vmatprep.mubr.bf16.mxu1 %v15541_v31 }
 0x77e   :  { %7277 = vmatpush1.bf16.msra.mxu0 %v14589_v18 }
 0x77f   :  { %7318 = vmatpush1.bf16.msra.mxu1 %v14593_v19  ;;  %7278 = vmatprep.subr.bf16.mxu0 %v14595_v20 }
 0x780   :  { %7319 = vmatprep.subr.bf16.mxu1 %v14598_v21 }
 0x782   :  { %7279 = vmatpush1.bf16.msra.mxu0 %v14601_v26 }
 0x783   :  { %7320 = vmatpush1.bf16.msra.mxu1 %v14605_v27  ;;  %7280 = vmatprep.subr.bf16.mxu0 %v14607_v28 }
 0x784   :  { %7321 = vmatprep.subr.bf16.mxu1 %v14610_v29 }
 0x786   :  { %7281 = vmatpush1.bf16.msra.mxu0 %v14613_v34 }
 0x787   :  { %7322 = vmatpush1.bf16.msra.mxu1 %v14617_v35  ;;  %7282 = vmatprep.subr.bf16.mxu0 %v14619_v36 }
 0x788   :  { %7323 = vmatprep.subr.bf16.mxu1 %v14622_v37 }
 0x78a   :  { %7283 = vmatpush1.bf16.msra.mxu0 %v14625_v42 }
 0x78b   :  { %7324 = vmatpush1.bf16.msra.mxu1 %v14629_v43  ;;  %7284 = vmatprep.subr.bf16.mxu0 %v14631_v44 }
 0x78c   :  { %7325 = vmatprep.subr.bf16.mxu1 %v14634_v45 }
 0x78e   :  { %7285 = vmatpush1.bf16.msra.mxu0 %v14637_v50 }
 0x78f   :  { %7326 = vmatpush1.bf16.msra.mxu1 %v14641_v51  ;;  %7286 = vmatprep.subr.bf16.mxu0 %v14643_v52 }
 0x790   :  { %7327 = vmatprep.subr.bf16.mxu1 %v14651_v54 }
 0x792   :  { %7287 = vmatpush1.bf16.msra.mxu0 %v14658_v60 }
 0x793   :  { %7328 = vmatpush1.bf16.msra.mxu1 %v14663_v61  ;;  %7288 = vmatprep.subr.bf16.mxu0 %v14665_v62 }
 0x794   :  { %7329 = vmatprep.subr.bf16.mxu1 %v14668_v63 }
 0x796   :  { %7289 = vmatpush1.bf16.msra.mxu0 %v14672_v6 }
 0x797   :  { %7330 = vmatpush1.bf16.msra.mxu1 %v14676_v7  ;;  %7290 = vmatprep.subr.bf16.mxu0 %v14678_v11 }
 0x798   :  { %7331 = vmatprep.subr.bf16.mxu1 %v14681_v12 }
 0x79a   :  { %7291 = vmatpush1.bf16.msra.mxu0 %v14684_v22 }
 0x79b   :  { %7332 = vmatpush1.bf16.msra.mxu1 %v14688_v23  ;;  %7292 = vmatprep.subr.bf16.mxu0 %v14690_v24 }
 0x79c   :  { %7333 = vmatprep.subr.bf16.mxu1 %v16261_v1 }
 0x79e   :  { %7293 = vmatpush1.bf16.msra.mxu0 %v16262_v55 }
 0x79f   :  { %7334 = vmatpush1.bf16.msra.mxu1 %v16263_v58  ;;  %7294 = vmatprep.subr.bf16.mxu0 %v16437_v49 }
 0x7a0   :  { %7335 = vmatprep.subr.bf16.mxu1 %v16438_v41 }
 0x7a2   :  { %7295 = vmatpush1.bf16.msra.mxu0 %v16439_v0 }
 0x7a3   :  { %7336 = vmatpush1.bf16.msra.mxu1 %v16440_v13  ;;  %7296 = vmatprep.subr.bf16.mxu0 %v16441_v57 }
 0x7a4   :  { %7337 = vmatprep.subr.bf16.mxu1 %v16442_v2 }
 0x7a6   :  { %7297 = vmatpush1.bf16.msra.mxu0 %v16443_v47 }
 0x7a7   :  { %7338 = vmatpush1.bf16.msra.mxu1 %v16444_v25  ;;  %7298 = vmatprep.subr.bf16.mxu0 %v16445_v16  ;;  %v13628_v16 = vld [vmem:[#allocation6 + $0x192c] ss:$48 sps:$4 sm:$0xff]  }
 0x7a8   :  { %7339 = vmatprep.subr.bf16.mxu1 %v16446_v30  ;;  %v16457_v30 = vld [vmem:[#allocation43_spill] sm:$0xff] }
 0x7aa   :  { %7299 = vmatpush1.bf16.msra.mxu0 %v16447_v17  ;;  %v16458_v17 = vld [vmem:[#allocation44_spill] sm:$0xff] }
 0x7ab   :  { %7340 = vmatpush1.bf16.msra.mxu1 %v16448_v56  ;;  %7300 = vmatprep.subr.bf16.mxu0 %v16449_v59  ;;  %v15609_v59 = vcombine.low %v15535_v40, %v15535_v40  ;;  %v16466_v40 = vld [vmem:[#allocation52_spill] sm:$0xff]  ;;  %v13625_v56 = vld [vmem:[#allocation6 + $0x1924] ss:$48 sps:$4 sm:$0xff]  }
 0x7ac   :  { %7341 = vmatprep.subr.bf16.mxu1 %v16450_v32  ;;  %v16459_v32 = vld [vmem:[#allocation45_spill] sm:$0xff] }
 0x7ae   :  { %7301 = vmatpush1.bf16.msra.mxu0 %v16451_v53  ;;  %v16460_v53 = vld [vmem:[#allocation46_spill] sm:$0xff] }
 0x7af   :  { %7342 = vmatpush1.bf16.msra.mxu1 %v16452_v15  ;;  %7302 = vmatprep.subr.bf16.mxu0 %v16453_v46  ;;  %v16461_v15 = vld [vmem:[#allocation47_spill] sm:$0xff]  ;;  %v16462_v46 = vld [vmem:[#allocation48_spill] sm:$0xff] }
 0x7b0   :  { %7343 = vmatprep.subr.bf16.mxu1 %v16454_v4  ;;  %v16476_v4 = vld [vmem:[#allocation62_spill] sm:$0xff] }
 0x7b2   :  { %7303 = vmatpush1.bf16.msra.mxu0 %v16455_v39  ;;  %v16471_v39 = vld [vmem:[#allocation57_spill] sm:$0xff] }
 0x7b3   :  { %7344 = vmatpush1.bf16.msra.mxu1 %v16456_v38  ;;  %7304 = vmatprep.subr.bf16.mxu0 %v16457_v30  ;;  %v16463_v38 = vld [vmem:[#allocation49_spill] sm:$0xff]  ;;  %v16464_v30 = vld [vmem:[#allocation50_spill] sm:$0xff] }
 0x7b4   :  { %7345 = vmatprep.subr.bf16.mxu1 %v16458_v17  ;;  %v16465_v17 = vld [vmem:[#allocation51_spill] sm:$0xff] }
 0x7b6   :  { %7305 = vmatpush1.bf16.msra.mxu0 %v16459_v32  ;;  %v16470_v32 = vld [vmem:[#allocation56_spill] sm:$0xff] }
 0x7b7   :  { %7346 = vmatpush1.bf16.msra.mxu1 %v16460_v53  ;;  %7356 = vmatprep.subr.bf16.mxu0 %v16461_v15  ;;  %v16467_v53 = vld [vmem:[#allocation53_spill] sm:$0xff]  ;;  %v16468_v15 = vld [vmem:[#allocation54_spill] sm:$0xff] }
 0x7b8   :  { %7397 = vmatprep.subr.bf16.mxu1 %v16462_v46  ;;  %v16469_v46 = vld [vmem:[#allocation55_spill] sm:$0xff] }
 0x7b9   :  { %7307 = vmatmul.mubr.bf16.vlgmr.msra.gmra.mrb[44].mxu0 %v15609_v59 }
 0x7ba   :  { %7348 = vmatmul.mubr.bf16.vlgmr.msra.gmra.mrb[44].mxu1 %v15609_v59  ;;  %7357 = vmatpush1.bf16.msra.mxu0 %v16463_v38  ;;  %v16472_v38 = vld [vmem:[#allocation58_spill] sm:$0xff] }
 0x7bb   :  { %7398 = vmatpush1.bf16.msra.mxu1 %v16464_v30  ;;  %7358 = vmatprep.subr.bf16.mxu0 %v16465_v17  ;;  %v16473_v30 = vld [vmem:[#allocation59_spill] sm:$0xff]  ;;  %v16474_v17 = vld [vmem:[#allocation60_spill] sm:$0xff] }
 0x7bc   :  { %7399 = vmatprep.subr.bf16.mxu1 %v16466_v40  ;;  %7388 = vmatprep.mubr.bf16.mxu0 %v15541_v31  ;;  %v16475_v40 = vld [vmem:[#allocation61_spill] sm:$0xff] }
 0x7bd   :  { %7429 = vmatprep.mubr.bf16.mxu1 %v15541_v31  ;;  %v16477_v31 = vld [vmem:[#allocation63_spill] sm:$0xff] }
 0x7be   :  { %7359 = vmatpush1.bf16.msra.mxu0 %v16467_v53  ;;  %v16478_v53 = vld [vmem:[#allocation64_spill] sm:$0xff] }
 0x7bf   :  { %7400 = vmatpush1.bf16.msra.mxu1 %v16468_v15  ;;  %7360 = vmatprep.subr.bf16.mxu0 %v16469_v46  ;;  %v16479_v15 = vld [vmem:[#allocation65_spill] sm:$0xff]  ;;  %v16480_v46 = vld [vmem:[#allocation66_spill] sm:$0xff] }
 0x7c0   :  { %7401 = vmatprep.subr.bf16.mxu1 %v16470_v32  ;;  %v16481_v32 = vld [vmem:[#allocation67_spill] sm:$0xff] }
 0x7c2   :  { %7361 = vmatpush1.bf16.msra.mxu0 %v16471_v39  ;;  %v16482_v39 = vld [vmem:[#allocation68_spill] sm:$0xff] }
 0x7c3   :  { %7402 = vmatpush1.bf16.msra.mxu1 %v16472_v38  ;;  %7362 = vmatprep.subr.bf16.mxu0 %v16473_v30  ;;  %v16483_v38 = vld [vmem:[#allocation69_spill] sm:$0xff]  ;;  %v16484_v30 = vld [vmem:[#allocation70_spill] sm:$0xff] }
 0x7c4   :  { %7403 = vmatprep.subr.bf16.mxu1 %v16474_v17  ;;  %v16485_v17 = vld [vmem:[#allocation71_spill] sm:$0xff] }
 0x7c6   :  { %7363 = vmatpush1.bf16.msra.mxu0 %v16475_v40  ;;  %v16486_v40 = vld [vmem:[#allocation72_spill] sm:$0xff] }
 0x7c7   :  { %7404 = vmatpush1.bf16.msra.mxu1 %v16476_v4  ;;  %7364 = vmatprep.subr.bf16.mxu0 %v16477_v31  ;;  %v16487_v4 = vld [vmem:[#allocation73_spill] sm:$0xff]  ;;  %v16488_v31 = vld [vmem:[#allocation74_spill] sm:$0xff] }
 0x7c8   :  { %7405 = vmatprep.subr.bf16.mxu1 %v16478_v53  ;;  %v16489_v53 = vld [vmem:[#allocation75_spill] sm:$0xff] }
 0x7ca   :  { %7365 = vmatpush1.bf16.msra.mxu0 %v16479_v15  ;;  %v16490_v15 = vld [vmem:[#allocation76_spill] sm:$0xff] }
 0x7cb   :  { %7406 = vmatpush1.bf16.msra.mxu1 %v16480_v46  ;;  %7366 = vmatprep.subr.bf16.mxu0 %v16481_v32  ;;  %v16491_v46 = vld [vmem:[#allocation77_spill] sm:$0xff]  ;;  %v16492_v32 = vld [vmem:[#allocation78_spill] sm:$0xff] }
 0x7cc   :  { %7407 = vmatprep.subr.bf16.mxu1 %v16482_v39  ;;  %v16493_v39 = vld [vmem:[#allocation79_spill] sm:$0xff] }
 0x7ce   :  { %7367 = vmatpush1.bf16.msra.mxu0 %v16483_v38  ;;  %v16494_v38 = vld [vmem:[#allocation80_spill] sm:$0xff] }
 0x7cf   :  { %7408 = vmatpush1.bf16.msra.mxu1 %v16484_v30  ;;  %7368 = vmatprep.subr.bf16.mxu0 %v16485_v17  ;;  %v16495_v30 = vld [vmem:[#allocation81_spill] sm:$0xff]  ;;  %v16496_v17 = vld [vmem:[#allocation82_spill] sm:$0xff] }
 0x7d0   :  { %7409 = vmatprep.subr.bf16.mxu1 %v16486_v40  ;;  %v16497_v40 = vld [vmem:[#allocation83_spill] sm:$0xff] }
 0x7d2   :  { %7369 = vmatpush1.bf16.msra.mxu0 %v16487_v4  ;;  %v16498_v4 = vld [vmem:[#allocation84_spill] sm:$0xff] }
 0x7d3   :  { %7410 = vmatpush1.bf16.msra.mxu1 %v16488_v31  ;;  %7370 = vmatprep.subr.bf16.mxu0 %v16489_v53  ;;  %v16499_v31 = vld [vmem:[#allocation85_spill] sm:$0xff]  ;;  %v16500_v53 = vld [vmem:[#allocation86_spill] sm:$0xff] }
 0x7d4   :  { %7411 = vmatprep.subr.bf16.mxu1 %v16490_v15  ;;  %v16501_v15 = vld [vmem:[#allocation87_spill] sm:$0xff] }
 0x7d6   :  { %7371 = vmatpush1.bf16.msra.mxu0 %v16491_v46  ;;  %v16502_v46 = vld [vmem:[#allocation88_spill] sm:$0xff] }
 0x7d7   :  { %7412 = vmatpush1.bf16.msra.mxu1 %v16492_v32  ;;  %7372 = vmatprep.subr.bf16.mxu0 %v16493_v39  ;;  %v16503_v32 = vld [vmem:[#allocation89_spill] sm:$0xff]  ;;  %v16504_v39 = vld [vmem:[#allocation90_spill] sm:$0xff] }
 0x7d8   :  { %7413 = vmatprep.subr.bf16.mxu1 %v16494_v38  ;;  %v16505_v38 = vld [vmem:[#allocation91_spill] sm:$0xff] }
 0x7da   :  { %7373 = vmatpush1.bf16.msra.mxu0 %v16495_v30  ;;  %v16506_v30 = vld [vmem:[#allocation92_spill] sm:$0xff] }
 0x7db   :  { %7414 = vmatpush1.bf16.msra.mxu1 %v16496_v17  ;;  %7374 = vmatprep.subr.bf16.mxu0 %v16497_v40  ;;  %v16507_v17 = vld [vmem:[#allocation93_spill] sm:$0xff]  ;;  %v16508_v40 = vld [vmem:[#allocation94_spill] sm:$0xff] }
 0x7dc   :  { %7415 = vmatprep.subr.bf16.mxu1 %v16498_v4  ;;  %v16509_v4 = vld [vmem:[#allocation95_spill] sm:$0xff] }
 0x7de   :  { %7375 = vmatpush1.bf16.msra.mxu0 %v16499_v31  ;;  %v16510_v31 = vld [vmem:[#allocation96_spill] sm:$0xff] }
 0x7df   :  { %7416 = vmatpush1.bf16.msra.mxu1 %v16500_v53  ;;  %7376 = vmatprep.subr.bf16.mxu0 %v16501_v15  ;;  %v16511_v53 = vld [vmem:[#allocation97_spill] sm:$0xff]  ;;  %v16512_v15 = vld [vmem:[#allocation98_spill] sm:$0xff] }
 0x7e0   :  { %7417 = vmatprep.subr.bf16.mxu1 %v16502_v46  ;;  %v16513_v46 = vld [vmem:[#allocation99_spill] sm:$0xff] }
 0x7e2   :  { %7377 = vmatpush1.bf16.msra.mxu0 %v16503_v32  ;;  %v16514_v32 = vld [vmem:[#allocation100_spill] sm:$0xff] }
 0x7e3   :  { %7418 = vmatpush1.bf16.msra.mxu1 %v16504_v39  ;;  %7378 = vmatprep.subr.bf16.mxu0 %v16505_v38  ;;  %v16515_v39 = vld [vmem:[#allocation101_spill] sm:$0xff]  ;;  %v16516_v38 = vld [vmem:[#allocation102_spill] sm:$0xff] }
 0x7e4   :  { %7419 = vmatprep.subr.bf16.mxu1 %v16506_v30  ;;  %v16517_v30 = vld [vmem:[#allocation103_spill] sm:$0xff] }
 0x7e6   :  { %7379 = vmatpush1.bf16.msra.mxu0 %v16507_v17  ;;  %v16518_v17 = vld [vmem:[#allocation104_spill] sm:$0xff] }
 0x7e7   :  { %7420 = vmatpush1.bf16.msra.mxu1 %v16508_v40  ;;  %7380 = vmatprep.subr.bf16.mxu0 %v16509_v4  ;;  %v16519_v40 = vld [vmem:[#allocation105_spill] sm:$0xff]  ;;  %v16520_v4 = vld [vmem:[#allocation106_spill] sm:$0xff] }
 0x7e8   :  { %7421 = vmatprep.subr.bf16.mxu1 %v16510_v31  ;;  %v16521_v31 = vld [vmem:[#allocation107_spill] sm:$0xff] }
 0x7ea   :  { %7381 = vmatpush1.bf16.msra.mxu0 %v16511_v53  ;;  %v16522_v53 = vld [vmem:[#allocation108_spill] sm:$0xff] }
 0x7eb   :  { %7422 = vmatpush1.bf16.msra.mxu1 %v16512_v15  ;;  %7382 = vmatprep.subr.bf16.mxu0 %v16513_v46  ;;  %v16523_v15 = vld [vmem:[#allocation109_spill] sm:$0xff]  ;;  %v16524_v46 = vld [vmem:[#allocation110_spill] sm:$0xff] }
 0x7ec   :  { %7423 = vmatprep.subr.bf16.mxu1 %v16514_v32  ;;  %v13613_v32 = vld [vmem:[#allocation6 + $0x1864] ss:$48 sps:$4 sm:$0xff]  }
 0x7ee   :  { %7383 = vmatpush1.bf16.msra.mxu0 %v16515_v39  ;;  %v13608_v39 = vld [vmem:[#allocation6 + $0x1808] ss:$48 sps:$4 sm:$0xff]  }
 0x7ef   :  { %7424 = vmatpush1.bf16.msra.mxu1 %v16516_v38  ;;  %7384 = vmatprep.subr.bf16.mxu0 %v16517_v30  ;;  %v13605_v38 = vld [vmem:[#allocation6 + $0x1800] ss:$48 sps:$4 sm:$0xff]   ;;  %v13607_v30 = vld [vmem:[#allocation6 + $0x1804] ss:$48 sps:$4 sm:$0xff]  }
 0x7f0   :  { %7425 = vmatprep.subr.bf16.mxu1 %v16518_v17  ;;  %v13610_v17 = vld [vmem:[#allocation6 + $0x180c] ss:$48 sps:$4 sm:$0xff]  }
 0x7f2   :  { %7385 = vmatpush1.bf16.msra.mxu0 %v16519_v40  ;;  %v13616_v40 = vld [vmem:[#allocation6 + $0x186c] ss:$48 sps:$4 sm:$0xff]  }
 0x7f3   :  { %7426 = vmatpush1.bf16.msra.mxu1 %v16520_v4  ;;  %7386 = vmatprep.subr.bf16.mxu0 %v16521_v31  ;;  %v13611_v31 = vld [vmem:[#allocation6 + $0x1860] ss:$48 sps:$4 sm:$0xff]  }
 0x7f4   :  { %7427 = vmatprep.subr.bf16.mxu1 %v16522_v53  ;;  %v13614_v53 = vld [vmem:[#allocation6 + $0x1868] ss:$48 sps:$4 sm:$0xff]   ;;  %v13617_v4 = vld [vmem:[#allocation6 + $0x18c0] ss:$48 sps:$4 sm:$0xff]  }
 0x7f6   :  { %7387 = vmatpush1.bf16.msra.mxu0 %v16523_v15  ;;  %v13619_v15 = vld [vmem:[#allocation6 + $0x18c4] ss:$48 sps:$4 sm:$0xff]  }
 0x7f7   :  { %7428 = vmatpush1.bf16.msra.mxu1 %v16524_v46  ;;  %8602 = vmatprep.subr.bf16.mxu0 %v13607_v30  ;;  %v13622_v46 = vld [vmem:[#allocation6 + $0x18cc] ss:$48 sps:$4 sm:$0xff]   ;;  %v13623_v30 = vld [vmem:[#allocation6 + $0x1920] ss:$48 sps:$4 sm:$0xff]  }
 0x7f8   :  { %8643 = vmatprep.subr.bf16.mxu1 %v13610_v17  ;;  %v13626_v17 = vld [vmem:[#allocation6 + $0x1928] ss:$48 sps:$4 sm:$0xff]  }
 0x7f9   :  { %7389 = vmatmul.mubr.bf16.vlgmr.msra.gmra.mrb[48].mxu0 %v15609_v59 }
 0x7fa   :  { %7430 = vmatmul.mubr.bf16.vlgmr.msra.gmra.mrb[48].mxu1 %v15609_v59  ;;  %8603 = vmatpush1.bf16.msra.mxu0 %v13605_v38  ;;  %v13620_v59 = vld [vmem:[#allocation6 + $0x18c8] ss:$48 sps:$4 sm:$0xff]   ;;  %v13631_v38 = vld [vmem:[#allocation6 + $0x1984] ss:$48 sps:$4 sm:$0xff]  }
 0x7fb   :  { %8644 = vmatpush1.bf16.msra.mxu1 %v13608_v39  ;;  %8604 = vmatprep.subr.bf16.mxu0 %v13613_v32  ;;  %v13634_v32 = vld [vmem:[#allocation6 + $0x198c] ss:$48 sps:$4 sm:$0xff]   ;;  %v13629_v39 = vld [vmem:[#allocation6 + $0x1980] ss:$48 sps:$4 sm:$0xff]  }
 0x7fc   :  { %8645 = vmatprep.subr.bf16.mxu1 %v13616_v40  ;;  %v13632_v40 = vld [vmem:[#allocation6 + $0x1988] ss:$48 sps:$4 sm:$0xff]  }
 0x7fe   :  { %8605 = vmatpush1.bf16.msra.mxu0 %v13611_v31  ;;  %v13637_v31 = vld [vmem:[#allocation6 + $0x19e4] ss:$48 sps:$4 sm:$0xff]  }
 0x7ff   :  { %8646 = vmatpush1.bf16.msra.mxu1 %v13614_v53  ;;  %8606 = vmatprep.subr.bf16.mxu0 %v13619_v15  ;;  %v13640_v53 = vld [vmem:[#allocation6 + $0x19ec] ss:$48 sps:$4 sm:$0xff]   ;;  %v13635_v15 = vld [vmem:[#allocation6 + $0x19e0] ss:$48 sps:$4 sm:$0xff]  }
 0x800   :  { %8647 = vmatprep.subr.bf16.mxu1 %v13622_v46  ;;  %v13638_v46 = vld [vmem:[#allocation6 + $0x19e8] ss:$48 sps:$4 sm:$0xff]  }
 0x802   :  { %8607 = vmatpush1.bf16.msra.mxu0 %v13617_v4  ;;  %v13643_v4 = vld [vmem:[#allocation6 + $0x1a44] ss:$48 sps:$4 sm:$0xff]  }
 0x803   :  { %8648 = vmatpush1.bf16.msra.mxu1 %v13620_v59  ;;  %8608 = vmatprep.subr.bf16.mxu0 %v13625_v56  ;;  %v13646_v56 = vld [vmem:[#allocation6 + $0x1a4c] ss:$48 sps:$4 sm:$0xff]   ;;  %v13641_v59 = vld [vmem:[#allocation6 + $0x1a40] ss:$48 sps:$4 sm:$0xff]  }
 0x804   :  { %8649 = vmatprep.subr.bf16.mxu1 %v13628_v16  ;;  %v13644_v16 = vld [vmem:[#allocation6 + $0x1a48] ss:$48 sps:$4 sm:$0xff]  }
 0x806   :  { %8609 = vmatpush1.bf16.msra.mxu0 %v13623_v30  ;;  %v13649_v30 = vld [vmem:[#allocation6 + $0x1aa4] ss:$48 sps:$4 sm:$0xff]  }
 0x807   :  { %8650 = vmatpush1.bf16.msra.mxu1 %v13626_v17  ;;  %8610 = vmatprep.subr.bf16.mxu0 %v13631_v38  ;;  %v13652_v17 = vld [vmem:[#allocation6 + $0x1aac] ss:$48 sps:$4 sm:$0xff]   ;;  %v13647_v38 = vld [vmem:[#allocation6 + $0x1aa0] ss:$48 sps:$4 sm:$0xff]  }
 0x808   :  { %8651 = vmatprep.subr.bf16.mxu1 %v13634_v32  ;;  %v13650_v32 = vld [vmem:[#allocation6 + $0x1aa8] ss:$48 sps:$4 sm:$0xff]  }
 0x80a   :  { %8611 = vmatpush1.bf16.msra.mxu0 %v13629_v39  ;;  %v13655_v39 = vld [vmem:[#allocation6 + $0x1b04] ss:$48 sps:$4 sm:$0xff]  }
 0x80b   :  { %8652 = vmatpush1.bf16.msra.mxu1 %v13632_v40  ;;  %8612 = vmatprep.subr.bf16.mxu0 %v13637_v31  ;;  %v13658_v40 = vld [vmem:[#allocation6 + $0x1b0c] ss:$48 sps:$4 sm:$0xff]   ;;  %v13653_v31 = vld [vmem:[#allocation6 + $0x1b00] ss:$48 sps:$4 sm:$0xff]  }
 0x80c   :  { %8653 = vmatprep.subr.bf16.mxu1 %v13640_v53  ;;  %v13656_v53 = vld [vmem:[#allocation6 + $0x1b08] ss:$48 sps:$4 sm:$0xff]  }
 0x80e   :  { %8613 = vmatpush1.bf16.msra.mxu0 %v13635_v15  ;;  %v13661_v15 = vld [vmem:[#allocation6 + $0x1b64] ss:$48 sps:$4 sm:$0xff]  }
 0x80f   :  { %8654 = vmatpush1.bf16.msra.mxu1 %v13638_v46  ;;  %8614 = vmatprep.subr.bf16.mxu0 %v13643_v4  ;;  %v13664_v46 = vld [vmem:[#allocation6 + $0x1b6c] ss:$48 sps:$4 sm:$0xff]   ;;  %v13659_v4 = vld [vmem:[#allocation6 + $0x1b60] ss:$48 sps:$4 sm:$0xff]  }
 0x810   :  { %8655 = vmatprep.subr.bf16.mxu1 %v13646_v56  ;;  %v13662_v56 = vld [vmem:[#allocation6 + $0x1b68] ss:$48 sps:$4 sm:$0xff]  }
 0x812   :  { %8615 = vmatpush1.bf16.msra.mxu0 %v13641_v59  ;;  %v13667_v59 = vld [vmem:[#allocation6 + $0x1bc4] ss:$48 sps:$4 sm:$0xff]  }
 0x813   :  { %8656 = vmatpush1.bf16.msra.mxu1 %v13644_v16  ;;  %8616 = vmatprep.subr.bf16.mxu0 %v13649_v30  ;;  %v13670_v16 = vld [vmem:[#allocation6 + $0x1bcc] ss:$48 sps:$4 sm:$0xff]   ;;  %v13665_v30 = vld [vmem:[#allocation6 + $0x1bc0] ss:$48 sps:$4 sm:$0xff]  }
 0x814   :  { %8657 = vmatprep.subr.bf16.mxu1 %v13652_v17  ;;  %v13668_v17 = vld [vmem:[#allocation6 + $0x1bc8] ss:$48 sps:$4 sm:$0xff]  }
 0x816   :  { %8617 = vmatpush1.bf16.msra.mxu0 %v13647_v38  ;;  %v13673_v38 = vld [vmem:[#allocation6 + $0x1c24] ss:$48 sps:$4 sm:$0xff]  }
 0x817   :  { %8658 = vmatpush1.bf16.msra.mxu1 %v13650_v32  ;;  %8618 = vmatprep.subr.bf16.mxu0 %v13655_v39  ;;  %v13676_v32 = vld [vmem:[#allocation6 + $0x1c2c] ss:$48 sps:$4 sm:$0xff]   ;;  %v13671_v39 = vld [vmem:[#allocation6 + $0x1c20] ss:$48 sps:$4 sm:$0xff]  }
 0x818   :  { %8659 = vmatprep.subr.bf16.mxu1 %v13658_v40  ;;  %v13674_v40 = vld [vmem:[#allocation6 + $0x1c28] ss:$48 sps:$4 sm:$0xff]  }
 0x81a   :  { %8619 = vmatpush1.bf16.msra.mxu0 %v13653_v31  ;;  %v13679_v31 = vld [vmem:[#allocation6 + $0x1c84] ss:$48 sps:$4 sm:$0xff]  }
 0x81b   :  { %8660 = vmatpush1.bf16.msra.mxu1 %v13656_v53  ;;  %8620 = vmatprep.subr.bf16.mxu0 %v13661_v15  ;;  %v13682_v53 = vld [vmem:[#allocation6 + $0x1c8c] ss:$48 sps:$4 sm:$0xff]   ;;  %v13677_v15 = vld [vmem:[#allocation6 + $0x1c80] ss:$48 sps:$4 sm:$0xff]  }
 0x81c   :  { %8661 = vmatprep.subr.bf16.mxu1 %v13664_v46  ;;  %v13680_v46 = vld [vmem:[#allocation6 + $0x1c88] ss:$48 sps:$4 sm:$0xff]  }
 0x81e   :  { %8621 = vmatpush1.bf16.msra.mxu0 %v13659_v4  ;;  %v13685_v4 = vld [vmem:[#allocation6 + $0x1ce4] ss:$48 sps:$4 sm:$0xff]  }
 0x81f   :  { %8662 = vmatpush1.bf16.msra.mxu1 %v13662_v56  ;;  %8622 = vmatprep.subr.bf16.mxu0 %v13667_v59  ;;  %v13688_v56 = vld [vmem:[#allocation6 + $0x1cec] ss:$48 sps:$4 sm:$0xff]   ;;  %v13683_v59 = vld [vmem:[#allocation6 + $0x1ce0] ss:$48 sps:$4 sm:$0xff]  }
 0x820   :  { %8663 = vmatprep.subr.bf16.mxu1 %v13670_v16  ;;  %v13686_v16 = vld [vmem:[#allocation6 + $0x1ce8] ss:$48 sps:$4 sm:$0xff]  }
 0x822   :  { %8623 = vmatpush1.bf16.msra.mxu0 %v13665_v30  ;;  %v13691_v30 = vld [vmem:[#allocation6 + $0x1d44] ss:$48 sps:$4 sm:$0xff]  }
 0x823   :  { %8664 = vmatpush1.bf16.msra.mxu1 %v13668_v17  ;;  %8624 = vmatprep.subr.bf16.mxu0 %v13673_v38  ;;  %v13694_v17 = vld [vmem:[#allocation6 + $0x1d4c] ss:$48 sps:$4 sm:$0xff]   ;;  %v13689_v38 = vld [vmem:[#allocation6 + $0x1d40] ss:$48 sps:$4 sm:$0xff]  }
 0x824   :  { %8665 = vmatprep.subr.bf16.mxu1 %v13676_v32  ;;  %v13692_v32 = vld [vmem:[#allocation6 + $0x1d48] ss:$48 sps:$4 sm:$0xff]  }
 0x826   :  { %8625 = vmatpush1.bf16.msra.mxu0 %v13671_v39  ;;  %v13697_v39 = vld [vmem:[#allocation6 + $0x1da4] ss:$48 sps:$4 sm:$0xff]  }
 0x827   :  { %8666 = vmatpush1.bf16.msra.mxu1 %v13674_v40  ;;  %8626 = vmatprep.subr.bf16.mxu0 %v13679_v31  ;;  %v13700_v40 = vld [vmem:[#allocation6 + $0x1dac] ss:$48 sps:$4 sm:$0xff]   ;;  %v13695_v31 = vld [vmem:[#allocation6 + $0x1da0] ss:$48 sps:$4 sm:$0xff]  }
 0x828   :  { %8667 = vmatprep.subr.bf16.mxu1 %v13682_v53  ;;  %v13698_v53 = vld [vmem:[#allocation6 + $0x1da8] ss:$48 sps:$4 sm:$0xff]  }
 0x82a   :  { %8627 = vmatpush1.bf16.msra.mxu0 %v13677_v15  ;;  %v13703_v15 = vld [vmem:[#allocation6 + $0x1814] ss:$48 sps:$4 sm:$0xff]  }
 0x82b   :  { %8668 = vmatpush1.bf16.msra.mxu1 %v13680_v46  ;;  %8628 = vmatprep.subr.bf16.mxu0 %v13685_v4  ;;  %v13706_v46 = vld [vmem:[#allocation6 + $0x181c] ss:$48 sps:$4 sm:$0xff]  }
 0x82c   :  { %8669 = vmatprep.subr.bf16.mxu1 %v13688_v56 }
 0x82e   :  { %8629 = vmatpush1.bf16.msra.mxu0 %v13683_v59 }
 0x82f   :  { %8670 = vmatpush1.bf16.msra.mxu1 %v13686_v16  ;;  %8630 = vmatprep.subr.bf16.mxu0 %v13691_v30 }
 0x830   :  { %8671 = vmatprep.subr.bf16.mxu1 %v13694_v17 }
 0x832   :  { %8631 = vmatpush1.bf16.msra.mxu0 %v13689_v38 }
 0x833   :  { %8672 = vmatpush1.bf16.msra.mxu1 %v13692_v32  ;;  %8632 = vmatprep.subr.bf16.mxu0 %v13697_v39 }
 0x834   :  { %8673 = vmatprep.subr.bf16.mxu1 %v13700_v40 }
 0x836   :  { %8633 = vmatpush1.bf16.msra.mxu0 %v13695_v31 }
 0x837   :  { %8674 = vmatpush1.bf16.msra.mxu1 %v13698_v53  ;;  %8684 = vmatprep.subr.bf16.mxu0 %v13703_v15 }
 0x838   :  { %8725 = vmatprep.subr.bf16.mxu1 %v13706_v46 }
 0x88c   :  { %v7308_v4 = vpop.f32.mrb[44].mxu0 }
 0x88d   :  { %v7349_v56 = vpop.f32.mrb[44].mxu1  ;;  %v7310_v59 = vpop.f32.mrb[45].mxu0 }
 0x88e   :  { %v7438_v16 = vmax.f32 %v7308_v4, %v7349_v56  ;;  %v7351_v30 = vpop.f32.mrb[45].mxu1  ;;  %v7312_v17 = vpop.f32.mrb[46].mxu0 }
 0x88f   :  { %v7439_v38 = vmax.f32 %v7310_v59, %v7351_v30  ;;  %v7353_v32 = vpop.f32.mrb[46].mxu1  ;;  %v7313_v25 = vpop.f32.mrb[47].mxu0  ;;  %v13704_v17 = vld [vmem:[#allocation6 + $0x1818] ss:$48 sps:$4 sm:$0xff]  }
 0x890   :  { %v7354_v47 = vpop.f32.mrb[47].mxu1 }
 0x891   :  { %v13701_v47 = vld [vmem:[#allocation6 + $0x1810] ss:$48 sps:$4 sm:$0xff]  }
 0x8cc   :  { %v7390_v2 = vpop.f32.mrb[48].mxu0 }
 0x8cd   :  { %v7431_v57 = vpop.f32.mrb[48].mxu1  ;;  %v7392_v39 = vpop.f32.mrb[49].mxu0 }
 0x8ce   :  { %v7440_v40 = vmax.f32 %v7390_v2, %v7431_v57  ;;  %v7433_v31 = vpop.f32.mrb[49].mxu1  ;;  %v7394_v53 = vpop.f32.mrb[50].mxu0  ;;  %v13712_v57 = vld [vmem:[#allocation6 + $0x187c] ss:$48 sps:$4 sm:$0xff]  }
 0x8cf   :  { %v7441_v13 = vmax.f32 %v7392_v39, %v7433_v31  ;;  %v7435_v0 = vpop.f32.mrb[50].mxu1  ;;  %v7395_v15 = vpop.f32.mrb[51].mxu0  ;;  %v13718_v2 = vld [vmem:[#allocation6 + $0x18dc] ss:$48 sps:$4 sm:$0xff]   ;;  %v13721_v39 = vld [vmem:[#allocation6 + $0x1934] ss:$48 sps:$4 sm:$0xff]  }
 0x8d0   :  { %v7442_v46 = vmax.f32 %v7438_v16, %v7440_v40  ;;  %v7436_v41 = vpop.f32.mrb[51].mxu1  ;;  %v13709_v0 = vld [vmem:[#allocation6 + $0x1874] ss:$48 sps:$4 sm:$0xff]   ;;  %v13713_v16 = vld [vmem:[#allocation6 + $0x18d0] ss:$48 sps:$4 sm:$0xff]  }
 0x8d1   :  { %v7443_v49 = vmax.f32 %v7439_v38, %v7441_v13  ;;  %v13710_v41 = vld [vmem:[#allocation6 + $0x1878] ss:$48 sps:$4 sm:$0xff]   ;;  %v13715_v13 = vld [vmem:[#allocation6 + $0x18d4] ss:$48 sps:$4 sm:$0xff]   ;;  %v13724_v40 = vld [vmem:[#allocation6 + $0x193c] ss:$48 sps:$4 sm:$0xff]  }
 0x8d2   :  { %v7444_v4 = vadd.f32 %v7442_v46, %v15156_v33  ;;  %v13716_v38 = vld [vmem:[#allocation6 + $0x18d8] ss:$48 sps:$4 sm:$0xff]   ;;  %v13719_v31 = vld [vmem:[#allocation6 + $0x1930] ss:$48 sps:$4 sm:$0xff]   ;;  %v13727_v15 = vld [vmem:[#allocation6 + $0x1994] ss:$48 sps:$4 sm:$0xff]  }
 0x8d3   :  { %v7445_v56 = vadd.f32 %v7443_v49, %v15160_v48  ;;  %v13707_v49 = vld [vmem:[#allocation6 + $0x1870] ss:$48 sps:$4 sm:$0xff]   ;;  %v13722_v53 = vld [vmem:[#allocation6 + $0x1938] ss:$48 sps:$4 sm:$0xff]   ;;  %v13730_v46 = vld [vmem:[#allocation6 + $0x199c] ss:$48 sps:$4 sm:$0xff]  }
 0x8d4   :  { %v7446_v59 = vmax.f32 %v7444_v4, 0.0  ;;  %v13725_v4 = vld [vmem:[#allocation6 + $0x1990] ss:$48 sps:$4 sm:$0xff]  }
 0x8d5   :  { %v7447_v30 = vmax.f32 %v7445_v56, 0.0  ;;  %v13728_v56 = vld [vmem:[#allocation6 + $0x1998] ss:$48 sps:$4 sm:$0xff]  }
 0x8d6   :  { %v15687_v32 = vpack.c.bf16 %v7446_v59, %v7446_v59  ;;  %v13733_v59 = vld [vmem:[#allocation6 + $0x19f4] ss:$48 sps:$4 sm:$0xff]  }
 0x8d7   :  { %v15685_v25 = vpack.c.bf16 %v7447_v30, %v7447_v30  ;;  %v13736_v30 = vld [vmem:[#allocation6 + $0x19fc] ss:$48 sps:$4 sm:$0xff]  }
 0x8d9   :  { %8634 = vmatprep.mubr.bf16.mxu0 %v15685_v25  ;;  %8675 = vmatprep.mubr.bf16.mxu1 %v15685_v25 }
 0x8da   :  { %8635 = vmatmul.mubr.bf16.vlgmr.msra.gmra.mrb[16].mxu0 %v15687_v32  ;;  %8676 = vmatmul.mubr.bf16.vlgmr.msra.gmra.mrb[16].mxu1 %v15687_v32 }
 0x8db   :  { %8685 = vmatpush1.bf16.msra.mxu0 %v13701_v47  ;;  %8726 = vmatpush1.bf16.msra.mxu1 %v13704_v17  ;;  %v13731_v47 = vld [vmem:[#allocation6 + $0x19f0] ss:$48 sps:$4 sm:$0xff]   ;;  %v13734_v17 = vld [vmem:[#allocation6 + $0x19f8] ss:$48 sps:$4 sm:$0xff]  }
 0x8dc   :  { %8716 = vmatprep.mubr.bf16.mxu0 %v15685_v25  ;;  %8757 = vmatprep.mubr.bf16.mxu1 %v15685_v25 }
 0x8dd   :  { %8686 = vmatprep.subr.bf16.mxu0 %v13709_v0  ;;  %8727 = vmatprep.subr.bf16.mxu1 %v13712_v57  ;;  %v13739_v0 = vld [vmem:[#allocation6 + $0x1a54] ss:$48 sps:$4 sm:$0xff]   ;;  %v13742_v57 = vld [vmem:[#allocation6 + $0x1a5c] ss:$48 sps:$4 sm:$0xff]  }
 0x8df   :  { %8687 = vmatpush1.bf16.msra.mxu0 %v13707_v49  ;;  %8728 = vmatpush1.bf16.msra.mxu1 %v13710_v41  ;;  %v13737_v49 = vld [vmem:[#allocation6 + $0x1a50] ss:$48 sps:$4 sm:$0xff]   ;;  %v13740_v41 = vld [vmem:[#allocation6 + $0x1a58] ss:$48 sps:$4 sm:$0xff]  }
 0x8e0   :  { %8688 = vmatprep.subr.bf16.mxu0 %v13715_v13  ;;  %8729 = vmatprep.subr.bf16.mxu1 %v13718_v2  ;;  %v13745_v13 = vld [vmem:[#allocation6 + $0x1ab4] ss:$48 sps:$4 sm:$0xff]   ;;  %v13748_v2 = vld [vmem:[#allocation6 + $0x1abc] ss:$48 sps:$4 sm:$0xff]  }
 0x8e3   :  { %8689 = vmatpush1.bf16.msra.mxu0 %v13713_v16  ;;  %8730 = vmatpush1.bf16.msra.mxu1 %v13716_v38  ;;  %v13743_v16 = vld [vmem:[#allocation6 + $0x1ab0] ss:$48 sps:$4 sm:$0xff]   ;;  %v13746_v38 = vld [vmem:[#allocation6 + $0x1ab8] ss:$48 sps:$4 sm:$0xff]  }
 0x8e4   :  { %8690 = vmatprep.subr.bf16.mxu0 %v13721_v39  ;;  %8731 = vmatprep.subr.bf16.mxu1 %v13724_v40  ;;  %v13751_v39 = vld [vmem:[#allocation6 + $0x1b14] ss:$48 sps:$4 sm:$0xff]   ;;  %v13754_v40 = vld [vmem:[#allocation6 + $0x1b1c] ss:$48 sps:$4 sm:$0xff]  }
 0x8e7   :  { %8691 = vmatpush1.bf16.msra.mxu0 %v13719_v31  ;;  %8732 = vmatpush1.bf16.msra.mxu1 %v13722_v53  ;;  %v13749_v31 = vld [vmem:[#allocation6 + $0x1b10] ss:$48 sps:$4 sm:$0xff]   ;;  %v13752_v53 = vld [vmem:[#allocation6 + $0x1b18] ss:$48 sps:$4 sm:$0xff]  }
 0x8e8   :  { %8692 = vmatprep.subr.bf16.mxu0 %v13727_v15  ;;  %8733 = vmatprep.subr.bf16.mxu1 %v13730_v46  ;;  %v13757_v15 = vld [vmem:[#allocation6 + $0x1b74] ss:$48 sps:$4 sm:$0xff]   ;;  %v13760_v46 = vld [vmem:[#allocation6 + $0x1b7c] ss:$48 sps:$4 sm:$0xff]  }
 0x8eb   :  { %8693 = vmatpush1.bf16.msra.mxu0 %v13725_v4  ;;  %8734 = vmatpush1.bf16.msra.mxu1 %v13728_v56  ;;  %v13755_v4 = vld [vmem:[#allocation6 + $0x1b70] ss:$48 sps:$4 sm:$0xff]   ;;  %v13758_v56 = vld [vmem:[#allocation6 + $0x1b78] ss:$48 sps:$4 sm:$0xff]  }
 0x8ec   :  { %8694 = vmatprep.subr.bf16.mxu0 %v13733_v59  ;;  %8735 = vmatprep.subr.bf16.mxu1 %v13736_v30  ;;  %v13763_v59 = vld [vmem:[#allocation6 + $0x1bd4] ss:$48 sps:$4 sm:$0xff]   ;;  %v13766_v30 = vld [vmem:[#allocation6 + $0x1bdc] ss:$48 sps:$4 sm:$0xff]  }
 0x8ef   :  { %8695 = vmatpush1.bf16.msra.mxu0 %v13731_v47  ;;  %8736 = vmatpush1.bf16.msra.mxu1 %v13734_v17  ;;  %v13761_v47 = vld [vmem:[#allocation6 + $0x1bd0] ss:$48 sps:$4 sm:$0xff]   ;;  %v13764_v17 = vld [vmem:[#allocation6 + $0x1bd8] ss:$48 sps:$4 sm:$0xff]  }
 0x8f0   :  { %8696 = vmatprep.subr.bf16.mxu0 %v13739_v0  ;;  %8737 = vmatprep.subr.bf16.mxu1 %v13742_v57  ;;  %v13769_v0 = vld [vmem:[#allocation6 + $0x1c34] ss:$48 sps:$4 sm:$0xff]   ;;  %v13772_v57 = vld [vmem:[#allocation6 + $0x1c3c] ss:$48 sps:$4 sm:$0xff]  }
 0x8f3   :  { %8697 = vmatpush1.bf16.msra.mxu0 %v13737_v49  ;;  %8738 = vmatpush1.bf16.msra.mxu1 %v13740_v41  ;;  %v13767_v49 = vld [vmem:[#allocation6 + $0x1c30] ss:$48 sps:$4 sm:$0xff]   ;;  %v13770_v41 = vld [vmem:[#allocation6 + $0x1c38] ss:$48 sps:$4 sm:$0xff]  }
 0x8f4   :  { %8698 = vmatprep.subr.bf16.mxu0 %v13745_v13  ;;  %8739 = vmatprep.subr.bf16.mxu1 %v13748_v2  ;;  %v13775_v13 = vld [vmem:[#allocation6 + $0x1c94] ss:$48 sps:$4 sm:$0xff]   ;;  %v13778_v2 = vld [vmem:[#allocation6 + $0x1c9c] ss:$48 sps:$4 sm:$0xff]  }
 0x8f7   :  { %8699 = vmatpush1.bf16.msra.mxu0 %v13743_v16  ;;  %8740 = vmatpush1.bf16.msra.mxu1 %v13746_v38  ;;  %v13773_v16 = vld [vmem:[#allocation6 + $0x1c90] ss:$48 sps:$4 sm:$0xff]   ;;  %v13776_v38 = vld [vmem:[#allocation6 + $0x1c98] ss:$48 sps:$4 sm:$0xff]  }
 0x8f8   :  { %8700 = vmatprep.subr.bf16.mxu0 %v13751_v39  ;;  %8741 = vmatprep.subr.bf16.mxu1 %v13754_v40  ;;  %v13781_v39 = vld [vmem:[#allocation6 + $0x1cf4] ss:$48 sps:$4 sm:$0xff]   ;;  %v13784_v40 = vld [vmem:[#allocation6 + $0x1cfc] ss:$48 sps:$4 sm:$0xff]  }
 0x8fb   :  { %8701 = vmatpush1.bf16.msra.mxu0 %v13749_v31  ;;  %8742 = vmatpush1.bf16.msra.mxu1 %v13752_v53  ;;  %v13779_v31 = vld [vmem:[#allocation6 + $0x1cf0] ss:$48 sps:$4 sm:$0xff]   ;;  %v13782_v53 = vld [vmem:[#allocation6 + $0x1cf8] ss:$48 sps:$4 sm:$0xff]  }
 0x8fc   :  { %8702 = vmatprep.subr.bf16.mxu0 %v13757_v15  ;;  %8743 = vmatprep.subr.bf16.mxu1 %v13760_v46  ;;  %v13787_v15 = vld [vmem:[#allocation6 + $0x1d54] ss:$48 sps:$4 sm:$0xff]   ;;  %v13790_v46 = vld [vmem:[#allocation6 + $0x1d5c] ss:$48 sps:$4 sm:$0xff]  }
 0x8ff   :  { %8703 = vmatpush1.bf16.msra.mxu0 %v13755_v4  ;;  %8744 = vmatpush1.bf16.msra.mxu1 %v13758_v56  ;;  %v13785_v4 = vld [vmem:[#allocation6 + $0x1d50] ss:$48 sps:$4 sm:$0xff]   ;;  %v13788_v56 = vld [vmem:[#allocation6 + $0x1d58] ss:$48 sps:$4 sm:$0xff]  }
 0x900   :  { %8704 = vmatprep.subr.bf16.mxu0 %v13763_v59  ;;  %8745 = vmatprep.subr.bf16.mxu1 %v13766_v30  ;;  %v13793_v59 = vld [vmem:[#allocation6 + $0x1db4] ss:$48 sps:$4 sm:$0xff]   ;;  %v13796_v30 = vld [vmem:[#allocation6 + $0x1dbc] ss:$48 sps:$4 sm:$0xff]  }
 0x903   :  { %8705 = vmatpush1.bf16.msra.mxu0 %v13761_v47  ;;  %8746 = vmatpush1.bf16.msra.mxu1 %v13764_v17  ;;  %v13791_v47 = vld [vmem:[#allocation6 + $0x1db0] ss:$48 sps:$4 sm:$0xff]   ;;  %v13794_v17 = vld [vmem:[#allocation6 + $0x1db8] ss:$48 sps:$4 sm:$0xff]  }
 0x904   :  { %8706 = vmatprep.subr.bf16.mxu0 %v13769_v0  ;;  %8747 = vmatprep.subr.bf16.mxu1 %v13772_v57  ;;  %v13799_v0 = vld [vmem:[#allocation6 + $0x1824] ss:$48 sps:$4 sm:$0xff]   ;;  %v13802_v57 = vld [vmem:[#allocation6 + $0x182c] ss:$48 sps:$4 sm:$0xff]  }
 0x907   :  { %8707 = vmatpush1.bf16.msra.mxu0 %v13767_v49  ;;  %8748 = vmatpush1.bf16.msra.mxu1 %v13770_v41  ;;  %v13797_v49 = vld [vmem:[#allocation6 + $0x1820] ss:$48 sps:$4 sm:$0xff]   ;;  %v13800_v41 = vld [vmem:[#allocation6 + $0x1828] ss:$48 sps:$4 sm:$0xff]  }
 0x908   :  { %8708 = vmatprep.subr.bf16.mxu0 %v13775_v13  ;;  %8749 = vmatprep.subr.bf16.mxu1 %v13778_v2  ;;  %v13805_v13 = vld [vmem:[#allocation6 + $0x1884] ss:$48 sps:$4 sm:$0xff]   ;;  %v13808_v2 = vld [vmem:[#allocation6 + $0x188c] ss:$48 sps:$4 sm:$0xff]  }
 0x90b   :  { %8709 = vmatpush1.bf16.msra.mxu0 %v13773_v16  ;;  %8750 = vmatpush1.bf16.msra.mxu1 %v13776_v38  ;;  %v13803_v16 = vld [vmem:[#allocation6 + $0x1880] ss:$48 sps:$4 sm:$0xff]   ;;  %v13806_v38 = vld [vmem:[#allocation6 + $0x1888] ss:$48 sps:$4 sm:$0xff]  }
 0x90c   :  { %8710 = vmatprep.subr.bf16.mxu0 %v13781_v39  ;;  %8751 = vmatprep.subr.bf16.mxu1 %v13784_v40  ;;  %v13811_v39 = vld [vmem:[#allocation6 + $0x18e4] ss:$48 sps:$4 sm:$0xff]   ;;  %v13814_v40 = vld [vmem:[#allocation6 + $0x18ec] ss:$48 sps:$4 sm:$0xff]  }
 0x90f   :  { %8711 = vmatpush1.bf16.msra.mxu0 %v13779_v31  ;;  %8752 = vmatpush1.bf16.msra.mxu1 %v13782_v53  ;;  %v13809_v31 = vld [vmem:[#allocation6 + $0x18e0] ss:$48 sps:$4 sm:$0xff]   ;;  %v13812_v53 = vld [vmem:[#allocation6 + $0x18e8] ss:$48 sps:$4 sm:$0xff]  }
 0x910   :  { %8712 = vmatprep.subr.bf16.mxu0 %v13787_v15  ;;  %8753 = vmatprep.subr.bf16.mxu1 %v13790_v46  ;;  %v13817_v15 = vld [vmem:[#allocation6 + $0x1944] ss:$48 sps:$4 sm:$0xff]   ;;  %v13820_v46 = vld [vmem:[#allocation6 + $0x194c] ss:$48 sps:$4 sm:$0xff]  }
 0x913   :  { %8713 = vmatpush1.bf16.msra.mxu0 %v13785_v4  ;;  %8754 = vmatpush1.bf16.msra.mxu1 %v13788_v56  ;;  %v13815_v4 = vld [vmem:[#allocation6 + $0x1940] ss:$48 sps:$4 sm:$0xff]   ;;  %v13818_v56 = vld [vmem:[#allocation6 + $0x1948] ss:$48 sps:$4 sm:$0xff]  }
 0x914   :  { %8714 = vmatprep.subr.bf16.mxu0 %v13793_v59  ;;  %8755 = vmatprep.subr.bf16.mxu1 %v13796_v30  ;;  %v13823_v59 = vld [vmem:[#allocation6 + $0x19a4] ss:$48 sps:$4 sm:$0xff]   ;;  %v13821_v30 = vld [vmem:[#allocation6 + $0x19a0] ss:$48 sps:$4 sm:$0xff]  }
 0x917   :  { %8715 = vmatpush1.bf16.msra.mxu0 %v13791_v47  ;;  %8756 = vmatpush1.bf16.msra.mxu1 %v13794_v17  ;;  %v13824_v47 = vld [vmem:[#allocation6 + $0x19a8] ss:$48 sps:$4 sm:$0xff]   ;;  %v13829_v17 = vld [vmem:[#allocation6 + $0x1a04] ss:$48 sps:$4 sm:$0xff]  }
 0x918   :  { %8766 = vmatprep.subr.bf16.mxu0 %v13799_v0  ;;  %8807 = vmatprep.subr.bf16.mxu1 %v13802_v57  ;;  %v13832_v0 = vld [vmem:[#allocation6 + $0x1a0c] ss:$48 sps:$4 sm:$0xff]   ;;  %v13827_v57 = vld [vmem:[#allocation6 + $0x1a00] ss:$48 sps:$4 sm:$0xff]  }
 0x91a   :  { %8717 = vmatmul.mubr.bf16.vlgmr.msra.gmra.mrb[20].mxu0 %v15687_v32  ;;  %8758 = vmatmul.mubr.bf16.vlgmr.msra.gmra.mrb[20].mxu1 %v15687_v32 }
 0x91b   :  { %8767 = vmatpush1.bf16.msra.mxu0 %v13797_v49  ;;  %8798 = vmatprep.mubr.bf16.mxu0 %v15685_v25  ;;  %v13830_v49 = vld [vmem:[#allocation6 + $0x1a08] ss:$48 sps:$4 sm:$0xff]  }
 0x91c   :  { %8808 = vmatpush1.bf16.msra.mxu1 %v13800_v41  ;;  %8839 = vmatprep.mubr.bf16.mxu1 %v15685_v25  ;;  %v13826_v25 = vld [vmem:[#allocation6 + $0x19ac] ss:$48 sps:$4 sm:$0xff]   ;;  %v13835_v41 = vld [vmem:[#allocation6 + $0x1a64] ss:$48 sps:$4 sm:$0xff]  }
 0x91d   :  { %8768 = vmatprep.subr.bf16.mxu0 %v13805_v13  ;;  %8809 = vmatprep.subr.bf16.mxu1 %v13808_v2  ;;  %v13838_v13 = vld [vmem:[#allocation6 + $0x1a6c] ss:$48 sps:$4 sm:$0xff]   ;;  %v13833_v2 = vld [vmem:[#allocation6 + $0x1a60] ss:$48 sps:$4 sm:$0xff]  }
 0x91f   :  { %8769 = vmatpush1.bf16.msra.mxu0 %v13803_v16  ;;  %v13836_v16 = vld [vmem:[#allocation6 + $0x1a68] ss:$48 sps:$4 sm:$0xff]  }
 0x920   :  { %8810 = vmatpush1.bf16.msra.mxu1 %v13806_v38  ;;  %8770 = vmatprep.subr.bf16.mxu0 %v13811_v39  ;;  %v13841_v38 = vld [vmem:[#allocation6 + $0x1ac4] ss:$48 sps:$4 sm:$0xff]   ;;  %v13844_v39 = vld [vmem:[#allocation6 + $0x1acc] ss:$48 sps:$4 sm:$0xff]  }
 0x921   :  { %8811 = vmatprep.subr.bf16.mxu1 %v13814_v40  ;;  %v13839_v40 = vld [vmem:[#allocation6 + $0x1ac0] ss:$48 sps:$4 sm:$0xff]  }
 0x923   :  { %8771 = vmatpush1.bf16.msra.mxu0 %v13809_v31  ;;  %v13842_v31 = vld [vmem:[#allocation6 + $0x1ac8] ss:$48 sps:$4 sm:$0xff]  }
 0x924   :  { %8812 = vmatpush1.bf16.msra.mxu1 %v13812_v53  ;;  %8772 = vmatprep.subr.bf16.mxu0 %v13817_v15  ;;  %v13847_v53 = vld [vmem:[#allocation6 + $0x1b24] ss:$48 sps:$4 sm:$0xff]   ;;  %v13850_v15 = vld [vmem:[#allocation6 + $0x1b2c] ss:$48 sps:$4 sm:$0xff]  }
 0x925   :  { %8813 = vmatprep.subr.bf16.mxu1 %v13820_v46  ;;  %v13845_v46 = vld [vmem:[#allocation6 + $0x1b20] ss:$48 sps:$4 sm:$0xff]  }
 0x927   :  { %8773 = vmatpush1.bf16.msra.mxu0 %v13815_v4  ;;  %v13848_v4 = vld [vmem:[#allocation6 + $0x1b28] ss:$48 sps:$4 sm:$0xff]  }
 0x928   :  { %8814 = vmatpush1.bf16.msra.mxu1 %v13818_v56  ;;  %8774 = vmatprep.subr.bf16.mxu0 %v13823_v59  ;;  %v13853_v56 = vld [vmem:[#allocation6 + $0x1b84] ss:$48 sps:$4 sm:$0xff]   ;;  %v13856_v59 = vld [vmem:[#allocation6 + $0x1b8c] ss:$48 sps:$4 sm:$0xff]  }
 0x929   :  { %8815 = vmatprep.subr.bf16.mxu1 %v13826_v25  ;;  %v13851_v25 = vld [vmem:[#allocation6 + $0x1b80] ss:$48 sps:$4 sm:$0xff]  }
 0x92b   :  { %8775 = vmatpush1.bf16.msra.mxu0 %v13821_v30  ;;  %v13854_v30 = vld [vmem:[#allocation6 + $0x1b88] ss:$48 sps:$4 sm:$0xff]  }
 0x92c   :  { %8816 = vmatpush1.bf16.msra.mxu1 %v13824_v47  ;;  %8776 = vmatprep.subr.bf16.mxu0 %v13829_v17  ;;  %v13859_v47 = vld [vmem:[#allocation6 + $0x1be4] ss:$48 sps:$4 sm:$0xff]   ;;  %v13862_v17 = vld [vmem:[#allocation6 + $0x1bec] ss:$48 sps:$4 sm:$0xff]  }
 0x92d   :  { %8817 = vmatprep.subr.bf16.mxu1 %v13832_v0  ;;  %v13857_v0 = vld [vmem:[#allocation6 + $0x1be0] ss:$48 sps:$4 sm:$0xff]  }
 0x92f   :  { %8777 = vmatpush1.bf16.msra.mxu0 %v13827_v57  ;;  %v13860_v57 = vld [vmem:[#allocation6 + $0x1be8] ss:$48 sps:$4 sm:$0xff]  }
 0x930   :  { %8818 = vmatpush1.bf16.msra.mxu1 %v13830_v49  ;;  %8778 = vmatprep.subr.bf16.mxu0 %v13835_v41  ;;  %v13865_v49 = vld [vmem:[#allocation6 + $0x1c44] ss:$48 sps:$4 sm:$0xff]   ;;  %v13868_v41 = vld [vmem:[#allocation6 + $0x1c4c] ss:$48 sps:$4 sm:$0xff]  }
 0x931   :  { %8819 = vmatprep.subr.bf16.mxu1 %v13838_v13  ;;  %v13863_v13 = vld [vmem:[#allocation6 + $0x1c40] ss:$48 sps:$4 sm:$0xff]  }
 0x933   :  { %8779 = vmatpush1.bf16.msra.mxu0 %v13833_v2  ;;  %v13866_v2 = vld [vmem:[#allocation6 + $0x1c48] ss:$48 sps:$4 sm:$0xff]  }
 0x934   :  { %8820 = vmatpush1.bf16.msra.mxu1 %v13836_v16  ;;  %8780 = vmatprep.subr.bf16.mxu0 %v13841_v38  ;;  %v13871_v16 = vld [vmem:[#allocation6 + $0x1ca4] ss:$48 sps:$4 sm:$0xff]   ;;  %v13874_v38 = vld [vmem:[#allocation6 + $0x1cac] ss:$48 sps:$4 sm:$0xff]  }
 0x935   :  { %8821 = vmatprep.subr.bf16.mxu1 %v13844_v39  ;;  %v13869_v39 = vld [vmem:[#allocation6 + $0x1ca0] ss:$48 sps:$4 sm:$0xff]  }
 0x937   :  { %8781 = vmatpush1.bf16.msra.mxu0 %v13839_v40  ;;  %v13872_v40 = vld [vmem:[#allocation6 + $0x1ca8] ss:$48 sps:$4 sm:$0xff]  }
 0x938   :  { %8822 = vmatpush1.bf16.msra.mxu1 %v13842_v31  ;;  %8782 = vmatprep.subr.bf16.mxu0 %v13847_v53  ;;  %v13877_v31 = vld [vmem:[#allocation6 + $0x1d04] ss:$48 sps:$4 sm:$0xff]   ;;  %v13880_v53 = vld [vmem:[#allocation6 + $0x1d0c] ss:$48 sps:$4 sm:$0xff]  }
 0x939   :  { %8823 = vmatprep.subr.bf16.mxu1 %v13850_v15  ;;  %v13875_v15 = vld [vmem:[#allocation6 + $0x1d00] ss:$48 sps:$4 sm:$0xff]  }
 0x93b   :  { %8783 = vmatpush1.bf16.msra.mxu0 %v13845_v46  ;;  %v13878_v46 = vld [vmem:[#allocation6 + $0x1d08] ss:$48 sps:$4 sm:$0xff]  }
 0x93c   :  { %8824 = vmatpush1.bf16.msra.mxu1 %v13848_v4  ;;  %8784 = vmatprep.subr.bf16.mxu0 %v13853_v56  ;;  %v13883_v4 = vld [vmem:[#allocation6 + $0x1d64] ss:$48 sps:$4 sm:$0xff]   ;;  %v13886_v56 = vld [vmem:[#allocation6 + $0x1d6c] ss:$48 sps:$4 sm:$0xff]  }
 0x93d   :  { %8825 = vmatprep.subr.bf16.mxu1 %v13856_v59  ;;  %v13881_v59 = vld [vmem:[#allocation6 + $0x1d60] ss:$48 sps:$4 sm:$0xff]  }
 0x93f   :  { %8785 = vmatpush1.bf16.msra.mxu0 %v13851_v25  ;;  %v13884_v25 = vld [vmem:[#allocation6 + $0x1d68] ss:$48 sps:$4 sm:$0xff]  }
 0x940   :  { %8826 = vmatpush1.bf16.msra.mxu1 %v13854_v30  ;;  %8786 = vmatprep.subr.bf16.mxu0 %v13859_v47  ;;  %v13889_v30 = vld [vmem:[#allocation6 + $0x1dc4] ss:$48 sps:$4 sm:$0xff]   ;;  %v13892_v47 = vld [vmem:[#allocation6 + $0x1dcc] ss:$48 sps:$4 sm:$0xff]  }
 0x941   :  { %8827 = vmatprep.subr.bf16.mxu1 %v13862_v17  ;;  %v13887_v17 = vld [vmem:[#allocation6 + $0x1dc0] ss:$48 sps:$4 sm:$0xff]  }
 0x943   :  { %8787 = vmatpush1.bf16.msra.mxu0 %v13857_v0  ;;  %v13890_v0 = vld [vmem:[#allocation6 + $0x1dc8] ss:$48 sps:$4 sm:$0xff]  }
 0x944   :  { %8828 = vmatpush1.bf16.msra.mxu1 %v13860_v57  ;;  %8788 = vmatprep.subr.bf16.mxu0 %v13865_v49  ;;  %v15702_v57 = vld [vmem:[%s15896_s0 + $0x28] sm:$0xff] }
 0x945   :  { %8829 = vmatprep.subr.bf16.mxu1 %v13868_v41  ;;  %v15708_v49 = vcombine.high %v15702_v57, %v15702_v57  ;;  %v16565_v41 = vld [vmem:[#allocation63_spill] sm:$0xff] }
 0x947   :  { %8789 = vmatpush1.bf16.msra.mxu0 %v13863_v13  ;;  %v16566_v13 = vld [vmem:[#allocation64_spill] sm:$0xff] }
 0x948   :  { %8830 = vmatpush1.bf16.msra.mxu1 %v13866_v2  ;;  %8790 = vmatprep.subr.bf16.mxu0 %v13871_v16  ;;  %v16567_v2 = vld [vmem:[#allocation65_spill] sm:$0xff]  ;;  %v16568_v16 = vld [vmem:[#allocation66_spill] sm:$0xff] }
 0x949   :  { %8831 = vmatprep.subr.bf16.mxu1 %v13874_v38  ;;  %v16569_v38 = vld [vmem:[#allocation67_spill] sm:$0xff] }
 0x94b   :  { %8791 = vmatpush1.bf16.msra.mxu0 %v13869_v39  ;;  %v16570_v39 = vld [vmem:[#allocation68_spill] sm:$0xff] }
 0x94c   :  { %8832 = vmatpush1.bf16.msra.mxu1 %v13872_v40  ;;  %8792 = vmatprep.subr.bf16.mxu0 %v13877_v31  ;;  %v16571_v40 = vld [vmem:[#allocation69_spill] sm:$0xff]  ;;  %v16572_v31 = vld [vmem:[#allocation70_spill] sm:$0xff] }
 0x94d   :  { %8833 = vmatprep.subr.bf16.mxu1 %v13880_v53  ;;  %v16573_v53 = vld [vmem:[#allocation71_spill] sm:$0xff] }
 0x94f   :  { %8793 = vmatpush1.bf16.msra.mxu0 %v13875_v15  ;;  %v16574_v15 = vld [vmem:[#allocation72_spill] sm:$0xff] }
 0x950   :  { %8834 = vmatpush1.bf16.msra.mxu1 %v13878_v46  ;;  %8794 = vmatprep.subr.bf16.mxu0 %v13883_v4  ;;  %v16575_v46 = vld [vmem:[#allocation73_spill] sm:$0xff]  ;;  %v16576_v4 = vld [vmem:[#allocation74_spill] sm:$0xff] }
 0x951   :  { %8835 = vmatprep.subr.bf16.mxu1 %v13886_v56  ;;  %v16577_v56 = vld [vmem:[#allocation75_spill] sm:$0xff] }
 0x953   :  { %8795 = vmatpush1.bf16.msra.mxu0 %v13881_v59  ;;  %v16578_v59 = vld [vmem:[#allocation76_spill] sm:$0xff] }
 0x954   :  { %8836 = vmatpush1.bf16.msra.mxu1 %v13884_v25  ;;  %8796 = vmatprep.subr.bf16.mxu0 %v13889_v30  ;;  %v16579_v25 = vld [vmem:[#allocation77_spill] sm:$0xff]  ;;  %v16580_v30 = vld [vmem:[#allocation78_spill] sm:$0xff] }
 0x955   :  { %8837 = vmatprep.subr.bf16.mxu1 %v13892_v47  ;;  %v16581_v47 = vld [vmem:[#allocation79_spill] sm:$0xff] }
 0x957   :  { %8797 = vmatpush1.bf16.msra.mxu0 %v13887_v17  ;;  %v16582_v17 = vld [vmem:[#allocation80_spill] sm:$0xff] }
 0x958   :  { %8838 = vmatpush1.bf16.msra.mxu1 %v13890_v0  ;;  %8868 = vmatprep.subr.bf16.mxu0 %v14574_v3  ;;  %v16525_v3 = vld [vmem:[#allocation23_spill] sm:$0xff]  ;;  %v16583_v0 = vld [vmem:[#allocation81_spill] sm:$0xff] }
 0x959   :  { %8909 = vmatprep.subr.bf16.mxu1 %v14578_v8  ;;  %v16527_v8 = vld [vmem:[#allocation25_spill] sm:$0xff] }
 0x95a   :  { %8799 = vmatmul.mubr.bf16.vlgmr.msra.gmra.mrb[24].mxu0 %v15687_v32 }
 0x95b   :  { %8840 = vmatmul.mubr.bf16.vlgmr.msra.gmra.mrb[24].mxu1 %v15687_v32  ;;  %8869 = vmatpush1.bf16.msra.mxu0 %v14576_v5  ;;  %v16526_v5 = vld [vmem:[#allocation24_spill] sm:$0xff]  ;;  %v16564_v32 = vld [vmem:[#allocation62_spill] sm:$0xff] }
 0x95c   :  { %8910 = vmatpush1.bf16.msra.mxu1 %v14580_v9  ;;  %8870 = vmatprep.subr.bf16.mxu0 %v14582_v10  ;;  %v16528_v9 = vld [vmem:[#allocation26_spill] sm:$0xff]  ;;  %v16529_v10 = vld [vmem:[#allocation27_spill] sm:$0xff] }
 0x95d   :  { %8911 = vmatprep.subr.bf16.mxu1 %v14585_v14  ;;  %8900 = vmatprep.mubr.bf16.mxu0 %v15708_v49  ;;  %v16530_v14 = vld [vmem:[#allocation28_spill] sm:$0xff] }
 0x95e   :  { %8941 = vmatprep.mubr.bf16.mxu1 %v15708_v49 }
 0x95f   :  { %8871 = vmatpush1.bf16.msra.mxu0 %v14589_v18  ;;  %v16531_v18 = vld [vmem:[#allocation29_spill] sm:$0xff] }
 0x960   :  { %8912 = vmatpush1.bf16.msra.mxu1 %v14593_v19  ;;  %8872 = vmatprep.subr.bf16.mxu0 %v14595_v20  ;;  %v16532_v19 = vld [vmem:[#allocation30_spill] sm:$0xff]  ;;  %v16533_v20 = vld [vmem:[#allocation31_spill] sm:$0xff] }
 0x961   :  { %8913 = vmatprep.subr.bf16.mxu1 %v14598_v21  ;;  %v16534_v21 = vld [vmem:[#allocation32_spill] sm:$0xff] }
 0x963   :  { %8873 = vmatpush1.bf16.msra.mxu0 %v14601_v26  ;;  %v16535_v26 = vld [vmem:[#allocation33_spill] sm:$0xff] }
 0x964   :  { %8914 = vmatpush1.bf16.msra.mxu1 %v14605_v27  ;;  %8874 = vmatprep.subr.bf16.mxu0 %v14607_v28  ;;  %v16536_v27 = vld [vmem:[#allocation34_spill] sm:$0xff]  ;;  %v16537_v28 = vld [vmem:[#allocation35_spill] sm:$0xff] }
 0x965   :  { %8915 = vmatprep.subr.bf16.mxu1 %v14610_v29  ;;  %v16538_v29 = vld [vmem:[#allocation36_spill] sm:$0xff] }
 0x967   :  { %8875 = vmatpush1.bf16.msra.mxu0 %v14613_v34  ;;  %v16539_v34 = vld [vmem:[#allocation37_spill] sm:$0xff] }
 0x968   :  { %8916 = vmatpush1.bf16.msra.mxu1 %v14617_v35  ;;  %8876 = vmatprep.subr.bf16.mxu0 %v14619_v36  ;;  %v16540_v35 = vld [vmem:[#allocation38_spill] sm:$0xff]  ;;  %v16541_v36 = vld [vmem:[#allocation39_spill] sm:$0xff] }
 0x969   :  { %8917 = vmatprep.subr.bf16.mxu1 %v14622_v37  ;;  %v16542_v37 = vld [vmem:[#allocation40_spill] sm:$0xff] }
 0x96b   :  { %8877 = vmatpush1.bf16.msra.mxu0 %v14625_v42  ;;  %v16543_v42 = vld [vmem:[#allocation41_spill] sm:$0xff] }
 0x96c   :  { %8918 = vmatpush1.bf16.msra.mxu1 %v14629_v43  ;;  %8878 = vmatprep.subr.bf16.mxu0 %v14631_v44  ;;  %v16544_v43 = vld [vmem:[#allocation42_spill] sm:$0xff]  ;;  %v16545_v44 = vld [vmem:[#allocation43_spill] sm:$0xff] }
 0x96d   :  { %8919 = vmatprep.subr.bf16.mxu1 %v14634_v45  ;;  %v16546_v45 = vld [vmem:[#allocation44_spill] sm:$0xff] }
 0x96f   :  { %8879 = vmatpush1.bf16.msra.mxu0 %v14637_v50  ;;  %v15776_v50 = vcombine.low %v15702_v57, %v15702_v57  ;;  %v16584_v57 = vld [vmem:[#allocation82_spill] sm:$0xff] }
 0x970   :  { %8920 = vmatpush1.bf16.msra.mxu1 %v14641_v51  ;;  %8880 = vmatprep.subr.bf16.mxu0 %v14643_v52  ;;  %v16547_v51 = vld [vmem:[#allocation45_spill] sm:$0xff]  ;;  %v16548_v52 = vld [vmem:[#allocation46_spill] sm:$0xff] }
 0x971   :  { %8921 = vmatprep.subr.bf16.mxu1 %v14651_v54  ;;  %v16549_v54 = vld [vmem:[#allocation47_spill] sm:$0xff] }
 0x973   :  { %8881 = vmatpush1.bf16.msra.mxu0 %v14658_v60  ;;  %v16550_v60 = vld [vmem:[#allocation48_spill] sm:$0xff] }
 0x974   :  { %8922 = vmatpush1.bf16.msra.mxu1 %v14663_v61  ;;  %8882 = vmatprep.subr.bf16.mxu0 %v14665_v62  ;;  %v16551_v61 = vld [vmem:[#allocation49_spill] sm:$0xff]  ;;  %v16552_v62 = vld [vmem:[#allocation50_spill] sm:$0xff] }
 0x975   :  { %8923 = vmatprep.subr.bf16.mxu1 %v14668_v63  ;;  %v16553_v63 = vld [vmem:[#allocation51_spill] sm:$0xff] }
 0x977   :  { %8883 = vmatpush1.bf16.msra.mxu0 %v14672_v6  ;;  %v16554_v6 = vld [vmem:[#allocation52_spill] sm:$0xff] }
 0x978   :  { %8924 = vmatpush1.bf16.msra.mxu1 %v14676_v7  ;;  %8884 = vmatprep.subr.bf16.mxu0 %v14678_v11  ;;  %v16555_v7 = vld [vmem:[#allocation53_spill] sm:$0xff]  ;;  %v16556_v11 = vld [vmem:[#allocation54_spill] sm:$0xff] }
 0x979   :  { %8925 = vmatprep.subr.bf16.mxu1 %v14681_v12  ;;  %v16557_v12 = vld [vmem:[#allocation55_spill] sm:$0xff] }
 0x97b   :  { %8885 = vmatpush1.bf16.msra.mxu0 %v14684_v22  ;;  %v16558_v22 = vld [vmem:[#allocation56_spill] sm:$0xff] }
 0x97c   :  { %8926 = vmatpush1.bf16.msra.mxu1 %v14688_v23  ;;  %8886 = vmatprep.subr.bf16.mxu0 %v14690_v24  ;;  %v16559_v23 = vld [vmem:[#allocation57_spill] sm:$0xff]  ;;  %v16560_v24 = vld [vmem:[#allocation58_spill] sm:$0xff] }
 0x97d   :  { %8927 = vmatprep.subr.bf16.mxu1 %v16261_v1  ;;  %v16561_v1 = vld [vmem:[#allocation59_spill] sm:$0xff] }
 0x97f   :  { %8887 = vmatpush1.bf16.msra.mxu0 %v16262_v55  ;;  %v16562_v55 = vld [vmem:[#allocation60_spill] sm:$0xff] }
 0x980   :  { %8928 = vmatpush1.bf16.msra.mxu1 %v16263_v58  ;;  %8888 = vmatprep.subr.bf16.mxu0 %v16525_v3  ;;  %v16563_v58 = vld [vmem:[#allocation61_spill] sm:$0xff]  ;;  %v16586_v3 = vld [vmem:[#allocation84_spill] sm:$0xff] }
 0x981   :  { %8929 = vmatprep.subr.bf16.mxu1 %v16526_v5  ;;  %v16587_v5 = vld [vmem:[#allocation85_spill] sm:$0xff] }
 0x983   :  { %8889 = vmatpush1.bf16.msra.mxu0 %v16527_v8  ;;  %v16588_v8 = vld [vmem:[#allocation86_spill] sm:$0xff] }
 0x984   :  { %8930 = vmatpush1.bf16.msra.mxu1 %v16528_v9  ;;  %8890 = vmatprep.subr.bf16.mxu0 %v16529_v10  ;;  %v16589_v9 = vld [vmem:[#allocation87_spill] sm:$0xff]  ;;  %v16590_v10 = vld [vmem:[#allocation88_spill] sm:$0xff] }
 0x985   :  { %8931 = vmatprep.subr.bf16.mxu1 %v16530_v14  ;;  %v16591_v14 = vld [vmem:[#allocation89_spill] sm:$0xff] }
 0x987   :  { %8891 = vmatpush1.bf16.msra.mxu0 %v16531_v18  ;;  %v16592_v18 = vld [vmem:[#allocation90_spill] sm:$0xff] }
 0x988   :  { %8932 = vmatpush1.bf16.msra.mxu1 %v16532_v19  ;;  %8892 = vmatprep.subr.bf16.mxu0 %v16533_v20  ;;  %v16593_v19 = vld [vmem:[#allocation91_spill] sm:$0xff]  ;;  %v16594_v20 = vld [vmem:[#allocation92_spill] sm:$0xff] }
 0x989   :  { %8933 = vmatprep.subr.bf16.mxu1 %v16534_v21  ;;  %v16595_v21 = vld [vmem:[#allocation93_spill] sm:$0xff] }
 0x98b   :  { %8893 = vmatpush1.bf16.msra.mxu0 %v16535_v26  ;;  %v16596_v26 = vld [vmem:[#allocation94_spill] sm:$0xff] }
 0x98c   :  { %8934 = vmatpush1.bf16.msra.mxu1 %v16536_v27  ;;  %8894 = vmatprep.subr.bf16.mxu0 %v16537_v28  ;;  %v16597_v27 = vld [vmem:[#allocation95_spill] sm:$0xff]  ;;  %v16598_v28 = vld [vmem:[#allocation96_spill] sm:$0xff] }
 0x98d   :  { %8935 = vmatprep.subr.bf16.mxu1 %v16538_v29  ;;  %v16599_v29 = vld [vmem:[#allocation97_spill] sm:$0xff] }
 0x98f   :  { %8895 = vmatpush1.bf16.msra.mxu0 %v16539_v34  ;;  %v16600_v34 = vld [vmem:[#allocation98_spill] sm:$0xff] }
 0x990   :  { %8936 = vmatpush1.bf16.msra.mxu1 %v16540_v35  ;;  %8896 = vmatprep.subr.bf16.mxu0 %v16541_v36  ;;  %v16601_v35 = vld [vmem:[#allocation99_spill] sm:$0xff]  ;;  %v16602_v36 = vld [vmem:[#allocation100_spill] sm:$0xff] }
 0x991   :  { %8937 = vmatprep.subr.bf16.mxu1 %v16542_v37  ;;  %v16603_v37 = vld [vmem:[#allocation101_spill] sm:$0xff] }
 0x993   :  { %8897 = vmatpush1.bf16.msra.mxu0 %v16543_v42  ;;  %v16604_v42 = vld [vmem:[#allocation102_spill] sm:$0xff] }
 0x994   :  { %8938 = vmatpush1.bf16.msra.mxu1 %v16544_v43  ;;  %8898 = vmatprep.subr.bf16.mxu0 %v16545_v44  ;;  %v16605_v43 = vld [vmem:[#allocation103_spill] sm:$0xff]  ;;  %v16606_v44 = vld [vmem:[#allocation104_spill] sm:$0xff] }
 0x995   :  { %8939 = vmatprep.subr.bf16.mxu1 %v16546_v45  ;;  %v16607_v45 = vld [vmem:[#allocation105_spill] sm:$0xff] }
 0x997   :  { %8899 = vmatpush1.bf16.msra.mxu0 %v16547_v51  ;;  %v16608_v51 = vld [vmem:[#allocation106_spill] sm:$0xff] }
 0x998   :  { %8940 = vmatpush1.bf16.msra.mxu1 %v16548_v52  ;;  %8950 = vmatprep.subr.bf16.mxu0 %v16549_v54  ;;  %v16609_v52 = vld [vmem:[#allocation107_spill] sm:$0xff]  ;;  %v16610_v54 = vld [vmem:[#allocation108_spill] sm:$0xff] }
 0x999   :  { %8991 = vmatprep.subr.bf16.mxu1 %v16550_v60  ;;  %v16611_v60 = vld [vmem:[#allocation109_spill] sm:$0xff] }
 0x99a   :  { %8901 = vmatmul.mubr.bf16.vlgmr.msra.gmra.mrb[52].mxu0 %v15776_v50 }
 0x99b   :  { %8942 = vmatmul.mubr.bf16.vlgmr.msra.gmra.mrb[52].mxu1 %v15776_v50  ;;  %8951 = vmatpush1.bf16.msra.mxu0 %v16551_v61  ;;  %v16612_v61 = vld [vmem:[#allocation110_spill] sm:$0xff] }
 0x99c   :  { %8992 = vmatpush1.bf16.msra.mxu1 %v16552_v62  ;;  %8952 = vmatprep.subr.bf16.mxu0 %v16553_v63  ;;  %v13895_v62 = vld [vmem:[#allocation6 + $0x1e00] ss:$48 sps:$4 sm:$0xff]   ;;  %v13897_v63 = vld [vmem:[#allocation6 + $0x1e04] ss:$48 sps:$4 sm:$0xff]  }
 0x99d   :  { %8993 = vmatprep.subr.bf16.mxu1 %v16554_v6  ;;  %8982 = vmatprep.mubr.bf16.mxu0 %v15708_v49  ;;  %v13898_v6 = vld [vmem:[#allocation6 + $0x1e08] ss:$48 sps:$4 sm:$0xff]  }
 0x99e   :  { %9023 = vmatprep.mubr.bf16.mxu1 %v15708_v49  ;;  %v16585_v49 = vld [vmem:[#allocation83_spill] sm:$0xff] }
 0x99f   :  { %8953 = vmatpush1.bf16.msra.mxu0 %v16555_v7  ;;  %v13900_v7 = vld [vmem:[#allocation6 + $0x1e0c] ss:$48 sps:$4 sm:$0xff]  }
 0x9a0   :  { %8994 = vmatpush1.bf16.msra.mxu1 %v16556_v11  ;;  %8954 = vmatprep.subr.bf16.mxu0 %v16557_v12  ;;  %v13903_v11 = vld [vmem:[#allocation6 + $0x1e64] ss:$48 sps:$4 sm:$0xff]   ;;  %v13906_v12 = vld [vmem:[#allocation6 + $0x1e6c] ss:$48 sps:$4 sm:$0xff]  }
 0x9a1   :  { %8995 = vmatprep.subr.bf16.mxu1 %v16558_v22  ;;  %v13901_v22 = vld [vmem:[#allocation6 + $0x1e60] ss:$48 sps:$4 sm:$0xff]  }
 0x9a3   :  { %8955 = vmatpush1.bf16.msra.mxu0 %v16559_v23  ;;  %v13904_v23 = vld [vmem:[#allocation6 + $0x1e68] ss:$48 sps:$4 sm:$0xff]  }
 0x9a4   :  { %8996 = vmatpush1.bf16.msra.mxu1 %v16560_v24  ;;  %8956 = vmatprep.subr.bf16.mxu0 %v16561_v1  ;;  %v13909_v24 = vld [vmem:[#allocation6 + $0x1ec4] ss:$48 sps:$4 sm:$0xff]   ;;  %v13912_v1 = vld [vmem:[#allocation6 + $0x1ecc] ss:$48 sps:$4 sm:$0xff]  }
 0x9a5   :  { %8997 = vmatprep.subr.bf16.mxu1 %v16562_v55  ;;  %v13907_v55 = vld [vmem:[#allocation6 + $0x1ec0] ss:$48 sps:$4 sm:$0xff]  }
 0x9a7   :  { %8957 = vmatpush1.bf16.msra.mxu0 %v16563_v58  ;;  %v13915_v58 = vld [vmem:[#allocation6 + $0x1f24] ss:$48 sps:$4 sm:$0xff]  }
 0x9a8   :  { %8998 = vmatpush1.bf16.msra.mxu1 %v16564_v32  ;;  %8958 = vmatprep.subr.bf16.mxu0 %v16565_v41  ;;  %v13918_v32 = vld [vmem:[#allocation6 + $0x1f2c] ss:$48 sps:$4 sm:$0xff]   ;;  %v13913_v41 = vld [vmem:[#allocation6 + $0x1f20] ss:$48 sps:$4 sm:$0xff]  }
 0x9a9   :  { %8999 = vmatprep.subr.bf16.mxu1 %v16566_v13  ;;  %v13916_v13 = vld [vmem:[#allocation6 + $0x1f28] ss:$48 sps:$4 sm:$0xff]  }
 0x9ab   :  { %8959 = vmatpush1.bf16.msra.mxu0 %v16567_v2  ;;  %v13921_v2 = vld [vmem:[#allocation6 + $0x1f84] ss:$48 sps:$4 sm:$0xff]  }
 0x9ac   :  { %9000 = vmatpush1.bf16.msra.mxu1 %v16568_v16  ;;  %8960 = vmatprep.subr.bf16.mxu0 %v16569_v38  ;;  %v13924_v16 = vld [vmem:[#allocation6 + $0x1f8c] ss:$48 sps:$4 sm:$0xff]   ;;  %v13919_v38 = vld [vmem:[#allocation6 + $0x1f80] ss:$48 sps:$4 sm:$0xff]  }
 0x9ad   :  { %9001 = vmatprep.subr.bf16.mxu1 %v16570_v39  ;;  %v13922_v39 = vld [vmem:[#allocation6 + $0x1f88] ss:$48 sps:$4 sm:$0xff]  }
 0x9af   :  { %8961 = vmatpush1.bf16.msra.mxu0 %v16571_v40  ;;  %v13927_v40 = vld [vmem:[#allocation6 + $0x1fe4] ss:$48 sps:$4 sm:$0xff]  }
 0x9b0   :  { %9002 = vmatpush1.bf16.msra.mxu1 %v16572_v31  ;;  %8962 = vmatprep.subr.bf16.mxu0 %v16573_v53  ;;  %v13930_v31 = vld [vmem:[#allocation6 + $0x1fec] ss:$48 sps:$4 sm:$0xff]   ;;  %v13925_v53 = vld [vmem:[#allocation6 + $0x1fe0] ss:$48 sps:$4 sm:$0xff]  }
 0x9b1   :  { %9003 = vmatprep.subr.bf16.mxu1 %v16574_v15  ;;  %v13928_v15 = vld [vmem:[#allocation6 + $0x1fe8] ss:$48 sps:$4 sm:$0xff]  }
 0x9b3   :  { %8963 = vmatpush1.bf16.msra.mxu0 %v16575_v46  ;;  %v13933_v46 = vld [vmem:[#allocation6 + $0x2044] ss:$48 sps:$4 sm:$0xff]  }
 0x9b4   :  { %9004 = vmatpush1.bf16.msra.mxu1 %v16576_v4  ;;  %8964 = vmatprep.subr.bf16.mxu0 %v16577_v56  ;;  %v13936_v4 = vld [vmem:[#allocation6 + $0x204c] ss:$48 sps:$4 sm:$0xff]   ;;  %v13931_v56 = vld [vmem:[#allocation6 + $0x2040] ss:$48 sps:$4 sm:$0xff]  }
 0x9b5   :  { %9005 = vmatprep.subr.bf16.mxu1 %v16578_v59  ;;  %v13934_v59 = vld [vmem:[#allocation6 + $0x2048] ss:$48 sps:$4 sm:$0xff]  }
 0x9b7   :  { %8965 = vmatpush1.bf16.msra.mxu0 %v16579_v25  ;;  %v13939_v25 = vld [vmem:[#allocation6 + $0x20a4] ss:$48 sps:$4 sm:$0xff]  }
 0x9b8   :  { %9006 = vmatpush1.bf16.msra.mxu1 %v16580_v30  ;;  %8966 = vmatprep.subr.bf16.mxu0 %v16581_v47  ;;  %v13942_v30 = vld [vmem:[#allocation6 + $0x20ac] ss:$48 sps:$4 sm:$0xff]   ;;  %v13937_v47 = vld [vmem:[#allocation6 + $0x20a0] ss:$48 sps:$4 sm:$0xff]  }
 0x9b9   :  { %9007 = vmatprep.subr.bf16.mxu1 %v16582_v17  ;;  %v13940_v17 = vld [vmem:[#allocation6 + $0x20a8] ss:$48 sps:$4 sm:$0xff]  }
 0x9bb   :  { %8967 = vmatpush1.bf16.msra.mxu0 %v16583_v0  ;;  %v13945_v0 = vld [vmem:[#allocation6 + $0x2104] ss:$48 sps:$4 sm:$0xff]  }
 0x9bc   :  { %9008 = vmatpush1.bf16.msra.mxu1 %v16584_v57  ;;  %8968 = vmatprep.subr.bf16.mxu0 %v16585_v49  ;;  %v13948_v57 = vld [vmem:[#allocation6 + $0x210c] ss:$48 sps:$4 sm:$0xff]   ;;  %v13943_v49 = vld [vmem:[#allocation6 + $0x2100] ss:$48 sps:$4 sm:$0xff]  }
 0x9bd   :  { %9009 = vmatprep.subr.bf16.mxu1 %v16586_v3  ;;  %v13946_v3 = vld [vmem:[#allocation6 + $0x2108] ss:$48 sps:$4 sm:$0xff]  }
 0x9bf   :  { %8969 = vmatpush1.bf16.msra.mxu0 %v16587_v5  ;;  %v13951_v5 = vld [vmem:[#allocation6 + $0x2164] ss:$48 sps:$4 sm:$0xff]  }
 0x9c0   :  { %9010 = vmatpush1.bf16.msra.mxu1 %v16588_v8  ;;  %8970 = vmatprep.subr.bf16.mxu0 %v16589_v9  ;;  %v13954_v8 = vld [vmem:[#allocation6 + $0x216c] ss:$48 sps:$4 sm:$0xff]   ;;  %v13949_v9 = vld [vmem:[#allocation6 + $0x2160] ss:$48 sps:$4 sm:$0xff]  }
 0x9c1   :  { %9011 = vmatprep.subr.bf16.mxu1 %v16590_v10  ;;  %v13952_v10 = vld [vmem:[#allocation6 + $0x2168] ss:$48 sps:$4 sm:$0xff]  }
 0x9c3   :  { %8971 = vmatpush1.bf16.msra.mxu0 %v16591_v14  ;;  %v13957_v14 = vld [vmem:[#allocation6 + $0x21c4] ss:$48 sps:$4 sm:$0xff]  }
 0x9c4   :  { %9012 = vmatpush1.bf16.msra.mxu1 %v16592_v18  ;;  %8972 = vmatprep.subr.bf16.mxu0 %v16593_v19  ;;  %v13960_v18 = vld [vmem:[#allocation6 + $0x21cc] ss:$48 sps:$4 sm:$0xff]   ;;  %v13955_v19 = vld [vmem:[#allocation6 + $0x21c0] ss:$48 sps:$4 sm:$0xff]  }
 0x9c5   :  { %9013 = vmatprep.subr.bf16.mxu1 %v16594_v20  ;;  %v13958_v20 = vld [vmem:[#allocation6 + $0x21c8] ss:$48 sps:$4 sm:$0xff]  }
 0x9c7   :  { %8973 = vmatpush1.bf16.msra.mxu0 %v16595_v21  ;;  %v13963_v21 = vld [vmem:[#allocation6 + $0x2224] ss:$48 sps:$4 sm:$0xff]  }
 0x9c8   :  { %9014 = vmatpush1.bf16.msra.mxu1 %v16596_v26  ;;  %8974 = vmatprep.subr.bf16.mxu0 %v16597_v27  ;;  %v13966_v26 = vld [vmem:[#allocation6 + $0x222c] ss:$48 sps:$4 sm:$0xff]   ;;  %v13961_v27 = vld [vmem:[#allocation6 + $0x2220] ss:$48 sps:$4 sm:$0xff]  }
 0x9c9   :  { %9015 = vmatprep.subr.bf16.mxu1 %v16598_v28  ;;  %v13964_v28 = vld [vmem:[#allocation6 + $0x2228] ss:$48 sps:$4 sm:$0xff]  }
 0x9cb   :  { %8975 = vmatpush1.bf16.msra.mxu0 %v16599_v29  ;;  %v13969_v29 = vld [vmem:[#allocation6 + $0x2284] ss:$48 sps:$4 sm:$0xff]  }
 0x9cc   :  { %9016 = vmatpush1.bf16.msra.mxu1 %v16600_v34  ;;  %8976 = vmatprep.subr.bf16.mxu0 %v16601_v35  ;;  %v13972_v34 = vld [vmem:[#allocation6 + $0x228c] ss:$48 sps:$4 sm:$0xff]   ;;  %v13967_v35 = vld [vmem:[#allocation6 + $0x2280] ss:$48 sps:$4 sm:$0xff]  }
 0x9cd   :  { %9017 = vmatprep.subr.bf16.mxu1 %v16602_v36  ;;  %v13970_v36 = vld [vmem:[#allocation6 + $0x2288] ss:$48 sps:$4 sm:$0xff]  }
 0x9cf   :  { %8977 = vmatpush1.bf16.msra.mxu0 %v16603_v37  ;;  %v13975_v37 = vld [vmem:[#allocation6 + $0x22e4] ss:$48 sps:$4 sm:$0xff]  }
 0x9d0   :  { %9018 = vmatpush1.bf16.msra.mxu1 %v16604_v42  ;;  %8978 = vmatprep.subr.bf16.mxu0 %v16605_v43  ;;  %v13978_v42 = vld [vmem:[#allocation6 + $0x22ec] ss:$48 sps:$4 sm:$0xff]   ;;  %v13973_v43 = vld [vmem:[#allocation6 + $0x22e0] ss:$48 sps:$4 sm:$0xff]  }
 0x9d1   :  { %9019 = vmatprep.subr.bf16.mxu1 %v16606_v44  ;;  %v13976_v44 = vld [vmem:[#allocation6 + $0x22e8] ss:$48 sps:$4 sm:$0xff]  }
 0x9d3   :  { %8979 = vmatpush1.bf16.msra.mxu0 %v16607_v45  ;;  %v13981_v45 = vld [vmem:[#allocation6 + $0x2344] ss:$48 sps:$4 sm:$0xff]  }
 0x9d4   :  { %9020 = vmatpush1.bf16.msra.mxu1 %v16608_v51  ;;  %8980 = vmatprep.subr.bf16.mxu0 %v16609_v52  ;;  %v13984_v51 = vld [vmem:[#allocation6 + $0x234c] ss:$48 sps:$4 sm:$0xff]   ;;  %v13979_v52 = vld [vmem:[#allocation6 + $0x2340] ss:$48 sps:$4 sm:$0xff]  }
 0x9d5   :  { %9021 = vmatprep.subr.bf16.mxu1 %v16610_v54  ;;  %v13982_v54 = vld [vmem:[#allocation6 + $0x2348] ss:$48 sps:$4 sm:$0xff]  }
 0x9d7   :  { %8981 = vmatpush1.bf16.msra.mxu0 %v16611_v60  ;;  %v13987_v60 = vld [vmem:[#allocation6 + $0x23a4] ss:$48 sps:$4 sm:$0xff]  }
 0x9d8   :  { %9022 = vmatpush1.bf16.msra.mxu1 %v16612_v61  ;;  %10196 = vmatprep.subr.bf16.mxu0 %v13897_v63  ;;  %v13990_v61 = vld [vmem:[#allocation6 + $0x23ac] ss:$48 sps:$4 sm:$0xff]   ;;  %v13988_v63 = vld [vmem:[#allocation6 + $0x23a8] ss:$48 sps:$4 sm:$0xff]  }
 0x9d9   :  { %10237 = vmatprep.subr.bf16.mxu1 %v13900_v7  ;;  %v13996_v7 = vld [vmem:[#allocation6 + $0x1e1c] ss:$48 sps:$4 sm:$0xff]  }
 0x9da   :  { %8983 = vmatmul.mubr.bf16.vlgmr.msra.gmra.mrb[56].mxu0 %v15776_v50 }
 0x9db   :  { %9024 = vmatmul.mubr.bf16.vlgmr.msra.gmra.mrb[56].mxu1 %v15776_v50  ;;  %10197 = vmatpush1.bf16.msra.mxu0 %v13895_v62  ;;  %v13910_v50 = vld [vmem:[#allocation6 + $0x1ec8] ss:$48 sps:$4 sm:$0xff]   ;;  %v13985_v62 = vld [vmem:[#allocation6 + $0x23a0] ss:$48 sps:$4 sm:$0xff]  }
 0x9dc   :  { %10238 = vmatpush1.bf16.msra.mxu1 %v13898_v6  ;;  %10198 = vmatprep.subr.bf16.mxu0 %v13903_v11  ;;  %v13993_v6 = vld [vmem:[#allocation6 + $0x1e14] ss:$48 sps:$4 sm:$0xff]  }
 0x9dd   :  { %10239 = vmatprep.subr.bf16.mxu1 %v13906_v12 }
 0x9df   :  { %10199 = vmatpush1.bf16.msra.mxu0 %v13901_v22 }
 0x9e0   :  { %10240 = vmatpush1.bf16.msra.mxu1 %v13904_v23  ;;  %10200 = vmatprep.subr.bf16.mxu0 %v13909_v24 }
 0x9e1   :  { %10241 = vmatprep.subr.bf16.mxu1 %v13912_v1 }
 0x9e3   :  { %10201 = vmatpush1.bf16.msra.mxu0 %v13907_v55 }
 0x9e4   :  { %10242 = vmatpush1.bf16.msra.mxu1 %v13910_v50  ;;  %10202 = vmatprep.subr.bf16.mxu0 %v13915_v58 }
 0x9e5   :  { %10243 = vmatprep.subr.bf16.mxu1 %v13918_v32 }
 0x9e7   :  { %10203 = vmatpush1.bf16.msra.mxu0 %v13913_v41 }
 0x9e8   :  { %10244 = vmatpush1.bf16.msra.mxu1 %v13916_v13  ;;  %10204 = vmatprep.subr.bf16.mxu0 %v13921_v2 }
 0x9e9   :  { %10245 = vmatprep.subr.bf16.mxu1 %v13924_v16 }
 0x9eb   :  { %10205 = vmatpush1.bf16.msra.mxu0 %v13919_v38 }
 0x9ec   :  { %10246 = vmatpush1.bf16.msra.mxu1 %v13922_v39  ;;  %10206 = vmatprep.subr.bf16.mxu0 %v13927_v40 }
 0x9ed   :  { %10247 = vmatprep.subr.bf16.mxu1 %v13930_v31 }
 0x9ef   :  { %10207 = vmatpush1.bf16.msra.mxu0 %v13925_v53 }
 0x9f0   :  { %10248 = vmatpush1.bf16.msra.mxu1 %v13928_v15  ;;  %10208 = vmatprep.subr.bf16.mxu0 %v13933_v46 }
 0x9f1   :  { %10249 = vmatprep.subr.bf16.mxu1 %v13936_v4 }
 0x9f3   :  { %10209 = vmatpush1.bf16.msra.mxu0 %v13931_v56 }
 0x9f4   :  { %10250 = vmatpush1.bf16.msra.mxu1 %v13934_v59  ;;  %10210 = vmatprep.subr.bf16.mxu0 %v13939_v25 }
 0x9f5   :  { %10251 = vmatprep.subr.bf16.mxu1 %v13942_v30 }
 0x9f7   :  { %10211 = vmatpush1.bf16.msra.mxu0 %v13937_v47 }
 0x9f8   :  { %10252 = vmatpush1.bf16.msra.mxu1 %v13940_v17  ;;  %10212 = vmatprep.subr.bf16.mxu0 %v13945_v0  ;;  %v13991_v17 = vld [vmem:[#allocation6 + $0x1e10] ss:$48 sps:$4 sm:$0xff]   ;;  %v13994_v0 = vld [vmem:[#allocation6 + $0x1e18] ss:$48 sps:$4 sm:$0xff]  }
 0x9f9   :  { %10253 = vmatprep.subr.bf16.mxu1 %v13948_v57 }
 0x9fb   :  { %10213 = vmatpush1.bf16.msra.mxu0 %v13943_v49  ;;  %v13999_v49 = vld [vmem:[#allocation6 + $0x1e74] ss:$48 sps:$4 sm:$0xff]  }
 0x9fc   :  { %10254 = vmatpush1.bf16.msra.mxu1 %v13946_v3  ;;  %10214 = vmatprep.subr.bf16.mxu0 %v13951_v5  ;;  %v14002_v3 = vld [vmem:[#allocation6 + $0x1e7c] ss:$48 sps:$4 sm:$0xff]   ;;  %v14005_v5 = vld [vmem:[#allocation6 + $0x1ed4] ss:$48 sps:$4 sm:$0xff]  }
 0x9fd   :  { %10255 = vmatprep.subr.bf16.mxu1 %v13954_v8  ;;  %v14008_v8 = vld [vmem:[#allocation6 + $0x1edc] ss:$48 sps:$4 sm:$0xff]  }
 0x9ff   :  { %10215 = vmatpush1.bf16.msra.mxu0 %v13949_v9  ;;  %v14003_v9 = vld [vmem:[#allocation6 + $0x1ed0] ss:$48 sps:$4 sm:$0xff]  }
 0xa00   :  { %10256 = vmatpush1.bf16.msra.mxu1 %v13952_v10  ;;  %10216 = vmatprep.subr.bf16.mxu0 %v13957_v14  ;;  %v14006_v10 = vld [vmem:[#allocation6 + $0x1ed8] ss:$48 sps:$4 sm:$0xff]   ;;  %v14011_v14 = vld [vmem:[#allocation6 + $0x1f34] ss:$48 sps:$4 sm:$0xff]  }
 0xa01   :  { %10257 = vmatprep.subr.bf16.mxu1 %v13960_v18  ;;  %v14014_v18 = vld [vmem:[#allocation6 + $0x1f3c] ss:$48 sps:$4 sm:$0xff]  }
 0xa03   :  { %10217 = vmatpush1.bf16.msra.mxu0 %v13955_v19  ;;  %v14009_v19 = vld [vmem:[#allocation6 + $0x1f30] ss:$48 sps:$4 sm:$0xff]  }
 0xa04   :  { %10258 = vmatpush1.bf16.msra.mxu1 %v13958_v20  ;;  %10218 = vmatprep.subr.bf16.mxu0 %v13963_v21  ;;  %v14012_v20 = vld [vmem:[#allocation6 + $0x1f38] ss:$48 sps:$4 sm:$0xff]   ;;  %v14017_v21 = vld [vmem:[#allocation6 + $0x1f94] ss:$48 sps:$4 sm:$0xff]  }
 0xa05   :  { %10259 = vmatprep.subr.bf16.mxu1 %v13966_v26  ;;  %v14020_v26 = vld [vmem:[#allocation6 + $0x1f9c] ss:$48 sps:$4 sm:$0xff]  }
 0xa07   :  { %10219 = vmatpush1.bf16.msra.mxu0 %v13961_v27  ;;  %v14015_v27 = vld [vmem:[#allocation6 + $0x1f90] ss:$48 sps:$4 sm:$0xff]  }
 0xa08   :  { %10260 = vmatpush1.bf16.msra.mxu1 %v13964_v28  ;;  %10220 = vmatprep.subr.bf16.mxu0 %v13969_v29  ;;  %v14018_v28 = vld [vmem:[#allocation6 + $0x1f98] ss:$48 sps:$4 sm:$0xff]   ;;  %v14023_v29 = vld [vmem:[#allocation6 + $0x1ff4] ss:$48 sps:$4 sm:$0xff]  }
 0xa09   :  { %10261 = vmatprep.subr.bf16.mxu1 %v13972_v34  ;;  %v14026_v34 = vld [vmem:[#allocation6 + $0x1ffc] ss:$48 sps:$4 sm:$0xff]  }
 0xa0b   :  { %10221 = vmatpush1.bf16.msra.mxu0 %v13967_v35  ;;  %v14021_v35 = vld [vmem:[#allocation6 + $0x1ff0] ss:$48 sps:$4 sm:$0xff]  }
 0xa0c   :  { %10262 = vmatpush1.bf16.msra.mxu1 %v13970_v36  ;;  %10222 = vmatprep.subr.bf16.mxu0 %v13975_v37  ;;  %v14024_v36 = vld [vmem:[#allocation6 + $0x1ff8] ss:$48 sps:$4 sm:$0xff]   ;;  %v14029_v37 = vld [vmem:[#allocation6 + $0x2054] ss:$48 sps:$4 sm:$0xff]  }
 0xa0d   :  { %10263 = vmatprep.subr.bf16.mxu1 %v13978_v42  ;;  %v14032_v42 = vld [vmem:[#allocation6 + $0x205c] ss:$48 sps:$4 sm:$0xff]  }
 0xa0f   :  { %10223 = vmatpush1.bf16.msra.mxu0 %v13973_v43  ;;  %v14027_v43 = vld [vmem:[#allocation6 + $0x2050] ss:$48 sps:$4 sm:$0xff]  }
 0xa10   :  { %10264 = vmatpush1.bf16.msra.mxu1 %v13976_v44  ;;  %10224 = vmatprep.subr.bf16.mxu0 %v13981_v45  ;;  %v14030_v44 = vld [vmem:[#allocation6 + $0x2058] ss:$48 sps:$4 sm:$0xff]   ;;  %v14035_v45 = vld [vmem:[#allocation6 + $0x20b4] ss:$48 sps:$4 sm:$0xff]  }
 0xa11   :  { %10265 = vmatprep.subr.bf16.mxu1 %v13984_v51  ;;  %v14038_v51 = vld [vmem:[#allocation6 + $0x20bc] ss:$48 sps:$4 sm:$0xff]  }
 0xa13   :  { %10225 = vmatpush1.bf16.msra.mxu0 %v13979_v52  ;;  %v14033_v52 = vld [vmem:[#allocation6 + $0x20b0] ss:$48 sps:$4 sm:$0xff]  }
 0xa14   :  { %10266 = vmatpush1.bf16.msra.mxu1 %v13982_v54  ;;  %10226 = vmatprep.subr.bf16.mxu0 %v13987_v60  ;;  %v14036_v54 = vld [vmem:[#allocation6 + $0x20b8] ss:$48 sps:$4 sm:$0xff]   ;;  %v14041_v60 = vld [vmem:[#allocation6 + $0x2114] ss:$48 sps:$4 sm:$0xff]  }
 0xa15   :  { %10267 = vmatprep.subr.bf16.mxu1 %v13990_v61  ;;  %v14044_v61 = vld [vmem:[#allocation6 + $0x211c] ss:$48 sps:$4 sm:$0xff]  }
 0xa17   :  { %10227 = vmatpush1.bf16.msra.mxu0 %v13985_v62  ;;  %v14039_v62 = vld [vmem:[#allocation6 + $0x2110] ss:$48 sps:$4 sm:$0xff]  }
 0xa18   :  { %10268 = vmatpush1.bf16.msra.mxu1 %v13988_v63  ;;  %10278 = vmatprep.subr.bf16.mxu0 %v13993_v6  ;;  %v14042_v63 = vld [vmem:[#allocation6 + $0x2118] ss:$48 sps:$4 sm:$0xff]   ;;  %v14047_v6 = vld [vmem:[#allocation6 + $0x2174] ss:$48 sps:$4 sm:$0xff]  }
 0xa19   :  { %10319 = vmatprep.subr.bf16.mxu1 %v13996_v7  ;;  %v14050_v7 = vld [vmem:[#allocation6 + $0x217c] ss:$48 sps:$4 sm:$0xff]  }
 0xa6d   :  { %v8902_v11 = vpop.f32.mrb[52].mxu0 }
 0xa6e   :  { %v8943_v12 = vpop.f32.mrb[52].mxu1  ;;  %v8904_v22 = vpop.f32.mrb[53].mxu0 }
 0xa6f   :  { %v9032_v23 = vmax.f32 %v8902_v11, %v8943_v12  ;;  %v8945_v24 = vpop.f32.mrb[53].mxu1  ;;  %v8906_v1 = vpop.f32.mrb[54].mxu0  ;;  %v14045_v11 = vld [vmem:[#allocation6 + $0x2170] ss:$48 sps:$4 sm:$0xff]   ;;  %v14048_v12 = vld [vmem:[#allocation6 + $0x2178] ss:$48 sps:$4 sm:$0xff]  }
 0xa70   :  { %v9033_v55 = vmax.f32 %v8904_v22, %v8945_v24  ;;  %v8947_v50 = vpop.f32.mrb[54].mxu1  ;;  %v8907_v58 = vpop.f32.mrb[55].mxu0  ;;  %v14053_v22 = vld [vmem:[#allocation6 + $0x21d4] ss:$48 sps:$4 sm:$0xff]   ;;  %v14051_v24 = vld [vmem:[#allocation6 + $0x21d0] ss:$48 sps:$4 sm:$0xff]  }
 0xa71   :  { %v8948_v32 = vpop.f32.mrb[55].mxu1  ;;  %v14054_v1 = vld [vmem:[#allocation6 + $0x21d8] ss:$48 sps:$4 sm:$0xff]   ;;  %v14062_v50 = vld [vmem:[#allocation6 + $0x223c] ss:$48 sps:$4 sm:$0xff]  }
 0xa72   :  { %v14057_v58 = vld [vmem:[#allocation6 + $0x2230] ss:$48 sps:$4 sm:$0xff]   ;;  %v14060_v32 = vld [vmem:[#allocation6 + $0x2238] ss:$48 sps:$4 sm:$0xff]  }
 0xaad   :  { %v8984_v41 = vpop.f32.mrb[56].mxu0 }
 0xaae   :  { %v9025_v13 = vpop.f32.mrb[56].mxu1  ;;  %v8986_v2 = vpop.f32.mrb[57].mxu0 }
 0xaaf   :  { %v9034_v16 = vmax.f32 %v8984_v41, %v9025_v13  ;;  %v9027_v38 = vpop.f32.mrb[57].mxu1  ;;  %v8988_v39 = vpop.f32.mrb[58].mxu0  ;;  %v14065_v41 = vld [vmem:[#allocation6 + $0x2294] ss:$48 sps:$4 sm:$0xff]   ;;  %v14068_v13 = vld [vmem:[#allocation6 + $0x229c] ss:$48 sps:$4 sm:$0xff]  }
 0xab0   :  { %v9035_v40 = vmax.f32 %v8986_v2, %v9027_v38  ;;  %v9029_v31 = vpop.f32.mrb[58].mxu1  ;;  %v8989_v53 = vpop.f32.mrb[59].mxu0  ;;  %v14063_v2 = vld [vmem:[#allocation6 + $0x2290] ss:$48 sps:$4 sm:$0xff]   ;;  %v14071_v38 = vld [vmem:[#allocation6 + $0x22f4] ss:$48 sps:$4 sm:$0xff]  }
 0xab1   :  { %v9036_v15 = vmax.f32 %v9032_v23, %v9034_v16  ;;  %v9030_v46 = vpop.f32.mrb[59].mxu1  ;;  %v14056_v23 = vld [vmem:[#allocation6 + $0x21dc] ss:$48 sps:$4 sm:$0xff]   ;;  %v14066_v16 = vld [vmem:[#allocation6 + $0x2298] ss:$48 sps:$4 sm:$0xff]  }
 0xab2   :  { %v9037_v4 = vmax.f32 %v9033_v55, %v9035_v40  ;;  %v14059_v55 = vld [vmem:[#allocation6 + $0x2234] ss:$48 sps:$4 sm:$0xff]   ;;  %v14074_v39 = vld [vmem:[#allocation6 + $0x22fc] ss:$48 sps:$4 sm:$0xff]   ;;  %v14069_v40 = vld [vmem:[#allocation6 + $0x22f0] ss:$48 sps:$4 sm:$0xff]  }
 0xab3   :  { %v9038_v56 = vadd.f32 %v9036_v15, %v15156_v33  ;;  %v13997_v33 = vld [vmem:[#allocation6 + $0x1e70] ss:$48 sps:$4 sm:$0xff]   ;;  %v14072_v31 = vld [vmem:[#allocation6 + $0x22f8] ss:$48 sps:$4 sm:$0xff]   ;;  %v14077_v53 = vld [vmem:[#allocation6 + $0x2354] ss:$48 sps:$4 sm:$0xff]  }
 0xab4   :  { %v9039_v59 = vadd.f32 %v9037_v4, %v15160_v48  ;;  %v14000_v48 = vld [vmem:[#allocation6 + $0x1e78] ss:$48 sps:$4 sm:$0xff]   ;;  %v14080_v15 = vld [vmem:[#allocation6 + $0x235c] ss:$48 sps:$4 sm:$0xff]   ;;  %v14075_v46 = vld [vmem:[#allocation6 + $0x2350] ss:$48 sps:$4 sm:$0xff]  }
 0xab5   :  { %v9040_v25 = vmax.f32 %v9038_v56, 0.0  ;;  %v14078_v4 = vld [vmem:[#allocation6 + $0x2358] ss:$48 sps:$4 sm:$0xff]   ;;  %v14083_v56 = vld [vmem:[#allocation6 + $0x23b4] ss:$48 sps:$4 sm:$0xff]  }
 0xab6   :  { %v9041_v30 = vmax.f32 %v9039_v59, 0.0  ;;  %v14086_v59 = vld [vmem:[#allocation6 + $0x23bc] ss:$48 sps:$4 sm:$0xff]  }
 0xab7   :  { %v15854_v57 = vpack.c.bf16 %v9040_v25, %v9040_v25  ;;  %v14081_v25 = vld [vmem:[#allocation6 + $0x23b0] ss:$48 sps:$4 sm:$0xff]  }
 0xab8   :  { %v15852_v47 = vpack.c.bf16 %v9041_v30, %v9041_v30  ;;  %v14084_v30 = vld [vmem:[#allocation6 + $0x23b8] ss:$48 sps:$4 sm:$0xff]  }
 0xaba   :  { %10228 = vmatprep.mubr.bf16.mxu0 %v15852_v47  ;;  %10269 = vmatprep.mubr.bf16.mxu1 %v15852_v47 }
 0xabb   :  { %10229 = vmatmul.mubr.bf16.vlgmr.msra.gmra.mrb[16].mxu0 %v15854_v57  ;;  %10270 = vmatmul.mubr.bf16.vlgmr.msra.gmra.mrb[16].mxu1 %v15854_v57 }
 0xabc   :  { %10279 = vmatpush1.bf16.msra.mxu0 %v13991_v17  ;;  %10320 = vmatpush1.bf16.msra.mxu1 %v13994_v0  ;;  %v14089_v17 = vld [vmem:[#allocation6 + $0x1e24] ss:$48 sps:$4 sm:$0xff]   ;;  %v14092_v0 = vld [vmem:[#allocation6 + $0x1e2c] ss:$48 sps:$4 sm:$0xff]  }
 0xabd   :  { %10310 = vmatprep.mubr.bf16.mxu0 %v15852_v47  ;;  %10351 = vmatprep.mubr.bf16.mxu1 %v15852_v47 }
 0xabe   :  { %10280 = vmatprep.subr.bf16.mxu0 %v13999_v49  ;;  %10321 = vmatprep.subr.bf16.mxu1 %v14002_v3  ;;  %v14087_v49 = vld [vmem:[#allocation6 + $0x1e20] ss:$48 sps:$4 sm:$0xff]   ;;  %v14090_v3 = vld [vmem:[#allocation6 + $0x1e28] ss:$48 sps:$4 sm:$0xff]  }
 0xac0   :  { %10281 = vmatpush1.bf16.msra.mxu0 %v13997_v33  ;;  %10322 = vmatpush1.bf16.msra.mxu1 %v14000_v48  ;;  %v14095_v33 = vld [vmem:[#allocation6 + $0x1e84] ss:$48 sps:$4 sm:$0xff]   ;;  %v14098_v48 = vld [vmem:[#allocation6 + $0x1e8c] ss:$48 sps:$4 sm:$0xff]  }
 0xac1   :  { %10282 = vmatprep.subr.bf16.mxu0 %v14005_v5  ;;  %10323 = vmatprep.subr.bf16.mxu1 %v14008_v8  ;;  %v14093_v5 = vld [vmem:[#allocation6 + $0x1e80] ss:$48 sps:$4 sm:$0xff]   ;;  %v14096_v8 = vld [vmem:[#allocation6 + $0x1e88] ss:$48 sps:$4 sm:$0xff]  }
 0xac4   :  { %10283 = vmatpush1.bf16.msra.mxu0 %v14003_v9  ;;  %10324 = vmatpush1.bf16.msra.mxu1 %v14006_v10  ;;  %v14101_v9 = vld [vmem:[#allocation6 + $0x1ee4] ss:$48 sps:$4 sm:$0xff]   ;;  %v14104_v10 = vld [vmem:[#allocation6 + $0x1eec] ss:$48 sps:$4 sm:$0xff]  }
 0xac5   :  { %10284 = vmatprep.subr.bf16.mxu0 %v14011_v14  ;;  %10325 = vmatprep.subr.bf16.mxu1 %v14014_v18  ;;  %v14099_v14 = vld [vmem:[#allocation6 + $0x1ee0] ss:$48 sps:$4 sm:$0xff]   ;;  %v14102_v18 = vld [vmem:[#allocation6 + $0x1ee8] ss:$48 sps:$4 sm:$0xff]  }
 0xac8   :  { %10285 = vmatpush1.bf16.msra.mxu0 %v14009_v19  ;;  %10326 = vmatpush1.bf16.msra.mxu1 %v14012_v20  ;;  %v14107_v19 = vld [vmem:[#allocation6 + $0x1f44] ss:$48 sps:$4 sm:$0xff]   ;;  %v14110_v20 = vld [vmem:[#allocation6 + $0x1f4c] ss:$48 sps:$4 sm:$0xff]  }
 0xac9   :  { %10286 = vmatprep.subr.bf16.mxu0 %v14017_v21  ;;  %10327 = vmatprep.subr.bf16.mxu1 %v14020_v26  ;;  %v14105_v21 = vld [vmem:[#allocation6 + $0x1f40] ss:$48 sps:$4 sm:$0xff]   ;;  %v14108_v26 = vld [vmem:[#allocation6 + $0x1f48] ss:$48 sps:$4 sm:$0xff]  }
 0xacc   :  { %10287 = vmatpush1.bf16.msra.mxu0 %v14015_v27  ;;  %10328 = vmatpush1.bf16.msra.mxu1 %v14018_v28  ;;  %v14113_v27 = vld [vmem:[#allocation6 + $0x1fa4] ss:$48 sps:$4 sm:$0xff]   ;;  %v14111_v28 = vld [vmem:[#allocation6 + $0x1fa0] ss:$48 sps:$4 sm:$0xff]  }
 0xacd   :  { %10288 = vmatprep.subr.bf16.mxu0 %v14023_v29  ;;  %10329 = vmatprep.subr.bf16.mxu1 %v14026_v34  ;;  %v14114_v29 = vld [vmem:[#allocation6 + $0x1fa8] ss:$48 sps:$4 sm:$0xff]   ;;  %v14119_v34 = vld [vmem:[#allocation6 + $0x2004] ss:$48 sps:$4 sm:$0xff]  }
 0xad0   :  { %10289 = vmatpush1.bf16.msra.mxu0 %v14021_v35  ;;  %10330 = vmatpush1.bf16.msra.mxu1 %v14024_v36  ;;  %v14122_v35 = vld [vmem:[#allocation6 + $0x200c] ss:$48 sps:$4 sm:$0xff]   ;;  %v14117_v36 = vld [vmem:[#allocation6 + $0x2000] ss:$48 sps:$4 sm:$0xff]  }
 0xad1   :  { %10290 = vmatprep.subr.bf16.mxu0 %v14029_v37  ;;  %10331 = vmatprep.subr.bf16.mxu1 %v14032_v42  ;;  %v14120_v37 = vld [vmem:[#allocation6 + $0x2008] ss:$48 sps:$4 sm:$0xff]   ;;  %v14125_v42 = vld [vmem:[#allocation6 + $0x2064] ss:$48 sps:$4 sm:$0xff]  }
 0xad4   :  { %10291 = vmatpush1.bf16.msra.mxu0 %v14027_v43  ;;  %10332 = vmatpush1.bf16.msra.mxu1 %v14030_v44  ;;  %v14128_v43 = vld [vmem:[#allocation6 + $0x206c] ss:$48 sps:$4 sm:$0xff]   ;;  %v14123_v44 = vld [vmem:[#allocation6 + $0x2060] ss:$48 sps:$4 sm:$0xff]  }
 0xad5   :  { %10292 = vmatprep.subr.bf16.mxu0 %v14035_v45  ;;  %10333 = vmatprep.subr.bf16.mxu1 %v14038_v51  ;;  %v14126_v45 = vld [vmem:[#allocation6 + $0x2068] ss:$48 sps:$4 sm:$0xff]   ;;  %v14131_v51 = vld [vmem:[#allocation6 + $0x20c4] ss:$48 sps:$4 sm:$0xff]  }
 0xad8   :  { %10293 = vmatpush1.bf16.msra.mxu0 %v14033_v52  ;;  %10334 = vmatpush1.bf16.msra.mxu1 %v14036_v54  ;;  %v14134_v52 = vld [vmem:[#allocation6 + $0x20cc] ss:$48 sps:$4 sm:$0xff]   ;;  %v14129_v54 = vld [vmem:[#allocation6 + $0x20c0] ss:$48 sps:$4 sm:$0xff]  }
 0xad9   :  { %10294 = vmatprep.subr.bf16.mxu0 %v14041_v60  ;;  %10335 = vmatprep.subr.bf16.mxu1 %v14044_v61  ;;  %v14132_v60 = vld [vmem:[#allocation6 + $0x20c8] ss:$48 sps:$4 sm:$0xff]   ;;  %v14137_v61 = vld [vmem:[#allocation6 + $0x2124] ss:$48 sps:$4 sm:$0xff]  }
 0xadc   :  { %10295 = vmatpush1.bf16.msra.mxu0 %v14039_v62  ;;  %10336 = vmatpush1.bf16.msra.mxu1 %v14042_v63  ;;  %v14140_v62 = vld [vmem:[#allocation6 + $0x212c] ss:$48 sps:$4 sm:$0xff]   ;;  %v14135_v63 = vld [vmem:[#allocation6 + $0x2120] ss:$48 sps:$4 sm:$0xff]  }
 0xadd   :  { %10296 = vmatprep.subr.bf16.mxu0 %v14047_v6  ;;  %10337 = vmatprep.subr.bf16.mxu1 %v14050_v7  ;;  %v14138_v6 = vld [vmem:[#allocation6 + $0x2128] ss:$48 sps:$4 sm:$0xff]   ;;  %v14143_v7 = vld [vmem:[#allocation6 + $0x2184] ss:$48 sps:$4 sm:$0xff]  }
 0xae0   :  { %10297 = vmatpush1.bf16.msra.mxu0 %v14045_v11  ;;  %10338 = vmatpush1.bf16.msra.mxu1 %v14048_v12  ;;  %v14146_v11 = vld [vmem:[#allocation6 + $0x218c] ss:$48 sps:$4 sm:$0xff]   ;;  %v14141_v12 = vld [vmem:[#allocation6 + $0x2180] ss:$48 sps:$4 sm:$0xff]  }
 0xae1   :  { %10298 = vmatprep.subr.bf16.mxu0 %v14053_v22  ;;  %10339 = vmatprep.subr.bf16.mxu1 %v14056_v23  ;;  %v14144_v22 = vld [vmem:[#allocation6 + $0x2188] ss:$48 sps:$4 sm:$0xff]   ;;  %v14149_v23 = vld [vmem:[#allocation6 + $0x21e4] ss:$48 sps:$4 sm:$0xff]  }
 0xae4   :  { %10299 = vmatpush1.bf16.msra.mxu0 %v14051_v24  ;;  %10340 = vmatpush1.bf16.msra.mxu1 %v14054_v1  ;;  %v14152_v24 = vld [vmem:[#allocation6 + $0x21ec] ss:$48 sps:$4 sm:$0xff]   ;;  %v14147_v1 = vld [vmem:[#allocation6 + $0x21e0] ss:$48 sps:$4 sm:$0xff]  }
 0xae5   :  { %10300 = vmatprep.subr.bf16.mxu0 %v14059_v55  ;;  %10341 = vmatprep.subr.bf16.mxu1 %v14062_v50  ;;  %v14150_v55 = vld [vmem:[#allocation6 + $0x21e8] ss:$48 sps:$4 sm:$0xff]   ;;  %v14155_v50 = vld [vmem:[#allocation6 + $0x2244] ss:$48 sps:$4 sm:$0xff]  }
 0xae8   :  { %10301 = vmatpush1.bf16.msra.mxu0 %v14057_v58  ;;  %10342 = vmatpush1.bf16.msra.mxu1 %v14060_v32  ;;  %v14158_v58 = vld [vmem:[#allocation6 + $0x224c] ss:$48 sps:$4 sm:$0xff]   ;;  %v14153_v32 = vld [vmem:[#allocation6 + $0x2240] ss:$48 sps:$4 sm:$0xff]  }
 0xae9   :  { %10302 = vmatprep.subr.bf16.mxu0 %v14065_v41  ;;  %10343 = vmatprep.subr.bf16.mxu1 %v14068_v13  ;;  %v14156_v41 = vld [vmem:[#allocation6 + $0x2248] ss:$48 sps:$4 sm:$0xff]   ;;  %v14161_v13 = vld [vmem:[#allocation6 + $0x22a4] ss:$48 sps:$4 sm:$0xff]  }
 0xaec   :  { %10303 = vmatpush1.bf16.msra.mxu0 %v14063_v2  ;;  %10344 = vmatpush1.bf16.msra.mxu1 %v14066_v16  ;;  %v14164_v2 = vld [vmem:[#allocation6 + $0x22ac] ss:$48 sps:$4 sm:$0xff]   ;;  %v14159_v16 = vld [vmem:[#allocation6 + $0x22a0] ss:$48 sps:$4 sm:$0xff]  }
 0xaed   :  { %10304 = vmatprep.subr.bf16.mxu0 %v14071_v38  ;;  %10345 = vmatprep.subr.bf16.mxu1 %v14074_v39  ;;  %v14162_v38 = vld [vmem:[#allocation6 + $0x22a8] ss:$48 sps:$4 sm:$0xff]   ;;  %v14167_v39 = vld [vmem:[#allocation6 + $0x2304] ss:$48 sps:$4 sm:$0xff]  }
 0xaf0   :  { %10305 = vmatpush1.bf16.msra.mxu0 %v14069_v40  ;;  %10346 = vmatpush1.bf16.msra.mxu1 %v14072_v31  ;;  %v14170_v40 = vld [vmem:[#allocation6 + $0x230c] ss:$48 sps:$4 sm:$0xff]   ;;  %v14165_v31 = vld [vmem:[#allocation6 + $0x2300] ss:$48 sps:$4 sm:$0xff]  }
 0xaf1   :  { %10306 = vmatprep.subr.bf16.mxu0 %v14077_v53  ;;  %10347 = vmatprep.subr.bf16.mxu1 %v14080_v15  ;;  %v14168_v53 = vld [vmem:[#allocation6 + $0x2308] ss:$48 sps:$4 sm:$0xff]   ;;  %v14173_v15 = vld [vmem:[#allocation6 + $0x2364] ss:$48 sps:$4 sm:$0xff]  }
 0xaf4   :  { %10307 = vmatpush1.bf16.msra.mxu0 %v14075_v46  ;;  %10348 = vmatpush1.bf16.msra.mxu1 %v14078_v4  ;;  %v14176_v46 = vld [vmem:[#allocation6 + $0x236c] ss:$48 sps:$4 sm:$0xff]   ;;  %v14171_v4 = vld [vmem:[#allocation6 + $0x2360] ss:$48 sps:$4 sm:$0xff]  }
 0xaf5   :  { %10308 = vmatprep.subr.bf16.mxu0 %v14083_v56  ;;  %10349 = vmatprep.subr.bf16.mxu1 %v14086_v59  ;;  %v14174_v56 = vld [vmem:[#allocation6 + $0x2368] ss:$48 sps:$4 sm:$0xff]   ;;  %v14179_v59 = vld [vmem:[#allocation6 + $0x23c4] ss:$48 sps:$4 sm:$0xff]  }
 0xaf8   :  { %10309 = vmatpush1.bf16.msra.mxu0 %v14081_v25  ;;  %10350 = vmatpush1.bf16.msra.mxu1 %v14084_v30  ;;  %v14182_v25 = vld [vmem:[#allocation6 + $0x23cc] ss:$48 sps:$4 sm:$0xff]   ;;  %v14177_v30 = vld [vmem:[#allocation6 + $0x23c0] ss:$48 sps:$4 sm:$0xff]  }
 0xaf9   :  { %10360 = vmatprep.subr.bf16.mxu0 %v14089_v17  ;;  %10401 = vmatprep.subr.bf16.mxu1 %v14092_v0  ;;  %v14180_v17 = vld [vmem:[#allocation6 + $0x23c8] ss:$48 sps:$4 sm:$0xff]  }
 0xafa   :  { %v14183_v0 = vld [vmem:[#allocation9 + $0x40] sm:$0xff]  }
 0xafb   :  { %10311 = vmatmul.mubr.bf16.vlgmr.msra.gmra.mrb[20].mxu0 %v15854_v57  ;;  %10352 = vmatmul.mubr.bf16.vlgmr.msra.gmra.mrb[20].mxu1 %v15854_v57 }
 0xafc   :  { %10361 = vmatpush1.bf16.msra.mxu0 %v14087_v49  ;;  %10392 = vmatprep.mubr.bf16.mxu0 %v15852_v47  ;;  %v14184_v49 = vld [vmem:[#allocation9] sm:$0xff]  }
 0xafd   :  { %10402 = vmatpush1.bf16.msra.mxu1 %v14090_v3  ;;  %10433 = vmatprep.mubr.bf16.mxu1 %v15852_v47  ;;  %v14116_v47 = vld [vmem:[#allocation6 + $0x1fac] ss:$48 sps:$4 sm:$0xff]   ;;  %v14185_v3 = vld [vmem:[#allocation9 + $0x80] sm:$0xff]  }
 0xafe   :  { %10362 = vmatprep.subr.bf16.mxu0 %v14095_v33  ;;  %10403 = vmatprep.subr.bf16.mxu1 %v14098_v48  ;;  %v14419_v33 = vmov 0.0   ;;  %v14186_v48 = vld [vmem:[#allocation9 + $0x48] sm:$0xff]  }
 0xb00   :  { %10363 = vmatpush1.bf16.msra.mxu0 %v14093_v5  ;;  %v14188_v5 = vld [vmem:[#allocation9 + $0x88] sm:$0xff]  }
 0xb01   :  { %10404 = vmatpush1.bf16.msra.mxu1 %v14096_v8  ;;  %10364 = vmatprep.subr.bf16.mxu0 %v14101_v9  ;;  %v14187_v8 = vld [vmem:[#allocation9 + $0x8] sm:$0xff]   ;;  %v14189_v9 = vld [vmem:[#allocation9 + $0x50] sm:$0xff]  }
 0xb02   :  { %10405 = vmatprep.subr.bf16.mxu1 %v14104_v10  ;;  %v14191_v10 = vld [vmem:[#allocation9 + $0x90] sm:$0xff]  }
 0xb04   :  { %10365 = vmatpush1.bf16.msra.mxu0 %v14099_v14  ;;  %v14192_v14 = vld [vmem:[#allocation9 + $0x58] sm:$0xff]  }
 0xb05   :  { %10406 = vmatpush1.bf16.msra.mxu1 %v14102_v18  ;;  %10366 = vmatprep.subr.bf16.mxu0 %v14107_v19  ;;  %v14194_v18 = vld [vmem:[#allocation9 + $0x98] sm:$0xff]  }
 0xb06   :  { %10407 = vmatprep.subr.bf16.mxu1 %v14110_v20  ;;  %v14193_v19 = vld [vmem:[#allocation9 + $0x18] sm:$0xff]   ;;  %v14195_v20 = vld [vmem:[#allocation9 + $0x60] sm:$0xff]  }
 0xb08   :  { %10367 = vmatpush1.bf16.msra.mxu0 %v14105_v21  ;;  %v14197_v21 = vld [vmem:[#allocation9 + $0xa0] sm:$0xff]  }
 0xb09   :  { %10408 = vmatpush1.bf16.msra.mxu1 %v14108_v26  ;;  %10368 = vmatprep.subr.bf16.mxu0 %v14113_v27  ;;  %v14196_v26 = vld [vmem:[#allocation9 + $0x20] sm:$0xff]   ;;  %v14198_v27 = vld [vmem:[#allocation9 + $0x68] sm:$0xff]  }
 0xb0a   :  { %10409 = vmatprep.subr.bf16.mxu1 %v14116_v47 }
 0xb0c   :  { %10369 = vmatpush1.bf16.msra.mxu0 %v14111_v28 }
 0xb0d   :  { %10410 = vmatpush1.bf16.msra.mxu1 %v14114_v29  ;;  %10370 = vmatprep.subr.bf16.mxu0 %v14119_v34  ;;  %v14199_v29 = vld [vmem:[#allocation9 + $0x28] sm:$0xff]  }
 0xb0e   :  { %10411 = vmatprep.subr.bf16.mxu1 %v14122_v35  ;;  %v14200_v34 = vld [vmem:[#allocation9 + $0xa8] sm:$0xff]  }
 0xb10   :  { %10371 = vmatpush1.bf16.msra.mxu0 %v14117_v36 }
 0xb11   :  { %10412 = vmatpush1.bf16.msra.mxu1 %v14120_v37  ;;  %10372 = vmatprep.subr.bf16.mxu0 %v14125_v42 }
 0xb12   :  { %10413 = vmatprep.subr.bf16.mxu1 %v14128_v43 }
 0xb14   :  { %10373 = vmatpush1.bf16.msra.mxu0 %v14123_v44 }
 0xb15   :  { %10414 = vmatpush1.bf16.msra.mxu1 %v14126_v45  ;;  %10374 = vmatprep.subr.bf16.mxu0 %v14131_v51  ;;  %v14201_v51 = vld [vmem:[#allocation9 + $0x70] sm:$0xff]  }
 0xb16   :  { %10415 = vmatprep.subr.bf16.mxu1 %v14134_v52  ;;  %v14202_v52 = vld [vmem:[#allocation9 + $0x30] sm:$0xff]  }
 0xb18   :  { %10375 = vmatpush1.bf16.msra.mxu0 %v14129_v54  ;;  %v14203_v54 = vld [vmem:[#allocation9 + $0xb0] sm:$0xff]  }
 0xb19   :  { %10416 = vmatpush1.bf16.msra.mxu1 %v14132_v60  ;;  %10376 = vmatprep.subr.bf16.mxu0 %v14137_v61  ;;  %v14204_v60 = vld [vmem:[#allocation9 + $0x78] sm:$0xff]  }
 0xb1a   :  { %10417 = vmatprep.subr.bf16.mxu1 %v14140_v62  ;;  %v14205_v61 = vld [vmem:[#allocation9 + $0x38] sm:$0xff]  }
 0xb1b   :  { %v14206_v62 = vld [vmem:[#allocation9 + $0xb8] sm:$0xff]  }
 0xb1c   :  { %10377 = vmatpush1.bf16.msra.mxu0 %v14135_v63 }
 0xb1d   :  { %10418 = vmatpush1.bf16.msra.mxu1 %v14138_v6  ;;  %10378 = vmatprep.subr.bf16.mxu0 %v14143_v7 }
 0xb1e   :  { %10419 = vmatprep.subr.bf16.mxu1 %v14146_v11 }
 0xb20   :  { %10379 = vmatpush1.bf16.msra.mxu0 %v14141_v12 }
 0xb21   :  { %10420 = vmatpush1.bf16.msra.mxu1 %v14144_v22  ;;  %10380 = vmatprep.subr.bf16.mxu0 %v14149_v23 }
 0xb22   :  { %10421 = vmatprep.subr.bf16.mxu1 %v14152_v24 }
 0xb24   :  { %10381 = vmatpush1.bf16.msra.mxu0 %v14147_v1 }
 0xb25   :  { %10422 = vmatpush1.bf16.msra.mxu1 %v14150_v55  ;;  %10382 = vmatprep.subr.bf16.mxu0 %v14155_v50  ;;  %v10463_v50 = vld [vmem:[#allocation7] sm:$0x7] }
 0xb26   :  { %10423 = vmatprep.subr.bf16.mxu1 %v14158_v58  ;;  %v16613_v58 = vld [vmem:[#allocation111_spill] sm:$0xff] }
 0xb28   :  { %10383 = vmatpush1.bf16.msra.mxu0 %v14153_v32  ;;  %v10475_v32 = vsub.s32 2, %v16613_v58 }
 0xb29   :  { %10424 = vmatpush1.bf16.msra.mxu1 %v14156_v41  ;;  %10384 = vmatprep.subr.bf16.mxu0 %v14161_v13 }
 0xb2a   :  { %10425 = vmatprep.subr.bf16.mxu1 %v14164_v2 }
 0xb2c   :  { %10385 = vmatpush1.bf16.msra.mxu0 %v14159_v16 }
 0xb2d   :  { %10426 = vmatpush1.bf16.msra.mxu1 %v14162_v38  ;;  %10386 = vmatprep.subr.bf16.mxu0 %v14167_v39  ;;  %v16614_v38 = vsub.s32 1, %v16613_v58 }
 0xb2e   :  { %10427 = vmatprep.subr.bf16.mxu1 %v14170_v40 }
 0xb2f   :  { %v10472_v39 = vrot.slane %v10463_v50, %v16614_v38 }
 0xb30   :  { %10387 = vmatpush1.bf16.msra.mxu0 %v14165_v31  ;;  %v16615_v31 = vsub.s32 0, %v16613_v58 }
 0xb31   :  { %10428 = vmatpush1.bf16.msra.mxu1 %v14168_v53  ;;  %10388 = vmatprep.subr.bf16.mxu0 %v14173_v15 }
 0xb32   :  { %10429 = vmatprep.subr.bf16.mxu1 %v14176_v46  ;;  %v10468_v53 = vrot.slane %v10463_v50, %v16615_v31 }
 0xb34   :  { %10389 = vmatpush1.bf16.msra.mxu0 %v14171_v4 }
 0xb35   :  { %10430 = vmatpush1.bf16.msra.mxu1 %v14174_v56  ;;  %10390 = vmatprep.subr.bf16.mxu0 %v14179_v59  ;;  %v10476_v56 = vrot.slane %v10463_v50, %v10475_v32 }
 0xb36   :  { %10431 = vmatprep.subr.bf16.mxu1 %v14182_v25 }
 0xb38   :  { %10391 = vmatpush1.bf16.msra.mxu0 %v14177_v30 }
 0xb39   :  { %10432 = vmatpush1.bf16.msra.mxu1 %v14180_v17  ;;  %12227 = vmatprep.subr.bf16.mxu0 %v14183_v0 }
 0xb3a   :  { %12267 = vmatprep.subr.bf16.mxu1 %v14419_v33 }
 0xb3b   :  { %10393 = vmatmul.mubr.bf16.vlgmr.msra.gmra.mrb[24].mxu0 %v15854_v57 }
 0xb3c   :  { %10434 = vmatmul.mubr.bf16.vlgmr.msra.gmra.mrb[24].mxu1 %v15854_v57  ;;  %12228 = vmatpush3.bf16.msra.mxu0 %v14184_v49  ;;  %v14190_v57 = vld [vmem:[#allocation9 + $0x10] sm:$0xff]  }
 0xb3d   :  { %12268 = vmatpush3.bf16.msra.mxu1 %v14185_v3  ;;  %12229 = vmatprep.subr.bf16.mxu0 %v14186_v48 }
 0xb3e   :  { %12269 = vmatprep.subr.bf16.mxu1 %v14419_v33  ;;  %12283 = vmatprep.mubr.msk.bf16.mxu1 %vm14420_vm0, %v14419_v33 }
 0xb40   :  { %12230 = vmatpush3.bf16.msra.mxu0 %v14187_v8 }
 0xb41   :  { %12270 = vmatpush3.bf16.msra.mxu1 %v14188_v5  ;;  %12231 = vmatprep.subr.bf16.mxu0 %v14189_v9 }
 0xb42   :  { %12271 = vmatprep.subr.bf16.mxu1 %v14419_v33 }
 0xb44   :  { %12232 = vmatpush3.bf16.msra.mxu0 %v14190_v57 }
 0xb45   :  { %12272 = vmatpush3.bf16.msra.mxu1 %v14191_v10  ;;  %12233 = vmatprep.subr.bf16.mxu0 %v14192_v14 }
 0xb46   :  { %12273 = vmatprep.subr.bf16.mxu1 %v14419_v33 }
 0xb48   :  { %12234 = vmatpush3.bf16.msra.mxu0 %v14193_v19 }
 0xb49   :  { %12274 = vmatpush3.bf16.msra.mxu1 %v14194_v18  ;;  %12235 = vmatprep.subr.bf16.mxu0 %v14195_v20  ;;  %v14207_v18 = vld [vmem:[#allocation12] sm:$0xff]   ;;  %v14208_v20 = vld [vmem:[#allocation12 + $0x8] sm:$0xff]  }
 0xb4a   :  { %12275 = vmatprep.subr.bf16.mxu1 %v14419_v33 }
 0xb4c   :  { %12236 = vmatpush3.bf16.msra.mxu0 %v14196_v26  ;;  %v14210_v26 = vld [vmem:[#allocation12 + $0x18] sm:$0xff]  }
 0xb4d   :  { %12276 = vmatpush3.bf16.msra.mxu1 %v14197_v21  ;;  %12237 = vmatprep.subr.bf16.mxu0 %v14198_v27  ;;  %v14209_v21 = vld [vmem:[#allocation12 + $0x10] sm:$0xff]   ;;  %v14211_v27 = vld [vmem:[#allocation12 + $0x20] sm:$0xff]  }
 0xb4e   :  { %12277 = vmatprep.subr.bf16.mxu1 %v14419_v33 }
 0xb50   :  { %12238 = vmatpush3.bf16.msra.mxu0 %v14199_v29  ;;  %v14214_v29 = vld [vmem:[#allocation12 + $0x38] sm:$0xff]  }
 0xb51   :  { %12278 = vmatpush3.bf16.msra.mxu1 %v14200_v34  ;;  %12239 = vmatprep.subr.bf16.mxu0 %v14201_v51 }
 0xb52   :  { %12279 = vmatprep.subr.bf16.mxu1 %v14419_v33 }
 0xb54   :  { %12240 = vmatpush3.bf16.msra.mxu0 %v14202_v52 }
 0xb55   :  { %12280 = vmatpush3.bf16.msra.mxu1 %v14203_v54  ;;  %12241 = vmatprep.subr.bf16.mxu0 %v14204_v60 }
 0xb56   :  { %12281 = vmatprep.subr.bf16.mxu1 %v14419_v33 }
 0xb58   :  { %12242 = vmatpush3.bf16.msra.mxu0 %v14205_v61 }
 0xb59   :  { %12282 = vmatpush3.bf16.msra.mxu1 %v14206_v62  ;;  %12287 = vmatprep.subr.bf16.mxu0 %v14419_v33 }
 0xb8e   :  { %v10230_v47 = vpop.f32.mrb[16].mxu0  ;;  %v10271_v28 = vpop.f32.mrb[16].mxu1 }
 0xb8f   :  { %v10232_v35 = vpop.f32.mrb[17].mxu0  ;;  %v10273_v36 = vpop.f32.mrb[17].mxu1 }
 0xb90   :  { %v10454_v37 = vmax.f32 %v10230_v47, %v10273_v36  ;;  %v10234_v42 = vpop.f32.mrb[18].mxu0  ;;  %v10275_v43 = vpop.f32.mrb[18].mxu1  ;;  %v14212_v47 = vld [vmem:[#allocation12 + $0x28] sm:$0xff]   ;;  %v12193_v36 = vld [vmem:[#allocation10] ss:$0 sm:$0xff] }
 0xb91   :  { %v10235_v44 = vpop.f32.mrb[19].mxu0  ;;  %v10276_v45 = vpop.f32.mrb[19].mxu1 }
 0xbce   :  { %v10312_v63 = vpop.f32.mrb[20].mxu0  ;;  %v10353_v6 = vpop.f32.mrb[20].mxu1 }
 0xbcf   :  { %v10455_v7 = vmax.f32 %v10232_v35, %v10312_v63  ;;  %v10314_v11 = vpop.f32.mrb[21].mxu0  ;;  %v10355_v12 = vpop.f32.mrb[21].mxu1  ;;  %v12218_v63 = vld [vmem:[#allocation13] ss:$0 sm:$0xff] }
 0xbd0   :  { %v10456_v22 = vmax.f32 %v10271_v28, %v10314_v11  ;;  %v10316_v23 = vpop.f32.mrb[22].mxu0  ;;  %v10357_v24 = vpop.f32.mrb[22].mxu1  ;;  %v14213_v28 = vld [vmem:[#allocation12 + $0x30] sm:$0xff]  }
 0xbd1   :  { %v10317_v1 = vpop.f32.mrb[23].mxu0  ;;  %v10358_v55 = vpop.f32.mrb[23].mxu1 }
 0xc0e   :  { %v10394_v41 = vpop.f32.mrb[24].mxu0 }
 0xc0f   :  { %v10435_v13 = vpop.f32.mrb[24].mxu1  ;;  %v10396_v2 = vpop.f32.mrb[25].mxu0 }
 0xc10   :  { %v10458_v16 = vmax.f32 %v10355_v12, %v10435_v13  ;;  %v10457_v40 = vmax.f32 %v10353_v6, %v10396_v2  ;;  %v10437_v15 = vpop.f32.mrb[25].mxu1  ;;  %v10398_v46 = vpop.f32.mrb[26].mxu0 }
 0xc11   :  { %v10459_v4 = vmax.f32 %v10394_v41, %v10437_v15  ;;  %v10439_v59 = vpop.f32.mrb[26].mxu1  ;;  %v10399_v25 = vpop.f32.mrb[27].mxu0 }
 0xc12   :  { %v10461_v30 = vmax.f32 %v10455_v7, %v10458_v16  ;;  %v10460_v17 = vmax.f32 %v10454_v37, %v10457_v40  ;;  %v10440_v0 = vpop.f32.mrb[27].mxu1 }
 0xc13   :  { %v10462_v49 = vmax.f32 %v10456_v22, %v10459_v4 }
 0xc14   :  { %v10481_v3 = vadd.f32 %v10472_v39, %v10461_v30  ;;  %v10480_v48 = vadd.f32 %v10468_v53, %v10460_v17 }
 0xc15   :  { %v10482_v5 = vadd.f32 %v10476_v56, %v10462_v49 }
 0xc16   :  { %v10483_v8 = vmax.f32 %v10480_v48, 0.0  ;;  %v10484_v9 = vmax.f32 %v10481_v3, 0.0 }
 0xc17   :  { %v10485_v10 = vmax.f32 %v10482_v5, 0.0 }
 0xc18   :  { %v10486_v57 = vpack.c.bf16 %v10483_v8, %v10483_v8  ;;  %v10487_v14 = vpack.c.bf16 %v10484_v9, %v10484_v9 }
 0xc19   :  { %v10488_v19 = vpack.c.bf16 %v10485_v10, %v10485_v10 }
 0xc1a   :  { %10720 = vmatprep.mubr.bf16.mxu0 %v10487_v14 }
 0xc1b   :  { %10721 = vmatmul.mubr.bf16.vlgmr.msra.gmra.mrb[60].mxu0 %v10486_v57  ;;  %12284 = vmatmul.mubr.bf16.vlgmr.msra.gmra.mrb[60].mxu1 %v10488_v19 }
 0xc1c   :  { %12288 = vmatpush3.bf16.msra.mxu0 %v14207_v18  ;;  %12303 = vmatprep.mubr.msk.bf16.mxu0 %vm14420_vm0, %v14419_v33 }
 0xc1d   :  { %12289 = vmatprep.subr.bf16.mxu0 %v14419_v33 }
 0xc20   :  { %12290 = vmatpush3.bf16.msra.mxu0 %v14208_v20 }
 0xc21   :  { %12291 = vmatprep.subr.bf16.mxu0 %v14419_v33 }
 0xc24   :  { %12292 = vmatpush3.bf16.msra.mxu0 %v14209_v21 }
 0xc25   :  { %12293 = vmatprep.subr.bf16.mxu0 %v14419_v33 }
 0xc28   :  { %12294 = vmatpush3.bf16.msra.mxu0 %v14210_v26 }
 0xc29   :  { %12295 = vmatprep.subr.bf16.mxu0 %v14419_v33 }
 0xc2c   :  { %12296 = vmatpush3.bf16.msra.mxu0 %v14211_v27 }
 0xc2d   :  { %12297 = vmatprep.subr.bf16.mxu0 %v14419_v33 }
 0xc30   :  { %12298 = vmatpush3.bf16.msra.mxu0 %v14212_v47 }
 0xc31   :  { %12299 = vmatprep.subr.bf16.mxu0 %v14419_v33 }
 0xc34   :  { %12300 = vmatpush3.bf16.msra.mxu0 %v14213_v28 }
 0xc35   :  { %12301 = vmatprep.subr.bf16.mxu0 %v14419_v33 }
 0xc38   :  { %12302 = vmatpush3.bf16.msra.mxu0 %v14214_v29 }
 0xcee   :  { %v12243_v34 = vpop.f32.mrb[60].mxu0  ;;  %v10762_v35 = vpop.f32.mrb[60].mxu1 }
 0xcef   :  { %v12244_v37 = vpop.f32.mrb[61].mxu0  ;;  %v12285_v42 = vpop.f32.mrb[61].mxu1 }
 0xcf0   :  { %v12245_v43 = vadd.f32 %v12244_v37, %v12243_v34  ;;  %v12246_v44 = vpop.f32.mrb[62].mxu0  ;;  %v10765_v45 = vpop.f32.mrb[62].mxu1 }
 0xcf1   :  { %v12247_v51 = vpop.f32.mrb[63].mxu0  ;;  %v12286_v52 = vpop.f32.mrb[63].mxu1 }
 0xcf2   :  { %v10723_v54 = vadd.f32 %v12245_v43, %v12193_v36 }
 0xcf4   :  { %v10763_v60 = vadd.f32 %v10762_v35, %v10723_v54 }
 0xcf6   :  { %v10768_v61 = vmax.f32 %v10763_v60, 0.0 }
 0xcf8   :  { %v10769_v62 = vpack.c.bf16 %v10768_v61, %v10768_v61 }
 0xcfa   :  { %12304 = vmatmul.mubr.bf16.vlgmr.msra.gmra.mrb[64].mxu0 %v10769_v62 }
 0xdcd   :  { %v10875_v6 = vpop.f32.mrb[64].mxu0 }
 0xdce   :  { %v10876_v33 = vadd.f32 %v12218_v63, %v10875_v6  ;;  %v12305_v7 = vpop.f32.mrb[65].mxu0 }
 0xdcf   :  { %v10878_v11 = vpop.f32.mrb[66].mxu0 }
 0xdd0   :  { %10881 = vmax.xlane.f32.xlu0 %v10876_v33  ;;  %v12306_v12 = vpop.f32.mrb[67].mxu0 }
 0xe5d   :  { %v10882_v22 = vpop.xlane.xlu0 %10881 }
 0xe5e   :  { %v10883_v23 = vsub.f32 %v10876_v33, %v10882_v22 }
 0xe60   :  { %v10884_v24 = vmul.f32 1.442695, %v10883_v23 }
 0xe62   :  { %14215 = vpow2.f32 %v10884_v24 }
 0xe6c   :  { %v14216_v1 = vpop.eup %14215 }
 0xe6d   :  { %10886 = vadd.xlane.f32.xlu0 %v14216_v1 }
 0xefa   :  { %v10887_v55 = vpop.xlane.xlu0 %10886 }
 0xefb   :  { %14217 = vlog2.f32 %v10887_v55 }
 0xf05   :  { %v14218_v50 = vpop.eup %14217 }
 0xf06   :  { %v10889_v58 = vmul.f32 0.6931472, %v14218_v50 }
 0xf08   :  { %v10890_v32 = vsub.f32 %v10883_v23, %v10889_v58 }
 0xf0a   :  { %10891 = vst [vmem:[%s15905_s9] sm:$0xff] %v10890_v32 }
 0xf0b   :  { %10896 = vsyncpa [#allocation3], 1 }
 0xf0c   :  { %10897 = vsyncpa [#allocation5], 1 }
 0xf0d   :  { %10898 = vsyncpa [#allocation8], 1 }
 0xf0e   :  { %10899 = vsyncpa [#allocation11], 1 }
 0xf0f   :  { %10900 = vsyncpa [#allocation14], 1 }

</bundles_post_ra>
